<compile_context>
chip_gen: v7x
topology: tpu7x:2x2x1
jax: 0.10.0
libtpu: 0.0.40
codegen_flags: <defaults>
</compile_context>

<pallas_src>
import math
import numpy as np
import jax
import jax.numpy as jnp
from jax import lax
from jax.experimental import pallas as pl
from jax.experimental.pallas import tpu as pltpu


# Architecture constants implied by the hard-coded 2912-dim flatten:
#   1024x256 --conv(7,7,s3)--> 340x84 --conv(7,7,s3)--> 112x26, 112*26 = 2912
H_IN, W_IN = 1024, 256
OH1, OW1 = 340, 84
OH2, OW2 = 112, 26
RG = 115                    # input row-groups of 9 rows (1035 = 9*115, 11 zero rows pad)
LN = 9 * W_IN               # 2304 lanes per row-group (18 lane tiles, fully dense)


# ----------------------------- Pallas kernels -----------------------------

def _conv_feat_kernel(x9_ref, s1_ref, b2s_ref, bias_ref, feat_ref):
    """first_conv (conv1+tanh, conv2+tanh) for one batch element, all on the MXU.

    x9_ref  : (1, C, 115, 2304) VMEM  x9[c, m, u*256+col] = x[c, 9m+u, col]
    s1_ref  : (C, 1792, 84)     VMEM  stacked conv1 column-band matrices:
                                      rows [i*256,(i+1)*256) = B1[c,i],
                                      B1[c,i][k,t] = w1[c,i,k-3t] (0<=k-3t<7)
    b2s_ref : (3, 84, 78)       VMEM  conv2 bands grouped per output-row phase p:
                                      cols [26s,26s+26) = B2[3s+p] (zero if 3s+p>6)
    bias_ref: (2,)              SMEM  [conv1 bias, conv2 bias]
    feat_ref: (1, 112, 26)      VMEM  tanh(conv2) output for this batch element

    conv1 output row 3m+p needs x rows 9m+3p+i (i=0..6).  For u = 3p+i <= 8 those
    live in row-group m of x9 at lane block u ("main" term); for u >= 9 they live in
    row-group m+1 at lane block u-9 ("carry" term).  Each term is one MXU matmul of
    a lane-block slice of x9 against the matching row-block of s1; the carry term's
    +1 row-group shift is applied to the small (115,84) result, not the 1 MB input.
    """
    C = x9_ref.shape[1]
    b1 = bias_ref[0]
    b2 = bias_ref[1]

    # (x9 lane range, s1 row range) per conv1 output-row phase p.
    main_x = ((0, 1792), (768, 2304), (1536, 2304))
    main_w = ((0, 1792), (0, 1536), (0, 768))
    carry_x = (None, (0, 256), (0, 1024))     # p=0 has no carry term
    carry_w = (None, (1536, 1792), (768, 1792))

    out2 = jnp.zeros((OH2, OW2), jnp.float32)
    for p in range(3):
        acc = jnp.zeros((114, OW1), jnp.float32)          # conv1 rows 3m+p, m=0..113
        for c in range(C):
            (x0, x1), (w0, w1) = main_x[p], main_w[p]
            z = jnp.dot(x9_ref[0, c, :, x0:x1], s1_ref[c, w0:w1, :],
                        preferred_element_type=jnp.float32)       # (115, 84)
            acc = acc + z[0:114, :]
            if carry_x[p] is not None:
                (x0, x1), (w0, w1) = carry_x[p], carry_w[p]
                z = jnp.dot(x9_ref[0, c, :, x0:x1], s1_ref[c, w0:w1, :],
                            preferred_element_type=jnp.float32)   # (115, 84)
                acc = acc + z[1:115, :]                    # row-group m+1 -> shift result
        y1p = jnp.tanh(acc + b1)                           # conv1+tanh, phase p (114, 84)
        # conv2 contribution of phase p: one grouped band matmul, then the three
        # kernel-row shifts (s = I//3) are slices of the small (114, 78) result.
        # (rows 113 of phases 1/2 come from padded input but are either sliced away
        #  or multiplied by an all-zero band block -- benign and finite.)
        zp = jnp.dot(y1p, b2s_ref[p], preferred_element_type=jnp.float32)   # (114, 78)
        out2 = out2 + zp[0:112, 0:26] + zp[1:113, 26:52] + zp[2:114, 52:78]
    feat_ref[0] = jnp.tanh(out2 + b2)


def _heads_kernel(f_ref, wh_ref, bh_ref, wa2_ref, ba2_ref, wc2_ref, bc2_ref,
                  logp_ref, val_ref, ent_ref):
    """Actor + critic heads for the whole batch.  Actor/critic Linear(2912,64) are
    fused into one (2912,128) MXU matmul; log-softmax / entropy from logits."""
    f = f_ref[...]                                                   # (B, 2912)
    h = jnp.tanh(jnp.dot(f, wh_ref[...],
                         preferred_element_type=jnp.float32) + bh_ref[...])
    ha, hc = h[:, :64], h[:, 64:]
    logits = jnp.dot(ha, wa2_ref[...],
                     preferred_element_type=jnp.float32) + ba2_ref[...]
    m = jnp.max(logits, axis=-1, keepdims=True)
    e = jnp.exp(logits - m)
    se = jnp.sum(e, axis=-1, keepdims=True)
    logp = logits - (m + jnp.log(se))                                # log-softmax
    logp_ref[...] = logp
    probs = e / se
    ent_ref[...] = -jnp.sum(probs * logp, axis=-1, keepdims=True)
    val_ref[...] = jnp.dot(hc, wc2_ref[...],
                           preferred_element_type=jnp.float32) + bc2_ref[...]


# ----------------------------- one-time weight prep ------------------------

def _band(w_row, K, T):
    """band[k, t] = w_row[k - 3t] if 0 <= k-3t < 7 else 0, shape (K, T)."""
    k = jnp.arange(K)[:, None]
    t = jnp.arange(T)[None, :]
    d = k - 3 * t
    return jnp.where((d >= 0) & (d < 7), w_row[jnp.clip(d, 0, 6)], 0.0
                     ).astype(jnp.float32)


def prepare_params(params):
    """Hoisted out of the per-call path: band matrices + fused head weights."""
    w1 = params["conv1_w"][0].astype(jnp.float32)          # (C, 7, 7)  (OIHW, O=1)
    w2 = params["conv2_w"][0, 0].astype(jnp.float32)       # (7, 7)
    C = w1.shape[0]

    # conv1: per-channel stack of the 7 per-kernel-row column bands -> (C, 1792, 84)
    s1 = jnp.stack(
        [jnp.concatenate([_band(w1[c, i], W_IN, OW1) for i in range(7)], axis=0)
         for c in range(C)], axis=0)

    # conv2: per output-row phase p, bands for kernel rows I = 3s+p stacked along
    # columns (zeros when 3s+p > 6) -> (3, 84, 78)
    blocks = []
    for p in range(3):
        cols = []
        for s in range(3):
            i = 3 * s + p
            cols.append(_band(w2[i], OW1, OW2) if i < 7
                        else jnp.zeros((OW1, OW2), jnp.float32))
        blocks.append(jnp.concatenate(cols, axis=1))
    b2s = jnp.stack(blocks, axis=0)

    biases = jnp.concatenate([params["conv1_b"].reshape(1),
                              params["conv2_b"].reshape(1)]).astype(jnp.float32)
    wh = jnp.concatenate([params["wa1"], params["wc1"]], axis=1)    # (2912, 128)
    bh = jnp.concatenate([params["ba1"], params["bc1"]], axis=1)    # (1, 128)
    return dict(s1=s1, b2s=b2s, biases=biases, wh=wh, bh=bh,
                wa2=params["wa2"], ba2=params["ba2"],
                wc2=params["wc2"], bc2=params["bc2"])


# ----------------------------- wrappers -----------------------------------

def conv_features(state_nchw, prep):
    """first_conv: Conv2d(C,1,7,7,s3)+Tanh -> Conv2d(1,1,7,7,s3)+Tanh, flattened."""
    B, C, H, W = state_nchw.shape
    assert (H, W) == (H_IN, W_IN), "2912-dim flatten implies a 1024x256 input"

    x = state_nchw.astype(jnp.float32)
    # +11 zero rows (1035 = 9*115), then a FREE row-major reshape to the
    # row-nonuple layout x9[b,c,m,u*256+col] = x[b,c,9m+u,col].  The pad is the
    # only wrapper-side copy; there is no transpose.  Padded rows only ever reach
    # conv1 outputs that conv2 never consumes (or are multiplied by zero bands).
    x9 = jnp.pad(x, ((0, 0), (0, 0), (0, 9 * RG - H_IN), (0, 0))
                 ).reshape(B, C, RG, LN)

    feat3 = pl.pallas_call(
        _conv_feat_kernel,
        out_shape=jax.ShapeDtypeStruct((B, OH2, OW2), jnp.float32),
        grid=(B,),
        in_specs=[
            pl.BlockSpec((1, C, RG, LN), lambda b: (b, 0, 0, 0)),
            pl.BlockSpec((C, 7 * W_IN, OW1), lambda b: (0, 0, 0)),   # resident
            pl.BlockSpec((3, OW1, 3 * OW2), lambda b: (0, 0, 0)),    # resident
            pl.BlockSpec(memory_space=pltpu.MemorySpace.SMEM),       # conv biases
        ],
        out_specs=pl.BlockSpec((1, OH2, OW2), lambda b: (b, 0, 0)),
        compiler_params=pltpu.CompilerParams(
            dimension_semantics=("parallel",)),
    )(x9, prep["s1"], prep["b2s"], prep["biases"])
    # torch.flatten(start_dim=1); (B,112,26)->(B,2912) is a free row-major bitcast.
    return feat3.reshape(B, OH2 * OW2)


def actor_critic_heads(feat, prep):
    B = feat.shape[0]
    A = prep["wa2"].shape[1]
    vmem = pl.BlockSpec(memory_space=pltpu.MemorySpace.VMEM)
    logp, vals, ent = pl.pallas_call(
        _heads_kernel,
        out_shape=(jax.ShapeDtypeStruct((B, A), jnp.float32),
                   jax.ShapeDtypeStruct((B, 1), jnp.float32),
                   jax.ShapeDtypeStruct((B, 1), jnp.float32)),
        in_specs=[vmem] * 7,
        out_specs=(vmem, vmem, vmem),
    )(feat, prep["wh"], prep["bh"], prep["wa2"], prep["ba2"],
      prep["wc2"], prep["bc2"])
    return logp, vals, ent


def ppo_evaluate(state_nchw, action, prep):
    """Discrete-action ActorCriticConv.evaluate(state, action)."""
    feat = conv_features(state_nchw, prep)
    logp_all, values, ent = actor_critic_heads(feat, prep)
    # Categorical log_prob(action): tiny gather on the in-kernel log-softmax.
    logp = jnp.take_along_axis(logp_all, action[:, None], axis=-1)[:, 0]
    return logp, values, ent[:, 0]


# ----------------------------- params & reference --------------------------

def init_params(key, state_dim, action_dim):
    C = state_dim // (1024 * 256)
    ks = jax.random.split(key, 12)

    def unif(k, shape, fan_in):
        b = 1.0 / math.sqrt(fan_in)
        return jax.random.uniform(k, shape, jnp.float32, -b, b)

    return dict(
        conv1_w=unif(ks[0], (1, C, 7, 7), C * 49),   # PyTorch OIHW
        conv1_b=unif(ks[1], (1,), C * 49),
        conv2_w=unif(ks[2], (1, 1, 7, 7), 49),
        conv2_b=unif(ks[3], (1,), 49),
        wa1=unif(ks[4], (2912, 64), 2912),           # (in, out) = W.T
        ba1=unif(ks[5], (1, 64), 2912),
        wa2=unif(ks[6], (64, action_dim), 64),
        ba2=unif(ks[7], (1, action_dim), 64),
        wc1=unif(ks[8], (2912, 64), 2912),
        bc1=unif(ks[9], (1, 64), 2912),
        wc2=unif(ks[10], (64, 1), 64),
        bc2=unif(ks[11], (1, 1), 64),
    )


def reference_evaluate(state, action, params):
    hp = lax.Precision.HIGHEST

    def conv(x, w, b):
        y = lax.conv_general_dilated(x, w, (3, 3), "VALID",
                                     dimension_numbers=("NCHW", "OIHW", "NCHW"),
                                     precision=hp)
        return jnp.tanh(y + b.reshape(1, -1, 1, 1))

    y = conv(conv(state, params["conv1_w"], params["conv1_b"]),
             params["conv2_w"], params["conv2_b"])
    feat = y.reshape(y.shape[0], -1)
    ha = jnp.tanh(jnp.dot(feat, params["wa1"], precision=hp) + params["ba1"])
    logits = jnp.dot(ha, params["wa2"], precision=hp) + params["ba2"]
    probs = jax.nn.softmax(logits, axis=-1)
    hc = jnp.tanh(jnp.dot(feat, params["wc1"], precision=hp) + params["bc1"])
    vals = jnp.dot(hc, params["wc2"], precision=hp) + params["bc2"]
    logp = jnp.log(jnp.take_along_axis(probs, action[:, None], axis=-1))[:, 0]
    entropy = -jnp.sum(probs * jnp.log(probs), axis=-1)
    return logp, vals, entropy


# ----------------------------- main ----------------------------------------

if __name__ == "__main__":
    B = 2
    C = 1
    H, W = H_IN, W_IN            # spatial size implied by the hard-coded 2912 flatten
    state_dim = C * H * W        # -> int(state_dim // (1024*256)) == C
    action_dim = 6               # discrete action space branch

    key = jax.random.PRNGKey(0)
    kx, ka, kp = jax.random.split(key, 3)
    state = jax.random.normal(kx, (B, C, H, W), jnp.float32)
    action = jax.random.randint(ka, (B,), 0, action_dim)
    params = init_params(kp, state_dim, action_dim)
    prep = prepare_params(params)        # one-time: band matrices + fused head weights

    logp, values, entropy = jax.jit(ppo_evaluate)(state, action, prep)
    jax.block_until_ready((logp, values, entropy))

    assert logp.shape == (B,) and values.shape == (B, 1) and entropy.shape == (B,)

    r_logp, r_vals, r_ent = jax.jit(reference_evaluate)(state, action, params)
    np.testing.assert_allclose(np.asarray(logp), np.asarray(r_logp), rtol=2e-3, atol=2e-3)
    np.testing.assert_allclose(np.asarray(values), np.asarray(r_vals), rtol=2e-3, atol=2e-3)
    np.testing.assert_allclose(np.asarray(entropy), np.asarray(r_ent), rtol=2e-3, atol=2e-3)

    print("KERNEL_OK")
</pallas_src>

<mosaic_0001>
module attributes {stable_mosaic.version = 11 : i64} {
  func.func @_conv_feat_kernel(%arg0: i32, %arg1: memref<1x1x115x2304xf32, #tpu.memory_space<vmem>>, %arg2: memref<1x1792x84xf32, #tpu.memory_space<vmem>>, %arg3: memref<3x84x78xf32, #tpu.memory_space<vmem>>, %arg4: memref<2xf32, #tpu.memory_space<smem>>, %arg5: memref<1x112x26xf32, #tpu.memory_space<vmem>>) attributes {dimension_semantics = [#tpu.dimension_semantics<parallel>], iteration_bounds = array<i64: 2>, scalar_prefetch = 0 : i64, scratch_operands = 0 : i64, tpu.core_type = #tpu.core_type<tc>, window_params = [{transform_indices = @transform_0, window_bounds = array<i64: 1, 1, 115, 2304>}, {pipeline_mode = #tpu.pipeline_mode<synchronous>, transform_indices = @transform_1, window_bounds = array<i64: 1, 1792, 84>}, {pipeline_mode = #tpu.pipeline_mode<synchronous>, transform_indices = @transform_2, window_bounds = array<i64: 3, 84, 78>}, {transform_indices = @transform_3, window_bounds = array<i64: 2>}, {transform_indices = @transform_4, window_bounds = array<i64: 1, 112, 26>}]} {
    %c0 = arith.constant 0 : index
    %0 = memref.load %arg4[%c0] : memref<2xf32, #tpu.memory_space<smem>>
    %c1 = arith.constant 1 : index
    %1 = memref.load %arg4[%c1] : memref<2xf32, #tpu.memory_space<smem>>
    %cst = arith.constant 0.000000e+00 : f32
    %2 = vector.broadcast %cst : f32 to vector<112x26xf32>
    %cst_0 = arith.constant 0.000000e+00 : f32
    %3 = vector.broadcast %cst_0 : f32 to vector<114x84xf32>
    %c0_1 = arith.constant 0 : index
    %c0_2 = arith.constant 0 : index
    %c0_3 = arith.constant 0 : index
    %c0_4 = arith.constant 0 : index
    %4 = vector.load %arg1[%c0_1, %c0_2, %c0_3, %c0_4] : memref<1x1x115x2304xf32, #tpu.memory_space<vmem>>, vector<1x1x115x1792xf32>
    %5 = vector.shape_cast %4 : vector<1x1x115x1792xf32> to vector<115x1792xf32>
    %c0_5 = arith.constant 0 : index
    %c0_6 = arith.constant 0 : index
    %c0_7 = arith.constant 0 : index
    %6 = vector.load %arg2[%c0_5, %c0_6, %c0_7] : memref<1x1792x84xf32, #tpu.memory_space<vmem>>, vector<1x1792x84xf32>
    %7 = vector.shape_cast %6 : vector<1x1792x84xf32> to vector<1792x84xf32>
    %cst_8 = arith.constant dense<0.000000e+00> : vector<115x84xf32>
    %8 = tpu.matmul %5, %7, %cst_8 {dimension_numbers = #tpu.dot_dimension_numbers<[1], [0], [0], [1], [0, 0, 1, 1], [], []>} : vector<115x1792xf32>, vector<1792x84xf32>, vector<115x84xf32> -> vector<115x84xf32>
    %9 = vector.extract_strided_slice %8 {offsets = [0, 0], sizes = [114, 84], strides = [1, 1]} : vector<115x84xf32> to vector<114x84xf32>
    %10 = arith.addf %3, %9 : vector<114x84xf32>
    %11 = vector.broadcast %0 : f32 to vector<114x84xf32>
    %12 = arith.addf %10, %11 : vector<114x84xf32>
    %13 = math.tanh %12 : vector<114x84xf32>
    %c0_9 = arith.constant 0 : index
    %c0_10 = arith.constant 0 : index
    %c0_11 = arith.constant 0 : index
    %14 = vector.load %arg3[%c0_9, %c0_10, %c0_11] : memref<3x84x78xf32, #tpu.memory_space<vmem>>, vector<1x84x78xf32>
    %15 = vector.shape_cast %14 : vector<1x84x78xf32> to vector<84x78xf32>
    %cst_12 = arith.constant dense<0.000000e+00> : vector<114x78xf32>
    %16 = tpu.matmul %13, %15, %cst_12 {dimension_numbers = #tpu.dot_dimension_numbers<[1], [0], [0], [1], [0, 0, 1, 1], [], []>} : vector<114x84xf32>, vector<84x78xf32>, vector<114x78xf32> -> vector<114x78xf32>
    %17 = vector.extract_strided_slice %16 {offsets = [0, 0], sizes = [112, 26], strides = [1, 1]} : vector<114x78xf32> to vector<112x26xf32>
    %18 = arith.addf %2, %17 : vector<112x26xf32>
    %19 = vector.extract_strided_slice %16 {offsets = [1, 26], sizes = [112, 26], strides = [1, 1]} : vector<114x78xf32> to vector<112x26xf32>
    %20 = arith.addf %18, %19 : vector<112x26xf32>
    %21 = vector.extract_strided_slice %16 {offsets = [2, 52], sizes = [112, 26], strides = [1, 1]} : vector<114x78xf32> to vector<112x26xf32>
    %22 = arith.addf %20, %21 : vector<112x26xf32>
    %cst_13 = arith.constant 0.000000e+00 : f32
    %23 = vector.broadcast %cst_13 : f32 to vector<114x84xf32>
    %c0_14 = arith.constant 0 : index
    %c0_15 = arith.constant 0 : index
    %c0_16 = arith.constant 0 : index
    %c768 = arith.constant 768 : index
    %24 = vector.load %arg1[%c0_14, %c0_15, %c0_16, %c768] : memref<1x1x115x2304xf32, #tpu.memory_space<vmem>>, vector<1x1x115x1536xf32>
    %25 = vector.shape_cast %24 : vector<1x1x115x1536xf32> to vector<115x1536xf32>
    %c0_17 = arith.constant 0 : index
    %c0_18 = arith.constant 0 : index
    %c0_19 = arith.constant 0 : index
    %26 = vector.load %arg2[%c0_17, %c0_18, %c0_19] : memref<1x1792x84xf32, #tpu.memory_space<vmem>>, vector<1x1536x84xf32>
    %27 = vector.shape_cast %26 : vector<1x1536x84xf32> to vector<1536x84xf32>
    %cst_20 = arith.constant dense<0.000000e+00> : vector<115x84xf32>
    %28 = tpu.matmul %25, %27, %cst_20 {dimension_numbers = #tpu.dot_dimension_numbers<[1], [0], [0], [1], [0, 0, 1, 1], [], []>} : vector<115x1536xf32>, vector<1536x84xf32>, vector<115x84xf32> -> vector<115x84xf32>
    %29 = vector.extract_strided_slice %28 {offsets = [0, 0], sizes = [114, 84], strides = [1, 1]} : vector<115x84xf32> to vector<114x84xf32>
    %30 = arith.addf %23, %29 : vector<114x84xf32>
    %c0_21 = arith.constant 0 : index
    %c0_22 = arith.constant 0 : index
    %c0_23 = arith.constant 0 : index
    %c0_24 = arith.constant 0 : index
    %31 = vector.load %arg1[%c0_21, %c0_22, %c0_23, %c0_24] : memref<1x1x115x2304xf32, #tpu.memory_space<vmem>>, vector<1x1x115x256xf32>
    %32 = vector.shape_cast %31 : vector<1x1x115x256xf32> to vector<115x256xf32>
    %c0_25 = arith.constant 0 : index
    %c1536 = arith.constant 1536 : index
    %c0_26 = arith.constant 0 : index
    %33 = vector.load %arg2[%c0_25, %c1536, %c0_26] : memref<1x1792x84xf32, #tpu.memory_space<vmem>>, vector<1x256x84xf32>
    %34 = vector.shape_cast %33 : vector<1x256x84xf32> to vector<256x84xf32>
    %cst_27 = arith.constant dense<0.000000e+00> : vector<115x84xf32>
    %35 = tpu.matmul %32, %34, %cst_27 {dimension_numbers = #tpu.dot_dimension_numbers<[1], [0], [0], [1], [0, 0, 1, 1], [], []>} : vector<115x256xf32>, vector<256x84xf32>, vector<115x84xf32> -> vector<115x84xf32>
    %36 = vector.extract_strided_slice %35 {offsets = [1, 0], sizes = [114, 84], strides = [1, 1]} : vector<115x84xf32> to vector<114x84xf32>
    %37 = arith.addf %30, %36 : vector<114x84xf32>
    %38 = vector.broadcast %0 : f32 to vector<114x84xf32>
    %39 = arith.addf %37, %38 : vector<114x84xf32>
    %40 = math.tanh %39 : vector<114x84xf32>
    %c1_28 = arith.constant 1 : index
    %c0_29 = arith.constant 0 : index
    %c0_30 = arith.constant 0 : index
    %41 = vector.load %arg3[%c1_28, %c0_29, %c0_30] : memref<3x84x78xf32, #tpu.memory_space<vmem>>, vector<1x84x78xf32>
    %42 = vector.shape_cast %41 : vector<1x84x78xf32> to vector<84x78xf32>
    %cst_31 = arith.constant dense<0.000000e+00> : vector<114x78xf32>
    %43 = tpu.matmul %40, %42, %cst_31 {dimension_numbers = #tpu.dot_dimension_numbers<[1], [0], [0], [1], [0, 0, 1, 1], [], []>} : vector<114x84xf32>, vector<84x78xf32>, vector<114x78xf32> -> vector<114x78xf32>
    %44 = vector.extract_strided_slice %43 {offsets = [0, 0], sizes = [112, 26], strides = [1, 1]} : vector<114x78xf32> to vector<112x26xf32>
    %45 = arith.addf %22, %44 : vector<112x26xf32>
    %46 = vector.extract_strided_slice %43 {offsets = [1, 26], sizes = [112, 26], strides = [1, 1]} : vector<114x78xf32> to vector<112x26xf32>
    %47 = arith.addf %45, %46 : vector<112x26xf32>
    %48 = vector.extract_strided_slice %43 {offsets = [2, 52], sizes = [112, 26], strides = [1, 1]} : vector<114x78xf32> to vector<112x26xf32>
    %49 = arith.addf %47, %48 : vector<112x26xf32>
    %cst_32 = arith.constant 0.000000e+00 : f32
    %50 = vector.broadcast %cst_32 : f32 to vector<114x84xf32>
    %c0_33 = arith.constant 0 : index
    %c0_34 = arith.constant 0 : index
    %c0_35 = arith.constant 0 : index
    %c1536_36 = arith.constant 1536 : index
    %51 = vector.load %arg1[%c0_33, %c0_34, %c0_35, %c1536_36] : memref<1x1x115x2304xf32, #tpu.memory_space<vmem>>, vector<1x1x115x768xf32>
    %52 = vector.shape_cast %51 : vector<1x1x115x768xf32> to vector<115x768xf32>
    %c0_37 = arith.constant 0 : index
    %c0_38 = arith.constant 0 : index
    %c0_39 = arith.constant 0 : index
    %53 = vector.load %arg2[%c0_37, %c0_38, %c0_39] : memref<1x1792x84xf32, #tpu.memory_space<vmem>>, vector<1x768x84xf32>
    %54 = vector.shape_cast %53 : vector<1x768x84xf32> to vector<768x84xf32>
    %cst_40 = arith.constant dense<0.000000e+00> : vector<115x84xf32>
    %55 = tpu.matmul %52, %54, %cst_40 {dimension_numbers = #tpu.dot_dimension_numbers<[1], [0], [0], [1], [0, 0, 1, 1], [], []>} : vector<115x768xf32>, vector<768x84xf32>, vector<115x84xf32> -> vector<115x84xf32>
    %56 = vector.extract_strided_slice %55 {offsets = [0, 0], sizes = [114, 84], strides = [1, 1]} : vector<115x84xf32> to vector<114x84xf32>
    %57 = arith.addf %50, %56 : vector<114x84xf32>
    %c0_41 = arith.constant 0 : index
    %c0_42 = arith.constant 0 : index
    %c0_43 = arith.constant 0 : index
    %c0_44 = arith.constant 0 : index
    %58 = vector.load %arg1[%c0_41, %c0_42, %c0_43, %c0_44] : memref<1x1x115x2304xf32, #tpu.memory_space<vmem>>, vector<1x1x115x1024xf32>
    %59 = vector.shape_cast %58 : vector<1x1x115x1024xf32> to vector<115x1024xf32>
    %c0_45 = arith.constant 0 : index
    %c768_46 = arith.constant 768 : index
    %c0_47 = arith.constant 0 : index
    %60 = vector.load %arg2[%c0_45, %c768_46, %c0_47] : memref<1x1792x84xf32, #tpu.memory_space<vmem>>, vector<1x1024x84xf32>
    %61 = vector.shape_cast %60 : vector<1x1024x84xf32> to vector<1024x84xf32>
    %cst_48 = arith.constant dense<0.000000e+00> : vector<115x84xf32>
    %62 = tpu.matmul %59, %61, %cst_48 {dimension_numbers = #tpu.dot_dimension_numbers<[1], [0], [0], [1], [0, 0, 1, 1], [], []>} : vector<115x1024xf32>, vector<1024x84xf32>, vector<115x84xf32> -> vector<115x84xf32>
    %63 = vector.extract_strided_slice %62 {offsets = [1, 0], sizes = [114, 84], strides = [1, 1]} : vector<115x84xf32> to vector<114x84xf32>
    %64 = arith.addf %57, %63 : vector<114x84xf32>
    %65 = vector.broadcast %0 : f32 to vector<114x84xf32>
    %66 = arith.addf %64, %65 : vector<114x84xf32>
    %67 = math.tanh %66 : vector<114x84xf32>
    %c2 = arith.constant 2 : index
    %c0_49 = arith.constant 0 : index
    %c0_50 = arith.constant 0 : index
    %68 = vector.load %arg3[%c2, %c0_49, %c0_50] : memref<3x84x78xf32, #tpu.memory_space<vmem>>, vector<1x84x78xf32>
    %69 = vector.shape_cast %68 : vector<1x84x78xf32> to vector<84x78xf32>
    %cst_51 = arith.constant dense<0.000000e+00> : vector<114x78xf32>
    %70 = tpu.matmul %67, %69, %cst_51 {dimension_numbers = #tpu.dot_dimension_numbers<[1], [0], [0], [1], [0, 0, 1, 1], [], []>} : vector<114x84xf32>, vector<84x78xf32>, vector<114x78xf32> -> vector<114x78xf32>
    %71 = vector.extract_strided_slice %70 {offsets = [0, 0], sizes = [112, 26], strides = [1, 1]} : vector<114x78xf32> to vector<112x26xf32>
    %72 = arith.addf %49, %71 : vector<112x26xf32>
    %73 = vector.extract_strided_slice %70 {offsets = [1, 26], sizes = [112, 26], strides = [1, 1]} : vector<114x78xf32> to vector<112x26xf32>
    %74 = arith.addf %72, %73 : vector<112x26xf32>
    %75 = vector.extract_strided_slice %70 {offsets = [2, 52], sizes = [112, 26], strides = [1, 1]} : vector<114x78xf32> to vector<112x26xf32>
    %76 = arith.addf %74, %75 : vector<112x26xf32>
    %77 = vector.broadcast %1 : f32 to vector<112x26xf32>
    %78 = arith.addf %76, %77 : vector<112x26xf32>
    %79 = math.tanh %78 : vector<112x26xf32>
    %c0_52 = arith.constant 0 : index
    %c0_53 = arith.constant 0 : index
    %c0_54 = arith.constant 0 : index
    %80 = vector.load %arg5[%c0_52, %c0_53, %c0_54] : memref<1x112x26xf32, #tpu.memory_space<vmem>>, vector<1x112x26xf32>
    %81 = vector.shape_cast %80 : vector<1x112x26xf32> to vector<112x26xf32>
    %82 = vector.shape_cast %79 : vector<112x26xf32> to vector<1x112x26xf32>
    tpu.vector_store %arg5[%c0_52, %c0_53, %c0_54], %82 {strides = array<i32>} : memref<1x112x26xf32, #tpu.memory_space<vmem>>, vector<1x112x26xf32>,
    return
  }
  func.func @transform_0(%arg0: i32) -> (i32, i32, i32, i32) {
    %c0_i32 = arith.constant 0 : i32
    %c0_i32_0 = arith.constant 0 : i32
    %c0_i32_1 = arith.constant 0 : i32
    %c0_i32_2 = arith.constant 0 : i32
    return %arg0, %c0_i32, %c0_i32_0, %c0_i32_1 : i32, i32, i32, i32
  }
  func.func @transform_1(%arg0: i32) -> (i32, i32, i32) {
    %c0_i32 = arith.constant 0 : i32
    %c0_i32_0 = arith.constant 0 : i32
    %c0_i32_1 = arith.constant 0 : i32
    %c0_i32_2 = arith.constant 0 : i32
    return %c0_i32, %c0_i32_0, %c0_i32_1 : i32, i32, i32
  }
  func.func @transform_2(%arg0: i32) -> (i32, i32, i32) {
    %c0_i32 = arith.constant 0 : i32
    %c0_i32_0 = arith.constant 0 : i32
    %c0_i32_1 = arith.constant 0 : i32
    %c0_i32_2 = arith.constant 0 : i32
    return %c0_i32, %c0_i32_0, %c0_i32_1 : i32, i32, i32
  }
  func.func @transform_3(%arg0: i32) -> i32 {
    %c0_i32 = arith.constant 0 : i32
    %c0_i32_0 = arith.constant 0 : i32
    return %c0_i32 : i32
  }
  func.func @transform_4(%arg0: i32) -> (i32, i32, i32) {
    %c0_i32 = arith.constant 0 : i32
    %c0_i32_0 = arith.constant 0 : i32
    %c0_i32_1 = arith.constant 0 : i32
    return %arg0, %c0_i32, %c0_i32_0 : i32, i32, i32
  }
}

module attributes {stable_mosaic.version = 11 : i64} {
  func.func @_heads_kernel(%arg0: memref<2x2912xf32, #tpu.memory_space<vmem>>, %arg1: memref<2912x128xf32, #tpu.memory_space<vmem>>, %arg2: memref<1x128xf32, #tpu.memory_space<vmem>>, %arg3: memref<64x6xf32, #tpu.memory_space<vmem>>, %arg4: memref<1x6xf32, #tpu.memory_space<vmem>>, %arg5: memref<64x1xf32, #tpu.memory_space<vmem>>, %arg6: memref<1x1xf32, #tpu.memory_space<vmem>>, %arg7: memref<2x6xf32, #tpu.memory_space<vmem>>, %arg8: memref<2x1xf32, #tpu.memory_space<vmem>>, %arg9: memref<2x1xf32, #tpu.memory_space<vmem>>) attributes {dimension_semantics = [], scalar_prefetch = 0 : i64, scratch_operands = 0 : i64, tpu.core_type = #tpu.core_type<tc>} {
    %c0 = arith.constant 0 : index
    %c0_0 = arith.constant 0 : index
    %0 = vector.load %arg0[%c0, %c0_0] : memref<2x2912xf32, #tpu.memory_space<vmem>>, vector<2x2912xf32>
    %c0_1 = arith.constant 0 : index
    %c0_2 = arith.constant 0 : index
    %1 = vector.load %arg1[%c0_1, %c0_2] : memref<2912x128xf32, #tpu.memory_space<vmem>>, vector<2912x128xf32>
    %cst = arith.constant dense<0.000000e+00> : vector<2x128xf32>
    %2 = tpu.matmul %0, %1, %cst {dimension_numbers = #tpu.dot_dimension_numbers<[1], [0], [0], [1], [0, 0, 1, 1], [], []>} : vector<2x2912xf32>, vector<2912x128xf32>, vector<2x128xf32> -> vector<2x128xf32>
    %c0_3 = arith.constant 0 : index
    %c0_4 = arith.constant 0 : index
    %3 = vector.load %arg2[%c0_3, %c0_4] : memref<1x128xf32, #tpu.memory_space<vmem>>, vector<1x128xf32>
    %4 = vector.broadcast %3 : vector<1x128xf32> to vector<2x128xf32>
    %5 = arith.addf %2, %4 : vector<2x128xf32>
    %6 = math.tanh %5 : vector<2x128xf32>
    %7 = vector.extract_strided_slice %6 {offsets = [0, 0], sizes = [2, 64], strides = [1, 1]} : vector<2x128xf32> to vector<2x64xf32>
    %8 = vector.extract_strided_slice %6 {offsets = [0, 64], sizes = [2, 64], strides = [1, 1]} : vector<2x128xf32> to vector<2x64xf32>
    %c0_5 = arith.constant 0 : index
    %c0_6 = arith.constant 0 : index
    %9 = vector.load %arg3[%c0_5, %c0_6] : memref<64x6xf32, #tpu.memory_space<vmem>>, vector<64x6xf32>
    %cst_7 = arith.constant dense<0.000000e+00> : vector<2x6xf32>
    %10 = tpu.matmul %7, %9, %cst_7 {dimension_numbers = #tpu.dot_dimension_numbers<[1], [0], [0], [1], [0, 0, 1, 1], [], []>} : vector<2x64xf32>, vector<64x6xf32>, vector<2x6xf32> -> vector<2x6xf32>
    %c0_8 = arith.constant 0 : index
    %c0_9 = arith.constant 0 : index
    %11 = vector.load %arg4[%c0_8, %c0_9] : memref<1x6xf32, #tpu.memory_space<vmem>>, vector<1x6xf32>
    %12 = vector.broadcast %11 : vector<1x6xf32> to vector<2x6xf32>
    %13 = arith.addf %10, %12 : vector<2x6xf32>
    %cst_10 = arith.constant dense<0xFF800000> : vector<2xf32>
    %14 = vector.multi_reduction <maximumf>, %13, %cst_10 [1] : vector<2x6xf32> to vector<2xf32>
    %15 = vector.shape_cast %14 : vector<2xf32> to vector<2x1xf32>
    %16 = vector.broadcast %15 : vector<2x1xf32> to vector<2x6xf32>
    %17 = arith.subf %13, %16 : vector<2x6xf32>
    %18 = math.exp %17 : vector<2x6xf32>
    %cst_11 = arith.constant dense<0.000000e+00> : vector<2xf32>
    %19 = vector.multi_reduction <add>, %18, %cst_11 [1] : vector<2x6xf32> to vector<2xf32>
    %20 = vector.shape_cast %19 : vector<2xf32> to vector<2x1xf32>
    %21 = math.log %20 : vector<2x1xf32>
    %22 = arith.addf %15, %21 : vector<2x1xf32>
    %23 = vector.broadcast %22 : vector<2x1xf32> to vector<2x6xf32>
    %24 = arith.subf %13, %23 : vector<2x6xf32>
    %c0_12 = arith.constant 0 : index
    %c0_13 = arith.constant 0 : index
    %25 = vector.load %arg7[%c0_12, %c0_13] : memref<2x6xf32, #tpu.memory_space<vmem>>, vector<2x6xf32>
    tpu.vector_store %arg7[%c0_12, %c0_13], %24 {strides = array<i32>} : memref<2x6xf32, #tpu.memory_space<vmem>>, vector<2x6xf32>,
    %26 = vector.broadcast %20 : vector<2x1xf32> to vector<2x6xf32>
    %27 = arith.divf %18, %26 : vector<2x6xf32>
    %28 = arith.mulf %27, %24 : vector<2x6xf32>
    %cst_14 = arith.constant dense<0.000000e+00> : vector<2xf32>
    %29 = vector.multi_reduction <add>, %28, %cst_14 [1] : vector<2x6xf32> to vector<2xf32>
    %30 = vector.shape_cast %29 : vector<2xf32> to vector<2x1xf32>
    %cst_15 = arith.constant 0.000000e+00 : f32
    %31 = vector.broadcast %cst_15 : f32 to vector<2x1xf32>
    %32 = arith.subf %31, %30 : vector<2x1xf32>
    %c0_16 = arith.constant 0 : index
    %c0_17 = arith.constant 0 : index
    %33 = vector.load %arg9[%c0_16, %c0_17] : memref<2x1xf32, #tpu.memory_space<vmem>>, vector<2x1xf32>
    tpu.vector_store %arg9[%c0_16, %c0_17], %32 {strides = array<i32>} : memref<2x1xf32, #tpu.memory_space<vmem>>, vector<2x1xf32>,
    %c0_18 = arith.constant 0 : index
    %c0_19 = arith.constant 0 : index
    %34 = vector.load %arg5[%c0_18, %c0_19] : memref<64x1xf32, #tpu.memory_space<vmem>>, vector<64x1xf32>
    %cst_20 = arith.constant dense<0.000000e+00> : vector<2x1xf32>
    %35 = tpu.matmul %8, %34, %cst_20 {dimension_numbers = #tpu.dot_dimension_numbers<[1], [0], [0], [1], [0, 0, 1, 1], [], []>} : vector<2x64xf32>, vector<64x1xf32>, vector<2x1xf32> -> vector<2x1xf32>
    %c0_21 = arith.constant 0 : index
    %c0_22 = arith.constant 0 : index
    %36 = vector.load %arg6[%c0_21, %c0_22] : memref<1x1xf32, #tpu.memory_space<vmem>>, vector<1x1xf32>
    %37 = vector.broadcast %36 : vector<1x1xf32> to vector<2x1xf32>
    %38 = arith.addf %35, %37 : vector<2x1xf32>
    %c0_23 = arith.constant 0 : index
    %c0_24 = arith.constant 0 : index
    %39 = vector.load %arg8[%c0_23, %c0_24] : memref<2x1xf32, #tpu.memory_space<vmem>>, vector<2x1xf32>
    tpu.vector_store %arg8[%c0_23, %c0_24], %38 {strides = array<i32>} : memref<2x1xf32, #tpu.memory_space<vmem>>, vector<2x1xf32>,
    return
  }
}

</mosaic_0001>

<bundles_post_ra>
// kernel: ppo_evaluate.3
= control target key start
LH: loop header
LB: loop body
LE: loop exit
PB: predicated region body
PF: predicated region fallthrough
CT: control target
= control target key end

     0   :  { %v2496_v43 = vmov 1983009808   ;;  %v418_v45 = vlaneseq  ;;  %vm2498_vm0 = vmmov 0   ;;  %vm537_vm1 = vcmask 785408   ;;  %s3817_s1 = inlined_call_operand.vmem [shape: f32[2912,128], index: 1, kind: input, shape index: {}]   ;;  %s3818_s0 = inlined_call_operand.vmem [shape: f32[2,2912], index: 0, kind: input, shape index: {}]   ;;  %s3819_s2 = inlined_call_operand.vmem [shape: f32[1,128], index: 2, kind: input, shape index: {}]   ;;  %s3820_s3 = inlined_call_operand.vmem [shape: f32[64,6], index: 3, kind: input, shape index: {}]   ;;  %s3821_s5 = inlined_call_operand.vmem [shape: f32[64,1], index: 5, kind: input, shape index: {}]   ;;  %s3822_s6 = inlined_call_operand.<no memory space> [shape: f32[1,1], index: 6, kind: input, shape index: {}]   ;;  %s3823_s4 = inlined_call_operand.vmem [shape: f32[1,6], index: 4, kind: input, shape index: {}]   ;;  %s3824_s8 = inlined_call_operand.vmem [shape: f32[2,1], index: 8, kind: output, shape index: {1}]   ;;  %s3825_s7 = inlined_call_operand.vmem [shape: f32[2,6], index: 7, kind: output, shape index: {0}]   ;;  %s3826_s9 = inlined_call_operand.vmem [shape: f32[2,1], index: 9, kind: output, shape index: {2}]  }
   0x1   :  { %v53_v0 = vld [vmem:[%s3817_s1 + $0x80] sm:$0xff]  ;;  %v54_v1 = vld [vmem:[%s3817_s1 + $0x88] sm:$0xff]  ;;  %v55_v11 = vld [vmem:[%s3817_s1 + $0x90] sm:$0xff]  ;;  %v416_v44 = vunpack.c.l.s4 %v2496_v43  ;;  %vm1396_vm2 = vcmask 523264   ;;  %vm1470_vm3 = vcmask 41984   ;;  %vm1492_vm4 = vcmask 1024  }
   0x2   :  { %v37_v2 = vld [vmem:[%s3817_s1] sm:$0xff]  ;;  %v2083_v3 = vpack.c.bf16 %v54_v1, %v53_v0  ;;  %v38_v4 = vld [vmem:[%s3817_s1 + $0x8] sm:$0xff]  ;;  %v56_v13 = vld [vmem:[%s3817_s1 + $0x98] sm:$0xff]  ;;  %v419_v60 = vshrl.u32 %v418_v45, 7 }
   0x3   :  { %v85_v5 = vld [vmem:[%s3817_s1 + $0x180] sm:$0xff]  ;;  %v86_v6 = vld [vmem:[%s3817_s1 + $0x188] sm:$0xff]  ;;  %v2085_v7 = vpack.c.bf16 %v38_v4, %v37_v2  ;;  %v39_v14 = vld [vmem:[%s3817_s1 + $0x10] sm:$0xff]  ;;  %v2087_v16 = vpack.c.bf16 %v56_v13, %v55_v11  ;;  %v417_v59 = vunpack.c.0.s8 %v416_v44 }
   0x4   :  { %v2115_v8 = vpack.c.bf16 %v86_v6, %v85_v5  ;;  %v69_v9 = vld [vmem:[%s3817_s1 + $0x100] sm:$0xff]  ;;  %v70_v10 = vld [vmem:[%s3817_s1 + $0x108] sm:$0xff]  ;;  %2084 = vmatprep.subr.bf16.mxu0 %v2083_v3  ;;  %v40_v15 = vld [vmem:[%s3817_s1 + $0x18] sm:$0xff] }
   0x5   :  { %v2117_v12 = vpack.c.bf16 %v70_v10, %v69_v9  ;;  %2086 = vmatpush3.bf16.msra.mxu0 %v2085_v7  ;;  %v2089_v17 = vpack.c.bf16 %v40_v15, %v39_v14  ;;  %v87_v18 = vld [vmem:[%s3817_s1 + $0x190] sm:$0xff]  ;;  %v88_v19 = vld [vmem:[%s3817_s1 + $0x198] sm:$0xff]  ;;  %v57_v23 = vld [vmem:[%s3817_s1 + $0xa0] sm:$0xff]  ;;  %v2695_v10 = vsub.s32 %v417_v59, %v419_v60 }
   0x6   :  { %2116 = vmatprep.subr.bf16.mxu1 %v2115_v8  ;;  %v71_v20 = vld [vmem:[%s3817_s1 + $0x110] sm:$0xff]  ;;  %v2119_v21 = vpack.c.bf16 %v88_v19, %v87_v18  ;;  %v72_v22 = vld [vmem:[%s3817_s1 + $0x118] sm:$0xff]  ;;  %v58_v24 = vld [vmem:[%s3817_s1 + $0xa8] sm:$0xff]  ;;  %2088 = vmatprep.subr.bf16.mxu0 %v2087_v16 }
   0x7   :  { %2118 = vmatpush3.bf16.msra.mxu1 %v2117_v12  ;;  %v2121_v25 = vpack.c.bf16 %v72_v22, %v71_v20  ;;  %v2091_v26 = vpack.c.bf16 %v58_v24, %v57_v23  ;;  %v41_v27 = vld [vmem:[%s3817_s1 + $0x20] sm:$0xff]  ;;  %v42_v28 = vld [vmem:[%s3817_s1 + $0x28] sm:$0xff]  ;;  %v59_v35 = vld [vmem:[%s3817_s1 + $0xb0] sm:$0xff] }
   0x8   :  { %v89_v29 = vld [vmem:[%s3817_s1 + $0x1a0] sm:$0xff]  ;;  %2120 = vmatprep.subr.bf16.mxu1 %v2119_v21  ;;  %v90_v30 = vld [vmem:[%s3817_s1 + $0x1a8] sm:$0xff]  ;;  %v2093_v33 = vpack.c.bf16 %v42_v28, %v41_v27  ;;  %v60_v36 = vld [vmem:[%s3817_s1 + $0xb8] sm:$0xff] }
   0x9   :  { %v73_v31 = vld [vmem:[%s3817_s1 + $0x120] sm:$0xff]  ;;  %v74_v32 = vld [vmem:[%s3817_s1 + $0x128] sm:$0xff]  ;;  %2090 = vmatpush3.bf16.msra.mxu0 %v2089_v17  ;;  %v2123_v34 = vpack.c.bf16 %v90_v30, %v89_v29  ;;  %v43_v37 = vld [vmem:[%s3817_s1 + $0x30] sm:$0xff]  ;;  %v2095_v39 = vpack.c.bf16 %v60_v36, %v59_v35 }
   0xa   :  { %2092 = vmatprep.subr.bf16.mxu0 %v2091_v26  ;;  %v2125_v38 = vpack.c.bf16 %v74_v32, %v73_v31  ;;  %v44_v40 = vld [vmem:[%s3817_s1 + $0x38] sm:$0xff]  ;;  %v91_v41 = vld [vmem:[%s3817_s1 + $0x1b0] sm:$0xff]  ;;  %v61_v49 = vld [vmem:[%s3817_s1 + $0xc0] sm:$0xff] }
   0xb   :  { %2122 = vmatpush3.bf16.msra.mxu1 %v2121_v25  ;;  %v92_v42 = vld [vmem:[%s3817_s1 + $0x1b8] sm:$0xff]  ;;  %v75_v47 = vld [vmem:[%s3817_s1 + $0x130] sm:$0xff]  ;;  %v62_v50 = vld [vmem:[%s3817_s1 + $0xc8] sm:$0xff]  ;;  %v2097_v51 = vpack.c.bf16 %v44_v40, %v43_v37 }
   0xc   :  { %2124 = vmatprep.subr.bf16.mxu1 %v2123_v34  ;;  %v2127_v46 = vpack.c.bf16 %v92_v42, %v91_v41  ;;  %v76_v48 = vld [vmem:[%s3817_s1 + $0x138] sm:$0xff]  ;;  %v93_v52 = vld [vmem:[%s3817_s1 + $0x1c0] sm:$0xff]  ;;  %v94_v53 = vld [vmem:[%s3817_s1 + $0x1c8] sm:$0xff]  ;;  %v2099_v55 = vpack.c.bf16 %v62_v50, %v61_v49 }
   0xd   :  { %2094 = vmatpush3.bf16.msra.mxu0 %v2093_v33  ;;  %v2129_v54 = vpack.c.bf16 %v76_v48, %v75_v47  ;;  %v45_v56 = vld [vmem:[%s3817_s1 + $0x40] sm:$0xff]  ;;  %v46_v57 = vld [vmem:[%s3817_s1 + $0x48] sm:$0xff]  ;;  %v2131_v61 = vpack.c.bf16 %v94_v53, %v93_v52  ;;  %v63_v63 = vld [vmem:[%s3817_s1 + $0xd0] sm:$0xff] }
   0xe   :  { %2096 = vmatprep.subr.bf16.mxu0 %v2095_v39  ;;  %v77_v58 = vld [vmem:[%s3817_s1 + $0x140] sm:$0xff]  ;;  %v78_v62 = vld [vmem:[%s3817_s1 + $0x148] sm:$0xff]  ;;  %v64_v0 = vld [vmem:[%s3817_s1 + $0xd8] sm:$0xff]  ;;  %v2101_v3 = vpack.c.bf16 %v46_v57, %v45_v56 }
   0xf   :  { %2126 = vmatpush3.bf16.msra.mxu1 %v2125_v38  ;;  %v95_v1 = vld [vmem:[%s3817_s1 + $0x1d0] sm:$0xff]  ;;  %v96_v2 = vld [vmem:[%s3817_s1 + $0x1d8] sm:$0xff]  ;;  %v2133_v5 = vpack.c.bf16 %v78_v62, %v77_v58  ;;  %v2103_v6 = vpack.c.bf16 %v64_v0, %v63_v63  ;;  %v65_v12 = vld [vmem:[%s3817_s1 + $0xe0] sm:$0xff] }
  0x10   :  { %2128 = vmatprep.subr.bf16.mxu1 %v2127_v46  ;;  %v47_v4 = vld [vmem:[%s3817_s1 + $0x50] sm:$0xff]  ;;  %v48_v7 = vld [vmem:[%s3817_s1 + $0x58] sm:$0xff]  ;;  %v2135_v11 = vpack.c.bf16 %v96_v2, %v95_v1  ;;  %v66_v13 = vld [vmem:[%s3817_s1 + $0xe8] sm:$0xff] }
  0x11   :  { %2098 = vmatpush3.bf16.msra.mxu0 %v2097_v51  ;;  %v79_v8 = vld [vmem:[%s3817_s1 + $0x150] sm:$0xff]  ;;  %v80_v9 = vld [vmem:[%s3817_s1 + $0x158] sm:$0xff]  ;;  %v97_v14 = vld [vmem:[%s3817_s1 + $0x1e0] sm:$0xff]  ;;  %v2105_v16 = vpack.c.bf16 %v48_v7, %v47_v4  ;;  %v2107_v19 = vpack.c.bf16 %v66_v13, %v65_v12 }
  0x12   :  { %2100 = vmatprep.subr.bf16.mxu0 %v2099_v55  ;;  %v98_v15 = vld [vmem:[%s3817_s1 + $0x1e8] sm:$0xff]  ;;  %v2137_v17 = vpack.c.bf16 %v80_v9, %v79_v8  ;;  %v31_v18 = vld [vmem:[%s3818_s0] sm:$0xff]  ;;  %v67_v27 = vld [vmem:[%s3817_s1 + $0xf0] sm:$0xff] }
  0x13   :  { %2130 = vmatpush3.bf16.msra.mxu1 %v2129_v54  ;;  %v49_v20 = vld [vmem:[%s3817_s1 + $0x60] sm:$0xff]  ;;  %v50_v21 = vld [vmem:[%s3817_s1 + $0x68] sm:$0xff]  ;;  %v421_v23 = vrot.slane %v31_v18, %v2695_v10  ;;  %v414_v24 = vcombine.high %v31_v18, %v31_v18  ;;  %v2139_v25 = vpack.c.bf16 %v98_v15, %v97_v14  ;;  %v68_v28 = vld [vmem:[%s3817_s1 + $0xf8] sm:$0xff] }
  0x14   :  { %2132 = vmatprep.subr.bf16.mxu1 %v2131_v61  ;;  %v81_v22 = vld [vmem:[%s3817_s1 + $0x160] sm:$0xff]  ;;  %v82_v26 = vld [vmem:[%s3817_s1 + $0x168] sm:$0xff]  ;;  %v99_v29 = vld [vmem:[%s3817_s1 + $0x1f0] sm:$0xff]  ;;  %v2109_v33 = vpack.c.bf16 %v50_v21, %v49_v20  ;;  %v2111_v35 = vpack.c.bf16 %v68_v28, %v67_v27 }
  0x15   :  { %2102 = vmatpush3.bf16.msra.mxu0 %v2101_v3  ;;  %v100_v30 = vld [vmem:[%s3817_s1 + $0x1f8] sm:$0xff]  ;;  %v429_v31 = vcombine.high %v421_v23, %v421_v23  ;;  %v428_v32 = vrot.slane %v414_v24, %v2695_v10  ;;  %v2141_v34 = vpack.c.bf16 %v82_v26, %v81_v22  ;;  %v51_v36 = vld [vmem:[%s3817_s1 + $0x70] sm:$0xff]  ;;  %v117_v42 = vld [vmem:[%s3817_s1 + $0x280] sm:$0xff] }
  0x16   :  { %2104 = vmatprep.subr.bf16.mxu0 %v2103_v6  ;;  %v52_v37 = vld [vmem:[%s3817_s1 + $0x78] sm:$0xff]  ;;  %v83_v38 = vld [vmem:[%s3817_s1 + $0x170] sm:$0xff]  ;;  %v2143_v40 = vpack.c.bf16 %v100_v30, %v99_v29  ;;  %v118_v43 = vld [vmem:[%s3817_s1 + $0x288] sm:$0xff] }
  0x17   :  { %2134 = vmatpush3.bf16.msra.mxu1 %v2133_v5  ;;  %v430_v39 = vcombine.high %v428_v32, %v428_v32  ;;  %604 = vmatprep.mubr.f32.mxu0 %v429_v31  ;;  %v84_v41 = vld [vmem:[%s3817_s1 + $0x178] sm:$0xff]  ;;  %v149_v44 = vld [vmem:[%s3817_s1 + $0x380] sm:$0xff]  ;;  %v150_v45 = vld [vmem:[%s3817_s1 + $0x388] sm:$0xff]  ;;  %v2113_v46 = vpack.c.bf16 %v52_v37, %v51_v36  ;;  %v2147_v48 = vpack.c.bf16 %v118_v43, %v117_v42 }
  0x18   :  { %2136 = vmatprep.subr.bf16.mxu1 %v2135_v11  ;;  %v2145_v47 = vpack.c.bf16 %v84_v41, %v83_v38  ;;  %v101_v49 = vld [vmem:[%s3817_s1 + $0x200] sm:$0xff]  ;;  %v102_v50 = vld [vmem:[%s3817_s1 + $0x208] sm:$0xff]  ;;  %v2179_v52 = vpack.c.bf16 %v150_v45, %v149_v44  ;;  %v119_v54 = vld [vmem:[%s3817_s1 + $0x290] sm:$0xff] }
  0x19   :  { %2106 = vmatpush3.bf16.msra.mxu0 %v2105_v16  ;;  %674 = vmatprep.mubr.f32.mxu1 %v430_v39  ;;  %v133_v51 = vld [vmem:[%s3817_s1 + $0x300] sm:$0xff]  ;;  %v134_v53 = vld [vmem:[%s3817_s1 + $0x308] sm:$0xff]  ;;  %v120_v55 = vld [vmem:[%s3817_s1 + $0x298] sm:$0xff]  ;;  %v2149_v58 = vpack.c.bf16 %v102_v50, %v101_v49 }
  0x1a   :  { %2108 = vmatprep.subr.bf16.mxu0 %v2107_v19  ;;  %v151_v56 = vld [vmem:[%s3817_s1 + $0x390] sm:$0xff]  ;;  %v152_v57 = vld [vmem:[%s3817_s1 + $0x398] sm:$0xff]  ;;  %v2181_v59 = vpack.c.bf16 %v134_v53, %v133_v51  ;;  %v2151_v60 = vpack.c.bf16 %v120_v55, %v119_v54  ;;  %v121_v2 = vld [vmem:[%s3817_s1 + $0x2a0] sm:$0xff] }
  0x1b   :  { %2138 = vmatpush3.bf16.msra.mxu1 %v2137_v17  ;;  %v103_v61 = vld [vmem:[%s3817_s1 + $0x210] sm:$0xff]  ;;  %v104_v62 = vld [vmem:[%s3817_s1 + $0x218] sm:$0xff]  ;;  %v2183_v0 = vpack.c.bf16 %v152_v57, %v151_v56  ;;  %v122_v3 = vld [vmem:[%s3817_s1 + $0x2a8] sm:$0xff] }
  0x1c   :  { %2140 = vmatprep.subr.bf16.mxu1 %v2139_v25  ;;  %v135_v63 = vld [vmem:[%s3817_s1 + $0x310] sm:$0xff]  ;;  %v136_v1 = vld [vmem:[%s3817_s1 + $0x318] sm:$0xff]  ;;  %v153_v4 = vld [vmem:[%s3817_s1 + $0x3a0] sm:$0xff]  ;;  %v2153_v6 = vpack.c.bf16 %v104_v62, %v103_v61  ;;  %v2155_v8 = vpack.c.bf16 %v122_v3, %v121_v2 }
  0x1d   :  { %2110 = vmatpush3.bf16.msra.mxu0 %v2109_v33  ;;  %v154_v5 = vld [vmem:[%s3817_s1 + $0x3a8] sm:$0xff]  ;;  %v2185_v7 = vpack.c.bf16 %v136_v1, %v135_v63  ;;  %v105_v9 = vld [vmem:[%s3817_s1 + $0x220] sm:$0xff]  ;;  %v123_v15 = vld [vmem:[%s3817_s1 + $0x2b0] sm:$0xff] }
  0x1e   :  { %2112 = vmatprep.subr.bf16.mxu0 %v2111_v35  ;;  %v106_v11 = vld [vmem:[%s3817_s1 + $0x228] sm:$0xff]  ;;  %v137_v12 = vld [vmem:[%s3817_s1 + $0x320] sm:$0xff]  ;;  %v2187_v13 = vpack.c.bf16 %v154_v5, %v153_v4  ;;  %v124_v16 = vld [vmem:[%s3817_s1 + $0x2b8] sm:$0xff] }
  0x1f   :  { %2142 = vmatpush3.bf16.msra.mxu1 %v2141_v34  ;;  %v138_v14 = vld [vmem:[%s3817_s1 + $0x328] sm:$0xff]  ;;  %v155_v17 = vld [vmem:[%s3817_s1 + $0x3b0] sm:$0xff]  ;;  %v156_v18 = vld [vmem:[%s3817_s1 + $0x3b8] sm:$0xff]  ;;  %v2157_v19 = vpack.c.bf16 %v106_v11, %v105_v9  ;;  %v2159_v22 = vpack.c.bf16 %v124_v16, %v123_v15 }
  0x20   :  { %2144 = vmatprep.subr.bf16.mxu1 %v2143_v40  ;;  %v107_v20 = vld [vmem:[%s3817_s1 + $0x230] sm:$0xff]  ;;  %v2189_v21 = vpack.c.bf16 %v138_v14, %v137_v12  ;;  %v140_v25 = vld [vmem:[%s3817_s1 + $0x338] sm:$0xff]  ;;  %v2191_v26 = vpack.c.bf16 %v156_v18, %v155_v17  ;;  %v125_v27 = vld [vmem:[%s3817_s1 + $0x2c0] sm:$0xff] }
  0x21   :  { %2114 = vmatpush3.bf16.msra.mxu0 %v2113_v46  ;;  %v139_v24 = vld [vmem:[%s3817_s1 + $0x330] sm:$0xff]  ;;  %v126_v28 = vld [vmem:[%s3817_s1 + $0x2c8] sm:$0xff]  ;;  %v157_v30 = vld [vmem:[%s3817_s1 + $0x3c0] sm:$0xff] }
  0x22   :  { %2148 = vmatprep.subr.bf16.mxu0 %v2147_v48  ;;  %v32_v29 = vld [vmem:[%s3818_s0 + $0x8] sm:$0xff]  ;;  %v2193_v35 = vpack.c.bf16 %v140_v25, %v139_v24  ;;  %v2163_v36 = vpack.c.bf16 %v126_v28, %v125_v27  ;;  %v109_v37 = vld [vmem:[%s3817_s1 + $0x240] sm:$0xff]  ;;  %v127_v44 = vld [vmem:[%s3817_s1 + $0x2d0] sm:$0xff] }
  0x23   :  { %2146 = vmatpush3.bf16.msra.mxu1 %v2145_v47  ;;  %v158_v31 = vld [vmem:[%s3817_s1 + $0x3c8] sm:$0xff]  ;;  %v431_v33 = vcombine.high %v32_v29, %v32_v29  ;;  %v141_v39 = vld [vmem:[%s3817_s1 + $0x340] sm:$0xff]  ;;  %v128_v45 = vld [vmem:[%s3817_s1 + $0x2d8] sm:$0xff] }
  0x24   :  { %2180 = vmatprep.subr.bf16.mxu1 %v2179_v52  ;;  %605 = vmatmul.mubr.f32.vlgmr.msra.gmra.mrb[0].mxu0 %v421_v23  ;;  %v108_v23 = vld [vmem:[%s3817_s1 + $0x238] sm:$0xff]  ;;  %v110_v38 = vld [vmem:[%s3817_s1 + $0x248] sm:$0xff]  ;;  %v2195_v42 = vpack.c.bf16 %v158_v31, %v157_v30  ;;  %v159_v46 = vld [vmem:[%s3817_s1 + $0x3d0] sm:$0xff]  ;;  %v2167_v51 = vpack.c.bf16 %v128_v45, %v127_v44 }
  0x25   :  { %2150 = vmatpush3.bf16.msra.mxu0 %v2149_v58  ;;  %v2161_v34 = vpack.c.bf16 %v108_v23, %v107_v20  ;;  %v2876_v41 = vrot.slane %v431_v33, %v2695_v10  ;;  %v142_v43 = vld [vmem:[%s3817_s1 + $0x348] sm:$0xff]  ;;  %v160_v47 = vld [vmem:[%s3817_s1 + $0x3d8] sm:$0xff]  ;;  %v2165_v49 = vpack.c.bf16 %v110_v38, %v109_v37  ;;  %v111_v52 = vld [vmem:[%s3817_s1 + $0x250] sm:$0xff] }
  0x26   :  { %675 = vmatmul.mubr.f32.vlgmr.msra.gmra.mrb[0].mxu1 %v428_v32  ;;  %2152 = vmatprep.subr.bf16.mxu0 %v2151_v60  ;;  %v2862_v32 = vrot.slane %v32_v29, %v2695_v10  ;;  %v2197_v50 = vpack.c.bf16 %v142_v43, %v141_v39  ;;  %v112_v53 = vld [vmem:[%s3817_s1 + $0x258] sm:$0xff]  ;;  %v143_v54 = vld [vmem:[%s3817_s1 + $0x350] sm:$0xff]  ;;  %v2199_v55 = vpack.c.bf16 %v160_v47, %v159_v46  ;;  %v129_v57 = vld [vmem:[%s3817_s1 + $0x2e0] sm:$0xff] }
  0x27   :  { %2182 = vmatpush3.bf16.msra.mxu1 %v2181_v59  ;;  %v447_v48 = vcombine.high %v2876_v41, %v2876_v41  ;;  %v144_v56 = vld [vmem:[%s3817_s1 + $0x358] sm:$0xff]  ;;  %v130_v58 = vld [vmem:[%s3817_s1 + $0x2e8] sm:$0xff]  ;;  %v161_v59 = vld [vmem:[%s3817_s1 + $0x3e0] sm:$0xff]  ;;  %v2169_v61 = vpack.c.bf16 %v112_v53, %v111_v52 }
  0x28   :  { %2184 = vmatprep.subr.bf16.mxu1 %v2183_v0  ;;  %v446_v40 = vcombine.high %v2862_v32, %v2862_v32  ;;  %v162_v60 = vld [vmem:[%s3817_s1 + $0x3e8] sm:$0xff]  ;;  %v2201_v62 = vpack.c.bf16 %v144_v56, %v143_v54  ;;  %v2171_v63 = vpack.c.bf16 %v130_v58, %v129_v57  ;;  %v113_v0 = vld [vmem:[%s3817_s1 + $0x260] sm:$0xff]  ;;  %v131_v5 = vld [vmem:[%s3817_s1 + $0x2f0] sm:$0xff] }
  0x29   :  { %2154 = vmatpush3.bf16.msra.mxu0 %v2153_v6  ;;  %814 = vmatprep.mubr.f32.mxu1 %v447_v48  ;;  %v114_v1 = vld [vmem:[%s3817_s1 + $0x268] sm:$0xff]  ;;  %v145_v2 = vld [vmem:[%s3817_s1 + $0x360] sm:$0xff]  ;;  %v2203_v3 = vpack.c.bf16 %v162_v60, %v161_v59  ;;  %v132_v6 = vld [vmem:[%s3817_s1 + $0x2f8] sm:$0xff] }
  0x2a   :  { %2156 = vmatprep.subr.bf16.mxu0 %v2155_v8  ;;  %744 = vmatprep.mubr.f32.mxu0 %v446_v40  ;;  %v146_v4 = vld [vmem:[%s3817_s1 + $0x368] sm:$0xff]  ;;  %v164_v8 = vld [vmem:[%s3817_s1 + $0x3f8] sm:$0xff]  ;;  %v2173_v9 = vpack.c.bf16 %v114_v1, %v113_v0  ;;  %v2175_v12 = vpack.c.bf16 %v132_v6, %v131_v5  ;;  %v147_v15 = vld [vmem:[%s3817_s1 + $0x370] sm:$0xff] }
  0x2b   :  { %2186 = vmatpush3.bf16.msra.mxu1 %v2185_v7  ;;  %v163_v7 = vld [vmem:[%s3817_s1 + $0x3f0] sm:$0xff]  ;;  %v2205_v11 = vpack.c.bf16 %v146_v4, %v145_v2  ;;  %v116_v14 = vld [vmem:[%s3817_s1 + $0x278] sm:$0xff]  ;;  %v181_v18 = vld [vmem:[%s3817_s1 + $0x480] sm:$0xff] }
  0x2c   :  { %2188 = vmatprep.subr.bf16.mxu1 %v2187_v13  ;;  %v115_v13 = vld [vmem:[%s3817_s1 + $0x270] sm:$0xff]  ;;  %v2207_v16 = vpack.c.bf16 %v164_v8, %v163_v7  ;;  %v148_v17 = vld [vmem:[%s3817_s1 + $0x378] sm:$0xff]  ;;  %v213_v20 = vld [vmem:[%s3817_s1 + $0x580] sm:$0xff] }
  0x2d   :  { %2158 = vmatpush3.bf16.msra.mxu0 %v2157_v19  ;;  %v182_v19 = vld [vmem:[%s3817_s1 + $0x488] sm:$0xff]  ;;  %v165_v23 = vld [vmem:[%s3817_s1 + $0x400] sm:$0xff]  ;;  %v2209_v24 = vpack.c.bf16 %v148_v17, %v147_v15  ;;  %v183_v30 = vld [vmem:[%s3817_s1 + $0x490] sm:$0xff] }
  0x2e   :  { %2160 = vmatprep.subr.bf16.mxu0 %v2159_v22  ;;  %v2177_v22 = vpack.c.bf16 %v116_v14, %v115_v13  ;;  %v2211_v25 = vpack.c.bf16 %v182_v19, %v181_v18  ;;  %v197_v27 = vld [vmem:[%s3817_s1 + $0x500] sm:$0xff]  ;;  %v198_v28 = vld [vmem:[%s3817_s1 + $0x508] sm:$0xff]  ;;  %v184_v31 = vld [vmem:[%s3817_s1 + $0x498] sm:$0xff] }
  0x2f   :  { %2190 = vmatpush3.bf16.msra.mxu1 %v2189_v21  ;;  %v214_v21 = vld [vmem:[%s3817_s1 + $0x588] sm:$0xff]  ;;  %v215_v33 = vld [vmem:[%s3817_s1 + $0x590] sm:$0xff]  ;;  %v2215_v38 = vpack.c.bf16 %v184_v31, %v183_v30  ;;  %v168_v40 = vld [vmem:[%s3817_s1 + $0x418] sm:$0xff] }
  0x30   :  { %2192 = vmatprep.subr.bf16.mxu1 %v2191_v26  ;;  %v166_v26 = vld [vmem:[%s3817_s1 + $0x408] sm:$0xff]  ;;  %v2243_v29 = vpack.c.bf16 %v214_v21, %v213_v20  ;;  %v33_v37 = vld [vmem:[%s3818_s0 + $0x10] sm:$0xff]  ;;  %v200_v46 = vld [vmem:[%s3817_s1 + $0x518] sm:$0xff] }
  0x31   :  { %2162 = vmatpush3.bf16.msra.mxu0 %v2161_v34  ;;  %v216_v34 = vld [vmem:[%s3817_s1 + $0x598] sm:$0xff]  ;;  %v167_v39 = vld [vmem:[%s3817_s1 + $0x410] sm:$0xff]  ;;  %v3004_v43 = vrot.slane %v33_v37, %v2695_v10  ;;  %v448_v44 = vcombine.high %v33_v37, %v33_v37  ;;  %v185_v47 = vld [vmem:[%s3817_s1 + $0x4a0] sm:$0xff] }
  0x32   :  { %2164 = vmatprep.subr.bf16.mxu0 %v2163_v36  ;;  %v2245_v36 = vpack.c.bf16 %v198_v28, %v197_v27  ;;  %v2247_v45 = vpack.c.bf16 %v216_v34, %v215_v33  ;;  %v186_v48 = vld [vmem:[%s3817_s1 + $0x4a8] sm:$0xff]  ;;  %v2217_v53 = vpack.c.bf16 %v168_v40, %v167_v39  ;;  %v201_v57 = vld [vmem:[%s3817_s1 + $0x520] sm:$0xff]  ;;  %v187_v60 = vld [vmem:[%s3817_s1 + $0x4b0] sm:$0xff] }
  0x33   :  { %2194 = vmatpush3.bf16.msra.mxu1 %v2193_v35  ;;  %v2213_v35 = vpack.c.bf16 %v166_v26, %v165_v23  ;;  %v3025_v52 = vrot.slane %v448_v44, %v2695_v10  ;;  %v2219_v54 = vpack.c.bf16 %v186_v48, %v185_v47  ;;  %v170_v56 = vld [vmem:[%s3817_s1 + $0x428] sm:$0xff]  ;;  %v172_v4 = vld [vmem:[%s3817_s1 + $0x438] sm:$0xff]  ;;  %v203_v5 = vld [vmem:[%s3817_s1 + $0x530] sm:$0xff] }
  0x34   :  { %2196 = vmatprep.subr.bf16.mxu1 %v2195_v42  ;;  %v199_v42 = vld [vmem:[%s3817_s1 + $0x510] sm:$0xff]  ;;  %v202_v59 = vld [vmem:[%s3817_s1 + $0x528] sm:$0xff]  ;;  %v204_v7 = vld [vmem:[%s3817_s1 + $0x538] sm:$0xff] }
  0x35   :  { %2166 = vmatpush3.bf16.msra.mxu0 %v2165_v49  ;;  %v217_v49 = vld [vmem:[%s3817_s1 + $0x5a0] sm:$0xff]  ;;  %v2253_v1 = vpack.c.bf16 %v202_v59, %v201_v57  ;;  %v2257_v14 = vpack.c.bf16 %v204_v7, %v203_v5  ;;  %v174_v17 = vld [vmem:[%s3817_s1 + $0x448] sm:$0xff]  ;;  %v191_v21 = vld [vmem:[%s3817_s1 + $0x4d0] sm:$0xff] }
  0x36   :  { %2168 = vmatprep.subr.bf16.mxu0 %v2167_v51  ;;  %v463_v51 = vcombine.high %v3004_v43, %v3004_v43  ;;  %v189_v8 = vld [vmem:[%s3817_s1 + $0x4c0] sm:$0xff]  ;;  %v206_v20 = vld [vmem:[%s3817_s1 + $0x548] sm:$0xff]  ;;  %v223_v23 = vld [vmem:[%s3817_s1 + $0x5d0] sm:$0xff] }
  0x37   :  { %2198 = vmatpush3.bf16.msra.mxu1 %v2197_v50  ;;  %v218_v50 = vld [vmem:[%s3817_s1 + $0x5a8] sm:$0xff]  ;;  %v205_v18 = vld [vmem:[%s3817_s1 + $0x540] sm:$0xff]  ;;  %v175_v28 = vld [vmem:[%s3817_s1 + $0x450] sm:$0xff] }
  0x38   :  { %2200 = vmatprep.subr.bf16.mxu1 %v2199_v55  ;;  %v169_v55 = vld [vmem:[%s3817_s1 + $0x420] sm:$0xff]  ;;  %v2251_v58 = vpack.c.bf16 %v218_v50, %v217_v49  ;;  %v2261_v26 = vpack.c.bf16 %v206_v20, %v205_v18  ;;  %v207_v30 = vld [vmem:[%s3817_s1 + $0x550] sm:$0xff]  ;;  %v208_v33 = vld [vmem:[%s3817_s1 + $0x558] sm:$0xff] }
  0x39   :  { %2170 = vmatpush3.bf16.msra.mxu0 %v2169_v61  ;;  %v188_v61 = vld [vmem:[%s3817_s1 + $0x4b8] sm:$0xff]  ;;  %v2221_v0 = vpack.c.bf16 %v170_v56, %v169_v55  ;;  %v193_v34 = vld [vmem:[%s3817_s1 + $0x4e0] sm:$0xff]  ;;  %v226_v37 = vld [vmem:[%s3817_s1 + $0x5e8] sm:$0xff]  ;;  %v2265_v39 = vpack.c.bf16 %v208_v33, %v207_v30 }
  0x3a   :  { %2172 = vmatprep.subr.bf16.mxu0 %v2171_v63  ;;  %v220_v63 = vld [vmem:[%s3817_s1 + $0x5b8] sm:$0xff]  ;;  %v2223_v2 = vpack.c.bf16 %v188_v61, %v187_v60  ;;  %v178_v44 = vld [vmem:[%s3817_s1 + $0x468] sm:$0xff]  ;;  %v195_v48 = vld [vmem:[%s3817_s1 + $0x4f0] sm:$0xff] }
  0x3b   :  { %2202 = vmatpush3.bf16.msra.mxu1 %v2201_v62  ;;  %v219_v62 = vld [vmem:[%s3817_s1 + $0x5b0] sm:$0xff]  ;;  %v210_v47 = vld [vmem:[%s3817_s1 + $0x568] sm:$0xff]  ;;  %v196_v49 = vld [vmem:[%s3817_s1 + $0x4f8] sm:$0xff] }
  0x3c   :  { %2204 = vmatprep.subr.bf16.mxu1 %v2203_v3  ;;  %v171_v3 = vld [vmem:[%s3817_s1 + $0x430] sm:$0xff]  ;;  %v2255_v6 = vpack.c.bf16 %v220_v63, %v219_v62  ;;  %v2239_v55 = vpack.c.bf16 %v196_v49, %v195_v48  ;;  %v180_v57 = vld [vmem:[%s3817_s1 + $0x478] sm:$0xff]  ;;  %v245_v60 = vld [vmem:[%s3817_s1 + $0x680] sm:$0xff] }
  0x3d   :  { %2174 = vmatpush3.bf16.msra.mxu0 %v2173_v9  ;;  %v190_v9 = vld [vmem:[%s3817_s1 + $0x4c8] sm:$0xff]  ;;  %v2225_v13 = vpack.c.bf16 %v172_v4, %v171_v3  ;;  %v227_v50 = vld [vmem:[%s3817_s1 + $0x5f0] sm:$0xff]  ;;  %v212_v59 = vld [vmem:[%s3817_s1 + $0x578] sm:$0xff] }
  0x3e   :  { %2176 = vmatprep.subr.bf16.mxu0 %v2175_v12  ;;  %v222_v12 = vld [vmem:[%s3817_s1 + $0x5c8] sm:$0xff]  ;;  %v2227_v15 = vpack.c.bf16 %v190_v9, %v189_v8  ;;  %v179_v56 = vld [vmem:[%s3817_s1 + $0x470] sm:$0xff]  ;;  %v277_v62 = vld [vmem:[%s3817_s1 + $0x780] sm:$0xff] }
  0x3f   :  { %2206 = vmatpush3.bf16.msra.mxu1 %v2205_v11  ;;  %v221_v11 = vld [vmem:[%s3817_s1 + $0x5c0] sm:$0xff]  ;;  %v246_v61 = vld [vmem:[%s3817_s1 + $0x688] sm:$0xff]  ;;  %v247_v9 = vld [vmem:[%s3817_s1 + $0x690] sm:$0xff] }
  0x40   :  { %2208 = vmatprep.subr.bf16.mxu1 %v2207_v16  ;;  %v173_v16 = vld [vmem:[%s3817_s1 + $0x440] sm:$0xff]  ;;  %v2259_v19 = vpack.c.bf16 %v222_v12, %v221_v11  ;;  %v278_v63 = vld [vmem:[%s3817_s1 + $0x788] sm:$0xff]  ;;  %v2275_v3 = vpack.c.bf16 %v246_v61, %v245_v60  ;;  %v248_v11 = vld [vmem:[%s3817_s1 + $0x698] sm:$0xff] }
  0x41   :  { %2178 = vmatpush3.bf16.msra.mxu0 %v2177_v22  ;;  %v192_v22 = vld [vmem:[%s3817_s1 + $0x4d8] sm:$0xff]  ;;  %v229_v4 = vld [vmem:[%s3817_s1 + $0x600] sm:$0xff]  ;;  %v230_v5 = vld [vmem:[%s3817_s1 + $0x608] sm:$0xff]  ;;  %v2307_v7 = vpack.c.bf16 %v278_v63, %v277_v62  ;;  %v2279_v18 = vpack.c.bf16 %v248_v11, %v247_v9 }
  0x42   :  { %2212 = vmatprep.subr.bf16.mxu0 %v2211_v25  ;;  %v2229_v25 = vpack.c.bf16 %v174_v17, %v173_v16  ;;  %v2231_v27 = vpack.c.bf16 %v192_v22, %v191_v21  ;;  %v262_v8 = vld [vmem:[%s3817_s1 + $0x708] sm:$0xff]  ;;  %v2277_v16 = vpack.c.bf16 %v230_v5, %v229_v4  ;;  %v232_v20 = vld [vmem:[%s3817_s1 + $0x618] sm:$0xff]  ;;  %v263_v21 = vld [vmem:[%s3817_s1 + $0x710] sm:$0xff] }
  0x43   :  { %2210 = vmatpush3.bf16.msra.mxu1 %v2209_v24  ;;  %v224_v24 = vld [vmem:[%s3817_s1 + $0x5d8] sm:$0xff]  ;;  %v267_v48 = vld [vmem:[%s3817_s1 + $0x730] sm:$0xff]  ;;  %v270_v61 = vld [vmem:[%s3817_s1 + $0x748] sm:$0xff] }
  0x44   :  { %2244 = vmatprep.subr.bf16.mxu1 %v2243_v29  ;;  %745 = vmatmul.mubr.f32.vlgmr.msra.gmra.mrb[2].mxu0 %v2862_v32  ;;  %v2249_v32 = vpack.c.bf16 %v200_v46, %v199_v42  ;;  %v176_v29 = vld [vmem:[%s3817_s1 + $0x458] sm:$0xff]  ;;  %v2263_v31 = vpack.c.bf16 %v224_v24, %v223_v23  ;;  %v177_v42 = vld [vmem:[%s3817_s1 + $0x460] sm:$0xff]  ;;  %v255_v62 = vld [vmem:[%s3817_s1 + $0x6d0] sm:$0xff] }
  0x45   :  { %2214 = vmatpush3.bf16.msra.mxu0 %v2213_v35  ;;  %884 = vmatprep.mubr.f32.mxu0 %v463_v51  ;;  %v194_v35 = vld [vmem:[%s3817_s1 + $0x4e8] sm:$0xff]  ;;  %v228_v51 = vld [vmem:[%s3817_s1 + $0x5f8] sm:$0xff]  ;;  %v249_v24 = vld [vmem:[%s3817_s1 + $0x6a0] sm:$0xff] }
  0x46   :  { %815 = vmatmul.mubr.f32.vlgmr.msra.gmra.mrb[2].mxu1 %v2876_v41  ;;  %2216 = vmatprep.subr.bf16.mxu0 %v2215_v38  ;;  %v464_v41 = vcombine.high %v3025_v52, %v3025_v52  ;;  %v2233_v38 = vpack.c.bf16 %v176_v29, %v175_v28  ;;  %v2235_v40 = vpack.c.bf16 %v194_v35, %v193_v34  ;;  %v264_v23 = vld [vmem:[%s3817_s1 + $0x718] sm:$0xff]  ;;  %v282_v28 = vld [vmem:[%s3817_s1 + $0x7a8] sm:$0xff]  ;;  %v265_v35 = vld [vmem:[%s3817_s1 + $0x720] sm:$0xff] }
  0x47   :  { %2246 = vmatpush3.bf16.msra.mxu1 %v2245_v36  ;;  %v225_v36 = vld [vmem:[%s3817_s1 + $0x5e0] sm:$0xff]  ;;  %v234_v34 = vld [vmem:[%s3817_s1 + $0x628] sm:$0xff]  ;;  %v256_v63 = vld [vmem:[%s3817_s1 + $0x6d8] sm:$0xff] }
  0x48   :  { %2248 = vmatprep.subr.bf16.mxu1 %v2247_v45  ;;  %954 = vmatprep.mubr.f32.mxu1 %v464_v41  ;;  %v209_v45 = vld [vmem:[%s3817_s1 + $0x560] sm:$0xff]  ;;  %v2267_v46 = vpack.c.bf16 %v226_v37, %v225_v36  ;;  %v211_v41 = vld [vmem:[%s3817_s1 + $0x570] sm:$0xff]  ;;  %v2295_v4 = vpack.c.bf16 %v256_v63, %v255_v62  ;;  %v272_v9 = vld [vmem:[%s3817_s1 + $0x758] sm:$0xff] }
  0x49   :  { %2218 = vmatpush3.bf16.msra.mxu0 %v2217_v53  ;;  %v2237_v53 = vpack.c.bf16 %v178_v44, %v177_v42  ;;  %v251_v37 = vld [vmem:[%s3817_s1 + $0x6b0] sm:$0xff]  ;;  %v257_v11 = vld [vmem:[%s3817_s1 + $0x6e0] sm:$0xff] }
  0x4a   :  { %2220 = vmatprep.subr.bf16.mxu0 %v2219_v54  ;;  %v2269_v54 = vpack.c.bf16 %v210_v47, %v209_v45  ;;  %v236_v47 = vld [vmem:[%s3817_s1 + $0x638] sm:$0xff]  ;;  %v239_v5 = vld [vmem:[%s3817_s1 + $0x650] sm:$0xff] }
  0x4b   :  { %2250 = vmatpush3.bf16.msra.mxu1 %v2249_v32  ;;  %v34_v32 = vld [vmem:[%s3818_s0 + $0x18] sm:$0xff]  ;;  %v327_v62 = vld [vmem:[%s3817_s1 + $0x910] sm:$0xff] }
  0x4c   :  { %2252 = vmatprep.subr.bf16.mxu1 %v2251_v58  ;;  %v2271_v58 = vpack.c.bf16 %v228_v51, %v227_v50  ;;  %v3196_v12 = vrot.slane %v34_v32, %v2695_v10  ;;  %v268_v50 = vld [vmem:[%s3817_s1 + $0x738] sm:$0xff]  ;;  %v253_v51 = vld [vmem:[%s3817_s1 + $0x6c0] sm:$0xff] }
  0x4d   :  { %2222 = vmatpush3.bf16.msra.mxu0 %v2221_v0  ;;  %v465_v0 = vcombine.high %v34_v32, %v34_v32  ;;  %v285_v32 = vld [vmem:[%s3817_s1 + $0x7c0] sm:$0xff] }
  0x4e   :  { %2224 = vmatprep.subr.bf16.mxu0 %v2223_v2  ;;  %v2273_v2 = vpack.c.bf16 %v212_v59, %v211_v41  ;;  %v237_v41 = vld [vmem:[%s3817_s1 + $0x640] sm:$0xff] }
  0x4f   :  { %2254 = vmatpush3.bf16.msra.mxu1 %v2253_v1  ;;  %v2241_v1 = vpack.c.bf16 %v180_v57, %v179_v56  ;;  %v2321_v56 = vpack.c.bf16 %v268_v50, %v267_v48  ;;  %v269_v59 = vld [vmem:[%s3817_s1 + $0x740] sm:$0xff]  ;;  %v294_v48 = vld [vmem:[%s3817_s1 + $0x808] sm:$0xff] }
  0x50   :  { %2256 = vmatprep.subr.bf16.mxu1 %v2255_v6  ;;  %v261_v6 = vld [vmem:[%s3817_s1 + $0x700] sm:$0xff] }
  0x51   :  { %2226 = vmatpush3.bf16.msra.mxu0 %v2225_v13  ;;  %v279_v13 = vld [vmem:[%s3817_s1 + $0x790] sm:$0xff]  ;;  %v2309_v17 = vpack.c.bf16 %v262_v8, %v261_v6  ;;  %v240_v6 = vld [vmem:[%s3817_s1 + $0x658] sm:$0xff] }
  0x52   :  { %2228 = vmatprep.subr.bf16.mxu0 %v2227_v15  ;;  %v3205_v15 = vrot.slane %v465_v0, %v2695_v10  ;;  %v287_v0 = vld [vmem:[%s3817_s1 + $0x7d0] sm:$0xff] }
  0x53   :  { %2258 = vmatpush3.bf16.msra.mxu1 %v2257_v14  ;;  %v280_v14 = vld [vmem:[%s3817_s1 + $0x798] sm:$0xff] }
  0x54   :  { %2260 = vmatprep.subr.bf16.mxu1 %v2259_v19  ;;  %v231_v19 = vld [vmem:[%s3817_s1 + $0x610] sm:$0xff]  ;;  %v2311_v22 = vpack.c.bf16 %v280_v14, %v279_v13  ;;  %v481_v29 = vcombine.high %v3205_v15, %v3205_v15  ;;  %v258_v13 = vld [vmem:[%s3817_s1 + $0x6e8] sm:$0xff]  ;;  %v289_v14 = vld [vmem:[%s3817_s1 + $0x7e0] sm:$0xff] }
  0x55   :  { %2230 = vmatpush3.bf16.msra.mxu0 %v2229_v25  ;;  %v250_v25 = vld [vmem:[%s3817_s1 + $0x6a8] sm:$0xff]  ;;  %v2281_v30 = vpack.c.bf16 %v232_v20, %v231_v19  ;;  %v2299_v19 = vpack.c.bf16 %v258_v13, %v257_v11  ;;  %v241_v20 = vld [vmem:[%s3817_s1 + $0x660] sm:$0xff] }
  0x56   :  { %2232 = vmatprep.subr.bf16.mxu0 %v2231_v27  ;;  %v281_v27 = vld [vmem:[%s3817_s1 + $0x7a0] sm:$0xff]  ;;  %v2283_v33 = vpack.c.bf16 %v250_v25, %v249_v24  ;;  %v274_v24 = vld [vmem:[%s3817_s1 + $0x768] sm:$0xff]  ;;  %v259_v25 = vld [vmem:[%s3817_s1 + $0x6f0] sm:$0xff] }
  0x57   :  { %2262 = vmatpush3.bf16.msra.mxu1 %v2261_v26  ;;  %v480_v26 = vcombine.high %v3196_v12, %v3196_v12  ;;  %v2315_v36 = vpack.c.bf16 %v282_v28, %v281_v27  ;;  %v291_v27 = vld [vmem:[%s3817_s1 + $0x7f0] sm:$0xff]  ;;  %v292_v28 = vld [vmem:[%s3817_s1 + $0x7f8] sm:$0xff]  ;;  %v298_v11 = vld [vmem:[%s3817_s1 + $0x828] sm:$0xff] }
  0x58   :  { %2264 = vmatprep.subr.bf16.mxu1 %v2263_v31  ;;  %v2313_v31 = vpack.c.bf16 %v264_v23, %v263_v21  ;;  %v242_v21 = vld [vmem:[%s3817_s1 + $0x668] sm:$0xff]  ;;  %v329_v13 = vld [vmem:[%s3817_s1 + $0x920] sm:$0xff] }
  0x59   :  { %2234 = vmatpush3.bf16.msra.mxu0 %v2233_v38  ;;  %v252_v38 = vld [vmem:[%s3817_s1 + $0x6b8] sm:$0xff] }
  0x5a   :  { %2236 = vmatprep.subr.bf16.mxu0 %v2235_v40  ;;  %v284_v40 = vld [vmem:[%s3817_s1 + $0x7b8] sm:$0xff]  ;;  %v2287_v45 = vpack.c.bf16 %v252_v38, %v251_v37  ;;  %v309_v37 = vld [vmem:[%s3817_s1 + $0x880] sm:$0xff]  ;;  %v310_v38 = vld [vmem:[%s3817_s1 + $0x888] sm:$0xff] }
  0x5b   :  { %2266 = vmatpush3.bf16.msra.mxu1 %v2265_v39  ;;  %v283_v39 = vld [vmem:[%s3817_s1 + $0x7b0] sm:$0xff] }
  0x5c   :  { %2268 = vmatprep.subr.bf16.mxu1 %v2267_v46  ;;  %v235_v46 = vld [vmem:[%s3817_s1 + $0x630] sm:$0xff]  ;;  %v2319_v49 = vpack.c.bf16 %v284_v40, %v283_v39  ;;  %v341_v39 = vld [vmem:[%s3817_s1 + $0x980] sm:$0xff]  ;;  %v342_v40 = vld [vmem:[%s3817_s1 + $0x988] sm:$0xff] }
  0x5d   :  { %2238 = vmatpush3.bf16.msra.mxu0 %v2237_v53  ;;  %v254_v53 = vld [vmem:[%s3817_s1 + $0x6c8] sm:$0xff]  ;;  %v2371_v50 = vpack.c.bf16 %v342_v40, %v341_v39  ;;  %v319_v39 = vld [vmem:[%s3817_s1 + $0x8d0] sm:$0xff]  ;;  %v320_v40 = vld [vmem:[%s3817_s1 + $0x8d8] sm:$0xff] }
  0x5e   :  { %2240 = vmatprep.subr.bf16.mxu0 %v2239_v55  ;;  %v2289_v55 = vpack.c.bf16 %v236_v47, %v235_v46  ;;  %v2291_v57 = vpack.c.bf16 %v254_v53, %v253_v51  ;;  %v2339_v46 = vpack.c.bf16 %v310_v38, %v309_v37  ;;  %v293_v47 = vld [vmem:[%s3817_s1 + $0x800] sm:$0xff]  ;;  %v326_v51 = vld [vmem:[%s3817_s1 + $0x908] sm:$0xff]  ;;  %v311_v53 = vld [vmem:[%s3817_s1 + $0x890] sm:$0xff] }
  0x5f   :  { %2270 = vmatpush3.bf16.msra.mxu1 %v2269_v54  ;;  %v286_v54 = vld [vmem:[%s3817_s1 + $0x7c8] sm:$0xff] }
  0x60   :  { %2272 = vmatprep.subr.bf16.mxu1 %v2271_v58  ;;  %v238_v58 = vld [vmem:[%s3817_s1 + $0x648] sm:$0xff]  ;;  %v2323_v60 = vpack.c.bf16 %v286_v54, %v285_v32  ;;  %v312_v32 = vld [vmem:[%s3817_s1 + $0x898] sm:$0xff] }
  0x61   :  { %2242 = vmatpush3.bf16.msra.mxu0 %v2241_v1  ;;  %v288_v1 = vld [vmem:[%s3817_s1 + $0x7d8] sm:$0xff]  ;;  %v334_v38 = vld [vmem:[%s3817_s1 + $0x948] sm:$0xff] }
  0x62   :  { %2276 = vmatprep.subr.bf16.mxu0 %v2275_v3  ;;  %v2325_v3 = vpack.c.bf16 %v270_v61, %v269_v59  ;;  %v2327_v8 = vpack.c.bf16 %v288_v1, %v287_v0  ;;  %v2343_v59 = vpack.c.bf16 %v312_v32, %v311_v53  ;;  %v296_v61 = vld [vmem:[%s3817_s1 + $0x818] sm:$0xff]  ;;  %v313_v1 = vld [vmem:[%s3817_s1 + $0x8a0] sm:$0xff] }
  0x63   :  { %2274 = vmatpush3.bf16.msra.mxu1 %v2273_v2  ;;  %v2293_v2 = vpack.c.bf16 %v238_v58, %v237_v41  ;;  %v2341_v41 = vpack.c.bf16 %v294_v48, %v293_v47  ;;  %v328_v0 = vld [vmem:[%s3817_s1 + $0x918] sm:$0xff]  ;;  %v2359_v47 = vpack.c.bf16 %v320_v40, %v319_v39  ;;  %v303_v48 = vld [vmem:[%s3817_s1 + $0x850] sm:$0xff]  ;;  %v321_v32 = vld [vmem:[%s3817_s1 + $0x8e0] sm:$0xff] }
  0x64   :  { %2308 = vmatprep.subr.bf16.mxu1 %v2307_v7  ;;  %885 = vmatmul.mubr.f32.vlgmr.msra.gmra.mrb[4].mxu0 %v3004_v43  ;;  %v233_v43 = vld [vmem:[%s3817_s1 + $0x620] sm:$0xff]  ;;  %v271_v7 = vld [vmem:[%s3817_s1 + $0x750] sm:$0xff]  ;;  %v336_v53 = vld [vmem:[%s3817_s1 + $0x958] sm:$0xff] }
  0x65   :  { %2278 = vmatpush3.bf16.msra.mxu0 %v2277_v16  ;;  %1024 = vmatprep.mubr.f32.mxu0 %v480_v26  ;;  %v2285_v42 = vpack.c.bf16 %v234_v34, %v233_v43  ;;  %v290_v16 = vld [vmem:[%s3817_s1 + $0x7e8] sm:$0xff]  ;;  %v260_v26 = vld [vmem:[%s3817_s1 + $0x6f8] sm:$0xff]  ;;  %v243_v43 = vld [vmem:[%s3817_s1 + $0x670] sm:$0xff] }
  0x66   :  { %955 = vmatmul.mubr.f32.vlgmr.msra.gmra.mrb[4].mxu1 %v3025_v52  ;;  %2280 = vmatprep.subr.bf16.mxu0 %v2279_v18  ;;  %v266_v52 = vld [vmem:[%s3817_s1 + $0x728] sm:$0xff]  ;;  %v2329_v18 = vpack.c.bf16 %v272_v9, %v271_v7  ;;  %v2331_v23 = vpack.c.bf16 %v290_v16, %v289_v14  ;;  %v244_v34 = vld [vmem:[%s3817_s1 + $0x678] sm:$0xff]  ;;  %v315_v16 = vld [vmem:[%s3817_s1 + $0x8b0] sm:$0xff] }
  0x67   :  { %2310 = vmatpush3.bf16.msra.mxu1 %v2309_v17  ;;  %1094 = vmatprep.mubr.f32.mxu1 %v481_v29  ;;  %v2317_v44 = vpack.c.bf16 %v266_v52, %v265_v35  ;;  %v2297_v17 = vpack.c.bf16 %v240_v6, %v239_v5  ;;  %v2301_v29 = vpack.c.bf16 %v242_v21, %v241_v20  ;;  %v275_v35 = vld [vmem:[%s3817_s1 + $0x770] sm:$0xff]  ;;  %v276_v52 = vld [vmem:[%s3817_s1 + $0x778] sm:$0xff]  ;;  %v346_v5 = vld [vmem:[%s3817_s1 + $0x9a8] sm:$0xff] }
  0x68   :  { %2312 = vmatprep.subr.bf16.mxu1 %v2311_v22  ;;  %v273_v22 = vld [vmem:[%s3817_s1 + $0x760] sm:$0xff] }
  0x69   :  { %2282 = vmatpush3.bf16.msra.mxu0 %v2281_v30  ;;  %v35_v30 = vld [vmem:[%s3818_s0 + $0x20] sm:$0xff] }
  0x6a   :  { %2284 = vmatprep.subr.bf16.mxu0 %v2283_v33  ;;  %v2303_v33 = vpack.c.bf16 %v260_v26, %v259_v25  ;;  %v3403_v54 = vrot.slane %v35_v30, %v2695_v10  ;;  %v331_v25 = vld [vmem:[%s3817_s1 + $0x930] sm:$0xff]  ;;  %v361_v40 = vld [vmem:[%s3817_s1 + $0xa20] sm:$0xff] }
  0x6b   :  { %2314 = vmatpush3.bf16.msra.mxu1 %v2313_v31  ;;  %v2333_v31 = vpack.c.bf16 %v274_v24, %v273_v22  ;;  %v300_v24 = vld [vmem:[%s3817_s1 + $0x838] sm:$0xff] }
  0x6c   :  { %2316 = vmatprep.subr.bf16.mxu1 %v2315_v36  ;;  %v2335_v36 = vpack.c.bf16 %v292_v28, %v291_v27  ;;  %v332_v27 = vld [vmem:[%s3817_s1 + $0x938] sm:$0xff]  ;;  %v317_v28 = vld [vmem:[%s3817_s1 + $0x8c0] sm:$0xff] }
  0x6d   :  { %2286 = vmatpush3.bf16.msra.mxu0 %v2285_v42  ;;  %v482_v42 = vcombine.high %v35_v30, %v35_v30  ;;  %v349_v30 = vld [vmem:[%s3817_s1 + $0x9c0] sm:$0xff] }
  0x6e   :  { %2288 = vmatprep.subr.bf16.mxu0 %v2287_v45  ;;  %v2337_v45 = vpack.c.bf16 %v276_v52, %v275_v35  ;;  %v301_v35 = vld [vmem:[%s3817_s1 + $0x840] sm:$0xff] }
  0x6f   :  { %2318 = vmatpush3.bf16.msra.mxu1 %v2317_v44  ;;  %v2305_v44 = vpack.c.bf16 %v244_v34, %v243_v43  ;;  %v2385_v43 = vpack.c.bf16 %v332_v27, %v331_v25  ;;  %v333_v52 = vld [vmem:[%s3817_s1 + $0x940] sm:$0xff] }
  0x70   :  { %2320 = vmatprep.subr.bf16.mxu1 %v2319_v49  ;;  %v325_v49 = vld [vmem:[%s3817_s1 + $0x900] sm:$0xff] }
  0x71   :  { %2290 = vmatpush3.bf16.msra.mxu0 %v2289_v55  ;;  %v343_v55 = vld [vmem:[%s3817_s1 + $0x990] sm:$0xff]  ;;  %v2373_v58 = vpack.c.bf16 %v326_v51, %v325_v49  ;;  %v304_v49 = vld [vmem:[%s3817_s1 + $0x858] sm:$0xff]  ;;  %v389_v25 = vld [vmem:[%s3817_s1 + $0xb00] sm:$0xff] }
  0x72   :  { %2292 = vmatprep.subr.bf16.mxu0 %v2291_v57  ;;  %v3412_v57 = vrot.slane %v482_v42, %v2695_v10  ;;  %v351_v42 = vld [vmem:[%s3817_s1 + $0x9d0] sm:$0xff] }
  0x73   :  { %2322 = vmatpush3.bf16.msra.mxu1 %v2321_v56  ;;  %v344_v56 = vld [vmem:[%s3817_s1 + $0x998] sm:$0xff] }
  0x74   :  { %2324 = vmatprep.subr.bf16.mxu1 %v2323_v60  ;;  %v295_v60 = vld [vmem:[%s3817_s1 + $0x810] sm:$0xff]  ;;  %v2375_v63 = vpack.c.bf16 %v344_v56, %v343_v55  ;;  %v498_v6 = vcombine.high %v3412_v57, %v3412_v57  ;;  %v322_v55 = vld [vmem:[%s3817_s1 + $0x8e8] sm:$0xff]  ;;  %v353_v56 = vld [vmem:[%s3817_s1 + $0x9e0] sm:$0xff] }
  0x75   :  { %2294 = vmatpush3.bf16.msra.mxu0 %v2293_v2  ;;  %v314_v2 = vld [vmem:[%s3817_s1 + $0x8a8] sm:$0xff]  ;;  %v2345_v7 = vpack.c.bf16 %v296_v61, %v295_v60  ;;  %v2363_v60 = vpack.c.bf16 %v322_v55, %v321_v32  ;;  %v305_v61 = vld [vmem:[%s3817_s1 + $0x860] sm:$0xff] }
  0x76   :  { %2296 = vmatprep.subr.bf16.mxu0 %v2295_v4  ;;  %v345_v4 = vld [vmem:[%s3817_s1 + $0x9a0] sm:$0xff]  ;;  %v2347_v9 = vpack.c.bf16 %v314_v2, %v313_v1  ;;  %v338_v1 = vld [vmem:[%s3817_s1 + $0x968] sm:$0xff]  ;;  %v323_v2 = vld [vmem:[%s3817_s1 + $0x8f0] sm:$0xff] }
  0x77   :  { %2326 = vmatpush3.bf16.msra.mxu1 %v2325_v3  ;;  %v497_v3 = vcombine.high %v3403_v54, %v3403_v54  ;;  %v2379_v14 = vpack.c.bf16 %v346_v5, %v345_v4  ;;  %v355_v4 = vld [vmem:[%s3817_s1 + $0x9f0] sm:$0xff]  ;;  %v356_v5 = vld [vmem:[%s3817_s1 + $0x9f8] sm:$0xff]  ;;  %v382_v55 = vld [vmem:[%s3817_s1 + $0xac8] sm:$0xff] }
  0x78   :  { %2328 = vmatprep.subr.bf16.mxu1 %v2327_v8  ;;  %v2377_v8 = vpack.c.bf16 %v328_v0, %v327_v62  ;;  %v306_v62 = vld [vmem:[%s3817_s1 + $0x868] sm:$0xff] }
  0x79   :  { %2298 = vmatpush3.bf16.msra.mxu0 %v2297_v17  ;;  %v316_v17 = vld [vmem:[%s3817_s1 + $0x8b8] sm:$0xff] }
  0x7a   :  { %2300 = vmatprep.subr.bf16.mxu0 %v2299_v19  ;;  %v348_v19 = vld [vmem:[%s3817_s1 + $0x9b8] sm:$0xff]  ;;  %v2351_v22 = vpack.c.bf16 %v316_v17, %v315_v16  ;;  %v374_v16 = vld [vmem:[%s3817_s1 + $0xa88] sm:$0xff] }
  0x7b   :  { %2330 = vmatpush3.bf16.msra.mxu1 %v2329_v18  ;;  %v347_v18 = vld [vmem:[%s3817_s1 + $0x9b0] sm:$0xff]  ;;  %v3585_v17 = vld [vmem:[%s3818_s0 + $0x28] sm:$0x3f] }
  0x7c   :  { %2332 = vmatprep.subr.bf16.mxu1 %v2331_v23  ;;  %v299_v23 = vld [vmem:[%s3817_s1 + $0x830] sm:$0xff]  ;;  %v2383_v26 = vpack.c.bf16 %v348_v19, %v347_v18  ;;  %v3607_v27 = vrot.slane %v3585_v17, %v2695_v10 }
  0x7d   :  { %2302 = vmatpush3.bf16.msra.mxu0 %v2301_v29  ;;  %v318_v29 = vld [vmem:[%s3817_s1 + $0x8c8] sm:$0xff] }
  0x7e   :  { %2304 = vmatprep.subr.bf16.mxu0 %v2303_v33  ;;  %v2353_v33 = vpack.c.bf16 %v300_v24, %v299_v23  ;;  %v2355_v34 = vpack.c.bf16 %v318_v29, %v317_v28  ;;  %v375_v23 = vld [vmem:[%s3817_s1 + $0xa90] sm:$0xff]  ;;  %v376_v24 = vld [vmem:[%s3817_s1 + $0xa98] sm:$0xff] }
  0x7f   :  { %2334 = vmatpush3.bf16.msra.mxu1 %v2333_v31  ;;  %v350_v31 = vld [vmem:[%s3817_s1 + $0x9c8] sm:$0xff]  ;;  %v2407_v29 = vpack.c.bf16 %v376_v24, %v375_v23  ;;  %v371_v24 = vld [vmem:[%s3817_s1 + $0xa70] sm:$0xff] }
  0x80   :  { %2336 = vmatprep.subr.bf16.mxu1 %v2335_v36  ;;  %v302_v36 = vld [vmem:[%s3817_s1 + $0x848] sm:$0xff]  ;;  %v2387_v37 = vpack.c.bf16 %v350_v31, %v349_v30  ;;  %v359_v30 = vld [vmem:[%s3817_s1 + $0xa10] sm:$0xff]  ;;  %v360_v31 = vld [vmem:[%s3817_s1 + $0xa18] sm:$0xff] }
  0x81   :  { %2306 = vmatpush3.bf16.msra.mxu0 %v2305_v44  ;;  %v352_v44 = vld [vmem:[%s3817_s1 + $0x9d8] sm:$0xff] }
  0x82   :  { %2340 = vmatprep.subr.bf16.mxu0 %v2339_v46  ;;  %v2389_v46 = vpack.c.bf16 %v334_v38, %v333_v52  ;;  %v2391_v51 = vpack.c.bf16 %v352_v44, %v351_v42  ;;  %v392_v52 = vld [vmem:[%s3817_s1 + $0xb18] sm:$0xff]  ;;  %v2409_v38 = vpack.c.bf16 %v360_v31, %v359_v30  ;;  %v362_v42 = vld [vmem:[%s3817_s1 + $0xa28] sm:$0xff]  ;;  %v379_v44 = vld [vmem:[%s3817_s1 + $0xab0] sm:$0xff] }
  0x83   :  { %2338 = vmatpush3.bf16.msra.mxu1 %v2337_v45  ;;  %v2357_v45 = vpack.c.bf16 %v302_v36, %v301_v35  ;;  %v2497_v35 = vmov 0.0|0.0   ;;  %v391_v36 = vld [vmem:[%s3817_s1 + $0xb10] sm:$0xff] }
  0x84   :  { %2372 = vmatprep.subr.bf16.mxu1 %v2371_v50  ;;  %1025 = vmatmul.mubr.f32.vlgmr.msra.gmra.mrb[6].mxu0 %v3196_v12  ;;  %v297_v12 = vld [vmem:[%s3817_s1 + $0x820] sm:$0xff]  ;;  %v335_v50 = vld [vmem:[%s3817_s1 + $0x950] sm:$0xff] }
  0x85   :  { %2342 = vmatpush3.bf16.msra.mxu0 %v2341_v41  ;;  %1164 = vmatprep.mubr.f32.mxu0 %v497_v3  ;;  %v2349_v20 = vpack.c.bf16 %v298_v11, %v297_v12  ;;  %v354_v41 = vld [vmem:[%s3817_s1 + $0x9e8] sm:$0xff]  ;;  %v324_v3 = vld [vmem:[%s3817_s1 + $0x8f8] sm:$0xff]  ;;  %v339_v11 = vld [vmem:[%s3817_s1 + $0x970] sm:$0xff] }
  0x86   :  { %1095 = vmatmul.mubr.f32.vlgmr.msra.gmra.mrb[6].mxu1 %v3205_v15  ;;  %2344 = vmatprep.subr.bf16.mxu0 %v2343_v59  ;;  %v330_v15 = vld [vmem:[%s3817_s1 + $0x928] sm:$0xff]  ;;  %v2393_v59 = vpack.c.bf16 %v336_v53, %v335_v50  ;;  %v2395_v0 = vpack.c.bf16 %v354_v41, %v353_v56  ;;  %v308_v12 = vld [vmem:[%s3817_s1 + $0x878] sm:$0xff]  ;;  %v363_v50 = vld [vmem:[%s3817_s1 + $0xa30] sm:$0xff] }
  0x87   :  { %2374 = vmatpush3.bf16.msra.mxu1 %v2373_v58  ;;  %1234 = vmatprep.mubr.f32.mxu1 %v498_v6  ;;  %v2381_v21 = vpack.c.bf16 %v330_v15, %v329_v13  ;;  %v2361_v58 = vpack.c.bf16 %v304_v49, %v303_v48  ;;  %v2365_v6 = vpack.c.bf16 %v306_v62, %v305_v61  ;;  %v373_v15 = vld [vmem:[%s3817_s1 + $0xa80] sm:$0xff]  ;;  %v395_v56 = vld [vmem:[%s3817_s1 + $0xb30] sm:$0xff]  ;;  %v396_v41 = vld [vmem:[%s3817_s1 + $0xb38] sm:$0xff] }
  0x88   :  { %2376 = vmatprep.subr.bf16.mxu1 %v2375_v63  ;;  %v337_v63 = vld [vmem:[%s3817_s1 + $0x960] sm:$0xff]  ;;  %v2399_v13 = vpack.c.bf16 %v356_v5, %v355_v4  ;;  %v2413_v48 = vpack.c.bf16 %v362_v42, %v361_v40  ;;  %v366_v61 = vld [vmem:[%s3817_s1 + $0xa48] sm:$0xff]  ;;  %v383_v62 = vld [vmem:[%s3817_s1 + $0xad0] sm:$0xff] }
  0x89   :  { %2346 = vmatpush3.bf16.msra.mxu0 %v2345_v7  ;;  %v2397_v7 = vpack.c.bf16 %v338_v1, %v337_v63  ;;  %v381_v53 = vld [vmem:[%s3817_s1 + $0xac0] sm:$0xff]  ;;  %v2445_v63 = vpack.c.bf16 %v396_v41, %v395_v56  ;;  %v367_v5 = vld [vmem:[%s3817_s1 + $0xa50] sm:$0xff]  ;;  %v1495_v41 = vld [vmem:[%s3821_s5 + $0x8] sm:$0xff] }
  0x8a   :  { %2348 = vmatprep.subr.bf16.mxu0 %v2347_v9  ;;  %v307_v9 = vld [vmem:[%s3817_s1 + $0x870] sm:$0xff]  ;;  %v397_v1 = vld [vmem:[%s3817_s1 + $0xb40] sm:$0xff] }
  0x8b   :  { %2378 = vmatpush3.bf16.msra.mxu1 %v2377_v8  ;;  %v2367_v8 = vpack.c.bf16 %v324_v3, %v323_v2  ;;  %v2369_v18 = vpack.c.bf16 %v308_v12, %v307_v9  ;;  %v398_v2 = vld [vmem:[%s3817_s1 + $0xb48] sm:$0xff]  ;;  %v399_v12 = vld [vmem:[%s3817_s1 + $0xb50] sm:$0xff]  ;;  %v1494_v56 = vld [vmem:[%s3821_s5] sm:$0xff] }
  0x8c   :  { %2380 = vmatprep.subr.bf16.mxu1 %v2379_v14  ;;  %v340_v14 = vld [vmem:[%s3817_s1 + $0x978] sm:$0xff]  ;;  %v386_v9 = vld [vmem:[%s3817_s1 + $0xae8] sm:$0xff] }
  0x8d   :  { %2350 = vmatpush3.bf16.msra.mxu0 %v2349_v20  ;;  %v2401_v19 = vpack.c.bf16 %v340_v14, %v339_v11  ;;  %v2403_v20 = vpack.c.bf16 %v374_v16, %v373_v15  ;;  %v400_v11 = vld [vmem:[%s3817_s1 + $0xb58] sm:$0xff]  ;;  %v499_v14 = vcombine.high %v3585_v17, %v3585_v17  ;;  %v369_v16 = vld [vmem:[%s3817_s1 + $0xa60] sm:$0xff] }
  0x8e   :  { %2352 = vmatprep.subr.bf16.mxu0 %v2351_v22  ;;  %v358_v22 = vld [vmem:[%s3817_s1 + $0xa08] sm:$0xff]  ;;  %v388_v17 = vld [vmem:[%s3817_s1 + $0xaf8] sm:$0xff] }
  0x8f   :  { %2382 = vmatpush3.bf16.msra.mxu1 %v2381_v21  ;;  %v357_v21 = vld [vmem:[%s3817_s1 + $0xa00] sm:$0xff] }
  0x90   :  { %2384 = vmatprep.subr.bf16.mxu1 %v2383_v26  ;;  %v390_v26 = vld [vmem:[%s3817_s1 + $0xb08] sm:$0xff]  ;;  %v2405_v28 = vpack.c.bf16 %v358_v22, %v357_v21  ;;  %v513_v22 = vrot.slane %v499_v14, %v2695_v10 }
  0x91   :  { %2354 = vmatpush3.bf16.msra.mxu0 %v2353_v33  ;;  %v377_v33 = vld [vmem:[%s3817_s1 + $0xaa0] sm:$0xff] }
  0x92   :  { %2356 = vmatprep.subr.bf16.mxu0 %v2355_v34  ;;  %v378_v34 = vld [vmem:[%s3817_s1 + $0xaa8] sm:$0xff] }
  0x93   :  { %2386 = vmatpush3.bf16.msra.mxu1 %v2385_v43  ;;  %v2436_v43 = vpack.c.bf16 %v390_v26, %v389_v25  ;;  %v2411_v39 = vpack.c.bf16 %v378_v34, %v377_v33  ;;  %v372_v25 = vld [vmem:[%s3817_s1 + $0xa78] sm:$0xff] }
  0x94   :  { %2388 = vmatprep.subr.bf16.mxu1 %v2387_v37  ;;  %v514_v37 = vcombine.high %v3607_v27, %v3607_v27  ;;  %v2433_v26 = vpack.c.bf16 %v372_v25, %v371_v24 }
  0x95   :  { %2358 = vmatpush3.bf16.msra.mxu0 %v2357_v45  ;;  %v393_v45 = vld [vmem:[%s3817_s1 + $0xb20] sm:$0xff] }
  0x96   :  { %2360 = vmatprep.subr.bf16.mxu0 %v2359_v47  ;;  %v2499_v47 = vmov 0.0  }
  0x97   :  { %2390 = vmatpush3.bf16.msra.mxu1 %v2389_v46  ;;  %v394_v46 = vld [vmem:[%s3817_s1 + $0xb28] sm:$0xff] }
  0x98   :  { %2392 = vmatprep.subr.bf16.mxu1 %v2391_v51  ;;  %v364_v51 = vld [vmem:[%s3817_s1 + $0xa38] sm:$0xff]  ;;  %v2442_v32 = vpack.c.bf16 %v394_v46, %v393_v45  ;;  %v1383_v45 = vld [vmem:[%s3820_s3 + $0x10] sm:$0xff] }
  0x99   :  { %2362 = vmatpush3.bf16.msra.mxu0 %v2361_v58  ;;  %v2417_v58 = vpack.c.bf16 %v364_v51, %v363_v50  ;;  %v1384_v46 = vld [vmem:[%s3820_s3 + $0x18] sm:$0xff]  ;;  %v1386_v50 = vld [vmem:[%s3820_s3 + $0x28] sm:$0xff] }
  0x9a   :  { %2364 = vmatprep.subr.bf16.mxu0 %v2363_v60  ;;  %v365_v60 = vld [vmem:[%s3817_s1 + $0xa40] sm:$0xff] }
  0x9b   :  { %2394 = vmatpush3.bf16.msra.mxu1 %v2393_v59  ;;  %v2419_v59 = vpack.c.bf16 %v382_v55, %v381_v53  ;;  %v2421_v3 = vpack.c.bf16 %v366_v61, %v365_v60  ;;  %v1387_v53 = vld [vmem:[%s3820_s3 + $0x30] sm:$0xff]  ;;  %v1497_v60 = vld [vmem:[%s3821_s5 + $0x18] sm:$0xff] }
  0x9c   :  { %2396 = vmatprep.subr.bf16.mxu1 %v2395_v0  ;;  %v384_v0 = vld [vmem:[%s3817_s1 + $0xad8] sm:$0xff] }
  0x9d   :  { %2366 = vmatpush3.bf16.msra.mxu0 %v2365_v6  ;;  %v2423_v4 = vpack.c.bf16 %v384_v0, %v383_v62  ;;  %v368_v6 = vld [vmem:[%s3817_s1 + $0xa58] sm:$0xff]  ;;  %v1498_v62 = vld [vmem:[%s3821_s5 + $0x20] sm:$0xff] }
  0x9e   :  { %2368 = vmatprep.subr.bf16.mxu0 %v2367_v8  ;;  %v2448_v8 = vpack.c.bf16 %v398_v2, %v397_v1  ;;  %v1500_v1 = vld [vmem:[%s3821_s5 + $0x30] sm:$0xff]  ;;  %v1501_v2 = vld [vmem:[%s3821_s5 + $0x38] sm:$0xff] }
  0x9f   :  { %2398 = vmatpush3.bf16.msra.mxu1 %v2397_v7  ;;  %v385_v7 = vld [vmem:[%s3817_s1 + $0xae0] sm:$0xff] }
  0xa0   :  { %2400 = vmatprep.subr.bf16.mxu1 %v2399_v13  ;;  %v2425_v13 = vpack.c.bf16 %v368_v6, %v367_v5  ;;  %v2427_v15 = vpack.c.bf16 %v386_v9, %v385_v7 }
  0xa1   :  { %2370 = vmatpush3.bf16.msra.mxu0 %v2369_v18  ;;  %v370_v18 = vld [vmem:[%s3817_s1 + $0xa68] sm:$0xff] }
  0xa2   :  { %2404 = vmatprep.subr.bf16.mxu0 %v2403_v20  ;;  %v387_v20 = vld [vmem:[%s3817_s1 + $0xaf0] sm:$0xff]  ;;  %v2429_v21 = vpack.c.bf16 %v370_v18, %v369_v16 }
  0xa3   :  { %2402 = vmatpush3.bf16.msra.mxu1 %v2401_v19  ;;  %v2451_v19 = vpack.c.bf16 %v400_v11, %v399_v12  ;;  %v2431_v23 = vpack.c.bf16 %v388_v17, %v387_v20 }
  0xa4   :  { %2435 = vmatprep.subr.bf16.mxu1 %v2497_v35  ;;  %1165 = vmatmul.mubr.f32.vlgmr.msra.gmra.mrb[8].mxu0 %v3403_v54  ;;  %v2439_v54 = vpack.c.bf16 %v392_v52, %v391_v36 }
  0xa5   :  { %2406 = vmatpush3.bf16.msra.mxu0 %v2405_v28  ;;  %1304 = vmatprep.mubr.f32.mxu0 %v514_v37  ;;  %v1596_v28 = vld [vmem:[%s3819_s2] ss:$0 sm:$0xff] }
  0xa6   :  { %1235 = vmatmul.mubr.f32.vlgmr.msra.gmra.mrb[8].mxu1 %v3412_v57  ;;  %2408 = vmatprep.subr.bf16.mxu0 %v2407_v29  ;;  %v380_v57 = vld [vmem:[%s3817_s1 + $0xab8] sm:$0xff] }
  0xa7   :  { %2437 = vmatpush3.bf16.msra.mxu1 %v2436_v43  ;;  %2042 = vmatprep.mubr.msk.f32.mxu1 %vm2498_vm0, %v2499_v47  ;;  %v2415_v49 = vpack.c.bf16 %v380_v57, %v379_v44 }
  0xa8   :  { %2438 = vmatprep.subr.bf16.mxu1 %v2497_v35 }
  0xa9   :  { %2410 = vmatpush3.bf16.msra.mxu0 %v2409_v38 }
  0xaa   :  { %2412 = vmatprep.subr.bf16.mxu0 %v2411_v39  ;;  %v1382_v39 = vld [vmem:[%s3820_s3 + $0x8] sm:$0xff] }
  0xab   :  { %2440 = vmatpush3.bf16.msra.mxu1 %v2439_v54 }
  0xac   :  { %2441 = vmatprep.subr.bf16.mxu1 %v2497_v35 }
  0xad   :  { %2414 = vmatpush3.bf16.msra.mxu0 %v2413_v48  ;;  %v2457_v48 = vpack.c.bf16 %v1384_v46, %v1383_v45 }
  0xae   :  { %2416 = vmatprep.subr.bf16.mxu0 %v2415_v49  ;;  %v1385_v49 = vld [vmem:[%s3820_s3 + $0x20] sm:$0xff] }
  0xaf   :  { %2443 = vmatpush3.bf16.msra.mxu1 %v2442_v32  ;;  %v2460_v51 = vpack.c.bf16 %v1386_v50, %v1385_v49  ;;  %v1388_v32 = vld [vmem:[%s3820_s3 + $0x38] sm:$0xff] }
  0xb0   :  { %2444 = vmatprep.subr.bf16.mxu1 %v2497_v35  ;;  %v2463_v55 = vpack.c.bf16 %v1388_v32, %v1387_v53 }
  0xb1   :  { %2418 = vmatpush3.bf16.msra.mxu0 %v2417_v58  ;;  %v1496_v58 = vld [vmem:[%s3821_s5 + $0x10] sm:$0xff] }
  0xb2   :  { %2420 = vmatprep.subr.bf16.mxu0 %v2419_v59  ;;  %v2466_v59 = vpack.c.bf16 %v1495_v41, %v1494_v56  ;;  %v2469_v61 = vpack.c.bf16 %v1497_v60, %v1496_v58 }
  0xb3   :  { %2446 = vmatpush3.bf16.msra.mxu1 %v2445_v63  ;;  %v1499_v63 = vld [vmem:[%s3821_s5 + $0x28] sm:$0xff]  ;;  %s2500_s5 = smov 64  }
  0xb4   :  { %2447 = vmatprep.subr.bf16.mxu1 %v2497_v35  ;;  %v2472_v0 = vpack.c.bf16 %v1499_v63, %v1498_v62 }
  0xb5   :  { %2422 = vmatpush3.bf16.msra.mxu0 %v2421_v3  ;;  %v2475_v3 = vpack.c.bf16 %v1501_v2, %v1500_v1 }
  0xb6   :  { %2424 = vmatprep.subr.bf16.mxu0 %v2423_v4 }
  0xb7   :  { %2449 = vmatpush3.bf16.msra.mxu1 %v2448_v8 }
  0xb8   :  { %2450 = vmatprep.subr.bf16.mxu1 %v2497_v35 }
  0xb9   :  { %2426 = vmatpush3.bf16.msra.mxu0 %v2425_v13 }
  0xba   :  { %2428 = vmatprep.subr.bf16.mxu0 %v2427_v15 }
  0xbb   :  { %2452 = vmatpush3.bf16.msra.mxu1 %v2451_v19 }
  0xbc   :  { %2453 = vmatprep.subr.bf16.mxu1 %v2497_v35 }
  0xbd   :  { %2430 = vmatpush3.bf16.msra.mxu0 %v2429_v21 }
  0xbe   :  { %2043 = vmatmul.mubr.msk.f32.vlgmr.msra.gmra.mrb[10].mxu1 %vm537_vm1, %v513_v22  ;;  %2432 = vmatprep.subr.bf16.mxu0 %v2431_v23 }
  0xbf   :  { %2061 = vmatprep.mubr.msk.f32.mxu1 %vm2498_vm0, %v2499_v47 }
  0xc1   :  { %2434 = vmatpush3.bf16.msra.mxu0 %v2433_v26 }
  0xc2   :  { %2465 = vmatprep.subr.bf16.mxu0 %v2497_v35 }
  0xc4   :  { %1305 = vmatmul.mubr.f32.vlgmr.msra.gmra.mrb[10].mxu0 %v3607_v27  ;;  %v1381_v27 = vld [vmem:[%s3820_s3] sm:$0xff] }
  0xc5   :  { %2080 = vmatprep.mubr.msk.f32.mxu0 %vm2498_vm0, %v2499_v47  ;;  %v2454_v44 = vpack.c.bf16 %v1382_v39, %v1381_v27  ;;  %2467 = vmatpush3.bf16.msra.mxu0 %v2466_v59 }
  0xc6   :  { %2468 = vmatprep.subr.bf16.mxu0 %v2497_v35 }
  0xc7   :  { %2455 = vmatpush3.bf16.msra.mxu1 %v2454_v44 }
  0xc8   :  { %2456 = vmatprep.subr.bf16.mxu1 %v2497_v35 }
  0xc9   :  { %2470 = vmatpush3.bf16.msra.mxu0 %v2469_v61 }
  0xca   :  { %2471 = vmatprep.subr.bf16.mxu0 %v2497_v35 }
  0xcb   :  { %2458 = vmatpush3.bf16.msra.mxu1 %v2457_v48 }
  0xcc   :  { %2459 = vmatprep.subr.bf16.mxu1 %v2497_v35 }
  0xcd   :  { %2473 = vmatpush3.bf16.msra.mxu0 %v2472_v0 }
  0xce   :  { %2474 = vmatprep.subr.bf16.mxu0 %v2497_v35 }
  0xcf   :  { %2461 = vmatpush3.bf16.msra.mxu1 %v2460_v51 }
  0xd0   :  { %2462 = vmatprep.subr.bf16.mxu1 %v2497_v35 }
  0xd1   :  { %2476 = vmatpush3.bf16.msra.mxu0 %v2475_v3 }
  0xd3   :  { %2464 = vmatpush3.bf16.msra.mxu1 %v2463_v55 }
  0xf7   :  { %v1634_v10 = vpop.f32.mrb[0].mxu0 }
  0xf8   :  { %v1635_v29 = vpop.f32.mrb[1].mxu0 }
  0xf9   :  { %v1669_v30 = vpop.f32.mrb[0].mxu1  ;;  %v1636_v31 = vadd.f32 %v1635_v29, %v1634_v10 }
  0xfa   :  { %v1670_v33 = vpop.f32.mrb[1].mxu1 }
  0xfb   :  { %v1671_v43 = vadd.f32 %v1670_v33, %v1669_v30  ;;  %v607_v34 = vadd.f32 %v1636_v31, %v1596_v28 }
  0xfd   :  { %v677_v36 = vadd.f32 %v1671_v43, %v607_v34 }
 0x117   :  { %v1704_v52 = vpop.f32.mrb[2].mxu0 }
 0x118   :  { %v1705_v37 = vpop.f32.mrb[3].mxu0 }
 0x119   :  { %v1739_v38 = vpop.f32.mrb[2].mxu1  ;;  %v1706_v40 = vadd.f32 %v1705_v37, %v1704_v52  ;;  %v15_v52 = vstv %s3822_s6 }
 0x11a   :  { %v1740_v42 = vpop.f32.mrb[3].mxu1  ;;  %16 = vst [vmem:[#allocation2] sm:$0x1] %v15_v52 }
 0x11b   :  { %v1741_v54 = vadd.f32 %v1740_v42, %v1739_v38  ;;  %v747_v57 = vadd.f32 %v1706_v40, %v677_v36  ;;  %v1598_v38 = vld [vmem:[%s3823_s4] ss:$0 sm:$0xff] }
 0x11d   :  { %v817_v47 = vadd.f32 %v1741_v54, %v747_v57 }
 0x121   :  { %v1600_v44 = vld [vmem:[#allocation2] ss:$0 sm:$0xff] }
 0x137   :  { %v1774_v4 = vpop.f32.mrb[4].mxu0 }
 0x138   :  { %v1775_v5 = vpop.f32.mrb[5].mxu0 }
 0x139   :  { %v1809_v6 = vpop.f32.mrb[4].mxu1  ;;  %v1776_v7 = vadd.f32 %v1775_v5, %v1774_v4 }
 0x13a   :  { %v1810_v8 = vpop.f32.mrb[5].mxu1 }
 0x13b   :  { %v1811_v9 = vadd.f32 %v1810_v8, %v1809_v6  ;;  %v887_v12 = vadd.f32 %v1776_v7, %v817_v47 }
 0x13d   :  { %v957_v11 = vadd.f32 %v1811_v9, %v887_v12 }
 0x157   :  { %v1844_v13 = vpop.f32.mrb[6].mxu0 }
 0x158   :  { %v1845_v14 = vpop.f32.mrb[7].mxu0 }
 0x159   :  { %v1879_v15 = vpop.f32.mrb[6].mxu1  ;;  %v1846_v16 = vadd.f32 %v1845_v14, %v1844_v13 }
 0x15a   :  { %v1880_v18 = vpop.f32.mrb[7].mxu1 }
 0x15b   :  { %v1881_v19 = vadd.f32 %v1880_v18, %v1879_v15  ;;  %v1027_v20 = vadd.f32 %v1846_v16, %v957_v11 }
 0x15d   :  { %v1097_v17 = vadd.f32 %v1881_v19, %v1027_v20 }
 0x177   :  { %v1914_v21 = vpop.f32.mrb[8].mxu0 }
 0x178   :  { %v1915_v22 = vpop.f32.mrb[9].mxu0 }
 0x179   :  { %v1949_v23 = vpop.f32.mrb[8].mxu1  ;;  %v1916_v35 = vadd.f32 %v1915_v22, %v1914_v21 }
 0x17a   :  { %v1950_v24 = vpop.f32.mrb[9].mxu1 }
 0x17b   :  { %v1951_v25 = vadd.f32 %v1950_v24, %v1949_v23  ;;  %v1167_v26 = vadd.f32 %v1916_v35, %v1097_v17 }
 0x17d   :  { %v1237_v10 = vadd.f32 %v1951_v25, %v1167_v26 }
 0x191   :  { %v1376_v28 = vpop.f32.mrb[10].mxu1 }
 0x192   :  { %v2044_v29 = vpop.f32.mrb[11].mxu1 }
 0x197   :  { %v1984_v30 = vpop.f32.mrb[10].mxu0 }
 0x198   :  { %v1985_v31 = vpop.f32.mrb[11].mxu0 }
 0x199   :  { %v1986_v33 = vadd.f32 %v1985_v31, %v1984_v30 }
 0x19b   :  { %v1307_v43 = vadd.f32 %v1986_v33, %v1237_v10 }
 0x19d   :  { %v1377_v34 = vadd.f32 %v1376_v28, %v1307_v43 }
 0x19f   :  { %2488 = vtanh.f32 %v1377_v34 }
 0x1a9   :  { %v2489_v36 = vpop.eup %2488 }
 0x1aa   :  { %1509 = vrot.lane.b32.xlu0 %v2489_v36, %s2500_s5  ;;  %2062 = vmatmul.mubr.msk.f32.vlgmr.msra.gmra.mrb[12].mxu1 %vm1396_vm2, %v2489_v36 }
 0x21c   :  { %v1510_v37 = vpop.permute.xlu0 %1509 }
 0x21d   :  { %2081 = vmatmul.mubr.msk.f32.vlgmr.msra.gmra.mrb[12].mxu0 %vm1396_vm2, %v1510_v37 }
 0x27d   :  { %v1466_v27 = vpop.f32.mrb[12].mxu1 }
 0x27e   :  { %v1467_v39 = vadd.f32 %v1598_v38, %v1466_v27  ;;  %v2063_v40 = vpop.f32.mrb[13].mxu1 }
 0x280   :  { %v1471_v42 = vsel %vm1470_vm3, %v1467_v39, -inf }
 0x281   :  { %1472 = vmax.xlane.f32.xlu0 %v1471_v42 }
 0x2f0   :  { %v1579_v54 = vpop.f32.mrb[12].mxu0 }
 0x2f1   :  { %v1580_v57 = vadd.f32 %v1600_v44, %v1579_v54  ;;  %v2082_v45 = vpop.f32.mrb[13].mxu0 }
 0x2f3   :  { %1583 = vst.msk [vmem:[%s3824_s8] sm:$0x3] %vm1492_vm4, %v1580_v57 }
 0x30e   :  { %v1473_v46 = vpop.xlane.xlu0 %1472 }
 0x30f   :  { %v1474_v47 = vsub.f32 %v1467_v39, %v1473_v46 }
 0x311   :  { %v1475_v48 = vmul.f32 1.442695, %v1474_v47 }
 0x313   :  { %2490 = vpow2.f32 %v1475_v48 }
 0x31d   :  { %v2491_v49 = vpop.eup %2490 }
 0x31e   :  { %v1477_v50 = vsel %vm1470_vm3, %v2491_v49, 0.0 }
 0x31f   :  { %1478 = vadd.xlane.f32.xlu1 %v1477_v50 }
 0x3ac   :  { %v1479_v51 = vpop.xlane.xlu1 %1478 }
 0x3ad   :  { %2492 = vlog2.f32 %v1479_v51 }
 0x3ae   :  { %2494 = vrcp.f32 %v1479_v51 }
 0x3b7   :  { %v2493_v53 = vpop.eup %2492 }
 0x3b8   :  { %v1481_v32 = vmul.f32 0.6931472, %v2493_v53  ;;  %v2495_v55 = vpop.eup %2494 }
 0x3b9   :  { %v1486_v58 = vmul.f32 %v2495_v55, %v2491_v49 }
 0x3ba   :  { %v1482_v56 = vadd.f32 %v1481_v32, %v1473_v46 }
 0x3bc   :  { %v1483_v41 = vsub.f32 %v1467_v39, %v1482_v56 }
 0x3be   :  { %v1487_v59 = vmul.f32 %v1486_v58, %v1483_v41  ;;  %1484 = vst.msk [vmem:[%s3825_s7] sm:$0x3] %vm1470_vm3, %v1483_v41 }
 0x3c0   :  { %v1488_v60 = vsel %vm1470_vm3, %v1487_v59, 0.0 }
 0x3c1   :  { %1489 = vadd.xlane.f32.xlu1 %v1488_v60 }
 0x44e   :  { %v1490_v61 = vpop.xlane.xlu1 %1489 }
 0x44f   :  { %v1491_v62 = vsub.f32 0.0, %v1490_v61 }
 0x451   :  { %1493 = vst.msk [vmem:[%s3826_s9] sm:$0x3] %vm1492_vm4, %v1491_v62 }

// kernel: ppo_evaluate.2
= control target key start
LH: loop header
LB: loop body
LE: loop exit
PB: predicated region body
PF: predicated region fallthrough
CT: control target
= control target key end

     0   :  { %9 = vsyncpa [#allocation3], 0  ;;  %s8787_s15 = smov 0   ;;  %s12687_s0 = inlined_call_operand.vmem [shape: f32[2,1,115,2304], index: 0, kind: input, shape index: {}]   ;;  %s12688_s1 = inlined_call_operand.vmem [shape: f32[1,1792,84], index: 1, kind: input, shape index: {}]   ;;  %s12689_s2 = inlined_call_operand.vmem [shape: f32[3,84,78], index: 2, kind: input, shape index: {}]   ;;  %s12690_s3 = inlined_call_operand.vmem [shape: f32[2], index: 3, kind: input, shape index: {}]   ;;  %s12691_s4 = inlined_call_operand.vmem [shape: f32[2,112,26], index: 4, kind: output, shape index: {}]  }
   0x1 LB: > { %s8793_s16 = sadd.s32 4294967295, %s8754_s15   ;;  %p5803_p0 = scmp.ge.s32.totalorder %s8754_s15, 1  ;;  %s8754_s15 = sphi %s8787_s15, %s15_s15  }
   0x2   : > { %p135_p1 = scmp.lt.s32.totalorder %s8754_s15, 3  ;;  %s154_s19 = sshll.u32 %s12690_s3, 4  ;;  %s155_s19 = int_to_ptr.vmem [resolvable:$true] %s154_s19 }
   0x3   : > { %p8506_p3 = scmp.eq.s32.totalorder %s8793_s16, 0  ;;  %s8729_s21 = scalar_lea.vmem %s155_s19, 16 }
   0x4   : > { %p8800_p2 = pnand %p5803_p0, %p135_p1  ;;  %p8730_p6 = scmp.ne.s32.totalorder %s155_s19, %s8729_s21 }
   0x5   : > { %p8737_p10 = scmp.lt.s32.totalorder %s155_s19, %s155_s19  ;;  %p8738_p11 = scmp.lt.s32.totalorder %s8729_s21, %s8729_s21 }
   0x6   : > { %p8502_p4 = pneg %p8800_p2 }
   0x7   : > { %p8739_p12 = por %p8738_p11, %p8737_p10 }
   0x8   : > { %p8503_p5 = pnand %p8506_p3, %p8502_p4 }
   0xa   : > { %p8731_p7 = pneg %p8503_p5 }
   0xc   : > { %p8732_p8 = pnand %p8731_p7, %p8730_p6 }
   0xe   : > { %p8733_p9 = pneg %p8732_p8 }
  0x10   : > { %p8740_p13 = pnand %p8739_p12, %p8733_p9 }
  0x12   : > { %8743 = shalt.err (!%p8740_p13)
}
  0x13   : > { %s8756_s22 = smov [#allocation2]   ;;  %175 = sbr.rel (%p8800_p2) target bundleno = 1714 (0x6b2), region = 36 }
  0x14   : > { %8505 = dma.vmem_to_smem (!%p8503_p5), %s155_s19, 16, %s8756_s22, [#allocation3]  }
  0x1a   : > { %8749 = dma.done.wait (%p8506_p3), [#allocation3], 16  }
  0x1b   : > { %8751 = vsyncadd (%p8506_p3), [#allocation3], 4294967280 }
  0x1c   : > { %181 = sfence }
  0x1d   : > { %v440_v0 = vld [vmem:[%s12688_s1 + $0x80] sm:$0xff]  ;;  %v441_v1 = vld [vmem:[%s12688_s1 + $0x88] sm:$0xff]  ;;  %v442_v11 = vld [vmem:[%s12688_s1 + $0x90] sm:$0xff]  ;;  %p202_p0 = scmp.lt.s32.totalorder %s8793_s16, 1  ;;  %vm1731_vm0 = vcmask 1043456   ;;  %vm8759_vm1 = vmmov 0  }
  0x1e   : > { %v472_v2 = vld [vmem:[%s12688_s1 + $0x180] sm:$0xff]  ;;  %v7779_v3 = vpack.c.bf16 %v441_v1, %v440_v0  ;;  %v473_v4 = vld [vmem:[%s12688_s1 + $0x188] sm:$0xff]  ;;  %v443_v13 = vld [vmem:[%s12688_s1 + $0x98] sm:$0xff]  ;;  %s10397_s12 = sld [smem:[#allocation2]]  ;;  %vm1685_vm2 = vcmask 687104   ;;  %vm1904_vm3 = vcmask 1046528  }
  0x1f   : > { %v424_v5 = vld [vmem:[%s12688_s1] sm:$0xff]  ;;  %v425_v6 = vld [vmem:[%s12688_s1 + $0x8] sm:$0xff]  ;;  %v7811_v7 = vpack.c.bf16 %v473_v4, %v472_v2  ;;  %v474_v14 = vld [vmem:[%s12688_s1 + $0x190] sm:$0xff]  ;;  %v7783_v16 = vpack.c.bf16 %v443_v13, %v442_v11  ;;  %s12981_s16 = smov (!%p202_p0, %s8793_s16), 1  ;;  %vm1990_vm4 = vcmask 1045504   ;;  %s8760_s26 = smov 102  }
  0x20   : > { %v7781_v8 = vpack.c.bf16 %v425_v6, %v424_v5  ;;  %v456_v9 = vld [vmem:[%s12688_s1 + $0x100] sm:$0xff]  ;;  %v457_v10 = vld [vmem:[%s12688_s1 + $0x108] sm:$0xff]  ;;  %7780 = vmatprep.subr.bf16.mxu0 %v7779_v3  ;;  %v475_v15 = vld [vmem:[%s12688_s1 + $0x198] sm:$0xff]  ;;  %s8496_s9 = smul.u32 2160, %s12981_s16  ;;  %s8761_s27 = smov 76   ;;  %vm5719_vm5 = vcmask 211968  }
  0x21   : > { %v7813_v12 = vpack.c.bf16 %v457_v10, %v456_v9  ;;  %7812 = vmatprep.subr.bf16.mxu1 %v7811_v7  ;;  %v7815_v17 = vpack.c.bf16 %v475_v15, %v474_v14  ;;  %v426_v18 = vld [vmem:[%s12688_s1 + $0x10] sm:$0xff]  ;;  %v427_v19 = vld [vmem:[%s12688_s1 + $0x18] sm:$0xff]  ;;  %v444_v23 = vld [vmem:[%s12688_s1 + $0xa0] sm:$0xff]  ;;  %s5810_s7 = sld [smem:[#allocation2 + $0x1]] }
  0x22   : > { %7782 = vmatpush3.bf16.msra.mxu0 %v7781_v8  ;;  %v458_v20 = vld [vmem:[%s12688_s1 + $0x110] sm:$0xff]  ;;  %v7785_v21 = vpack.c.bf16 %v427_v19, %v426_v18  ;;  %v459_v22 = vld [vmem:[%s12688_s1 + $0x118] sm:$0xff]  ;;  %v445_v24 = vld [vmem:[%s12688_s1 + $0xa8] sm:$0xff]  ;;  %s8975_s30 = scalar_lea.vmem %s12687_s0, %s8496_s9 }
  0x23   : > { %7814 = vmatpush3.bf16.msra.mxu1 %v7813_v12  ;;  %7784 = vmatprep.subr.bf16.mxu0 %v7783_v16  ;;  %v7817_v25 = vpack.c.bf16 %v459_v22, %v458_v20  ;;  %v7787_v26 = vpack.c.bf16 %v445_v24, %v444_v23  ;;  %v476_v27 = vld [vmem:[%s12688_s1 + $0x1a0] sm:$0xff]  ;;  %v477_v28 = vld [vmem:[%s12688_s1 + $0x1a8] sm:$0xff]  ;;  %v446_v35 = vld [vmem:[%s12688_s1 + $0xb0] sm:$0xff] }
  0x24   : > { %7816 = vmatprep.subr.bf16.mxu1 %v7815_v17  ;;  %v428_v29 = vld [vmem:[%s12688_s1 + $0x20] sm:$0xff]  ;;  %v7819_v30 = vpack.c.bf16 %v477_v28, %v476_v27  ;;  %v429_v31 = vld [vmem:[%s12688_s1 + $0x28] sm:$0xff]  ;;  %v447_v36 = vld [vmem:[%s12688_s1 + $0xb8] sm:$0xff] }
  0x25   : > { %v460_v32 = vld [vmem:[%s12688_s1 + $0x120] sm:$0xff]  ;;  %v461_v33 = vld [vmem:[%s12688_s1 + $0x128] sm:$0xff]  ;;  %v7789_v34 = vpack.c.bf16 %v429_v31, %v428_v29  ;;  %v478_v37 = vld [vmem:[%s12688_s1 + $0x1b0] sm:$0xff]  ;;  %v7791_v39 = vpack.c.bf16 %v447_v36, %v446_v35 }
  0x26   : > { %7786 = vmatpush3.bf16.msra.mxu0 %v7785_v21  ;;  %v7821_v38 = vpack.c.bf16 %v461_v33, %v460_v32  ;;  %v479_v40 = vld [vmem:[%s12688_s1 + $0x1b8] sm:$0xff]  ;;  %v430_v41 = vld [vmem:[%s12688_s1 + $0x30] sm:$0xff]  ;;  %v448_v46 = vld [vmem:[%s12688_s1 + $0xc0] sm:$0xff] }
  0x27   : > { %7818 = vmatpush3.bf16.msra.mxu1 %v7817_v25  ;;  %7788 = vmatprep.subr.bf16.mxu0 %v7787_v26  ;;  %v431_v42 = vld [vmem:[%s12688_s1 + $0x38] sm:$0xff]  ;;  %v7823_v43 = vpack.c.bf16 %v479_v40, %v478_v37  ;;  %v462_v44 = vld [vmem:[%s12688_s1 + $0x130] sm:$0xff]  ;;  %v449_v47 = vld [vmem:[%s12688_s1 + $0xc8] sm:$0xff] }
  0x28   : > { %7820 = vmatprep.subr.bf16.mxu1 %v7819_v30  ;;  %v463_v45 = vld [vmem:[%s12688_s1 + $0x138] sm:$0xff]  ;;  %v480_v48 = vld [vmem:[%s12688_s1 + $0x1c0] sm:$0xff]  ;;  %v481_v49 = vld [vmem:[%s12688_s1 + $0x1c8] sm:$0xff]  ;;  %v7793_v50 = vpack.c.bf16 %v431_v42, %v430_v41  ;;  %v7795_v52 = vpack.c.bf16 %v449_v47, %v448_v46 }
  0x29   : > { %v7825_v51 = vpack.c.bf16 %v463_v45, %v462_v44  ;;  %v432_v53 = vld [vmem:[%s12688_s1 + $0x40] sm:$0xff]  ;;  %v433_v54 = vld [vmem:[%s12688_s1 + $0x48] sm:$0xff]  ;;  %v7827_v56 = vpack.c.bf16 %v481_v49, %v480_v48  ;;  %v450_v58 = vld [vmem:[%s12688_s1 + $0xd0] sm:$0xff] }
  0x2a   : > { %7790 = vmatpush3.bf16.msra.mxu0 %v7789_v34  ;;  %v464_v55 = vld [vmem:[%s12688_s1 + $0x140] sm:$0xff]  ;;  %v465_v57 = vld [vmem:[%s12688_s1 + $0x148] sm:$0xff]  ;;  %v451_v59 = vld [vmem:[%s12688_s1 + $0xd8] sm:$0xff]  ;;  %v7797_v62 = vpack.c.bf16 %v433_v54, %v432_v53 }
  0x2b   : > { %7822 = vmatpush3.bf16.msra.mxu1 %v7821_v38  ;;  %7792 = vmatprep.subr.bf16.mxu0 %v7791_v39  ;;  %v482_v60 = vld [vmem:[%s12688_s1 + $0x1d0] sm:$0xff]  ;;  %v483_v61 = vld [vmem:[%s12688_s1 + $0x1d8] sm:$0xff]  ;;  %v7829_v63 = vpack.c.bf16 %v465_v57, %v464_v55  ;;  %v7799_v0 = vpack.c.bf16 %v451_v59, %v450_v58  ;;  %v452_v6 = vld [vmem:[%s12688_s1 + $0xe0] sm:$0xff] }
  0x2c   : > { %7824 = vmatprep.subr.bf16.mxu1 %v7823_v43  ;;  %v434_v1 = vld [vmem:[%s12688_s1 + $0x50] sm:$0xff]  ;;  %v435_v2 = vld [vmem:[%s12688_s1 + $0x58] sm:$0xff]  ;;  %v7831_v4 = vpack.c.bf16 %v483_v61, %v482_v60  ;;  %v453_v7 = vld [vmem:[%s12688_s1 + $0xe8] sm:$0xff] }
  0x2d   : > { %v466_v3 = vld [vmem:[%s12688_s1 + $0x150] sm:$0xff]  ;;  %v467_v5 = vld [vmem:[%s12688_s1 + $0x158] sm:$0xff]  ;;  %v484_v8 = vld [vmem:[%s12688_s1 + $0x1e0] sm:$0xff]  ;;  %v7801_v10 = vpack.c.bf16 %v435_v2, %v434_v1  ;;  %v7803_v14 = vpack.c.bf16 %v453_v7, %v452_v6 }
  0x2e   : > { %7794 = vmatpush3.bf16.msra.mxu0 %v7793_v50  ;;  %v485_v9 = vld [vmem:[%s12688_s1 + $0x1e8] sm:$0xff]  ;;  %v436_v11 = vld [vmem:[%s12688_s1 + $0x60] sm:$0xff]  ;;  %v7833_v13 = vpack.c.bf16 %v467_v5, %v466_v3  ;;  %v217_v17 = vld [vmem:[%s8975_s30 + $0x18] sm:$0xff] }
  0x2f   : > { %7826 = vmatpush3.bf16.msra.mxu1 %v7825_v51  ;;  %7796 = vmatprep.subr.bf16.mxu0 %v7795_v52  ;;  %v437_v12 = vld [vmem:[%s12688_s1 + $0x68] sm:$0xff]  ;;  %v468_v15 = vld [vmem:[%s12688_s1 + $0x160] sm:$0xff]  ;;  %v7835_v18 = vpack.c.bf16 %v485_v9, %v484_v8  ;;  %v454_v20 = vld [vmem:[%s12688_s1 + $0xf0] sm:$0xff] }
  0x30   : > { %7828 = vmatprep.subr.bf16.mxu1 %v7827_v56  ;;  %v215_v16 = vld [vmem:[%s8975_s30 + $0x8] sm:$0xff]  ;;  %v455_v21 = vld [vmem:[%s12688_s1 + $0xf8] sm:$0xff]  ;;  %v486_v22 = vld [vmem:[%s12688_s1 + $0x1f0] sm:$0xff]  ;;  %852 = vmatprep.mubr.f32.mxu1 %v217_v17  ;;  %v7805_v24 = vpack.c.bf16 %v437_v12, %v436_v11 }
  0x31   : > { %v469_v19 = vld [vmem:[%s12688_s1 + $0x168] sm:$0xff]  ;;  %712 = vmatprep.mubr.f32.mxu0 %v215_v16  ;;  %v487_v23 = vld [vmem:[%s12688_s1 + $0x1f8] sm:$0xff]  ;;  %v7807_v26 = vpack.c.bf16 %v455_v21, %v454_v20  ;;  %v438_v27 = vld [vmem:[%s12688_s1 + $0x70] sm:$0xff] }
  0x32   : > { %7798 = vmatpush3.bf16.msra.mxu0 %v7797_v62  ;;  %v7837_v25 = vpack.c.bf16 %v469_v19, %v468_v15  ;;  %v439_v28 = vld [vmem:[%s12688_s1 + $0x78] sm:$0xff]  ;;  %v470_v29 = vld [vmem:[%s12688_s1 + $0x170] sm:$0xff]  ;;  %v7839_v30 = vpack.c.bf16 %v487_v23, %v486_v22  ;;  %v504_v32 = vld [vmem:[%s12688_s1 + $0x280] sm:$0xff] }
  0x33   : > { %7830 = vmatpush3.bf16.msra.mxu1 %v7829_v63  ;;  %7800 = vmatprep.subr.bf16.mxu0 %v7799_v0  ;;  %v471_v31 = vld [vmem:[%s12688_s1 + $0x178] sm:$0xff]  ;;  %v505_v33 = vld [vmem:[%s12688_s1 + $0x288] sm:$0xff]  ;;  %v7809_v34 = vpack.c.bf16 %v439_v28, %v438_v27  ;;  %v488_v37 = vld [vmem:[%s12688_s1 + $0x200] sm:$0xff] }
  0x34   : > { %7832 = vmatprep.subr.bf16.mxu1 %v7831_v4  ;;  %v7841_v35 = vpack.c.bf16 %v471_v31, %v470_v29  ;;  %v7843_v36 = vpack.c.bf16 %v505_v33, %v504_v32  ;;  %v489_v38 = vld [vmem:[%s12688_s1 + $0x208] sm:$0xff]  ;;  %v506_v39 = vld [vmem:[%s12688_s1 + $0x290] sm:$0xff]  ;;  %v507_v40 = vld [vmem:[%s12688_s1 + $0x298] sm:$0xff] }
  0x35   : > { %v214_v41 = vld [vmem:[%s8975_s30] sm:$0xff]  ;;  %v7845_v42 = vpack.c.bf16 %v489_v38, %v488_v37  ;;  %v216_v43 = vld [vmem:[%s8975_s30 + $0x10] sm:$0xff]  ;;  %v229_v44 = vld [vmem:[%s8975_s30 + $0x98] sm:$0xff]  ;;  %v7847_v46 = vpack.c.bf16 %v507_v40, %v506_v39 }
  0x36   : > { %7802 = vmatpush3.bf16.msra.mxu0 %v7801_v10  ;;  %v231_v45 = vld [vmem:[%s8975_s30 + $0xa8] sm:$0xff]  ;;  %v490_v47 = vld [vmem:[%s12688_s1 + $0x210] sm:$0xff]  ;;  %v491_v48 = vld [vmem:[%s12688_s1 + $0x218] sm:$0xff] }
  0x37   : > { %7834 = vmatpush3.bf16.msra.mxu1 %v7833_v13  ;;  %7804 = vmatprep.subr.bf16.mxu0 %v7803_v14  ;;  %v508_v49 = vld [vmem:[%s12688_s1 + $0x2a0] sm:$0xff]  ;;  %v509_v50 = vld [vmem:[%s12688_s1 + $0x2a8] sm:$0xff]  ;;  %v228_v51 = vld [vmem:[%s8975_s30 + $0x90] sm:$0xff]  ;;  %v7849_v55 = vpack.c.bf16 %v491_v48, %v490_v47 }
  0x38   : > { %7836 = vmatprep.subr.bf16.mxu1 %v7835_v18  ;;  %v230_v52 = vld [vmem:[%s8975_s30 + $0xa0] sm:$0xff]  ;;  %v243_v53 = vld [vmem:[%s8975_s30 + $0x128] sm:$0xff]  ;;  %v245_v54 = vld [vmem:[%s8975_s30 + $0x138] sm:$0xff]  ;;  %v7851_v58 = vpack.c.bf16 %v509_v50, %v508_v49 }
  0x39   : > { %v492_v56 = vld [vmem:[%s12688_s1 + $0x220] sm:$0xff]  ;;  %v493_v59 = vld [vmem:[%s12688_s1 + $0x228] sm:$0xff]  ;;  %v244_v62 = vld [vmem:[%s8975_s30 + $0x130] sm:$0xff] }
  0x3a   : > { %7806 = vmatpush3.bf16.msra.mxu0 %v7805_v24  ;;  %v242_v57 = vld [vmem:[%s8975_s30 + $0x120] sm:$0xff]  ;;  %v537_v61 = vld [vmem:[%s12688_s1 + $0x388] sm:$0xff]  ;;  %v510_v63 = vld [vmem:[%s12688_s1 + $0x2b0] sm:$0xff]  ;;  %v7853_v6 = vpack.c.bf16 %v493_v59, %v492_v56 }
  0x3b   : > { %7838 = vmatpush3.bf16.msra.mxu1 %v7837_v25  ;;  %7808 = vmatprep.subr.bf16.mxu0 %v7807_v26  ;;  %v536_v60 = vld [vmem:[%s12688_s1 + $0x380] sm:$0xff]  ;;  %v511_v0 = vld [vmem:[%s12688_s1 + $0x2b8] sm:$0xff]  ;;  %v521_v4 = vld [vmem:[%s12688_s1 + $0x308] sm:$0xff] }
  0x3c   : > { %7840 = vmatprep.subr.bf16.mxu1 %v7839_v30  ;;  %v9079_v1 = vpack.c.bf16 %v537_v61, %v536_v60  ;;  %v257_v2 = vld [vmem:[%s8975_s30 + $0x1b8] sm:$0xff]  ;;  %v520_v3 = vld [vmem:[%s12688_s1 + $0x300] sm:$0xff]  ;;  %v259_v5 = vld [vmem:[%s8975_s30 + $0x1c8] sm:$0xff]  ;;  %v7855_v10 = vpack.c.bf16 %v511_v0, %v510_v63 }
  0x3d   : > { %v9089_v7 = vpack.c.bf16 %v521_v4, %v520_v3  ;;  %v538_v8 = vld [vmem:[%s12688_s1 + $0x390] sm:$0xff]  ;;  %v539_v9 = vld [vmem:[%s12688_s1 + $0x398] sm:$0xff]  ;;  %v512_v15 = vld [vmem:[%s12688_s1 + $0x2c0] sm:$0xff] }
  0x3e   : > { %7810 = vmatpush3.bf16.msra.mxu0 %v7809_v34  ;;  %12770 = vst [vmem:[#allocation5_spill] sm:$0xff] %v9079_v1  ;;  %v494_v11 = vld [vmem:[%s12688_s1 + $0x230] sm:$0xff]  ;;  %v495_v12 = vld [vmem:[%s12688_s1 + $0x238] sm:$0xff]  ;;  %v9104_v13 = vpack.c.bf16 %v539_v9, %v538_v8  ;;  %v513_v16 = vld [vmem:[%s12688_s1 + $0x2c8] sm:$0xff] }
  0x3f   : > { %7842 = vmatpush3.bf16.msra.mxu1 %v7841_v35  ;;  %7844 = vmatprep.subr.bf16.mxu0 %v7843_v36  ;;  %12771 = vst [vmem:[#allocation6_spill] sm:$0xff] %v9089_v7  ;;  %v522_v14 = vld [vmem:[%s12688_s1 + $0x310] sm:$0xff]  ;;  %v523_v17 = vld [vmem:[%s12688_s1 + $0x318] sm:$0xff]  ;;  %v258_v19 = vld [vmem:[%s8975_s30 + $0x1c0] sm:$0xff]  ;;  %v7857_v24 = vpack.c.bf16 %v495_v12, %v494_v11  ;;  %v7859_v27 = vpack.c.bf16 %v513_v16, %v512_v15 }
  0x40   : > { %7876 = vmatprep.subr.bf16.mxu1 %v9079_v1  ;;  %12772 = vst [vmem:[#allocation7_spill] sm:$0xff] %v9104_v13  ;;  %v256_v18 = vld [vmem:[%s8975_s30 + $0x1b0] sm:$0xff]  ;;  %v9121_v20 = vpack.c.bf16 %v523_v17, %v522_v14  ;;  %v540_v21 = vld [vmem:[%s12688_s1 + $0x3a0] sm:$0xff]  ;;  %v271_v22 = vld [vmem:[%s8975_s30 + $0x248] sm:$0xff] }
  0x41   : > { %713 = vmatmul.mubr.f32.vlgmr.msra.gmra.mrb[0].mxu0 %v214_v41  ;;  %v273_v23 = vld [vmem:[%s8975_s30 + $0x258] sm:$0xff]  ;;  %v541_v25 = vld [vmem:[%s12688_s1 + $0x3a8] sm:$0xff]  ;;  %v270_v26 = vld [vmem:[%s8975_s30 + $0x240] sm:$0xff] }
  0x42   : > { %853 = vmatmul.mubr.f32.vlgmr.msra.gmra.mrb[0].mxu1 %v216_v43  ;;  %7846 = vmatpush3.bf16.msra.mxu0 %v7845_v42  ;;  %12773 = vst [vmem:[#allocation8_spill] sm:$0xff] %v9121_v20  ;;  %v496_v28 = vld [vmem:[%s12688_s1 + $0x240] sm:$0xff]  ;;  %v497_v29 = vld [vmem:[%s12688_s1 + $0x248] sm:$0xff]  ;;  %v9139_v30 = vpack.c.bf16 %v541_v25, %v540_v21  ;;  %v514_v32 = vld [vmem:[%s12688_s1 + $0x2d0] sm:$0xff] }
  0x43   : > { %717 = vmatprep.mubr.f32.mxu0 %v229_v44  ;;  %857 = vmatprep.mubr.f32.mxu1 %v231_v45  ;;  %v524_v31 = vld [vmem:[%s12688_s1 + $0x320] sm:$0xff]  ;;  %v515_v33 = vld [vmem:[%s12688_s1 + $0x2d8] sm:$0xff]  ;;  %v525_v34 = vld [vmem:[%s12688_s1 + $0x328] sm:$0xff]  ;;  %v7861_v40 = vpack.c.bf16 %v497_v29, %v496_v28 }
  0x44   : > { %7848 = vmatprep.subr.bf16.mxu0 %v7847_v46  ;;  %7878 = vmatpush3.bf16.msra.mxu1 %v9089_v7  ;;  %12774 = vst [vmem:[#allocation9_spill] sm:$0xff] %v9139_v30  ;;  %v272_v35 = vld [vmem:[%s8975_s30 + $0x250] sm:$0xff]  ;;  %v9155_v36 = vpack.c.bf16 %v525_v34, %v524_v31  ;;  %v543_v38 = vld [vmem:[%s12688_s1 + $0x3b8] sm:$0xff]  ;;  %v287_v43 = vld [vmem:[%s8975_s30 + $0x2e8] sm:$0xff]  ;;  %v7863_v44 = vpack.c.bf16 %v515_v33, %v514_v32 }
  0x45   : > { %718 = vmatmul.mubr.f32.gmra.mrb[2].mxu0 %v228_v51  ;;  %7880 = vmatprep.subr.bf16.mxu1 %v9104_v13  ;;  %v542_v37 = vld [vmem:[%s12688_s1 + $0x3b0] sm:$0xff]  ;;  %v285_v39 = vld [vmem:[%s8975_s30 + $0x2d8] sm:$0xff]  ;;  %v516_v50 = vld [vmem:[%s12688_s1 + $0x2e0] sm:$0xff] }
  0x46   : > { %858 = vmatmul.mubr.f32.gmra.mrb[2].mxu1 %v230_v52  ;;  %722 = vmatprep.mubr.f32.mxu0 %v243_v53  ;;  %12775 = vst [vmem:[#allocation10_spill] sm:$0xff] %v9155_v36  ;;  %v526_v41 = vld [vmem:[%s12688_s1 + $0x330] sm:$0xff]  ;;  %v527_v42 = vld [vmem:[%s12688_s1 + $0x338] sm:$0xff]  ;;  %v9178_v47 = vpack.c.bf16 %v543_v38, %v542_v37  ;;  %v517_v51 = vld [vmem:[%s12688_s1 + $0x2e8] sm:$0xff] }
  0x47   : > { %862 = vmatprep.mubr.f32.mxu1 %v245_v54  ;;  %7850 = vmatpush3.bf16.msra.mxu0 %v7849_v55  ;;  %v498_v45 = vld [vmem:[%s12688_s1 + $0x250] sm:$0xff]  ;;  %v499_v46 = vld [vmem:[%s12688_s1 + $0x258] sm:$0xff]  ;;  %v9182_v49 = vpack.c.bf16 %v527_v42, %v526_v41  ;;  %v286_v52 = vld [vmem:[%s8975_s30 + $0x2e0] sm:$0xff]  ;;  %v7867_v60 = vpack.c.bf16 %v517_v51, %v516_v50 }
  0x48   : > { %7852 = vmatprep.subr.bf16.mxu0 %v7851_v58  ;;  %7882 = vmatpush3.bf16.msra.mxu1 %v9121_v20  ;;  %12776 = vst [vmem:[#allocation11_spill] sm:$0xff] %v9178_v47  ;;  %v284_v48 = vld [vmem:[%s8975_s30 + $0x2d0] sm:$0xff]  ;;  %v544_v53 = vld [vmem:[%s12688_s1 + $0x3c0] sm:$0xff]  ;;  %v545_v54 = vld [vmem:[%s12688_s1 + $0x3c8] sm:$0xff]  ;;  %v7865_v56 = vpack.c.bf16 %v499_v46, %v498_v45 }
  0x49   : > { %723 = vmatmul.mubr.f32.gmra.mrb[4].mxu0 %v242_v57  ;;  %7884 = vmatprep.subr.bf16.mxu1 %v9139_v30  ;;  %12777 = vst [vmem:[#allocation12_spill] sm:$0xff] %v9182_v49  ;;  %v299_v55 = vld [vmem:[%s8975_s30 + $0x368] sm:$0xff]  ;;  %v528_v57 = vld [vmem:[%s12688_s1 + $0x340] sm:$0xff]  ;;  %v301_v59 = vld [vmem:[%s8975_s30 + $0x378] sm:$0xff]  ;;  %v9212_v63 = vpack.c.bf16 %v545_v54, %v544_v53 }
  0x4a   : > { %863 = vmatmul.mubr.f32.gmra.mrb[4].mxu1 %v244_v62  ;;  %727 = vmatprep.mubr.f32.mxu0 %v257_v2  ;;  %v529_v58 = vld [vmem:[%s12688_s1 + $0x348] sm:$0xff]  ;;  %v500_v61 = vld [vmem:[%s12688_s1 + $0x260] sm:$0xff]  ;;  %v546_v3 = vld [vmem:[%s12688_s1 + $0x3d0] sm:$0xff] }
  0x4b   : > { %867 = vmatprep.mubr.f32.mxu1 %v259_v5  ;;  %7854 = vmatpush3.bf16.msra.mxu0 %v7853_v6  ;;  %v501_v62 = vld [vmem:[%s12688_s1 + $0x268] sm:$0xff]  ;;  %12778 = vst [vmem:[#allocation13_spill] sm:$0xff] %v9212_v63  ;;  %v298_v0 = vld [vmem:[%s8975_s30 + $0x360] sm:$0xff]  ;;  %v9216_v2 = vpack.c.bf16 %v529_v58, %v528_v57  ;;  %v547_v4 = vld [vmem:[%s12688_s1 + $0x3d8] sm:$0xff] }
  0x4c   : > { %7856 = vmatprep.subr.bf16.mxu0 %v7855_v10  ;;  %7886 = vmatpush3.bf16.msra.mxu1 %v9155_v36  ;;  %v300_v5 = vld [vmem:[%s8975_s30 + $0x370] sm:$0xff]  ;;  %v531_v8 = vld [vmem:[%s12688_s1 + $0x358] sm:$0xff]  ;;  %v7869_v10 = vpack.c.bf16 %v501_v62, %v500_v61  ;;  %v315_v14 = vld [vmem:[%s8975_s30 + $0x408] sm:$0xff]  ;;  %v9240_v15 = vpack.c.bf16 %v547_v4, %v546_v3 }
  0x4d   : > { %728 = vmatmul.mubr.f32.gmra.mrb[6].mxu0 %v256_v18  ;;  %7888 = vmatprep.subr.bf16.mxu1 %v9178_v47  ;;  %12779 = vst [vmem:[#allocation14_spill] sm:$0xff] %v9216_v2  ;;  %v530_v6 = vld [vmem:[%s12688_s1 + $0x350] sm:$0xff]  ;;  %v313_v9 = vld [vmem:[%s8975_s30 + $0x3f8] sm:$0xff]  ;;  %v548_v21 = vld [vmem:[%s12688_s1 + $0x3e0] sm:$0xff] }
  0x4e   : > { %868 = vmatmul.mubr.f32.gmra.mrb[6].mxu1 %v258_v19  ;;  %732 = vmatprep.mubr.f32.mxu0 %v271_v22  ;;  %v518_v11 = vld [vmem:[%s12688_s1 + $0x2f0] sm:$0xff]  ;;  %v519_v12 = vld [vmem:[%s12688_s1 + $0x2f8] sm:$0xff]  ;;  %12780 = vst [vmem:[#allocation15_spill] sm:$0xff] %v9240_v15  ;;  %v9249_v19 = vpack.c.bf16 %v531_v8, %v530_v6  ;;  %v549_v22 = vld [vmem:[%s12688_s1 + $0x3e8] sm:$0xff] }
  0x4f   : > { %872 = vmatprep.mubr.f32.mxu1 %v273_v23  ;;  %7858 = vmatpush3.bf16.msra.mxu0 %v7857_v24  ;;  %v7871_v16 = vpack.c.bf16 %v519_v12, %v518_v11  ;;  %v502_v17 = vld [vmem:[%s12688_s1 + $0x270] sm:$0xff]  ;;  %v503_v18 = vld [vmem:[%s12688_s1 + $0x278] sm:$0xff]  ;;  %v532_v24 = vld [vmem:[%s12688_s1 + $0x360] sm:$0xff]  ;;  %v9268_v31 = vpack.c.bf16 %v549_v22, %v548_v21 }
  0x50   : > { %7860 = vmatprep.subr.bf16.mxu0 %v7859_v27  ;;  %7890 = vmatpush3.bf16.msra.mxu1 %v9182_v49  ;;  %12781 = vst [vmem:[#allocation16_spill] sm:$0xff] %v9249_v19  ;;  %v312_v23 = vld [vmem:[%s8975_s30 + $0x3f0] sm:$0xff]  ;;  %v533_v25 = vld [vmem:[%s12688_s1 + $0x368] sm:$0xff]  ;;  %v7873_v28 = vpack.c.bf16 %v503_v18, %v502_v17  ;;  %v329_v29 = vld [vmem:[%s8975_s30 + $0x498] sm:$0xff] }
  0x51   : > { %733 = vmatmul.mubr.f32.gmra.mrb[8].mxu0 %v270_v26  ;;  %7892 = vmatprep.subr.bf16.mxu1 %v9212_v63  ;;  %v314_v26 = vld [vmem:[%s8975_s30 + $0x400] sm:$0xff]  ;;  %v327_v27 = vld [vmem:[%s8975_s30 + $0x488] sm:$0xff]  ;;  %12782 = vst [vmem:[#allocation17_spill] sm:$0xff] %v9268_v31  ;;  %v550_v32 = vld [vmem:[%s12688_s1 + $0x3f0] sm:$0xff]  ;;  %v9277_v34 = vpack.c.bf16 %v533_v25, %v532_v24 }
  0x52   : > { %873 = vmatmul.mubr.f32.gmra.mrb[8].mxu1 %v272_v35  ;;  %737 = vmatprep.mubr.f32.mxu0 %v285_v39  ;;  %v551_v33 = vld [vmem:[%s12688_s1 + $0x3f8] sm:$0xff]  ;;  %v568_v35 = vld [vmem:[%s12688_s1 + $0x480] sm:$0xff]  ;;  %v569_v37 = vld [vmem:[%s12688_s1 + $0x488] sm:$0xff] }
  0x53   : > { %877 = vmatprep.mubr.f32.mxu1 %v287_v43  ;;  %7862 = vmatpush3.bf16.msra.mxu0 %v7861_v40  ;;  %12783 = vst [vmem:[#allocation18_spill] sm:$0xff] %v9277_v34  ;;  %v326_v38 = vld [vmem:[%s8975_s30 + $0x480] sm:$0xff]  ;;  %v534_v39 = vld [vmem:[%s12688_s1 + $0x370] sm:$0xff]  ;;  %v535_v40 = vld [vmem:[%s12688_s1 + $0x378] sm:$0xff]  ;;  %v9292_v41 = vpack.c.bf16 %v569_v37, %v568_v35 }
  0x54   : > { %7864 = vmatprep.subr.bf16.mxu0 %v7863_v44  ;;  %7894 = vmatpush3.bf16.msra.mxu1 %v9216_v2  ;;  %v328_v42 = vld [vmem:[%s8975_s30 + $0x490] sm:$0xff]  ;;  %v341_v43 = vld [vmem:[%s8975_s30 + $0x518] sm:$0xff]  ;;  %v9296_v44 = vpack.c.bf16 %v551_v33, %v550_v32  ;;  %v343_v45 = vld [vmem:[%s8975_s30 + $0x528] sm:$0xff]  ;;  %v9302_v46 = vpack.c.bf16 %v535_v40, %v534_v39 }
  0x55   : > { %738 = vmatmul.mubr.f32.gmra.mrb[10].mxu0 %v284_v48  ;;  %7896 = vmatprep.subr.bf16.mxu1 %v9240_v15  ;;  %v340_v48 = vld [vmem:[%s8975_s30 + $0x510] sm:$0xff]  ;;  %v342_v50 = vld [vmem:[%s8975_s30 + $0x520] sm:$0xff]  ;;  %v355_v51 = vld [vmem:[%s8975_s30 + $0x5a8] sm:$0xff] }
  0x56   : > { %878 = vmatmul.mubr.f32.gmra.mrb[10].mxu1 %v286_v52  ;;  %742 = vmatprep.mubr.f32.mxu0 %v299_v55  ;;  %12784 = vst [vmem:[#allocation19_spill] sm:$0xff] %v9296_v44  ;;  %12785 = vst [vmem:[#allocation20_spill] sm:$0xff] %v9302_v46  ;;  %v357_v52 = vld [vmem:[%s8975_s30 + $0x5b8] sm:$0xff]  ;;  %v354_v53 = vld [vmem:[%s8975_s30 + $0x5a0] sm:$0xff] }
  0x57   : > { %882 = vmatprep.mubr.f32.mxu1 %v301_v59  ;;  %7866 = vmatpush3.bf16.msra.mxu0 %v7865_v56  ;;  %v356_v54 = vld [vmem:[%s8975_s30 + $0x5b0] sm:$0xff]  ;;  %v369_v55 = vld [vmem:[%s8975_s30 + $0x638] sm:$0xff]  ;;  %v371_v56 = vld [vmem:[%s8975_s30 + $0x648] sm:$0xff] }
  0x58   : > { %7868 = vmatprep.subr.bf16.mxu0 %v7867_v60  ;;  %7898 = vmatpush3.bf16.msra.mxu1 %v9249_v19  ;;  %v368_v57 = vld [vmem:[%s8975_s30 + $0x630] sm:$0xff]  ;;  %v370_v58 = vld [vmem:[%s8975_s30 + $0x640] sm:$0xff]  ;;  %v383_v59 = vld [vmem:[%s8975_s30 + $0x6c8] sm:$0xff] }
  0x59   : > { %743 = vmatmul.mubr.f32.gmra.mrb[12].mxu0 %v298_v0  ;;  %7900 = vmatprep.subr.bf16.mxu1 %v9268_v31  ;;  %v385_v60 = vld [vmem:[%s8975_s30 + $0x6d8] sm:$0xff]  ;;  %v600_v61 = vld [vmem:[%s12688_s1 + $0x580] sm:$0xff]  ;;  %v601_v62 = vld [vmem:[%s12688_s1 + $0x588] sm:$0xff] }
  0x5a   : > { %883 = vmatmul.mubr.f32.gmra.mrb[12].mxu1 %v300_v5  ;;  %747 = vmatprep.mubr.f32.mxu0 %v313_v9  ;;  %v382_v0 = vld [vmem:[%s8975_s30 + $0x6c0] sm:$0xff]  ;;  %v9325_v3 = vpack.c.bf16 %v601_v62, %v600_v61  ;;  %v384_v4 = vld [vmem:[%s8975_s30 + $0x6d0] sm:$0xff]  ;;  %v397_v5 = vld [vmem:[%s8975_s30 + $0x758] sm:$0xff] }
  0x5b   : > { %887 = vmatprep.mubr.f32.mxu1 %v315_v14  ;;  %7870 = vmatpush3.bf16.msra.mxu0 %v7869_v10  ;;  %v399_v6 = vld [vmem:[%s8975_s30 + $0x768] sm:$0xff]  ;;  %v396_v8 = vld [vmem:[%s8975_s30 + $0x750] sm:$0xff]  ;;  %v398_v9 = vld [vmem:[%s8975_s30 + $0x760] sm:$0xff] }
  0x5c   : > { %7872 = vmatprep.subr.bf16.mxu0 %v7871_v16  ;;  %7902 = vmatpush3.bf16.msra.mxu1 %v9277_v34  ;;  %12786 = vst [vmem:[#allocation21_spill] sm:$0xff] %v9325_v3  ;;  %v411_v10 = vld [vmem:[%s8975_s30 + $0x7e8] sm:$0x7]  ;;  %v413_v11 = vld [vmem:[%s8975_s30 + $0x7f8] sm:$0x7]  ;;  %v552_v17 = vld [vmem:[%s12688_s1 + $0x400] sm:$0xff] }
  0x5d   : > { %748 = vmatmul.mubr.f32.gmra.mrb[14].mxu0 %v312_v23  ;;  %7904 = vmatprep.subr.bf16.mxu1 %v9296_v44  ;;  %v410_v12 = vld [vmem:[%s8975_s30 + $0x7e0] sm:$0x7]  ;;  %v412_v14 = vld [vmem:[%s8975_s30 + $0x7f0] sm:$0x7]  ;;  %v219_v16 = vld [vmem:[%s8975_s30 + $0x28] sm:$0xff] }
  0x5e   : > { %888 = vmatmul.mubr.f32.gmra.mrb[14].mxu1 %v314_v26  ;;  %752 = vmatprep.mubr.f32.mxu0 %v327_v27  ;;  %v553_v18 = vld [vmem:[%s12688_s1 + $0x408] sm:$0xff]  ;;  %v221_v21 = vld [vmem:[%s8975_s30 + $0x38] sm:$0xff]  ;;  %v570_v22 = vld [vmem:[%s12688_s1 + $0x490] sm:$0xff] }
  0x5f   : > { %892 = vmatprep.mubr.f32.mxu1 %v329_v29  ;;  %7874 = vmatpush3.bf16.msra.mxu0 %v7873_v28  ;;  %v571_v23 = vld [vmem:[%s12688_s1 + $0x498] sm:$0xff]  ;;  %v584_v24 = vld [vmem:[%s12688_s1 + $0x500] sm:$0xff]  ;;  %v585_v25 = vld [vmem:[%s12688_s1 + $0x508] sm:$0xff]  ;;  %v9358_v27 = vpack.c.bf16 %v553_v18, %v552_v17 }
  0x60   : > { %7908 = vmatprep.subr.bf16.mxu0 %v9292_v41  ;;  %7906 = vmatpush3.bf16.msra.mxu1 %v9302_v46  ;;  %v218_v26 = vld [vmem:[%s8975_s30 + $0x20] sm:$0xff]  ;;  %v602_v28 = vld [vmem:[%s12688_s1 + $0x590] sm:$0xff]  ;;  %v603_v29 = vld [vmem:[%s12688_s1 + $0x598] sm:$0xff]  ;;  %v9369_v37 = vpack.c.bf16 %v571_v23, %v570_v22 }
  0x61   : > { %753 = vmatmul.mubr.f32.gmra.mrb[16].mxu0 %v326_v38  ;;  %7940 = vmatprep.subr.bf16.mxu1 %v9325_v3  ;;  %v220_v32 = vld [vmem:[%s8975_s30 + $0x30] sm:$0xff]  ;;  %v233_v33 = vld [vmem:[%s8975_s30 + $0xb8] sm:$0xff]  ;;  %v235_v35 = vld [vmem:[%s8975_s30 + $0xc8] sm:$0xff] }
  0x62   : > { %893 = vmatmul.mubr.f32.gmra.mrb[16].mxu1 %v328_v42  ;;  %757 = vmatprep.mubr.f32.mxu0 %v341_v43  ;;  %v554_v38 = vld [vmem:[%s12688_s1 + $0x410] sm:$0xff]  ;;  %v555_v39 = vld [vmem:[%s12688_s1 + $0x418] sm:$0xff]  ;;  %v572_v40 = vld [vmem:[%s12688_s1 + $0x4a0] sm:$0xff]  ;;  %v9380_v42 = vpack.c.bf16 %v585_v25, %v584_v24 }
  0x63   : > { %897 = vmatprep.mubr.f32.mxu1 %v343_v45  ;;  %v573_v43 = vld [vmem:[%s12688_s1 + $0x4a8] sm:$0xff]  ;;  %v9385_v45 = vpack.c.bf16 %v603_v29, %v602_v28  ;;  %v574_v61 = vld [vmem:[%s12688_s1 + $0x4b0] sm:$0xff]  ;;  %v576_v22 = vld [vmem:[%s12688_s1 + $0x4c0] sm:$0xff] }
  0x64   : > { %12787 = vst [vmem:[#allocation22_spill] sm:$0xff] %v9380_v42  ;;  %v558_v18 = vld [vmem:[%s12688_s1 + $0x430] sm:$0xff]  ;;  %v577_v24 = vld [vmem:[%s12688_s1 + $0x4c8] sm:$0xff]  ;;  %v591_v28 = vld [vmem:[%s12688_s1 + $0x538] sm:$0xff] }
  0x65   : > { %758 = vmatmul.mubr.f32.gmra.mrb[18].mxu0 %v340_v48  ;;  %12788 = vst [vmem:[#allocation23_spill] sm:$0xff] %v9385_v45  ;;  %v586_v48 = vld [vmem:[%s12688_s1 + $0x510] sm:$0xff]  ;;  %v366_v46 = vld [vmem:[%s8975_s30 + $0x600] sm:$0xff]  ;;  %v423_v19 = vld [vmem:[%s8975_s30 + $0x848] sm:$0x7] }
  0x66   : > { %898 = vmatmul.mubr.f32.gmra.mrb[18].mxu1 %v342_v50  ;;  %762 = vmatprep.mubr.f32.mxu0 %v355_v51  ;;  %v587_v50 = vld [vmem:[%s12688_s1 + $0x518] sm:$0xff]  ;;  %v232_v51 = vld [vmem:[%s8975_s30 + $0xb0] sm:$0xff]  ;;  %v394_v34 = vld [vmem:[%s8975_s30 + $0x720] sm:$0xff] }
  0x67   : > { %902 = vmatprep.mubr.f32.mxu1 %v357_v52  ;;  %v604_v52 = vld [vmem:[%s12688_s1 + $0x5a0] sm:$0xff]  ;;  %v9419_v62 = vpack.c.bf16 %v587_v50, %v586_v48  ;;  %v260_v29 = vld [vmem:[%s8975_s30 + $0x1d0] sm:$0xff]  ;;  %v561_v50 = vld [vmem:[%s12688_s1 + $0x448] sm:$0xff] }
  0x68   : > { %v560_v48 = vld [vmem:[%s12688_s1 + $0x440] sm:$0xff]  ;;  %v2286_v13 = vld [vmem:[%s12688_s1 + $0xf0] sm:$0xff] }
  0x69   : > { %763 = vmatmul.mubr.f32.gmra.mrb[20].mxu0 %v354_v53  ;;  %v605_v53 = vld [vmem:[%s12688_s1 + $0x5a8] sm:$0xff]  ;;  %12791 = vst [vmem:[#allocation26_spill] sm:$0xff] %v9419_v62  ;;  %v1674_v31 = vld [vmem:[%s12689_s2] sm:$0xff] }
  0x6a   : > { %903 = vmatmul.mubr.f32.gmra.mrb[20].mxu1 %v356_v54  ;;  %767 = vmatprep.mubr.f32.mxu0 %v369_v55  ;;  %v234_v54 = vld [vmem:[%s8975_s30 + $0xc0] sm:$0xff]  ;;  %v247_v55 = vld [vmem:[%s8975_s30 + $0x148] sm:$0xff] }
  0x6b   : > { %907 = vmatprep.mubr.f32.mxu1 %v371_v56  ;;  %v249_v56 = vld [vmem:[%s8975_s30 + $0x158] sm:$0xff]  ;;  %v422_v15 = vld [vmem:[%s8975_s30 + $0x840] sm:$0x7] }
  0x6d   : > { %768 = vmatmul.mubr.f32.gmra.mrb[22].mxu0 %v368_v57  ;;  %v9404_v57 = vpack.c.bf16 %v555_v39, %v554_v38  ;;  %v275_v38 = vld [vmem:[%s8975_s30 + $0x268] sm:$0xff]  ;;  %v277_v39 = vld [vmem:[%s8975_s30 + $0x278] sm:$0xff] }
  0x6e   : > { %908 = vmatmul.mubr.f32.gmra.mrb[22].mxu1 %v370_v58  ;;  %772 = vmatprep.mubr.f32.mxu0 %v383_v59  ;;  %v9407_v58 = vpack.c.bf16 %v573_v43, %v572_v40  ;;  %v556_v59 = vld [vmem:[%s12688_s1 + $0x420] sm:$0xff]  ;;  %v9487_v43 = vpack.c.bf16 %v577_v24, %v576_v22  ;;  %v594_v22 = vld [vmem:[%s12688_s1 + $0x550] sm:$0xff]  ;;  %v595_v24 = vld [vmem:[%s12688_s1 + $0x558] sm:$0xff] }
  0x6f   : > { %912 = vmatprep.mubr.f32.mxu1 %v385_v60  ;;  %12789 = vst [vmem:[#allocation24_spill] sm:$0xff] %v9404_v57  ;;  %v557_v60 = vld [vmem:[%s12688_s1 + $0x428] sm:$0xff] }
  0x70   : > { %12790 = vst [vmem:[#allocation25_spill] sm:$0xff] %v9407_v58  ;;  %12798 = vst [vmem:[#allocation33_spill] sm:$0xff] %v9487_v43 }
  0x71   : > { %773 = vmatmul.mubr.f32.gmra.mrb[24].mxu0 %v382_v0  ;;  %v575_v0 = vld [vmem:[%s12688_s1 + $0x4b8] sm:$0xff] }
  0x72   : > { %913 = vmatmul.mubr.f32.gmra.mrb[24].mxu1 %v384_v4  ;;  %777 = vmatprep.mubr.f32.mxu0 %v397_v5  ;;  %v9425_v4 = vpack.c.bf16 %v605_v53, %v604_v52  ;;  %v588_v5 = vld [vmem:[%s12688_s1 + $0x520] sm:$0xff]  ;;  %v9447_v17 = vpack.c.bf16 %v575_v0, %v574_v61  ;;  %v579_v53 = vld [vmem:[%s12688_s1 + $0x4d8] sm:$0xff]  ;;  %v276_v0 = vld [vmem:[%s8975_s30 + $0x270] sm:$0xff] }
  0x73   : > { %917 = vmatprep.mubr.f32.mxu1 %v399_v6  ;;  %v589_v6 = vld [vmem:[%s12688_s1 + $0x528] sm:$0xff]  ;;  %v611_v61 = vld [vmem:[%s12688_s1 + $0x5d8] sm:$0xff] }
  0x74   : > { %12792 = vst [vmem:[#allocation27_spill] sm:$0xff] %v9425_v4  ;;  %12794 = vst [vmem:[#allocation29_spill] sm:$0xff] %v9447_v17  ;;  %v9459_v23 = vpack.c.bf16 %v589_v6, %v588_v5  ;;  %v289_v5 = vld [vmem:[%s8975_s30 + $0x2f8] sm:$0xff]  ;;  %v291_v6 = vld [vmem:[%s8975_s30 + $0x308] sm:$0xff] }
  0x75   : > { %778 = vmatmul.mubr.f32.gmra.mrb[26].mxu0 %v396_v8  ;;  %v246_v8 = vld [vmem:[%s8975_s30 + $0x140] sm:$0xff] }
  0x76   : > { %918 = vmatmul.mubr.f32.gmra.mrb[26].mxu1 %v398_v9  ;;  %782 = vmatprep.mubr.f32.mxu0 %v411_v10  ;;  %v606_v9 = vld [vmem:[%s12688_s1 + $0x5b0] sm:$0xff]  ;;  %v607_v10 = vld [vmem:[%s12688_s1 + $0x5b8] sm:$0xff]  ;;  %12795 = vst [vmem:[#allocation30_spill] sm:$0xff] %v9459_v23 }
  0x77   : > { %922 = vmatprep.mubr.f32.mxu1 %v413_v11  ;;  %v248_v11 = vld [vmem:[%s8975_s30 + $0x150] sm:$0xff]  ;;  %v9465_v25 = vpack.c.bf16 %v607_v10, %v606_v9 }
  0x78   : > { %v562_v10 = vld [vmem:[%s12688_s1 + $0x450] sm:$0xff] }
  0x79   : > { %783 = vmatmul.mubr.f32.gmra.mrb[28].mxu0 %v410_v12  ;;  %v261_v12 = vld [vmem:[%s8975_s30 + $0x1d8] sm:$0xff]  ;;  %12796 = vst [vmem:[#allocation31_spill] sm:$0xff] %v9465_v25 }
  0x7a   : > { %923 = vmatmul.mubr.f32.gmra.mrb[28].mxu1 %v412_v14  ;;  %992 = vmatprep.mubr.f32.mxu0 %v219_v16  ;;  %v263_v14 = vld [vmem:[%s8975_s30 + $0x1e8] sm:$0xff]  ;;  %v9444_v16 = vpack.c.bf16 %v557_v60, %v556_v59  ;;  %v274_v59 = vld [vmem:[%s8975_s30 + $0x260] sm:$0xff]  ;;  %v610_v60 = vld [vmem:[%s12688_s1 + $0x5d0] sm:$0xff] }
  0x7b   : > { %1132 = vmatprep.mubr.f32.mxu1 %v221_v21  ;;  %v559_v21 = vld [vmem:[%s12688_s1 + $0x438] sm:$0xff] }
  0x7c   : > { %12793 = vst [vmem:[#allocation28_spill] sm:$0xff] %v9444_v16  ;;  %v9484_v40 = vpack.c.bf16 %v559_v21, %v558_v18  ;;  %v581_v18 = vld [vmem:[%s12688_s1 + $0x4e8] sm:$0xff]  ;;  %v9545_v21 = vpack.c.bf16 %v611_v61, %v610_v60  ;;  %v302_v61 = vld [vmem:[%s8975_s30 + $0x380] sm:$0xff] }
  0x7d   : > { %993 = vmatmul.mubr.f32.vlgmr.msra.gmra.mrb[30].mxu0 %v218_v26  ;;  %v590_v26 = vld [vmem:[%s12688_s1 + $0x530] sm:$0xff]  ;;  %v597_v60 = vld [vmem:[%s12688_s1 + $0x568] sm:$0xff] }
  0x7e   : > { %7910 = vmatpush3.bf16.msra.mxu0 %v9358_v27  ;;  %1133 = vmatmul.mubr.f32.vlgmr.msra.gmra.mrb[30].mxu1 %v220_v32  ;;  %v608_v32 = vld [vmem:[%s12688_s1 + $0x5c0] sm:$0xff]  ;;  %12797 = vst [vmem:[#allocation32_spill] sm:$0xff] %v9484_v40  ;;  %v9499_v52 = vpack.c.bf16 %v591_v28, %v590_v26  ;;  %12804 = vst [vmem:[#allocation39_spill] sm:$0xff] %v9545_v21  ;;  %v288_v26 = vld [vmem:[%s8975_s30 + $0x2f0] sm:$0xff] }
  0x7f   : > { %997 = vmatprep.mubr.f32.mxu0 %v233_v33  ;;  %1137 = vmatprep.mubr.f32.mxu1 %v235_v35  ;;  %v609_v33 = vld [vmem:[%s12688_s1 + $0x5c8] sm:$0xff]  ;;  %v262_v35 = vld [vmem:[%s8975_s30 + $0x1e0] sm:$0xff] }
  0x80   : > { %7912 = vmatprep.subr.bf16.mxu0 %v9369_v37  ;;  %7942 = vmatpush3.bf16.msra.mxu1 %v9380_v42  ;;  %12799 = vst [vmem:[#allocation34_spill] sm:$0xff] %v9499_v52  ;;  %v612_v28 = vld [vmem:[%s12688_s1 + $0x5e0] sm:$0xff] }
  0x81   : > { %998 = vmatmul.mubr.f32.gmra.mrb[32].mxu0 %v232_v51  ;;  %7944 = vmatprep.subr.bf16.mxu1 %v9385_v45  ;;  %v578_v51 = vld [vmem:[%s12688_s1 + $0x4d0] sm:$0xff] }
  0x82   : > { %1138 = vmatmul.mubr.f32.gmra.mrb[32].mxu1 %v234_v54  ;;  %1002 = vmatprep.mubr.f32.mxu0 %v247_v55  ;;  %v9505_v54 = vpack.c.bf16 %v609_v33, %v608_v32  ;;  %v592_v55 = vld [vmem:[%s12688_s1 + $0x540] sm:$0xff]  ;;  %v9527_v9 = vpack.c.bf16 %v579_v53, %v578_v51  ;;  %v303_v33 = vld [vmem:[%s8975_s30 + $0x388] sm:$0xff]  ;;  %v9576_v51 = vpack.c.bf16 %v595_v24, %v594_v22  ;;  %v582_v53 = vld [vmem:[%s12688_s1 + $0x4f0] sm:$0xff] }
  0x83   : > { %1142 = vmatprep.mubr.f32.mxu1 %v249_v56  ;;  %7914 = vmatpush3.bf16.msra.mxu0 %v9404_v57  ;;  %v593_v56 = vld [vmem:[%s12688_s1 + $0x548] sm:$0xff]  ;;  %v290_v32 = vld [vmem:[%s8975_s30 + $0x300] sm:$0xff]  ;;  %v566_v22 = vld [vmem:[%s12688_s1 + $0x470] sm:$0xff] }
  0x84   : > { %7916 = vmatprep.subr.bf16.mxu0 %v9407_v58  ;;  %7946 = vmatpush3.bf16.msra.mxu1 %v9419_v62  ;;  %12800 = vst [vmem:[#allocation35_spill] sm:$0xff] %v9505_v54  ;;  %12802 = vst [vmem:[#allocation37_spill] sm:$0xff] %v9527_v9  ;;  %v567_v24 = vld [vmem:[%s12688_s1 + $0x478] sm:$0xff]  ;;  %v2255_v58 = vld [vmem:[%s8975_s30 + $0x868] sm:$0x7] }
  0x85   : > { %1003 = vmatmul.mubr.f32.gmra.mrb[34].mxu0 %v246_v8  ;;  %7948 = vmatprep.subr.bf16.mxu1 %v9425_v4  ;;  %v9524_v8 = vpack.c.bf16 %v561_v50, %v560_v48  ;;  %v564_v48 = vld [vmem:[%s12688_s1 + $0x460] sm:$0xff]  ;;  %v565_v50 = vld [vmem:[%s12688_s1 + $0x468] sm:$0xff]  ;;  %12807 = vst [vmem:[#allocation42_spill] sm:$0xff] %v9576_v51 }
  0x86   : > { %1143 = vmatmul.mubr.f32.gmra.mrb[34].mxu1 %v248_v11  ;;  %1007 = vmatprep.mubr.f32.mxu0 %v261_v12  ;;  %v563_v11 = vld [vmem:[%s12688_s1 + $0x458] sm:$0xff]  ;;  %v580_v12 = vld [vmem:[%s12688_s1 + $0x4e0] sm:$0xff] }
  0x87   : > { %1147 = vmatprep.mubr.f32.mxu1 %v263_v14  ;;  %7918 = vmatpush3.bf16.msra.mxu0 %v9444_v16  ;;  %12801 = vst [vmem:[#allocation36_spill] sm:$0xff] %v9524_v8  ;;  %v9539_v14 = vpack.c.bf16 %v593_v56, %v592_v55  ;;  %v583_v55 = vld [vmem:[%s12688_s1 + $0x4f8] sm:$0xff] }
  0x88   : > { %7920 = vmatprep.subr.bf16.mxu0 %v9447_v17  ;;  %7950 = vmatpush3.bf16.msra.mxu1 %v9459_v23  ;;  %v419_v23 = vld [vmem:[%s8975_s30 + $0x828] sm:$0x7]  ;;  %v2243_v17 = vld [vmem:[%s8975_s30 + $0x7d8] sm:$0xff] }
  0x89   : > { %1008 = vmatmul.mubr.f32.gmra.mrb[36].mxu0 %v260_v29  ;;  %7952 = vmatprep.subr.bf16.mxu1 %v9465_v25  ;;  %12803 = vst [vmem:[#allocation38_spill] sm:$0xff] %v9539_v14  ;;  %v613_v29 = vld [vmem:[%s12688_s1 + $0x5e8] sm:$0xff] }
  0x8a   : > { %1148 = vmatmul.mubr.f32.gmra.mrb[36].mxu1 %v262_v35  ;;  %1012 = vmatprep.mubr.f32.mxu0 %v275_v38  ;;  %v305_v35 = vld [vmem:[%s8975_s30 + $0x398] sm:$0xff]  ;;  %v9564_v38 = vpack.c.bf16 %v563_v11, %v562_v10  ;;  %v9585_v56 = vpack.c.bf16 %v613_v29, %v612_v28  ;;  %v319_v11 = vld [vmem:[%s8975_s30 + $0x428] sm:$0xff]  ;;  %v598_v28 = vld [vmem:[%s12688_s1 + $0x570] sm:$0xff] }
  0x8b   : > { %1152 = vmatprep.mubr.f32.mxu1 %v277_v39  ;;  %7922 = vmatpush3.bf16.msra.mxu0 %v9484_v40  ;;  %v9567_v39 = vpack.c.bf16 %v581_v18, %v580_v12  ;;  %v317_v10 = vld [vmem:[%s8975_s30 + $0x418] sm:$0xff]  ;;  %v9604_v12 = vpack.c.bf16 %v565_v50, %v564_v48  ;;  %v9608_v18 = vpack.c.bf16 %v583_v55, %v582_v53  ;;  %v316_v48 = vld [vmem:[%s8975_s30 + $0x410] sm:$0xff]  ;;  %v318_v50 = vld [vmem:[%s8975_s30 + $0x420] sm:$0xff] }
  0x8c   : > { %7924 = vmatprep.subr.bf16.mxu0 %v9487_v43  ;;  %7954 = vmatpush3.bf16.msra.mxu1 %v9499_v52  ;;  %12805 = vst [vmem:[#allocation40_spill] sm:$0xff] %v9564_v38  ;;  %12808 = vst [vmem:[#allocation43_spill] sm:$0xff] %v9585_v56  ;;  %v331_v53 = vld [vmem:[%s8975_s30 + $0x4a8] sm:$0xff]  ;;  %v9637_v55 = vpack.c.bf16 %v567_v24, %v566_v22  ;;  %v346_v22 = vld [vmem:[%s8975_s30 + $0x540] sm:$0xff] }
  0x8d   : > { %1013 = vmatmul.mubr.f32.gmra.mrb[38].mxu0 %v274_v59  ;;  %7956 = vmatprep.subr.bf16.mxu1 %v9505_v54  ;;  %12806 = vst [vmem:[#allocation41_spill] sm:$0xff] %v9567_v39  ;;  %v596_v59 = vld [vmem:[%s12688_s1 + $0x560] sm:$0xff]  ;;  %12809 = vst [vmem:[#allocation44_spill] sm:$0xff] %v9604_v12  ;;  %v359_v24 = vld [vmem:[%s8975_s30 + $0x5c8] sm:$0xff] }
  0x8e   : > { %1153 = vmatmul.mubr.f32.gmra.mrb[38].mxu1 %v276_v0  ;;  %1017 = vmatprep.mubr.f32.mxu0 %v289_v5  ;;  %v614_v0 = vld [vmem:[%s12688_s1 + $0x5f0] sm:$0xff]  ;;  %v615_v5 = vld [vmem:[%s12688_s1 + $0x5f8] sm:$0xff]  ;;  %12810 = vst [vmem:[#allocation45_spill] sm:$0xff] %v9608_v18  ;;  %12813 = vst [vmem:[#allocation48_spill] sm:$0xff] %v9637_v55 }
  0x8f   : > { %1157 = vmatprep.mubr.f32.mxu1 %v291_v6  ;;  %7926 = vmatpush3.bf16.msra.mxu0 %v9524_v8  ;;  %v304_v6 = vld [vmem:[%s8975_s30 + $0x390] sm:$0xff]  ;;  %v9622_v29 = vpack.c.bf16 %v615_v5, %v614_v0  ;;  %v330_v0 = vld [vmem:[%s8975_s30 + $0x4a0] sm:$0xff]  ;;  %v323_v52 = vld [vmem:[%s8975_s30 + $0x448] sm:$0xff] }
  0x90   : > { %7928 = vmatprep.subr.bf16.mxu0 %v9527_v9  ;;  %7958 = vmatpush3.bf16.msra.mxu1 %v9539_v14  ;;  %v332_v5 = vld [vmem:[%s8975_s30 + $0x4b0] sm:$0xff]  ;;  %v309_v14 = vld [vmem:[%s8975_s30 + $0x3b8] sm:$0xff]  ;;  %v2231_v8 = vld [vmem:[%s8975_s30 + $0x748] sm:$0xff] }
  0x91   : > { %1018 = vmatmul.mubr.f32.gmra.mrb[40].mxu0 %v288_v26  ;;  %7960 = vmatprep.subr.bf16.mxu1 %v9545_v21  ;;  %v9616_v26 = vpack.c.bf16 %v597_v60, %v596_v59  ;;  %12812 = vst [vmem:[#allocation47_spill] sm:$0xff] %v9622_v29  ;;  %v333_v59 = vld [vmem:[%s8975_s30 + $0x4b8] sm:$0xff]  ;;  %v2230_v40 = vld [vmem:[%s8975_s30 + $0x740] sm:$0xff] }
  0x92   : > { %1158 = vmatmul.mubr.f32.gmra.mrb[40].mxu1 %v290_v32  ;;  %1022 = vmatprep.mubr.f32.mxu0 %v303_v33  ;;  %v599_v32 = vld [vmem:[%s12688_s1 + $0x578] sm:$0xff]  ;;  %v632_v33 = vld [vmem:[%s12688_s1 + $0x680] sm:$0xff] }
  0x93   : > { %1162 = vmatprep.mubr.f32.mxu1 %v305_v35  ;;  %7930 = vmatpush3.bf16.msra.mxu0 %v9564_v38  ;;  %12811 = vst [vmem:[#allocation46_spill] sm:$0xff] %v9616_v26  ;;  %v633_v35 = vld [vmem:[%s12688_s1 + $0x688] sm:$0xff]  ;;  %v9642_v60 = vpack.c.bf16 %v599_v32, %v598_v28  ;;  %v361_v28 = vld [vmem:[%s8975_s30 + $0x5d8] sm:$0xff]  ;;  %v358_v32 = vld [vmem:[%s8975_s30 + $0x5c0] sm:$0xff] }
  0x94   : > { %7932 = vmatprep.subr.bf16.mxu0 %v9567_v39  ;;  %7962 = vmatpush3.bf16.msra.mxu1 %v9576_v51  ;;  %v295_v51 = vld [vmem:[%s8975_s30 + $0x328] sm:$0xff]  ;;  %v2148_v39 = vld [vmem:[%s8975_s30 + $0x390] sm:$0xff] }
  0x95   : > { %1023 = vmatmul.mubr.f32.gmra.mrb[42].mxu0 %v302_v61  ;;  %7964 = vmatprep.subr.bf16.mxu1 %v9585_v56  ;;  %12814 = vst [vmem:[#allocation49_spill] sm:$0xff] %v9642_v60  ;;  %v9644_v61 = vpack.c.bf16 %v633_v35, %v632_v33  ;;  %v360_v33 = vld [vmem:[%s8975_s30 + $0x5d0] sm:$0xff]  ;;  %v373_v35 = vld [vmem:[%s8975_s30 + $0x658] sm:$0xff] }
  0x96   : > { %1163 = vmatmul.mubr.f32.gmra.mrb[42].mxu1 %v304_v6  ;;  %1027 = vmatprep.mubr.f32.mxu0 %v317_v10  ;;  %v345_v6 = vld [vmem:[%s8975_s30 + $0x538] sm:$0xff]  ;;  %v347_v10 = vld [vmem:[%s8975_s30 + $0x548] sm:$0xff] }
  0x97   : > { %1167 = vmatprep.mubr.f32.mxu1 %v319_v11  ;;  %7934 = vmatpush3.bf16.msra.mxu0 %v9604_v12  ;;  %12815 = vst [vmem:[#allocation50_spill] sm:$0xff] %v9644_v61  ;;  %v344_v11 = vld [vmem:[%s8975_s30 + $0x530] sm:$0xff]  ;;  %v2149_v12 = vld [vmem:[%s8975_s30 + $0x398] sm:$0xff] }
  0x98   : > { %7936 = vmatprep.subr.bf16.mxu0 %v9608_v18  ;;  %7966 = vmatpush3.bf16.msra.mxu1 %v9616_v26  ;;  %v281_v26 = vld [vmem:[%s8975_s30 + $0x298] sm:$0xff] }
  0x99   : > { %1028 = vmatmul.mubr.f32.gmra.mrb[44].mxu0 %v316_v48  ;;  %7968 = vmatprep.subr.bf16.mxu1 %v9622_v29  ;;  %v375_v48 = vld [vmem:[%s8975_s30 + $0x668] sm:$0xff] }
  0x9a   : > { %1168 = vmatmul.mubr.f32.gmra.mrb[44].mxu1 %v318_v50  ;;  %1032 = vmatprep.mubr.f32.mxu0 %v331_v53  ;;  %v372_v50 = vld [vmem:[%s8975_s30 + $0x650] sm:$0xff]  ;;  %v374_v53 = vld [vmem:[%s8975_s30 + $0x660] sm:$0xff] }
  0x9b   : > { %1172 = vmatprep.mubr.f32.mxu1 %v333_v59  ;;  %7938 = vmatpush3.bf16.msra.mxu0 %v9637_v55  ;;  %v387_v59 = vld [vmem:[%s8975_s30 + $0x6e8] sm:$0xff]  ;;  %v2076_v55 = vld [vmem:[%s8975_s30 + $0x30] sm:$0xff] }
  0x9c   : > { %7970 = vmatpush3.bf16.msra.mxu1 %v9642_v60  ;;  %7972 = vmatprep.subr.bf16.mxu0 %v9644_v61  ;;  %v267_v60 = vld [vmem:[%s8975_s30 + $0x208] sm:$0xff] }
  0x9d   : > { %1033 = vmatmul.mubr.f32.gmra.mrb[46].mxu0 %v330_v0  ;;  %v389_v0 = vld [vmem:[%s8975_s30 + $0x6f8] sm:$0xff] }
  0x9e   : > { %1173 = vmatmul.mubr.f32.gmra.mrb[46].mxu1 %v332_v5  ;;  %1037 = vmatprep.mubr.f32.mxu0 %v345_v6  ;;  %v386_v5 = vld [vmem:[%s8975_s30 + $0x6e0] sm:$0xff]  ;;  %v388_v6 = vld [vmem:[%s8975_s30 + $0x6f0] sm:$0xff] }
  0x9f   : > { %1177 = vmatprep.mubr.f32.mxu1 %v347_v10  ;;  %v401_v10 = vld [vmem:[%s8975_s30 + $0x778] sm:$0xff] }
  0xa1   : > { %1038 = vmatmul.mubr.f32.gmra.mrb[48].mxu0 %v344_v11  ;;  %v403_v11 = vld [vmem:[%s8975_s30 + $0x788] sm:$0xff] }
  0xa2   : > { %1178 = vmatmul.mubr.f32.gmra.mrb[48].mxu1 %v346_v22  ;;  %1042 = vmatprep.mubr.f32.mxu0 %v359_v24  ;;  %v400_v22 = vld [vmem:[%s8975_s30 + $0x770] sm:$0xff]  ;;  %v402_v24 = vld [vmem:[%s8975_s30 + $0x780] sm:$0xff] }
  0xa3   : > { %1182 = vmatprep.mubr.f32.mxu1 %v361_v28  ;;  %v415_v28 = vld [vmem:[%s8975_s30 + $0x808] sm:$0x7] }
  0xa5   : > { %1043 = vmatmul.mubr.f32.gmra.mrb[50].mxu0 %v358_v32  ;;  %v417_v32 = vld [vmem:[%s8975_s30 + $0x818] sm:$0x7] }
  0xa6   : > { %1183 = vmatmul.mubr.f32.gmra.mrb[50].mxu1 %v360_v33  ;;  %1047 = vmatprep.mubr.f32.mxu0 %v373_v35  ;;  %v414_v33 = vld [vmem:[%s8975_s30 + $0x800] sm:$0x7]  ;;  %v416_v35 = vld [vmem:[%s8975_s30 + $0x810] sm:$0x7] }
  0xa7   : > { %1187 = vmatprep.mubr.f32.mxu1 %v375_v48  ;;  %v223_v48 = vld [vmem:[%s8975_s30 + $0x48] sm:$0xff] }
  0xa9   : > { %1048 = vmatmul.mubr.f32.gmra.mrb[52].mxu0 %v372_v50  ;;  %v616_v50 = vld [vmem:[%s12688_s1 + $0x600] sm:$0xff] }
  0xaa   : > { %1188 = vmatmul.mubr.f32.gmra.mrb[52].mxu1 %v374_v53  ;;  %1052 = vmatprep.mubr.f32.mxu0 %v387_v59  ;;  %v617_v53 = vld [vmem:[%s12688_s1 + $0x608] sm:$0xff]  ;;  %v225_v59 = vld [vmem:[%s8975_s30 + $0x58] sm:$0xff] }
  0xab   : > { %1192 = vmatprep.mubr.f32.mxu1 %v389_v0  ;;  %v634_v0 = vld [vmem:[%s12688_s1 + $0x690] sm:$0xff] }
  0xad   : > { %1053 = vmatmul.mubr.f32.gmra.mrb[54].mxu0 %v386_v5  ;;  %v635_v5 = vld [vmem:[%s12688_s1 + $0x698] sm:$0xff] }
  0xae   : > { %1193 = vmatmul.mubr.f32.gmra.mrb[54].mxu1 %v388_v6  ;;  %1057 = vmatprep.mubr.f32.mxu0 %v401_v10  ;;  %v222_v6 = vld [vmem:[%s8975_s30 + $0x40] sm:$0xff]  ;;  %v9691_v10 = vpack.c.bf16 %v617_v53, %v616_v50  ;;  %v236_v50 = vld [vmem:[%s8975_s30 + $0xd0] sm:$0xff] }
  0xaf   : > { %1197 = vmatprep.mubr.f32.mxu1 %v403_v11  ;;  %v224_v11 = vld [vmem:[%s8975_s30 + $0x50] sm:$0xff]  ;;  %v238_v53 = vld [vmem:[%s8975_s30 + $0xe0] sm:$0xff] }
  0xb0   : > { %12816 = vst [vmem:[#allocation51_spill] sm:$0xff] %v9691_v10 }
  0xb1   : > { %1058 = vmatmul.mubr.f32.gmra.mrb[56].mxu0 %v400_v22  ;;  %v237_v22 = vld [vmem:[%s8975_s30 + $0xd8] sm:$0xff] }
  0xb2   : > { %1198 = vmatmul.mubr.f32.gmra.mrb[56].mxu1 %v402_v24  ;;  %1062 = vmatprep.mubr.f32.mxu0 %v415_v28  ;;  %v239_v24 = vld [vmem:[%s8975_s30 + $0xe8] sm:$0xff]  ;;  %v9696_v28 = vpack.c.bf16 %v635_v5, %v634_v0  ;;  %v253_v5 = vld [vmem:[%s8975_s30 + $0x178] sm:$0xff] }
  0xb3   : > { %1202 = vmatprep.mubr.f32.mxu1 %v417_v32  ;;  %v618_v32 = vld [vmem:[%s12688_s1 + $0x610] sm:$0xff] }
  0xb4   : > { %12817 = vst [vmem:[#allocation52_spill] sm:$0xff] %v9696_v28 }
  0xb5   : > { %1063 = vmatmul.mubr.f32.gmra.mrb[58].mxu0 %v414_v33  ;;  %v619_v33 = vld [vmem:[%s12688_s1 + $0x618] sm:$0xff] }
  0xb6   : > { %1203 = vmatmul.mubr.f32.gmra.mrb[58].mxu1 %v416_v35  ;;  %1272 = vmatprep.mubr.f32.mxu0 %v223_v48  ;;  %v636_v35 = vld [vmem:[%s12688_s1 + $0x6a0] sm:$0xff]  ;;  %v637_v48 = vld [vmem:[%s12688_s1 + $0x6a8] sm:$0xff]  ;;  %v9714_v0 = vpack.c.bf16 %v619_v33, %v618_v32  ;;  %v639_v32 = vld [vmem:[%s12688_s1 + $0x6b8] sm:$0xff] }
  0xb7   : > { %1412 = vmatprep.mubr.f32.mxu1 %v225_v59  ;;  %v251_v59 = vld [vmem:[%s8975_s30 + $0x168] sm:$0xff]  ;;  %v250_v33 = vld [vmem:[%s8975_s30 + $0x160] sm:$0xff] }
  0xb8   : > { %12818 = vst [vmem:[#allocation53_spill] sm:$0xff] %v9714_v0 }
  0xb9   : > { %1273 = vmatmul.mubr.f32.vlgmr.msra.gmra.mrb[60].mxu0 %v222_v6  ;;  %v9718_v6 = vpack.c.bf16 %v637_v48, %v636_v35  ;;  %v252_v35 = vld [vmem:[%s8975_s30 + $0x170] sm:$0xff]  ;;  %v265_v48 = vld [vmem:[%s8975_s30 + $0x1f8] sm:$0xff] }
  0xba   : > { %7974 = vmatpush3.bf16.msra.mxu0 %v9691_v10  ;;  %1413 = vmatmul.mubr.f32.vlgmr.msra.gmra.mrb[60].mxu1 %v224_v11  ;;  %v620_v11 = vld [vmem:[%s12688_s1 + $0x620] sm:$0xff] }
  0xbb   : > { %1277 = vmatprep.mubr.f32.mxu0 %v237_v22  ;;  %1417 = vmatprep.mubr.f32.mxu1 %v239_v24  ;;  %12819 = vst [vmem:[#allocation54_spill] sm:$0xff] %v9718_v6  ;;  %v621_v22 = vld [vmem:[%s12688_s1 + $0x628] sm:$0xff]  ;;  %v638_v24 = vld [vmem:[%s12688_s1 + $0x6b0] sm:$0xff] }
  0xbc   : > { %7976 = vmatprep.subr.bf16.mxu0 %v9696_v28  ;;  %v9740_v29 = vpack.c.bf16 %v639_v32, %v638_v24  ;;  %v266_v24 = vld [vmem:[%s8975_s30 + $0x200] sm:$0xff]  ;;  %v279_v32 = vld [vmem:[%s8975_s30 + $0x288] sm:$0xff] }
  0xbd   : > { %1278 = vmatmul.mubr.f32.gmra.mrb[62].mxu0 %v236_v50  ;;  %v9736_v50 = vpack.c.bf16 %v621_v22, %v620_v11  ;;  %v641_v11 = vld [vmem:[%s12688_s1 + $0x6c8] sm:$0xff]  ;;  %v264_v22 = vld [vmem:[%s8975_s30 + $0x1f0] sm:$0xff] }
  0xbe   : > { %1418 = vmatmul.mubr.f32.gmra.mrb[62].mxu1 %v238_v53  ;;  %1282 = vmatprep.mubr.f32.mxu0 %v251_v59  ;;  %12821 = vst [vmem:[#allocation56_spill] sm:$0xff] %v9740_v29  ;;  %v622_v53 = vld [vmem:[%s12688_s1 + $0x630] sm:$0xff]  ;;  %v623_v59 = vld [vmem:[%s12688_s1 + $0x638] sm:$0xff] }
  0xbf   : > { %1422 = vmatprep.mubr.f32.mxu1 %v253_v5  ;;  %7978 = vmatpush3.bf16.msra.mxu0 %v9714_v0  ;;  %12820 = vst [vmem:[#allocation55_spill] sm:$0xff] %v9736_v50  ;;  %v640_v5 = vld [vmem:[%s12688_s1 + $0x6c0] sm:$0xff] }
  0xc0   : > { %7980 = vmatprep.subr.bf16.mxu0 %v9718_v6  ;;  %v9762_v56 = vpack.c.bf16 %v641_v11, %v640_v5  ;;  %v280_v5 = vld [vmem:[%s8975_s30 + $0x290] sm:$0xff]  ;;  %v293_v11 = vld [vmem:[%s8975_s30 + $0x318] sm:$0xff] }
  0xc1   : > { %1283 = vmatmul.mubr.f32.gmra.mrb[64].mxu0 %v250_v33  ;;  %v9758_v33 = vpack.c.bf16 %v623_v59, %v622_v53  ;;  %v643_v53 = vld [vmem:[%s12688_s1 + $0x6d8] sm:$0xff]  ;;  %v278_v59 = vld [vmem:[%s8975_s30 + $0x280] sm:$0xff] }
  0xc2   : > { %1423 = vmatmul.mubr.f32.gmra.mrb[64].mxu1 %v252_v35  ;;  %1287 = vmatprep.mubr.f32.mxu0 %v265_v48  ;;  %12823 = vst [vmem:[#allocation58_spill] sm:$0xff] %v9762_v56  ;;  %v624_v35 = vld [vmem:[%s12688_s1 + $0x640] sm:$0xff]  ;;  %v642_v48 = vld [vmem:[%s12688_s1 + $0x6d0] sm:$0xff] }
  0xc3   : > { %1427 = vmatprep.mubr.f32.mxu1 %v267_v60  ;;  %7982 = vmatpush3.bf16.msra.mxu0 %v9736_v50  ;;  %12822 = vst [vmem:[#allocation57_spill] sm:$0xff] %v9758_v33  ;;  %v625_v60 = vld [vmem:[%s12688_s1 + $0x648] sm:$0xff]  ;;  %v9784_v21 = vpack.c.bf16 %v643_v53, %v642_v48  ;;  %v294_v48 = vld [vmem:[%s8975_s30 + $0x320] sm:$0xff] }
  0xc4   : > { %7984 = vmatprep.subr.bf16.mxu0 %v9740_v29  ;;  %v307_v53 = vld [vmem:[%s8975_s30 + $0x3a8] sm:$0xff] }
  0xc5   : > { %1288 = vmatmul.mubr.f32.gmra.mrb[66].mxu0 %v264_v22  ;;  %v9780_v22 = vpack.c.bf16 %v625_v60, %v624_v35  ;;  %12825 = vst [vmem:[#allocation60_spill] sm:$0xff] %v9784_v21  ;;  %v645_v35 = vld [vmem:[%s12688_s1 + $0x6e8] sm:$0xff]  ;;  %v292_v60 = vld [vmem:[%s8975_s30 + $0x310] sm:$0xff] }
  0xc6   : > { %1428 = vmatmul.mubr.f32.gmra.mrb[66].mxu1 %v266_v24  ;;  %1292 = vmatprep.mubr.f32.mxu0 %v279_v32  ;;  %v626_v24 = vld [vmem:[%s12688_s1 + $0x650] sm:$0xff]  ;;  %v644_v32 = vld [vmem:[%s12688_s1 + $0x6e0] sm:$0xff] }
  0xc7   : > { %1432 = vmatprep.mubr.f32.mxu1 %v281_v26  ;;  %7986 = vmatpush3.bf16.msra.mxu0 %v9758_v33  ;;  %12824 = vst [vmem:[#allocation59_spill] sm:$0xff] %v9780_v22  ;;  %v627_v26 = vld [vmem:[%s12688_s1 + $0x658] sm:$0xff]  ;;  %v9806_v54 = vpack.c.bf16 %v645_v35, %v644_v32  ;;  %v308_v32 = vld [vmem:[%s8975_s30 + $0x3b0] sm:$0xff] }
  0xc8   : > { %7988 = vmatprep.subr.bf16.mxu0 %v9762_v56  ;;  %v321_v35 = vld [vmem:[%s8975_s30 + $0x438] sm:$0xff] }
  0xc9   : > { %1293 = vmatmul.mubr.f32.gmra.mrb[68].mxu0 %v278_v59  ;;  %v9802_v59 = vpack.c.bf16 %v627_v26, %v626_v24  ;;  %12827 = vst [vmem:[#allocation62_spill] sm:$0xff] %v9806_v54  ;;  %v647_v24 = vld [vmem:[%s12688_s1 + $0x6f8] sm:$0xff]  ;;  %v306_v26 = vld [vmem:[%s8975_s30 + $0x3a0] sm:$0xff] }
  0xca   : > { %1433 = vmatmul.mubr.f32.gmra.mrb[68].mxu1 %v280_v5  ;;  %1297 = vmatprep.mubr.f32.mxu0 %v293_v11  ;;  %v628_v5 = vld [vmem:[%s12688_s1 + $0x660] sm:$0xff]  ;;  %v646_v11 = vld [vmem:[%s12688_s1 + $0x6f0] sm:$0xff] }
  0xcb   : > { %1437 = vmatprep.mubr.f32.mxu1 %v295_v51  ;;  %7990 = vmatpush3.bf16.msra.mxu0 %v9780_v22  ;;  %12826 = vst [vmem:[#allocation61_spill] sm:$0xff] %v9802_v59  ;;  %v629_v51 = vld [vmem:[%s12688_s1 + $0x668] sm:$0xff]  ;;  %v9828_v25 = vpack.c.bf16 %v647_v24, %v646_v11  ;;  %v337_v24 = vld [vmem:[%s8975_s30 + $0x4d8] sm:$0xff] }
  0xcc   : > { %7992 = vmatprep.subr.bf16.mxu0 %v9784_v21 }
  0xcd   : > { %1298 = vmatmul.mubr.f32.gmra.mrb[70].mxu0 %v292_v60  ;;  %v9824_v60 = vpack.c.bf16 %v629_v51, %v628_v5  ;;  %12829 = vst [vmem:[#allocation64_spill] sm:$0xff] %v9828_v25  ;;  %v322_v5 = vld [vmem:[%s8975_s30 + $0x440] sm:$0xff]  ;;  %v335_v51 = vld [vmem:[%s8975_s30 + $0x4c8] sm:$0xff] }
  0xce   : > { %1438 = vmatmul.mubr.f32.gmra.mrb[70].mxu1 %v294_v48  ;;  %1302 = vmatprep.mubr.f32.mxu0 %v307_v53  ;;  %v630_v48 = vld [vmem:[%s12688_s1 + $0x670] sm:$0xff] }
  0xcf   : > { %1442 = vmatprep.mubr.f32.mxu1 %v309_v14  ;;  %7994 = vmatpush3.bf16.msra.mxu0 %v9802_v59  ;;  %12828 = vst [vmem:[#allocation63_spill] sm:$0xff] %v9824_v60  ;;  %v631_v14 = vld [vmem:[%s12688_s1 + $0x678] sm:$0xff]  ;;  %v320_v53 = vld [vmem:[%s8975_s30 + $0x430] sm:$0xff] }
  0xd0   : > { %7996 = vmatprep.subr.bf16.mxu0 %v9806_v54  ;;  %v9840_v11 = vpack.c.bf16 %v631_v14, %v630_v48  ;;  %v348_v48 = vld [vmem:[%s8975_s30 + $0x550] sm:$0xff]  ;;  %v350_v14 = vld [vmem:[%s8975_s30 + $0x560] sm:$0xff] }
  0xd1   : > { %1303 = vmatmul.mubr.f32.gmra.mrb[72].mxu0 %v306_v26  ;;  %v334_v26 = vld [vmem:[%s8975_s30 + $0x4c0] sm:$0xff] }
  0xd2   : > { %1443 = vmatmul.mubr.f32.gmra.mrb[72].mxu1 %v308_v32  ;;  %1307 = vmatprep.mubr.f32.mxu0 %v321_v35  ;;  %12830 = vst [vmem:[#allocation65_spill] sm:$0xff] %v9840_v11  ;;  %v349_v32 = vld [vmem:[%s8975_s30 + $0x558] sm:$0xff]  ;;  %v351_v35 = vld [vmem:[%s8975_s30 + $0x568] sm:$0xff] }
  0xd3   : > { %1447 = vmatprep.mubr.f32.mxu1 %v323_v52  ;;  %7998 = vmatpush3.bf16.msra.mxu0 %v9824_v60  ;;  %v336_v52 = vld [vmem:[%s8975_s30 + $0x4d0] sm:$0xff] }
  0xd4   : > { %8000 = vmatprep.subr.bf16.mxu0 %v9828_v25 }
  0xd5   : > { %1308 = vmatmul.mubr.f32.gmra.mrb[74].mxu0 %v320_v53  ;;  %v363_v53 = vld [vmem:[%s8975_s30 + $0x5e8] sm:$0xff] }
  0xd6   : > { %1448 = vmatmul.mubr.f32.gmra.mrb[74].mxu1 %v322_v5  ;;  %1312 = vmatprep.mubr.f32.mxu0 %v335_v51  ;;  %v365_v5 = vld [vmem:[%s8975_s30 + $0x5f8] sm:$0xff]  ;;  %v362_v51 = vld [vmem:[%s8975_s30 + $0x5e0] sm:$0xff] }
  0xd7   : > { %1452 = vmatprep.mubr.f32.mxu1 %v337_v24  ;;  %8002 = vmatpush3.bf16.msra.mxu0 %v9840_v11  ;;  %v364_v24 = vld [vmem:[%s8975_s30 + $0x5f0] sm:$0xff] }
  0xd9   : > { %1313 = vmatmul.mubr.f32.gmra.mrb[76].mxu0 %v334_v26  ;;  %v377_v26 = vld [vmem:[%s8975_s30 + $0x678] sm:$0xff] }
  0xda   : > { %1453 = vmatmul.mubr.f32.gmra.mrb[76].mxu1 %v336_v52  ;;  %1317 = vmatprep.mubr.f32.mxu0 %v349_v32  ;;  %v379_v52 = vld [vmem:[%s8975_s30 + $0x688] sm:$0xff]  ;;  %v376_v32 = vld [vmem:[%s8975_s30 + $0x670] sm:$0xff] }
  0xdb   : > { %1457 = vmatprep.mubr.f32.mxu1 %v351_v35  ;;  %v378_v35 = vld [vmem:[%s8975_s30 + $0x680] sm:$0xff] }
  0xdd   : > { %1318 = vmatmul.mubr.f32.gmra.mrb[78].mxu0 %v348_v48  ;;  %v391_v48 = vld [vmem:[%s8975_s30 + $0x708] sm:$0xff] }
  0xde   : > { %1458 = vmatmul.mubr.f32.gmra.mrb[78].mxu1 %v350_v14  ;;  %1322 = vmatprep.mubr.f32.mxu0 %v363_v53  ;;  %v393_v14 = vld [vmem:[%s8975_s30 + $0x718] sm:$0xff]  ;;  %v390_v53 = vld [vmem:[%s8975_s30 + $0x700] sm:$0xff] }
  0xdf   : > { %1462 = vmatprep.mubr.f32.mxu1 %v365_v5  ;;  %v392_v5 = vld [vmem:[%s8975_s30 + $0x710] sm:$0xff] }
  0xe1   : > { %1323 = vmatmul.mubr.f32.gmra.mrb[80].mxu0 %v362_v51  ;;  %v405_v51 = vld [vmem:[%s8975_s30 + $0x798] sm:$0xff] }
  0xe2   : > { %1463 = vmatmul.mubr.f32.gmra.mrb[80].mxu1 %v364_v24  ;;  %1327 = vmatprep.mubr.f32.mxu0 %v377_v26  ;;  %v407_v24 = vld [vmem:[%s8975_s30 + $0x7a8] sm:$0xff]  ;;  %v404_v26 = vld [vmem:[%s8975_s30 + $0x790] sm:$0xff] }
  0xe3   : > { %1467 = vmatprep.mubr.f32.mxu1 %v379_v52  ;;  %v406_v52 = vld [vmem:[%s8975_s30 + $0x7a0] sm:$0xff] }
  0xe5   : > { %1328 = vmatmul.mubr.f32.gmra.mrb[82].mxu0 %v376_v32  ;;  %v421_v32 = vld [vmem:[%s8975_s30 + $0x838] sm:$0x7] }
  0xe6   : > { %1468 = vmatmul.mubr.f32.gmra.mrb[82].mxu1 %v378_v35  ;;  %1332 = vmatprep.mubr.f32.mxu0 %v391_v48  ;;  %v418_v35 = vld [vmem:[%s8975_s30 + $0x820] sm:$0x7]  ;;  %v420_v48 = vld [vmem:[%s8975_s30 + $0x830] sm:$0x7] }
  0xe7   : > { %1472 = vmatprep.mubr.f32.mxu1 %v393_v14  ;;  %v227_v14 = vld [vmem:[%s8975_s30 + $0x68] sm:$0xff] }
  0xe9   : > { %1333 = vmatmul.mubr.f32.gmra.mrb[84].mxu0 %v390_v53  ;;  %v226_v53 = vld [vmem:[%s8975_s30 + $0x60] sm:$0xff] }
  0xea   : > { %1473 = vmatmul.mubr.f32.gmra.mrb[84].mxu1 %v392_v5  ;;  %1337 = vmatprep.mubr.f32.mxu0 %v405_v51  ;;  %v241_v5 = vld [vmem:[%s8975_s30 + $0xf8] sm:$0xff]  ;;  %v240_v51 = vld [vmem:[%s8975_s30 + $0xf0] sm:$0xff] }
  0xeb   : > { %1477 = vmatprep.mubr.f32.mxu1 %v407_v24  ;;  %v254_v24 = vld [vmem:[%s8975_s30 + $0x180] sm:$0xff] }
  0xed   : > { %1338 = vmatmul.mubr.f32.gmra.mrb[86].mxu0 %v404_v26  ;;  %v269_v26 = vld [vmem:[%s8975_s30 + $0x218] sm:$0xff] }
  0xee   : > { %1478 = vmatmul.mubr.f32.gmra.mrb[86].mxu1 %v406_v52  ;;  %1342 = vmatprep.mubr.f32.mxu0 %v419_v23  ;;  %v255_v23 = vld [vmem:[%s8975_s30 + $0x188] sm:$0xff]  ;;  %v268_v52 = vld [vmem:[%s8975_s30 + $0x210] sm:$0xff] }
  0xef   : > { %1482 = vmatprep.mubr.f32.mxu1 %v421_v32  ;;  %v283_v32 = vld [vmem:[%s8975_s30 + $0x2a8] sm:$0xff] }
  0xf1   : > { %1343 = vmatmul.mubr.f32.gmra.mrb[88].mxu0 %v418_v35  ;;  %v282_v35 = vld [vmem:[%s8975_s30 + $0x2a0] sm:$0xff] }
  0xf2   : > { %1483 = vmatmul.mubr.f32.gmra.mrb[88].mxu1 %v420_v48  ;;  %1552 = vmatprep.mubr.f32.mxu0 %v227_v14  ;;  %v297_v48 = vld [vmem:[%s8975_s30 + $0x338] sm:$0xff]  ;;  %v296_v14 = vld [vmem:[%s8975_s30 + $0x330] sm:$0xff] }
  0xf5   : > { %1553 = vmatmul.mubr.f32.vlgmr.msra.gmra.mrb[90].mxu0 %v226_v53  ;;  %v311_v53 = vld [vmem:[%s8975_s30 + $0x3c8] sm:$0xff] }
  0xf6   : > { %1557 = vmatprep.mubr.f32.mxu0 %v241_v5  ;;  %v310_v5 = vld [vmem:[%s8975_s30 + $0x3c0] sm:$0xff] }
  0xf9   : > { %1558 = vmatmul.mubr.f32.gmra.mrb[92].mxu0 %v240_v51  ;;  %v325_v51 = vld [vmem:[%s8975_s30 + $0x458] sm:$0xff] }
  0xfa   : > { %1562 = vmatprep.mubr.f32.mxu0 %v255_v23  ;;  %v324_v23 = vld [vmem:[%s8975_s30 + $0x450] sm:$0xff] }
  0xfd   : > { %1563 = vmatmul.mubr.f32.gmra.mrb[94].mxu0 %v254_v24  ;;  %v339_v24 = vld [vmem:[%s8975_s30 + $0x4e8] sm:$0xff] }
  0xfe   : > { %1567 = vmatprep.mubr.f32.mxu0 %v269_v26  ;;  %v338_v26 = vld [vmem:[%s8975_s30 + $0x4e0] sm:$0xff] }
 0x101   : > { %1568 = vmatmul.mubr.f32.gmra.mrb[96].mxu0 %v268_v52  ;;  %v353_v52 = vld [vmem:[%s8975_s30 + $0x578] sm:$0xff] }
 0x102   : > { %1572 = vmatprep.mubr.f32.mxu0 %v283_v32 }
 0x105   : > { %1573 = vmatmul.mubr.f32.gmra.mrb[98].mxu0 %v282_v35 }
 0x106   : > { %1577 = vmatprep.mubr.f32.mxu0 %v297_v48 }
 0x109   : > { %1578 = vmatmul.mubr.f32.gmra.mrb[100].mxu0 %v296_v14 }
 0x10a   : > { %1582 = vmatprep.mubr.f32.mxu0 %v311_v53  ;;  %v352_v53 = vld [vmem:[%s8975_s30 + $0x570] sm:$0xff] }
 0x10d   : > { %1583 = vmatmul.mubr.f32.gmra.mrb[102].mxu0 %v310_v5  ;;  %v367_v5 = vld [vmem:[%s8975_s30 + $0x608] sm:$0xff] }
 0x10e   : > { %1587 = vmatprep.mubr.f32.mxu0 %v325_v51 }
 0x111   : > { %1588 = vmatmul.mubr.f32.gmra.mrb[104].mxu0 %v324_v23 }
 0x112   : > { %1592 = vmatprep.mubr.f32.mxu0 %v339_v24 }
 0x114   : > { %v5915_v32 = vpop.f32.mrb[0].mxu0 }
 0x115   : > { %v5992_v4 = vpop.f32.mrb[0].mxu1  ;;  %v5916_v35 = vpop.f32.mrb[1].mxu0  ;;  %1593 = vmatmul.mubr.f32.gmra.mrb[106].mxu0 %v338_v26  ;;  %v381_v26 = vld [vmem:[%s8975_s30 + $0x698] sm:$0xff] }
 0x116   : > { %v5917_v48 = vadd.f32 %v5916_v35, %v5915_v32  ;;  %v5993_v14 = vpop.f32.mrb[1].mxu1  ;;  %1597 = vmatprep.mubr.f32.mxu0 %v353_v52 }
 0x117   : > { %v5994_v62 = vadd.f32 %v5993_v14, %v5992_v4  ;;  %v2272_v4 = vld [vmem:[%s12688_s1 + $0x80] sm:$0xff] }
 0x118   : > { %v5918_v51 = vpop.f32.mrb[2].mxu0 }
 0x119   : > { %v9892_v45 = vadd.f32 %v5994_v62, %v5917_v48  ;;  %v5995_v42 = vpop.f32.mrb[2].mxu1  ;;  %v5919_v23 = vpop.f32.mrb[3].mxu0  ;;  %1598 = vmatmul.mubr.f32.gmra.mrb[108].mxu0 %v352_v53  ;;  %v2273_v62 = vld [vmem:[%s12688_s1 + $0x88] sm:$0xff] }
 0x11a   : > { %v5920_v24 = vadd.f32 %v5919_v23, %v5918_v51  ;;  %v5996_v3 = vpop.f32.mrb[3].mxu1  ;;  %1602 = vmatprep.mubr.f32.mxu0 %v367_v5  ;;  %v8018_v14 = vpack.c.bf16 %v2273_v62, %v2272_v4  ;;  %v2257_v51 = vld [vmem:[%s12688_s1 + $0x8] sm:$0xff] }
 0x11b   : > { %v5997_v44 = vadd.f32 %v5996_v3, %v5995_v42  ;;  %v380_v3 = vld [vmem:[%s8975_s30 + $0x690] sm:$0xff]  ;;  %v2256_v42 = vld [vmem:[%s12688_s1] sm:$0xff] }
 0x11c   : > { %v5921_v32 = vpop.f32.mrb[4].mxu0  ;;  %8019 = vmatprep.subr.bf16.mxu0 %v8018_v14 }
 0x11d   : > { %v9902_v52 = vadd.f32 %v5997_v44, %v5920_v24  ;;  %v5998_v35 = vpop.f32.mrb[4].mxu1  ;;  %v5922_v48 = vpop.f32.mrb[5].mxu0  ;;  %1603 = vmatmul.mubr.f32.gmra.mrb[110].mxu0 %v366_v46  ;;  %v395_v44 = vld [vmem:[%s8975_s30 + $0x728] sm:$0xff]  ;;  %v8020_v24 = vpack.c.bf16 %v2257_v51, %v2256_v42  ;;  %v2274_v51 = vld [vmem:[%s12688_s1 + $0x90] sm:$0xff] }
 0x11e   : > { %v5923_v53 = vadd.f32 %v5922_v48, %v5921_v32  ;;  %v5999_v5 = vpop.f32.mrb[5].mxu1  ;;  %1607 = vmatprep.mubr.f32.mxu0 %v381_v26 }
 0x11f   : > { %v6000_v23 = vadd.f32 %v5999_v5, %v5998_v35  ;;  %8021 = vmatpush3.bf16.msra.mxu0 %v8020_v24  ;;  %v1675_v35 = vld [vmem:[%s12689_s2 + $0x8] sm:$0xff]  ;;  %v409_v5 = vld [vmem:[%s8975_s30 + $0x7b8] sm:$0xff] }
 0x120   : > { %v5924_v46 = vpop.f32.mrb[6].mxu0 }
 0x121   : > { %v9912_v4 = vadd.f32 %v6000_v23, %v5923_v53  ;;  %v6001_v32 = vpop.f32.mrb[6].mxu1  ;;  %v5925_v26 = vpop.f32.mrb[7].mxu0  ;;  %1608 = vmatmul.mubr.f32.gmra.mrb[112].mxu0 %v380_v3  ;;  %v12712_v53 = vmov 0.0|0.0   ;;  %v8004_v3 = vpack.c.bf16 %v1675_v35, %v1674_v31  ;;  %v2275_v23 = vld [vmem:[%s12688_s1 + $0x98] sm:$0xff]  ;;  %v408_v31 = vld [vmem:[%s8975_s30 + $0x7b0] sm:$0xff] }
 0x122   : > { %v5926_v62 = vadd.f32 %v5925_v26, %v5924_v46  ;;  %v6002_v48 = vpop.f32.mrb[7].mxu1  ;;  %1612 = vmatprep.mubr.f32.mxu0 %v395_v44  ;;  %8003 = vmatprep.subr.bf16.mxu1 %v12712_v53  ;;  %v2258_v35 = vld [vmem:[%s12688_s1 + $0x10] sm:$0xff]  ;;  %v2259_v53 = vld [vmem:[%s12688_s1 + $0x18] sm:$0xff] }
 0x123   : > { %v6003_v14 = vadd.f32 %v6002_v48, %v6001_v32  ;;  %8005 = vmatpush3.bf16.msra.mxu1 %v8004_v3  ;;  %v8022_v32 = vpack.c.bf16 %v2275_v23, %v2274_v51 }
 0x124   : > { %v5927_v42 = vpop.f32.mrb[8].mxu0 }
 0x125   : > { %v9929_v44 = vadd.f32 %v6003_v14, %v5926_v62  ;;  %v6004_v24 = vpop.f32.mrb[8].mxu1  ;;  %v5928_v46 = vpop.f32.mrb[9].mxu0  ;;  %1613 = vmatmul.mubr.f32.gmra.mrb[114].mxu0 %v394_v34  ;;  %v12831_v62 = vmov 0.0|0.0   ;;  %8023 = vmatprep.subr.bf16.mxu0 %v8022_v32  ;;  %v8024_v34 = vpack.c.bf16 %v2259_v53, %v2258_v35  ;;  %v2277_v53 = vld [vmem:[%s12688_s1 + $0xa8] sm:$0xff]  ;;  %v1676_v32 = vld [vmem:[%s12689_s2 + $0x10] sm:$0xff]  ;;  %v1677_v35 = vld [vmem:[%s12689_s2 + $0x18] sm:$0xff] }
 0x126   : > { %v5929_v26 = vadd.f32 %v5928_v46, %v5927_v42  ;;  %v6005_v48 = vpop.f32.mrb[9].mxu1  ;;  %1617 = vmatprep.mubr.f32.mxu0 %v409_v5  ;;  %8006 = vmatprep.subr.bf16.mxu1 %v12831_v62 }
 0x127   : > { %v6006_v14 = vadd.f32 %v6005_v48, %v6004_v24  ;;  %8025 = vmatpush3.bf16.msra.mxu0 %v8024_v34  ;;  %v2276_v24 = vld [vmem:[%s12688_s1 + $0xa0] sm:$0xff]  ;;  %v2261_v34 = vld [vmem:[%s12688_s1 + $0x28] sm:$0xff] }
 0x128   : > { %v5930_v3 = vpop.f32.mrb[10].mxu0 }
 0x129   : > { %v9940_v42 = vadd.f32 %v6006_v14, %v5929_v26  ;;  %v6007_v5 = vpop.f32.mrb[10].mxu1  ;;  %v5931_v51 = vpop.f32.mrb[11].mxu0  ;;  %1618 = vmatmul.mubr.f32.gmra.mrb[116].mxu0 %v408_v31  ;;  %v8026_v31 = vpack.c.bf16 %v2277_v53, %v2276_v24  ;;  %v2260_v14 = vld [vmem:[%s12688_s1 + $0x20] sm:$0xff] }
 0x12a   : > { %v5932_v23 = vadd.f32 %v5931_v51, %v5930_v3  ;;  %v6008_v46 = vpop.f32.mrb[11].mxu1  ;;  %1622 = vmatprep.mubr.f32.mxu0 %v423_v19  ;;  %v8028_v51 = vpack.c.bf16 %v2261_v34, %v2260_v14  ;;  %v1678_v34 = vld [vmem:[%s12689_s2 + $0x20] sm:$0xff] }
 0x12b   : > { %v6009_v2 = vadd.f32 %v6008_v46, %v6007_v5  ;;  %8027 = vmatprep.subr.bf16.mxu0 %v8026_v31 }
 0x12c   : > { %v5933_v63 = vpop.f32.mrb[12].mxu0  ;;  %8029 = vmatpush3.bf16.msra.mxu0 %v8028_v51 }
 0x12d   : > { %v9952_v26 = vadd.f32 %v6009_v2, %v5932_v23  ;;  %v6010_v48 = vpop.f32.mrb[12].mxu1  ;;  %v5934_v19 = vpop.f32.mrb[13].mxu0  ;;  %1623 = vmatmul.mubr.f32.gmra.mrb[118].mxu0 %v422_v15  ;;  %v8007_v2 = vpack.c.bf16 %v1677_v35, %v1676_v32  ;;  %v2279_v32 = vld [vmem:[%s12688_s1 + $0xb8] sm:$0xff] }
 0x12e   : > { %v5935_v3 = vadd.f32 %v5934_v19, %v5933_v63  ;;  %v6011_v5 = vpop.f32.mrb[13].mxu1  ;;  %v2278_v63 = vld [vmem:[%s12688_s1 + $0xb0] sm:$0xff] }
 0x12f   : > { %v6012_v23 = vadd.f32 %v6011_v5, %v6010_v48  ;;  %8008 = vmatpush3.bf16.msra.mxu1 %v8007_v2  ;;  %v2262_v48 = vld [vmem:[%s12688_s1 + $0x30] sm:$0xff]  ;;  %v8030_v14 = vpack.c.bf16 %v2279_v32, %v2278_v63 }
 0x130   : > { %v5936_v15 = vpop.f32.mrb[14].mxu0  ;;  %8009 = vmatprep.subr.bf16.mxu1 %v12831_v62 }
 0x131   : > { %v9963_v46 = vadd.f32 %v6012_v23, %v5935_v3  ;;  %v6013_v24 = vpop.f32.mrb[14].mxu1  ;;  %v5937_v53 = vpop.f32.mrb[15].mxu0  ;;  %v1679_v3 = vld [vmem:[%s12689_s2 + $0x28] sm:$0xff]  ;;  %8031 = vmatprep.subr.bf16.mxu0 %v8030_v14 }
 0x132   : > { %v5938_v49 = vadd.f32 %v5937_v53, %v5936_v15  ;;  %v6014_v47 = vpop.f32.mrb[15].mxu1  ;;  %v2280_v15 = vld [vmem:[%s12688_s1 + $0xc0] sm:$0xff] }
 0x133   : > { %v6015_v36 = vadd.f32 %v6014_v47, %v6013_v24  ;;  %v2263_v47 = vld [vmem:[%s12688_s1 + $0x38] sm:$0xff]  ;;  %v2281_v24 = vld [vmem:[%s12688_s1 + $0xc8] sm:$0xff] }
 0x134   : > { %v5939_v30 = vpop.f32.mrb[16].mxu0  ;;  %v8032_v51 = vpack.c.bf16 %v2263_v47, %v2262_v48  ;;  %v8034_v32 = vpack.c.bf16 %v2281_v24, %v2280_v15  ;;  %v2264_v47 = vld [vmem:[%s12688_s1 + $0x40] sm:$0xff]  ;;  %v1680_v24 = vld [vmem:[%s12689_s2 + $0x30] sm:$0xff] }
 0x135   : > { %v9975_v19 = vadd.f32 %v6015_v36, %v5938_v49  ;;  %v6016_v31 = vpop.f32.mrb[16].mxu1  ;;  %v5940_v35 = vpop.f32.mrb[17].mxu0  ;;  %v8010_v36 = vpack.c.bf16 %v1679_v3, %v1678_v34  ;;  %v2265_v34 = vld [vmem:[%s12688_s1 + $0x48] sm:$0xff] }
 0x136   : > { %v5941_v5 = vadd.f32 %v5940_v35, %v5939_v30  ;;  %v6017_v2 = vpop.f32.mrb[17].mxu1  ;;  %8033 = vmatpush3.bf16.msra.mxu0 %v8032_v51  ;;  %v8036_v51 = vpack.c.bf16 %v2265_v34, %v2264_v47 }
 0x137   : > { %v6018_v49 = vadd.f32 %v6017_v2, %v6016_v31  ;;  %8011 = vmatpush3.bf16.msra.mxu1 %v8010_v36  ;;  %8035 = vmatprep.subr.bf16.mxu0 %v8034_v32 }
 0x138   : > { %v5942_v23 = vpop.f32.mrb[18].mxu0  ;;  %8012 = vmatprep.subr.bf16.mxu1 %v12831_v62 }
 0x139   : > { %v9992_v53 = vadd.f32 %v6018_v49, %v5941_v5  ;;  %v6019_v63 = vpop.f32.mrb[18].mxu1  ;;  %v5943_v30 = vpop.f32.mrb[19].mxu0 }
 0x13a   : > { %v5944_v48 = vadd.f32 %v5943_v30, %v5942_v23  ;;  %v6020_v31 = vpop.f32.mrb[19].mxu1  ;;  %8037 = vmatpush3.bf16.msra.mxu0 %v8036_v51  ;;  %v2282_v30 = vld [vmem:[%s12688_s1 + $0xd0] sm:$0xff] }
 0x13b   : > { %v6021_v35 = vadd.f32 %v6020_v31, %v6019_v63  ;;  %v1681_v63 = vld [vmem:[%s12689_s2 + $0x38] sm:$0xff] }
 0x13c   : > { %v5945_v14 = vpop.f32.mrb[20].mxu0 }
 0x13d   : > { %v10001_v3 = vadd.f32 %v6021_v35, %v5944_v48  ;;  %v6022_v5 = vpop.f32.mrb[20].mxu1  ;;  %v5946_v2 = vpop.f32.mrb[21].mxu0  ;;  %v8013_v35 = vpack.c.bf16 %v1681_v63, %v1680_v24 }
 0x13e   : > { %v5947_v36 = vadd.f32 %v5946_v2, %v5945_v14  ;;  %v6023_v49 = vpop.f32.mrb[21].mxu1  ;;  %v2283_v14 = vld [vmem:[%s12688_s1 + $0xd8] sm:$0xff] }
 0x13f   : > { %v6024_v23 = vadd.f32 %v6023_v49, %v6022_v5  ;;  %v8038_v5 = vpack.c.bf16 %v2283_v14, %v2282_v30  ;;  %8014 = vmatpush3.bf16.msra.mxu1 %v8013_v35  ;;  %v2266_v49 = vld [vmem:[%s12688_s1 + $0x50] sm:$0xff]  ;;  %v2284_v35 = vld [vmem:[%s12688_s1 + $0xe0] sm:$0xff]  ;;  %v2285_v14 = vld [vmem:[%s12688_s1 + $0xe8] sm:$0xff] }
 0x140   : > { %v5948_v15 = vpop.f32.mrb[22].mxu0  ;;  %8015 = vmatprep.subr.bf16.mxu1 %v12831_v62 }
 0x141   : > { %v10012_v32 = vadd.f32 %v6024_v23, %v5947_v36  ;;  %v6025_v48 = vpop.f32.mrb[22].mxu1  ;;  %v5949_v31 = vpop.f32.mrb[23].mxu0  ;;  %8039 = vmatprep.subr.bf16.mxu0 %v8038_v5  ;;  %v2267_v36 = vld [vmem:[%s12688_s1 + $0x58] sm:$0xff]  ;;  %v8042_v5 = vpack.c.bf16 %v2285_v14, %v2284_v35 }
 0x142   : > { %v5950_v47 = vadd.f32 %v5949_v31, %v5948_v15  ;;  %v6026_v34 = vpop.f32.mrb[23].mxu1  ;;  %v8040_v63 = vpack.c.bf16 %v2267_v36, %v2266_v49 }
 0x143   : > { %v6027_v2 = vadd.f32 %v6026_v34, %v6025_v48 }
 0x144   : > { %v5951_v51 = vpop.f32.mrb[24].mxu0  ;;  %8041 = vmatpush3.bf16.msra.mxu0 %v8040_v63  ;;  %v2269_v63 = vld [vmem:[%s12688_s1 + $0x68] sm:$0xff] }
 0x145   : > { %v10024_v23 = vadd.f32 %v6027_v2, %v5950_v47  ;;  %v6028_v24 = vpop.f32.mrb[24].mxu1  ;;  %v5952_v15 = vpop.f32.mrb[25].mxu0  ;;  %v1682_v47 = vld [vmem:[%s12689_s2 + $0x40] sm:$0xff]  ;;  %v1683_v2 = vld [vmem:[%s12689_s2 + $0x48] sm:$0xff]  ;;  %8043 = vmatprep.subr.bf16.mxu0 %v8042_v5  ;;  %v2271_v5 = vld [vmem:[%s12688_s1 + $0x78] sm:$0xff] }
 0x146   : > { %v5953_v30 = vadd.f32 %v5952_v15, %v5951_v51  ;;  %v6029_v48 = vpop.f32.mrb[25].mxu1  ;;  %v2268_v51 = vld [vmem:[%s12688_s1 + $0x60] sm:$0xff]  ;;  %v8016_v15 = vpack.c.bf16 %v1683_v2, %v1682_v47 }
 0x147   : > { %v6030_v31 = vadd.f32 %v6029_v48, %v6028_v24  ;;  %v8044_v14 = vpack.c.bf16 %v2269_v63, %v2268_v51 }
 0x148   : > { %v5954_v34 = vpop.f32.mrb[26].mxu0  ;;  %8017 = vmatpush3.bf16.msra.mxu1 %v8016_v15 }
 0x149   : > { %v10041_v49 = vadd.f32 %v6030_v31, %v5953_v30  ;;  %v6031_v36 = vpop.f32.mrb[26].mxu1  ;;  %v5955_v24 = vpop.f32.mrb[27].mxu0  ;;  %v2287_v30 = vld [vmem:[%s12688_s1 + $0xf8] sm:$0xff]  ;;  %8045 = vmatpush3.bf16.msra.mxu0 %v8044_v14 }
 0x14a   : > { %v5956_v48 = vadd.f32 %v5955_v24, %v5954_v34  ;;  %v6032_v35 = vpop.f32.mrb[27].mxu1  ;;  %v8046_v47 = vpack.c.bf16 %v2287_v30, %v2286_v13  ;;  %v2270_v34 = vld [vmem:[%s12688_s1 + $0x70] sm:$0xff]  ;;  %v2077_v14 = vld [vmem:[%s8975_s30 + $0x38] sm:$0xff] }
 0x14b   : > { %v6033_v20 = vadd.f32 %v6032_v35, %v6031_v36  ;;  %v8048_v24 = vpack.c.bf16 %v2271_v5, %v2270_v34  ;;  %2512 = vmatprep.mubr.f32.mxu0 %v2077_v14  ;;  %v2089_v34 = vld [vmem:[%s8975_s30 + $0xc8] sm:$0xff] }
 0x14c   : > { %v5957_v31 = vpop.f32.mrb[28].mxu0  ;;  %8047 = vmatprep.subr.bf16.mxu0 %v8046_v47 }
 0x14d   : > { %v10058_v2 = vadd.f32 %v6033_v20, %v5956_v48  ;;  %v6034_v51 = vpop.f32.mrb[28].mxu1  ;;  %v5958_v36 = vpop.f32.mrb[29].mxu0  ;;  %8049 = vmatpush3.bf16.msra.mxu0 %v8048_v24 }
 0x14e   : > { %v5959_v15 = vadd.f32 %v5958_v36, %v5957_v31  ;;  %v6035_v63 = vpop.f32.mrb[29].mxu1  ;;  %v2088_v36 = vld [vmem:[%s8975_s30 + $0xc0] sm:$0xff] }
 0x14f   : > { %v6036_v35 = vadd.f32 %v6035_v63, %v6034_v51 }
 0x150   : > { %v6069_v13 = vpop.f32.mrb[30].mxu0  ;;  %2513 = vmatmul.mubr.f32.vlgmr.msra.gmra.mrb[120].mxu0 %v2076_v55  ;;  %v2101_v55 = vld [vmem:[%s8975_s30 + $0x158] sm:$0xff] }
 0x151   : > { %v10061_v30 = vadd.f32 %v6036_v35, %v5959_v15  ;;  %v6070_v7 = vpop.f32.mrb[31].mxu0  ;;  %v6146_v1 = vpop.f32.mrb[30].mxu1  ;;  %2517 = vmatprep.mubr.f32.mxu0 %v2089_v34 }
 0x152   : > { %v6071_v20 = vadd.f32 %v6070_v7, %v6069_v13  ;;  %v6147_v48 = vpop.f32.mrb[31].mxu1 }
 0x153   : > { %v6148_v18 = vadd.f32 %v6147_v48, %v6146_v1 }
 0x154   : > { %v995_v31 = vadd.f32 %v6071_v20, %v9892_v45  ;;  %v6072_v47 = vpop.f32.mrb[32].mxu0  ;;  %2518 = vmatmul.mubr.f32.gmra.mrb[122].mxu0 %v2088_v36  ;;  %v1684_v45 = vld [vmem:[%s12689_s2 + $0x50] sm:$0xf]  ;;  %v12728_v20 = vmov 0.0   ;;  %v2337_v36 = vld [vmem:[%s12688_s1 + $0x288] sm:$0xff] }
 0x155   : > { %v6073_v5 = vpop.f32.mrb[33].mxu0  ;;  %v6149_v51 = vpop.f32.mrb[32].mxu1  ;;  %7598 = vmatprep.subr.mxu1 %v12728_v20  ;;  %2522 = vmatprep.mubr.f32.mxu0 %v2101_v55 }
 0x156   : > { %v10067_v24 = vadd.f32 %v6148_v18, %v995_v31  ;;  %v6074_v15 = vadd.f32 %v6073_v5, %v6072_v47  ;;  %v6150_v63 = vpop.f32.mrb[33].mxu1  ;;  %v2100_v18 = vld [vmem:[%s8975_s30 + $0x150] sm:$0xff]  ;;  %7599 = vmatpush3.msk.msra.mxu1 %vm1731_vm0, %v1684_v45  ;;  %7600 = vmatprep.mubr.msk.f32.mxu1 %vm8759_vm1, %v12728_v20  ;;  %v2112_v45 = vld [vmem:[%s8975_s30 + $0x1e0] sm:$0xff] }
 0x157   : > { %v6151_v35 = vadd.f32 %v6150_v63, %v6149_v51  ;;  %v2336_v51 = vld [vmem:[%s12688_s1 + $0x280] sm:$0xff] }
 0x158   : > { %v1000_v7 = vadd.f32 %v6074_v15, %v9902_v52  ;;  %v6075_v1 = vpop.f32.mrb[34].mxu0  ;;  %2523 = vmatmul.mubr.f32.gmra.mrb[124].mxu0 %v2100_v18  ;;  %v2320_v15 = vld [vmem:[%s12688_s1 + $0x200] sm:$0xff] }
 0x159   : > { %v6076_v13 = vpop.f32.mrb[35].mxu0  ;;  %v6152_v14 = vpop.f32.mrb[34].mxu1 }
 0x15a   : > { %v10076_v48 = vadd.f32 %v6151_v35, %v1000_v7  ;;  %v6077_v31 = vadd.f32 %v6076_v13, %v6075_v1  ;;  %v6153_v47 = vpop.f32.mrb[35].mxu1  ;;  %v8082_v7 = vpack.c.bf16 %v2337_v36, %v2336_v51  ;;  %v2113_v1 = vld [vmem:[%s8975_s30 + $0x1e8] sm:$0xff]  ;;  %v2304_v36 = vld [vmem:[%s12688_s1 + $0x180] sm:$0xff] }
 0x15b   : > { %v6154_v52 = vadd.f32 %v6153_v47, %v6152_v14  ;;  %2527 = vmatprep.mubr.f32.mxu0 %v2113_v1 }
 0x15c   : > { %v1005_v34 = vadd.f32 %v6077_v31, %v9912_v4  ;;  %v6078_v5 = vpop.f32.mrb[36].mxu0  ;;  %v2321_v4 = vld [vmem:[%s12688_s1 + $0x208] sm:$0xff]  ;;  %8083 = vmatprep.subr.bf16.mxu0 %v8082_v7  ;;  %2528 = vmatmul.mubr.f32.gmra.mrb[126].mxu0 %v2112_v45 }
 0x15d   : > { %v6079_v63 = vpop.f32.mrb[37].mxu0  ;;  %v6155_v35 = vpop.f32.mrb[36].mxu1  ;;  %v8084_v18 = vpack.c.bf16 %v2321_v4, %v2320_v15  ;;  %v2125_v15 = vld [vmem:[%s8975_s30 + $0x278] sm:$0xff]  ;;  %v2124_v4 = vld [vmem:[%s8975_s30 + $0x270] sm:$0xff] }
 0x15e   : > { %v10096_v55 = vadd.f32 %v6154_v52, %v1005_v34  ;;  %v6080_v13 = vadd.f32 %v6079_v63, %v6078_v5  ;;  %v6156_v14 = vpop.f32.mrb[37].mxu1  ;;  %v2305_v52 = vld [vmem:[%s12688_s1 + $0x188] sm:$0xff]  ;;  %2532 = vmatprep.mubr.f32.mxu0 %v2125_v15 }
 0x15f   : > { %v6157_v31 = vadd.f32 %v6156_v14, %v6155_v35  ;;  %8085 = vmatpush3.bf16.msra.mxu0 %v8084_v18  ;;  %v8050_v63 = vpack.c.bf16 %v2305_v52, %v2304_v36  ;;  %v2338_v14 = vld [vmem:[%s12688_s1 + $0x290] sm:$0xff]  ;;  %v2339_v18 = vld [vmem:[%s12688_s1 + $0x298] sm:$0xff]  ;;  %v2137_v52 = vld [vmem:[%s8975_s30 + $0x308] sm:$0xff] }
 0x160   : > { %v1010_v47 = vadd.f32 %v6080_v13, %v9929_v44  ;;  %v6081_v51 = vpop.f32.mrb[38].mxu0  ;;  %2533 = vmatmul.mubr.f32.gmra.mrb[128].mxu0 %v2124_v4  ;;  %v8086_v36 = vpack.c.bf16 %v2339_v18, %v2338_v14 }
 0x161   : > { %v6082_v34 = vpop.f32.mrb[39].mxu0  ;;  %v6158_v5 = vpop.f32.mrb[38].mxu1  ;;  %8051 = vmatprep.subr.bf16.mxu1 %v8050_v63  ;;  %2537 = vmatprep.mubr.f32.mxu0 %v2137_v52 }
 0x162   : > { %v10107_v35 = vadd.f32 %v6157_v31, %v1010_v47  ;;  %v6083_v7 = vadd.f32 %v6082_v34, %v6081_v51  ;;  %v6159_v44 = vpop.f32.mrb[39].mxu1  ;;  %v2322_v31 = vld [vmem:[%s12688_s1 + $0x210] sm:$0xff]  ;;  %v2136_v34 = vld [vmem:[%s8975_s30 + $0x300] sm:$0xff]  ;;  %8087 = vmatprep.subr.bf16.mxu0 %v8086_v36 }
 0x163   : > { %v6160_v1 = vadd.f32 %v6159_v44, %v6158_v5  ;;  %v2324_v36 = vld [vmem:[%s12688_s1 + $0x220] sm:$0xff] }
 0x164   : > { %v1015_v45 = vadd.f32 %v6083_v7, %v9940_v42  ;;  %v6084_v13 = vpop.f32.mrb[40].mxu0  ;;  %v2323_v42 = vld [vmem:[%s12688_s1 + $0x218] sm:$0xff]  ;;  %2538 = vmatmul.mubr.f32.gmra.mrb[130].mxu0 %v2136_v34 }
 0x165   : > { %v6085_v47 = vpop.f32.mrb[41].mxu0  ;;  %v6161_v51 = vpop.f32.mrb[40].mxu1  ;;  %v8088_v4 = vpack.c.bf16 %v2323_v42, %v2322_v31  ;;  %2542 = vmatprep.mubr.f32.mxu0 %v2149_v12 }
 0x166   : > { %v10124_v5 = vadd.f32 %v6160_v1, %v1015_v45  ;;  %v6086_v63 = vadd.f32 %v6085_v47, %v6084_v13  ;;  %v6162_v15 = vpop.f32.mrb[41].mxu1 }
 0x167   : > { %v6163_v7 = vadd.f32 %v6162_v15, %v6161_v51  ;;  %8089 = vmatpush3.bf16.msra.mxu0 %v8088_v4  ;;  %v2341_v51 = vld [vmem:[%s12688_s1 + $0x2a8] sm:$0xff] }
 0x168   : > { %v1020_v44 = vadd.f32 %v6086_v63, %v9952_v26  ;;  %v6087_v14 = vpop.f32.mrb[42].mxu0  ;;  %2543 = vmatmul.mubr.f32.gmra.mrb[132].mxu0 %v2148_v39  ;;  %v2340_v26 = vld [vmem:[%s12688_s1 + $0x2a0] sm:$0xff]  ;;  %v2325_v39 = vld [vmem:[%s12688_s1 + $0x228] sm:$0xff] }
 0x169   : > { %v6088_v18 = vpop.f32.mrb[43].mxu0  ;;  %v6164_v20 = vpop.f32.mrb[42].mxu1  ;;  %v8090_v12 = vpack.c.bf16 %v2341_v51, %v2340_v26  ;;  %v8092_v4 = vpack.c.bf16 %v2325_v39, %v2324_v36  ;;  %v2172_v26 = vld [vmem:[%s8975_s30 + $0x4b0] sm:$0xff] }
 0x16a   : > { %v10129_v38 = vadd.f32 %v6163_v7, %v1020_v44  ;;  %v6089_v1 = vadd.f32 %v6088_v18, %v6087_v14  ;;  %v6165_v45 = vpop.f32.mrb[43].mxu1 }
 0x16b   : > { %v6166_v13 = vadd.f32 %v6165_v45, %v6164_v20  ;;  %v2160_v20 = vld [vmem:[%s8975_s30 + $0x420] sm:$0xff]  ;;  %8091 = vmatprep.subr.bf16.mxu0 %v8090_v12  ;;  %v2173_v45 = vld [vmem:[%s8975_s30 + $0x4b8] sm:$0xff]  ;;  %v2326_v12 = vld [vmem:[%s12688_s1 + $0x230] sm:$0xff] }
 0x16c   : > { %v1025_v31 = vadd.f32 %v6089_v1, %v9963_v46  ;;  %v6090_v47 = vpop.f32.mrb[44].mxu0  ;;  %v2161_v46 = vld [vmem:[%s8975_s30 + $0x428] sm:$0xff]  ;;  %8093 = vmatpush3.bf16.msra.mxu0 %v8092_v4 }
 0x16d   : > { %v6091_v42 = vpop.f32.mrb[45].mxu0  ;;  %v6167_v52 = vpop.f32.mrb[44].mxu1  ;;  %2547 = vmatprep.mubr.f32.mxu0 %v2161_v46 }
 0x16e   : > { %v10146_v34 = vadd.f32 %v6166_v13, %v1025_v31  ;;  %v6092_v63 = vadd.f32 %v6091_v42, %v6090_v47  ;;  %v6168_v15 = vpop.f32.mrb[45].mxu1  ;;  %2548 = vmatmul.mubr.f32.gmra.mrb[134].mxu0 %v2160_v20 }
 0x16f   : > { %v6169_v7 = vadd.f32 %v6168_v15, %v6167_v52  ;;  %2552 = vmatprep.mubr.f32.mxu0 %v2173_v45  ;;  %v2343_v52 = vld [vmem:[%s12688_s1 + $0x2b8] sm:$0xff]  ;;  %v2184_v15 = vld [vmem:[%s8975_s30 + $0x540] sm:$0xff] }
 0x170   : > { %v1030_v44 = vadd.f32 %v6092_v63, %v9975_v19  ;;  %v6093_v14 = vpop.f32.mrb[46].mxu0  ;;  %v2342_v19 = vld [vmem:[%s12688_s1 + $0x2b0] sm:$0xff]  ;;  %v2185_v63 = vld [vmem:[%s8975_s30 + $0x548] sm:$0xff] }
 0x171   : > { %v6094_v18 = vpop.f32.mrb[47].mxu0  ;;  %v6170_v1 = vpop.f32.mrb[46].mxu1  ;;  %v8094_v20 = vpack.c.bf16 %v2343_v52, %v2342_v19 }
 0x172   : > { %v10151_v51 = vadd.f32 %v6169_v7, %v1030_v44  ;;  %v6095_v13 = vadd.f32 %v6094_v18, %v6093_v14  ;;  %v6171_v31 = vpop.f32.mrb[47].mxu1  ;;  %2553 = vmatmul.mubr.f32.gmra.mrb[136].mxu0 %v2172_v26 }
 0x173   : > { %v6172_v47 = vadd.f32 %v6171_v31, %v6170_v1  ;;  %2557 = vmatprep.mubr.f32.mxu0 %v2185_v63  ;;  %8095 = vmatprep.subr.bf16.mxu0 %v8094_v20  ;;  %v2344_v31 = vld [vmem:[%s12688_s1 + $0x2c0] sm:$0xff]  ;;  %v2329_v63 = vld [vmem:[%s12688_s1 + $0x248] sm:$0xff] }
 0x174   : > { %v1035_v36 = vadd.f32 %v6095_v13, %v9992_v53  ;;  %v6096_v42 = vpop.f32.mrb[48].mxu0  ;;  %v2327_v53 = vld [vmem:[%s12688_s1 + $0x238] sm:$0xff] }
 0x175   : > { %v6097_v39 = vpop.f32.mrb[49].mxu0  ;;  %v6173_v46 = vpop.f32.mrb[48].mxu1  ;;  %v8096_v14 = vpack.c.bf16 %v2327_v53, %v2326_v12  ;;  %v2196_v12 = vld [vmem:[%s8975_s30 + $0x5d0] sm:$0xff]  ;;  %v2328_v53 = vld [vmem:[%s12688_s1 + $0x240] sm:$0xff] }
 0x176   : > { %v10168_v4 = vadd.f32 %v6172_v47, %v1035_v36  ;;  %v6098_v7 = vadd.f32 %v6097_v39, %v6096_v42  ;;  %v6174_v44 = vpop.f32.mrb[49].mxu1  ;;  %2558 = vmatmul.mubr.f32.gmra.mrb[138].mxu0 %v2184_v15  ;;  %v2345_v47 = vld [vmem:[%s12688_s1 + $0x2c8] sm:$0xff] }
 0x177   : > { %v6175_v18 = vadd.f32 %v6174_v44, %v6173_v46  ;;  %8097 = vmatpush3.bf16.msra.mxu0 %v8096_v14  ;;  %v8098_v52 = vpack.c.bf16 %v2345_v47, %v2344_v31  ;;  %v2209_v15 = vld [vmem:[%s8975_s30 + $0x668] sm:$0xff]  ;;  %v8100_v14 = vpack.c.bf16 %v2329_v63, %v2328_v53  ;;  %v2347_v31 = vld [vmem:[%s12688_s1 + $0x2d8] sm:$0xff] }
 0x178   : > { %v1040_v1 = vadd.f32 %v6098_v7, %v10001_v3  ;;  %v6099_v45 = vpop.f32.mrb[50].mxu0  ;;  %v2197_v3 = vld [vmem:[%s8975_s30 + $0x5d8] sm:$0xff] }
 0x179   : > { %v6100_v26 = vpop.f32.mrb[51].mxu0  ;;  %v6176_v13 = vpop.f32.mrb[50].mxu1  ;;  %2562 = vmatprep.mubr.f32.mxu0 %v2197_v3  ;;  %8099 = vmatprep.subr.bf16.mxu0 %v8098_v52  ;;  %v2221_v63 = vld [vmem:[%s8975_s30 + $0x6f8] sm:$0xff] }
 0x17a   : > { %v10177_v36 = vadd.f32 %v6175_v18, %v1040_v1  ;;  %v6101_v42 = vadd.f32 %v6100_v26, %v6099_v45  ;;  %v6177_v19 = vpop.f32.mrb[51].mxu1  ;;  %2563 = vmatmul.mubr.f32.gmra.mrb[140].mxu0 %v2196_v12  ;;  %v2208_v18 = vld [vmem:[%s8975_s30 + $0x660] sm:$0xff]  ;;  %v2330_v12 = vld [vmem:[%s12688_s1 + $0x250] sm:$0xff] }
 0x17b   : > { %v6178_v39 = vadd.f32 %v6177_v19, %v6176_v13  ;;  %2567 = vmatprep.mubr.f32.mxu0 %v2209_v15  ;;  %8101 = vmatpush3.bf16.msra.mxu0 %v8100_v14  ;;  %v2346_v13 = vld [vmem:[%s12688_s1 + $0x2d0] sm:$0xff]  ;;  %v2349_v14 = vld [vmem:[%s12688_s1 + $0x2e8] sm:$0xff] }
 0x17c   : > { %v1045_v46 = vadd.f32 %v6101_v42, %v10012_v32  ;;  %v6102_v20 = vpop.f32.mrb[52].mxu0  ;;  %v8102_v19 = vpack.c.bf16 %v2347_v31, %v2346_v13  ;;  %v2220_v15 = vld [vmem:[%s8975_s30 + $0x6f0] sm:$0xff]  ;;  %v2333_v13 = vld [vmem:[%s12688_s1 + $0x268] sm:$0xff] }
 0x17d   : > { %v6103_v7 = vpop.f32.mrb[53].mxu0  ;;  %v6179_v44 = vpop.f32.mrb[52].mxu1  ;;  %v2233_v31 = vld [vmem:[%s8975_s30 + $0x788] sm:$0xff] }
 0x17e   : > { %v10190_v1 = vadd.f32 %v6178_v39, %v1045_v46  ;;  %v6104_v32 = vadd.f32 %v6103_v7, %v6102_v20  ;;  %v6180_v45 = vpop.f32.mrb[53].mxu1  ;;  %2568 = vmatmul.mubr.f32.gmra.mrb[142].mxu0 %v2208_v18  ;;  %v2331_v39 = vld [vmem:[%s12688_s1 + $0x258] sm:$0xff]  ;;  %8103 = vmatprep.subr.bf16.mxu0 %v8102_v19 }
 0x17f   : > { %v6181_v26 = vadd.f32 %v6180_v45, %v6179_v44  ;;  %2572 = vmatprep.mubr.f32.mxu0 %v2221_v63  ;;  %v2348_v44 = vld [vmem:[%s12688_s1 + $0x2e0] sm:$0xff] }
 0x180   : > { %v1050_v47 = vadd.f32 %v6104_v32, %v10024_v23  ;;  %v6105_v42 = vpop.f32.mrb[54].mxu0  ;;  %v8104_v23 = vpack.c.bf16 %v2331_v39, %v2330_v12  ;;  %v8106_v45 = vpack.c.bf16 %v2349_v14, %v2348_v44  ;;  %v2232_v12 = vld [vmem:[%s8975_s30 + $0x780] sm:$0xff] }
 0x181   : > { %v6106_v52 = vpop.f32.mrb[55].mxu0  ;;  %v6182_v3 = vpop.f32.mrb[54].mxu1 }
 0x182   : > { %v10205_v46 = vadd.f32 %v6181_v26, %v1050_v47  ;;  %v6107_v20 = vadd.f32 %v6106_v52, %v6105_v42  ;;  %v6183_v53 = vpop.f32.mrb[55].mxu1  ;;  %8105 = vmatpush3.bf16.msra.mxu0 %v8104_v23  ;;  %v2332_v26 = vld [vmem:[%s12688_s1 + $0x260] sm:$0xff] }
 0x183   : > { %v6184_v7 = vadd.f32 %v6183_v53, %v6182_v3  ;;  %2573 = vmatmul.mubr.f32.gmra.mrb[144].mxu0 %v2220_v15  ;;  %v8108_v19 = vpack.c.bf16 %v2333_v13, %v2332_v26  ;;  %8107 = vmatprep.subr.bf16.mxu0 %v8106_v45  ;;  %v2351_v53 = vld [vmem:[%s12688_s1 + $0x2f8] sm:$0xff]  ;;  %v2244_v13 = vld [vmem:[%s8975_s30 + $0x810] sm:$0x7] }
 0x184   : > { %v1055_v18 = vadd.f32 %v6107_v20, %v10041_v49  ;;  %v6108_v32 = vpop.f32.mrb[56].mxu0  ;;  %2577 = vmatprep.mubr.f32.mxu0 %v2233_v31  ;;  %v2350_v20 = vld [vmem:[%s12688_s1 + $0x2f0] sm:$0xff]  ;;  %v2245_v45 = vld [vmem:[%s8975_s30 + $0x818] sm:$0x7] }
 0x185   : > { %v6109_v47 = vpop.f32.mrb[57].mxu0  ;;  %v6185_v42 = vpop.f32.mrb[56].mxu1  ;;  %v8110_v15 = vpack.c.bf16 %v2351_v53, %v2350_v20  ;;  %v2335_v31 = vld [vmem:[%s12688_s1 + $0x278] sm:$0xff] }
 0x186   : > { %v10223_v52 = vadd.f32 %v6184_v7, %v1055_v18  ;;  %v6110_v49 = vadd.f32 %v6109_v47, %v6108_v32  ;;  %v6186_v3 = vpop.f32.mrb[57].mxu1  ;;  %8109 = vmatpush3.bf16.msra.mxu0 %v8108_v19 }
 0x187   : > { %v6187_v39 = vadd.f32 %v6186_v3, %v6185_v42  ;;  %2578 = vmatmul.mubr.f32.gmra.mrb[146].mxu0 %v2232_v12  ;;  %8111 = vmatprep.subr.bf16.mxu0 %v8110_v15 }
 0x188   : > { %v1060_v23 = vadd.f32 %v6110_v49, %v10058_v2  ;;  %v6111_v63 = vpop.f32.mrb[58].mxu0  ;;  %2582 = vmatprep.mubr.f32.mxu0 %v2245_v45  ;;  %v2334_v2 = vld [vmem:[%s12688_s1 + $0x270] sm:$0xff]  ;;  %v2081_v49 = vld [vmem:[%s8975_s30 + $0x58] sm:$0xff]  ;;  %v2401_v45 = vld [vmem:[%s12688_s1 + $0x488] sm:$0xff] }
 0x189   : > { %v6112_v7 = vpop.f32.mrb[59].mxu0  ;;  %v6188_v44 = vpop.f32.mrb[58].mxu1  ;;  %v8112_v19 = vpack.c.bf16 %v2335_v31, %v2334_v2 }
 0x18a   : > { %v10233_v14 = vadd.f32 %v6187_v39, %v1060_v23  ;;  %v6113_v18 = vadd.f32 %v6112_v7, %v6111_v63  ;;  %v6189_v32 = vpop.f32.mrb[59].mxu1  ;;  %v2080_v23 = vld [vmem:[%s8975_s30 + $0x50] sm:$0xff] }
 0x18b   : > { %v6190_v26 = vadd.f32 %v6189_v32, %v6188_v44  ;;  %2583 = vmatmul.mubr.f32.gmra.mrb[148].mxu0 %v2244_v13  ;;  %v2400_v32 = vld [vmem:[%s12688_s1 + $0x480] sm:$0xff] }
 0x18c   : > { %v1065_v47 = vadd.f32 %v6113_v18, %v10061_v30  ;;  %v6223_v42 = vpop.f32.mrb[60].mxu0  ;;  %8113 = vmatpush3.bf16.msra.mxu0 %v8112_v19  ;;  %2792 = vmatprep.mubr.f32.mxu0 %v2081_v49  ;;  %v2093_v30 = vld [vmem:[%s8975_s30 + $0xe8] sm:$0xff]  ;;  %v8146_v31 = vpack.c.bf16 %v2401_v45, %v2400_v32  ;;  %v2105_v49 = vld [vmem:[%s8975_s30 + $0x178] sm:$0xff] }
 0x18d   : > { %v6224_v3 = vpop.f32.mrb[61].mxu0  ;;  %v6300_v12 = vpop.f32.mrb[60].mxu1  ;;  %v2385_v19 = vld [vmem:[%s12688_s1 + $0x408] sm:$0xff] }
 0x18e   : > { %v10245_v39 = vadd.f32 %v6190_v26, %v1065_v47  ;;  %v6225_v20 = vadd.f32 %v6224_v3, %v6223_v42  ;;  %v6301_v53 = vpop.f32.mrb[61].mxu1  ;;  %v2384_v42 = vld [vmem:[%s12688_s1 + $0x400] sm:$0xff]  ;;  %8147 = vmatprep.subr.bf16.mxu0 %v8146_v31 }
 0x18f   : > { %v6302_v63 = vadd.f32 %v6301_v53, %v6300_v12  ;;  %2793 = vmatmul.mubr.f32.vlgmr.msra.gmra.mrb[150].mxu0 %v2080_v23 }
 0x190   : > { %v1275_v15 = vadd.f32 %v6225_v20, %v10067_v24  ;;  %v6226_v7 = vpop.f32.mrb[62].mxu0  ;;  %2797 = vmatprep.mubr.f32.mxu0 %v2093_v30  ;;  %v2092_v24 = vld [vmem:[%s8975_s30 + $0xe0] sm:$0xff]  ;;  %v8148_v20 = vpack.c.bf16 %v2385_v19, %v2384_v42  ;;  %v2104_v30 = vld [vmem:[%s8975_s30 + $0x170] sm:$0xff] }
 0x191   : > { %v6227_v44 = vpop.f32.mrb[63].mxu0  ;;  %v6303_v18 = vpop.f32.mrb[62].mxu1 }
 0x192   : > { %v10256_v26 = vadd.f32 %v6302_v63, %v1275_v15  ;;  %v6228_v13 = vadd.f32 %v6227_v44, %v6226_v7  ;;  %v6304_v2 = vpop.f32.mrb[63].mxu1  ;;  %8149 = vmatpush3.bf16.msra.mxu0 %v8148_v20  ;;  %v2129_v20 = vld [vmem:[%s8975_s30 + $0x298] sm:$0xff] }
 0x193   : > { %v6305_v47 = vadd.f32 %v6304_v2, %v6303_v18  ;;  %2798 = vmatmul.mubr.f32.gmra.mrb[152].mxu0 %v2092_v24  ;;  %v2402_v2 = vld [vmem:[%s12688_s1 + $0x490] sm:$0xff]  ;;  %v2403_v24 = vld [vmem:[%s12688_s1 + $0x498] sm:$0xff] }
 0x194   : > { %v1280_v3 = vadd.f32 %v6228_v13, %v10076_v48  ;;  %v6229_v12 = vpop.f32.mrb[64].mxu0  ;;  %2802 = vmatprep.mubr.f32.mxu0 %v2105_v49  ;;  %v2117_v48 = vld [vmem:[%s8975_s30 + $0x208] sm:$0xff]  ;;  %v8150_v19 = vpack.c.bf16 %v2403_v24, %v2402_v2  ;;  %v2404_v24 = vld [vmem:[%s12688_s1 + $0x4a0] sm:$0xff] }
 0x195   : > { %v6230_v53 = vpop.f32.mrb[65].mxu0  ;;  %v6306_v23 = vpop.f32.mrb[64].mxu1 }
 0x196   : > { %v10267_v63 = vadd.f32 %v6305_v47, %v1280_v3  ;;  %v6231_v15 = vadd.f32 %v6230_v53, %v6229_v12  ;;  %v6307_v7 = vpop.f32.mrb[65].mxu1  ;;  %v2386_v3 = vld [vmem:[%s12688_s1 + $0x410] sm:$0xff]  ;;  %v2387_v12 = vld [vmem:[%s12688_s1 + $0x418] sm:$0xff]  ;;  %8151 = vmatprep.subr.bf16.mxu0 %v8150_v19 }
 0x197   : > { %v6308_v44 = vadd.f32 %v6307_v7, %v6306_v23  ;;  %2803 = vmatmul.mubr.f32.gmra.mrb[154].mxu0 %v2104_v30 }
 0x198   : > { %v1285_v18 = vadd.f32 %v6231_v15, %v10096_v55  ;;  %v6232_v32 = vpop.f32.mrb[66].mxu0  ;;  %2807 = vmatprep.mubr.f32.mxu0 %v2117_v48  ;;  %v2116_v55 = vld [vmem:[%s8975_s30 + $0x200] sm:$0xff]  ;;  %v8152_v15 = vpack.c.bf16 %v2387_v12, %v2386_v3  ;;  %v2128_v48 = vld [vmem:[%s8975_s30 + $0x290] sm:$0xff] }
 0x199   : > { %v6233_v45 = vpop.f32.mrb[67].mxu0  ;;  %v6309_v13 = vpop.f32.mrb[66].mxu1  ;;  %v2140_v12 = vld [vmem:[%s8975_s30 + $0x320] sm:$0xff] }
 0x19a   : > { %v10278_v31 = vadd.f32 %v6308_v44, %v1285_v18  ;;  %v6234_v47 = vadd.f32 %v6233_v45, %v6232_v32  ;;  %v6310_v42 = vpop.f32.mrb[67].mxu1  ;;  %8153 = vmatpush3.bf16.msra.mxu0 %v8152_v15 }
 0x19b   : > { %v6311_v49 = vadd.f32 %v6310_v42, %v6309_v13  ;;  %2808 = vmatmul.mubr.f32.gmra.mrb[156].mxu0 %v2116_v55  ;;  %v2405_v55 = vld [vmem:[%s12688_s1 + $0x4a8] sm:$0xff] }
 0x19c   : > { %v1290_v53 = vadd.f32 %v6234_v47, %v10107_v35  ;;  %v6235_v23 = vpop.f32.mrb[68].mxu0  ;;  %2812 = vmatprep.mubr.f32.mxu0 %v2129_v20  ;;  %v2141_v35 = vld [vmem:[%s8975_s30 + $0x328] sm:$0xff]  ;;  %v2388_v20 = vld [vmem:[%s12688_s1 + $0x420] sm:$0xff] }
 0x19d   : > { %v6236_v7 = vpop.f32.mrb[69].mxu0  ;;  %v6312_v30 = vpop.f32.mrb[68].mxu1 }
 0x19e   : > { %v10289_v44 = vadd.f32 %v6311_v49, %v1290_v53  ;;  %v6237_v18 = vadd.f32 %v6236_v7, %v6235_v23  ;;  %v6313_v32 = vpop.f32.mrb[69].mxu1  ;;  %v2389_v53 = vld [vmem:[%s12688_s1 + $0x428] sm:$0xff]  ;;  %v2153_v7 = vld [vmem:[%s8975_s30 + $0x3b8] sm:$0xff] }
 0x19f   : > { %v6314_v45 = vadd.f32 %v6313_v32, %v6312_v30  ;;  %2813 = vmatmul.mubr.f32.gmra.mrb[158].mxu0 %v2128_v48  ;;  %v8156_v15 = vpack.c.bf16 %v2389_v53, %v2388_v20  ;;  %v2390_v20 = vld [vmem:[%s12688_s1 + $0x430] sm:$0xff] }
 0x1a0   : > { %v1295_v13 = vadd.f32 %v6237_v18, %v10124_v5  ;;  %v6238_v2 = vpop.f32.mrb[70].mxu0  ;;  %2817 = vmatprep.mubr.f32.mxu0 %v2141_v35  ;;  %v8154_v5 = vpack.c.bf16 %v2405_v55, %v2404_v24  ;;  %v2152_v35 = vld [vmem:[%s8975_s30 + $0x3b0] sm:$0xff] }
 0x1a1   : > { %v6239_v47 = vpop.f32.mrb[71].mxu0  ;;  %v6315_v42 = vpop.f32.mrb[70].mxu1 }
 0x1a2   : > { %v10300_v19 = vadd.f32 %v6314_v45, %v1295_v13  ;;  %v6240_v49 = vadd.f32 %v6239_v47, %v6238_v2  ;;  %v6316_v3 = vpop.f32.mrb[71].mxu1  ;;  %8155 = vmatprep.subr.bf16.mxu0 %v8154_v5  ;;  %v2165_v47 = vld [vmem:[%s8975_s30 + $0x448] sm:$0xff] }
 0x1a3   : > { %v6317_v23 = vadd.f32 %v6316_v3, %v6315_v42  ;;  %2818 = vmatmul.mubr.f32.gmra.mrb[160].mxu0 %v2140_v12 }
 0x1a4   : > { %v1300_v30 = vadd.f32 %v6240_v49, %v10129_v38  ;;  %v6241_v18 = vpop.f32.mrb[72].mxu0  ;;  %8157 = vmatpush3.bf16.msra.mxu0 %v8156_v15  ;;  %2822 = vmatprep.mubr.f32.mxu0 %v2153_v7  ;;  %v2406_v38 = vld [vmem:[%s12688_s1 + $0x4b0] sm:$0xff]  ;;  %v2407_v49 = vld [vmem:[%s12688_s1 + $0x4b8] sm:$0xff]  ;;  %v2164_v7 = vld [vmem:[%s8975_s30 + $0x440] sm:$0xff] }
 0x1a5   : > { %v6242_v32 = vpop.f32.mrb[73].mxu0  ;;  %v6318_v48 = vpop.f32.mrb[72].mxu1  ;;  %v8158_v12 = vpack.c.bf16 %v2407_v49, %v2406_v38  ;;  %v2408_v49 = vld [vmem:[%s12688_s1 + $0x4c0] sm:$0xff] }
 0x1a6   : > { %v10311_v45 = vadd.f32 %v6317_v23, %v1300_v30  ;;  %v6243_v13 = vadd.f32 %v6242_v32, %v6241_v18  ;;  %v6319_v2 = vpop.f32.mrb[73].mxu1  ;;  %v2177_v32 = vld [vmem:[%s8975_s30 + $0x4d8] sm:$0xff] }
 0x1a7   : > { %v6320_v24 = vadd.f32 %v6319_v2, %v6318_v48  ;;  %2823 = vmatmul.mubr.f32.gmra.mrb[162].mxu0 %v2152_v35  ;;  %8159 = vmatprep.subr.bf16.mxu0 %v8158_v12  ;;  %v2189_v12 = vld [vmem:[%s8975_s30 + $0x568] sm:$0xff] }
 0x1a8   : > { %v1305_v42 = vadd.f32 %v6243_v13, %v10146_v34  ;;  %v6244_v55 = vpop.f32.mrb[74].mxu0  ;;  %v2391_v34 = vld [vmem:[%s12688_s1 + $0x438] sm:$0xff]  ;;  %2827 = vmatprep.mubr.f32.mxu0 %v2165_v47  ;;  %v2176_v47 = vld [vmem:[%s8975_s30 + $0x4d0] sm:$0xff] }
 0x1a9   : > { %v6245_v3 = vpop.f32.mrb[75].mxu0  ;;  %v6321_v5 = vpop.f32.mrb[74].mxu1  ;;  %v8160_v30 = vpack.c.bf16 %v2391_v34, %v2390_v20  ;;  %v2392_v20 = vld [vmem:[%s12688_s1 + $0x440] sm:$0xff] }
 0x1aa   : > { %v10328_v53 = vadd.f32 %v6320_v24, %v1305_v42  ;;  %v6246_v23 = vadd.f32 %v6245_v3, %v6244_v55  ;;  %v6322_v15 = vpop.f32.mrb[75].mxu1 }
 0x1ab   : > { %v6323_v18 = vadd.f32 %v6322_v15, %v6321_v5  ;;  %8161 = vmatpush3.bf16.msra.mxu0 %v8160_v30  ;;  %v2409_v5 = vld [vmem:[%s12688_s1 + $0x4c8] sm:$0xff] }
 0x1ac   : > { %v1310_v48 = vadd.f32 %v6246_v23, %v10151_v51  ;;  %v6247_v13 = vpop.f32.mrb[76].mxu0  ;;  %2828 = vmatmul.mubr.f32.gmra.mrb[164].mxu0 %v2164_v7  ;;  %v8162_v15 = vpack.c.bf16 %v2409_v5, %v2408_v49  ;;  %v2393_v7 = vld [vmem:[%s12688_s1 + $0x448] sm:$0xff] }
 0x1ad   : > { %v6248_v2 = vpop.f32.mrb[77].mxu0  ;;  %v6324_v35 = vpop.f32.mrb[76].mxu1  ;;  %2832 = vmatprep.mubr.f32.mxu0 %v2177_v32  ;;  %v8164_v32 = vpack.c.bf16 %v2393_v7, %v2392_v20  ;;  %v2213_v20 = vld [vmem:[%s8975_s30 + $0x688] sm:$0xff]  ;;  %v2394_v7 = vld [vmem:[%s12688_s1 + $0x450] sm:$0xff] }
 0x1ae   : > { %v6249_v38 = vadd.f32 %v6248_v2, %v6247_v13  ;;  %v6325_v24 = vpop.f32.mrb[77].mxu1  ;;  %v10333_v42 = vadd.f32 %v6323_v18, %v1310_v48  ;;  %v2188_v48 = vld [vmem:[%s8975_s30 + $0x560] sm:$0xff]  ;;  %8163 = vmatprep.subr.bf16.mxu0 %v8162_v15  ;;  %v2201_v2 = vld [vmem:[%s8975_s30 + $0x5f8] sm:$0xff] }
 0x1af   : > { %v6326_v55 = vadd.f32 %v6325_v24, %v6324_v35  ;;  %8165 = vmatpush3.bf16.msra.mxu0 %v8164_v32 }
 0x1b0   : > { %v1315_v51 = vadd.f32 %v6249_v38, %v10168_v4  ;;  %v6250_v3 = vpop.f32.mrb[78].mxu0  ;;  %2833 = vmatmul.mubr.f32.gmra.mrb[166].mxu0 %v2176_v47 }
 0x1b1   : > { %v6251_v34 = vpop.f32.mrb[79].mxu0  ;;  %v6327_v23 = vpop.f32.mrb[78].mxu1  ;;  %2837 = vmatprep.mubr.f32.mxu0 %v2189_v12  ;;  %v2410_v12 = vld [vmem:[%s12688_s1 + $0x4d0] sm:$0xff] }
 0x1b2   : > { %v6252_v4 = vadd.f32 %v6251_v34, %v6250_v3  ;;  %v6328_v30 = vpop.f32.mrb[79].mxu1  ;;  %v10350_v18 = vadd.f32 %v6326_v55, %v1315_v51  ;;  %v2200_v55 = vld [vmem:[%s8975_s30 + $0x5f0] sm:$0xff] }
 0x1b3   : > { %v6329_v13 = vadd.f32 %v6328_v30, %v6327_v23 }
 0x1b4   : > { %v1320_v35 = vadd.f32 %v6252_v4, %v10177_v36  ;;  %v6253_v38 = vpop.f32.mrb[80].mxu0  ;;  %2838 = vmatmul.mubr.f32.gmra.mrb[168].mxu0 %v2188_v48  ;;  %v2411_v36 = vld [vmem:[%s12688_s1 + $0x4d8] sm:$0xff] }
 0x1b5   : > { %v6254_v24 = vpop.f32.mrb[81].mxu0  ;;  %v6330_v47 = vpop.f32.mrb[80].mxu1  ;;  %2842 = vmatprep.mubr.f32.mxu0 %v2201_v2  ;;  %v8166_v15 = vpack.c.bf16 %v2411_v36, %v2410_v12  ;;  %v2395_v4 = vld [vmem:[%s12688_s1 + $0x458] sm:$0xff] }
 0x1b6   : > { %v6255_v49 = vadd.f32 %v6254_v24, %v6253_v38  ;;  %v6331_v3 = vpop.f32.mrb[81].mxu1  ;;  %v10355_v5 = vadd.f32 %v6329_v13, %v1320_v35  ;;  %v8168_v48 = vpack.c.bf16 %v2395_v4, %v2394_v7  ;;  %v2225_v24 = vld [vmem:[%s8975_s30 + $0x718] sm:$0xff] }
 0x1b7   : > { %v6332_v51 = vadd.f32 %v6331_v3, %v6330_v47  ;;  %8167 = vmatprep.subr.bf16.mxu0 %v8166_v15  ;;  %v2396_v15 = vld [vmem:[%s12688_s1 + $0x460] sm:$0xff] }
 0x1b8   : > { %v1325_v34 = vadd.f32 %v6255_v49, %v10190_v1  ;;  %v6256_v23 = vpop.f32.mrb[82].mxu0  ;;  %2843 = vmatmul.mubr.f32.gmra.mrb[170].mxu0 %v2200_v55  ;;  %v2212_v1 = vld [vmem:[%s8975_s30 + $0x680] sm:$0xff] }
 0x1b9   : > { %v6257_v30 = vpop.f32.mrb[83].mxu0  ;;  %v6333_v32 = vpop.f32.mrb[82].mxu1  ;;  %2847 = vmatprep.mubr.f32.mxu0 %v2213_v20  ;;  %8169 = vmatpush3.bf16.msra.mxu0 %v8168_v48  ;;  %v2412_v20 = vld [vmem:[%s12688_s1 + $0x4e0] sm:$0xff]  ;;  %v2237_v48 = vld [vmem:[%s8975_s30 + $0x7a8] sm:$0xff] }
 0x1ba   : > { %v6258_v13 = vadd.f32 %v6257_v30, %v6256_v23  ;;  %v6334_v2 = vpop.f32.mrb[83].mxu1  ;;  %v10372_v35 = vadd.f32 %v6332_v51, %v1325_v34  ;;  %v2224_v51 = vld [vmem:[%s8975_s30 + $0x710] sm:$0xff] }
 0x1bb   : > { %v6335_v38 = vadd.f32 %v6334_v2, %v6333_v32  ;;  %v2397_v32 = vld [vmem:[%s12688_s1 + $0x468] sm:$0xff] }
 0x1bc   : > { %v1330_v47 = vadd.f32 %v6258_v13, %v10205_v46  ;;  %v6259_v49 = vpop.f32.mrb[84].mxu0  ;;  %2848 = vmatmul.mubr.f32.gmra.mrb[172].mxu0 %v2212_v1  ;;  %v2413_v46 = vld [vmem:[%s12688_s1 + $0x4e8] sm:$0xff]  ;;  %v8172_v1 = vpack.c.bf16 %v2397_v32, %v2396_v15  ;;  %v2399_v32 = vld [vmem:[%s12688_s1 + $0x478] sm:$0xff] }
 0x1bd   : > { %v6260_v3 = vpop.f32.mrb[85].mxu0  ;;  %v6336_v12 = vpop.f32.mrb[84].mxu1  ;;  %2852 = vmatprep.mubr.f32.mxu0 %v2225_v24  ;;  %v8170_v30 = vpack.c.bf16 %v2413_v46, %v2412_v20  ;;  %v2415_v20 = vld [vmem:[%s12688_s1 + $0x4f8] sm:$0xff] }
 0x1be   : > { %v6261_v55 = vadd.f32 %v6260_v3, %v6259_v49  ;;  %v6337_v36 = vpop.f32.mrb[85].mxu1  ;;  %v10377_v23 = vadd.f32 %v6335_v38, %v1330_v47  ;;  %v2236_v49 = vld [vmem:[%s8975_s30 + $0x7a0] sm:$0xff]  ;;  %v2249_v3 = vld [vmem:[%s8975_s30 + $0x838] sm:$0x7] }
 0x1bf   : > { %v6338_v34 = vadd.f32 %v6337_v36, %v6336_v12  ;;  %8171 = vmatprep.subr.bf16.mxu0 %v8170_v30  ;;  %v2398_v30 = vld [vmem:[%s12688_s1 + $0x470] sm:$0xff] }
 0x1c0   : > { %v1335_v7 = vadd.f32 %v6261_v55, %v10223_v52  ;;  %v6262_v4 = vpop.f32.mrb[86].mxu0  ;;  %2853 = vmatmul.mubr.f32.gmra.mrb[174].mxu0 %v2224_v51 }
 0x1c1   : > { %v6263_v13 = vpop.f32.mrb[87].mxu0  ;;  %v6339_v2 = vpop.f32.mrb[86].mxu1  ;;  %2857 = vmatprep.mubr.f32.mxu0 %v2237_v48  ;;  %8173 = vmatpush3.bf16.msra.mxu0 %v8172_v1 }
 0x1c2   : > { %v6264_v38 = vadd.f32 %v6263_v13, %v6262_v4  ;;  %v6340_v24 = vpop.f32.mrb[87].mxu1  ;;  %v10394_v47 = vadd.f32 %v6338_v34, %v1335_v7  ;;  %v2414_v34 = vld [vmem:[%s12688_s1 + $0x4f0] sm:$0xff]  ;;  %v8176_v13 = vpack.c.bf16 %v2399_v32, %v2398_v30 }
 0x1c3   : > { %v6341_v52 = vadd.f32 %v6340_v24, %v6339_v2  ;;  %v2248_v4 = vld [vmem:[%s8975_s30 + $0x830] sm:$0x7]  ;;  %v2085_v2 = vld [vmem:[%s8975_s30 + $0x78] sm:$0xff] }
 0x1c4   : > { %v1340_v12 = vadd.f32 %v6264_v38, %v10233_v14  ;;  %v6265_v55 = vpop.f32.mrb[88].mxu0  ;;  %2858 = vmatmul.mubr.f32.gmra.mrb[176].mxu0 %v2236_v49  ;;  %v8174_v14 = vpack.c.bf16 %v2415_v20, %v2414_v34 }
 0x1c5   : > { %v6266_v36 = vpop.f32.mrb[89].mxu0  ;;  %v6342_v51 = vpop.f32.mrb[88].mxu1  ;;  %2862 = vmatprep.mubr.f32.mxu0 %v2249_v3  ;;  %v2084_v3 = vld [vmem:[%s8975_s30 + $0x70] sm:$0xff] }
 0x1c6   : > { %v6267_v46 = vadd.f32 %v6266_v36, %v6265_v55  ;;  %v6343_v15 = vpop.f32.mrb[89].mxu1  ;;  %v10407_v7 = vadd.f32 %v6341_v52, %v1340_v12  ;;  %8175 = vmatprep.subr.bf16.mxu0 %v8174_v14  ;;  %v10422_v12 = vstv %s10397_s12 }
 0x1c7   : > { %v6344_v48 = vadd.f32 %v6343_v15, %v6342_v51  ;;  %8177 = vmatpush3.bf16.msra.mxu0 %v8176_v13  ;;  %12832 = vst [vmem:[#allocation66_spill] sm:$0xff] %v10422_v12  ;;  %v2109_v15 = vld [vmem:[%s8975_s30 + $0x198] sm:$0xff] }
 0x1c8   : > { %v1345_v1 = vadd.f32 %v6267_v46, %v10245_v39  ;;  %v6377_v38 = vpop.f32.mrb[90].mxu0  ;;  %2863 = vmatmul.mubr.f32.gmra.mrb[178].mxu0 %v2248_v4  ;;  %8211 = vmatprep.subr.bf16.mxu0 %v9644_v61  ;;  %v2097_v39 = vld [vmem:[%s8975_s30 + $0x108] sm:$0xff]  ;;  %v2096_v46 = vld [vmem:[%s8975_s30 + $0x100] sm:$0xff] }
 0x1c9   : > { %v6378_v24 = vpop.f32.mrb[91].mxu0  ;;  %3072 = vmatprep.mubr.f32.mxu0 %v2085_v2 }
 0x1ca   : > { %v6379_v49 = vadd.f32 %v6378_v24, %v6377_v38  ;;  %v10418_v52 = vadd.f32 %v6344_v48, %v1345_v1  ;;  %v2108_v48 = vld [vmem:[%s8975_s30 + $0x190] sm:$0xff]  ;;  %v2121_v1 = vld [vmem:[%s8975_s30 + $0x228] sm:$0xff]  ;;  %v2288_v38 = vld [vmem:[%s12688_s1 + $0x100] sm:$0xff] }
 0x1cb   : > { %v2289_v24 = vld [vmem:[%s12688_s1 + $0x108] sm:$0xff] }
 0x1cc   : > { %v1555_v55 = vadd.f32 %v6379_v49, %v10256_v26  ;;  %v6380_v36 = vpop.f32.mrb[92].mxu0  ;;  %3073 = vmatmul.mubr.f32.vlgmr.msra.gmra.mrb[180].mxu0 %v2084_v3 }
 0x1cd   : > { %v6381_v51 = vpop.f32.mrb[93].mxu0  ;;  %3077 = vmatprep.mubr.f32.mxu0 %v2097_v39  ;;  %8213 = vmatpush3.bf16.msra.mxu0 %v9691_v10  ;;  %v2133_v39 = vld [vmem:[%s8975_s30 + $0x2b8] sm:$0xff] }
 0x1ce   : > { %v1644_v34 = vadd.f32 %v10422_v12, %v1555_v55  ;;  %v6382_v20 = vadd.f32 %v6381_v51, %v6380_v36  ;;  %8215 = vmatprep.subr.bf16.mxu0 %v9696_v28  ;;  %v2306_v55 = vld [vmem:[%s12688_s1 + $0x190] sm:$0xff]  ;;  %v2120_v36 = vld [vmem:[%s8975_s30 + $0x220] sm:$0xff]  ;;  %v2219_v10 = vld [vmem:[%s8975_s30 + $0x6b8] sm:$0xff] }
 0x1d0   : > { %8522 = vtanh.f32 %v1644_v34  ;;  %v1560_v4 = vadd.f32 %v6382_v20, %v10267_v63  ;;  %v6383_v26 = vpop.f32.mrb[94].mxu0  ;;  %3078 = vmatmul.mubr.f32.gmra.mrb[182].mxu0 %v2096_v46  ;;  %v8052_v20 = vpack.c.bf16 %v2289_v24, %v2288_v38  ;;  %v2145_v24 = vld [vmem:[%s8975_s30 + $0x348] sm:$0xff] }
 0x1d1   : > { %v6384_v14 = vpop.f32.mrb[95].mxu0  ;;  %3082 = vmatprep.mubr.f32.mxu0 %v2109_v15  ;;  %8217 = vmatpush3.bf16.msra.mxu0 %v9714_v0 }
 0x1d2   : > { %v1645_v30 = vadd.f32 %v10422_v12, %v1560_v4  ;;  %v6385_v32 = vadd.f32 %v6384_v14, %v6383_v26  ;;  %8219 = vmatprep.subr.bf16.mxu0 %v9718_v6  ;;  %v2290_v4 = vld [vmem:[%s12688_s1 + $0x110] sm:$0xff]  ;;  %v2291_v26 = vld [vmem:[%s12688_s1 + $0x118] sm:$0xff] }
 0x1d3   : > { %v8056_v38 = vpack.c.bf16 %v2291_v26, %v2290_v4 }
 0x1d4   : > { %8524 = vtanh.f32 %v1645_v30  ;;  %v1565_v13 = vadd.f32 %v6385_v32, %v10278_v31  ;;  %v6386_v2 = vpop.f32.mrb[96].mxu0  ;;  %3083 = vmatmul.mubr.f32.gmra.mrb[184].mxu0 %v2108_v48  ;;  %v2307_v31 = vld [vmem:[%s12688_s1 + $0x198] sm:$0xff]  ;;  %v2309_v48 = vld [vmem:[%s12688_s1 + $0x1a8] sm:$0xff] }
 0x1d5   : > { %v6387_v63 = vpop.f32.mrb[97].mxu0  ;;  %3087 = vmatprep.mubr.f32.mxu0 %v2121_v1  ;;  %8221 = vmatpush3.bf16.msra.mxu0 %v9736_v50  ;;  %v8054_v15 = vpack.c.bf16 %v2307_v31, %v2306_v55  ;;  %v2292_v55 = vld [vmem:[%s12688_s1 + $0x120] sm:$0xff] }
 0x1d6   : > { %v1646_v49 = vadd.f32 %v10422_v12, %v1565_v13  ;;  %v6388_v3 = vadd.f32 %v6387_v63, %v6386_v2  ;;  %8223 = vmatprep.subr.bf16.mxu0 %v9740_v29  ;;  %v2132_v13 = vld [vmem:[%s8975_s30 + $0x2b0] sm:$0xff]  ;;  %v12833_v63 = vmov 0.0  }
 0x1d8   : > { %8526 = vtanh.f32 %v1646_v49  ;;  %v1570_v51 = vadd.f32 %v6388_v3, %v10289_v44  ;;  %v6389_v34 = vpop.f32.mrb[98].mxu0  ;;  %3088 = vmatmul.mubr.f32.gmra.mrb[186].mxu0 %v2120_v36  ;;  %v2308_v44 = vld [vmem:[%s12688_s1 + $0x1a0] sm:$0xff] }
 0x1d9   : > { %v6390_v46 = vpop.f32.mrb[99].mxu0  ;;  %3092 = vmatprep.mubr.f32.mxu0 %v2133_v39  ;;  %8225 = vmatpush3.bf16.msra.mxu0 %v9758_v33  ;;  %v8058_v3 = vpack.c.bf16 %v2309_v48, %v2308_v44  ;;  %v2295_v44 = vld [vmem:[%s12688_s1 + $0x138] sm:$0xff] }
 0x1da   : > { %v8523_v14 = vpop.eup %8522  ;;  %v1647_v30 = vadd.f32 %v10422_v12, %v1570_v51  ;;  %v6391_v32 = vadd.f32 %v6390_v46, %v6389_v34  ;;  %8227 = vmatprep.subr.bf16.mxu0 %v9762_v56  ;;  %v2310_v51 = vld [vmem:[%s12688_s1 + $0x1b0] sm:$0xff]  ;;  %v2311_v34 = vld [vmem:[%s12688_s1 + $0x1b8] sm:$0xff] }
 0x1db   : > { %7601 = vmatmul.mubr.msk.f32.vlgmr.msra.gmra.mrb[90].mxu1 %vm1685_vm2, %v8523_v14  ;;  %v2157_v46 = vld [vmem:[%s8975_s30 + $0x3d8] sm:$0xff] }
 0x1dc   : > { %8528 = vtanh.f32 %v1647_v30  ;;  %v1575_v2 = vadd.f32 %v6391_v32, %v10300_v19  ;;  %v6392_v1 = vpop.f32.mrb[100].mxu0  ;;  %8053 = vmatpush3.bf16.msra.mxu1 %v8052_v20  ;;  %7603 = vmatprep.mubr.msk.f32.mxu1 %vm8759_vm1, %v12833_v63  ;;  %v2293_v19 = vld [vmem:[%s12688_s1 + $0x128] sm:$0xff]  ;;  %v2144_v20 = vld [vmem:[%s8975_s30 + $0x340] sm:$0xff]  ;;  %v8062_v30 = vpack.c.bf16 %v2311_v34, %v2310_v51  ;;  %v2294_v32 = vld [vmem:[%s12688_s1 + $0x130] sm:$0xff] }
 0x1dd   : > { %v6393_v49 = vpop.f32.mrb[101].mxu0  ;;  %8055 = vmatprep.subr.bf16.mxu1 %v8054_v15  ;;  %3093 = vmatmul.mubr.f32.gmra.mrb[188].mxu0 %v2132_v13  ;;  %v8060_v26 = vpack.c.bf16 %v2293_v19, %v2292_v55  ;;  %v8064_v55 = vpack.c.bf16 %v2295_v44, %v2294_v32 }
 0x1de   : > { %v8525_v31 = vpop.eup %8524  ;;  %v1648_v36 = vadd.f32 %v10422_v12, %v1575_v2  ;;  %v6394_v39 = vadd.f32 %v6393_v49, %v6392_v1  ;;  %3097 = vmatprep.mubr.f32.mxu0 %v2145_v24  ;;  %8229 = vmatpush3.bf16.msra.mxu0 %v9780_v22  ;;  %v2312_v2 = vld [vmem:[%s12688_s1 + $0x1c0] sm:$0xff]  ;;  %v2313_v1 = vld [vmem:[%s12688_s1 + $0x1c8] sm:$0xff] }
 0x1df   : > { %7604 = vmatmul.mubr.msk.f32.gmra.mrb[92].mxu1 %vm1685_vm2, %v8525_v31  ;;  %8231 = vmatprep.subr.bf16.mxu0 %v9784_v21  ;;  %v2169_v24 = vld [vmem:[%s8975_s30 + $0x468] sm:$0xff]  ;;  %v8066_v31 = vpack.c.bf16 %v2313_v1, %v2312_v2  ;;  %v2316_v1 = vld [vmem:[%s12688_s1 + $0x1e0] sm:$0xff] }
 0x1e0   : > { %8530 = vtanh.f32 %v1648_v36  ;;  %v1580_v15 = vadd.f32 %v6394_v39, %v10311_v45  ;;  %v6395_v4 = vpop.f32.mrb[102].mxu0  ;;  %7606 = vmatprep.mubr.msk.f32.mxu1 %vm8759_vm1, %v12833_v63  ;;  %8057 = vmatpush3.bf16.msra.mxu1 %v8056_v38  ;;  %v2156_v38 = vld [vmem:[%s8975_s30 + $0x3d0] sm:$0xff]  ;;  %v2296_v36 = vld [vmem:[%s12688_s1 + $0x140] sm:$0xff]  ;;  %v2297_v39 = vld [vmem:[%s12688_s1 + $0x148] sm:$0xff] }
 0x1e1   : > { %v6396_v14 = vpop.f32.mrb[103].mxu0  ;;  %8059 = vmatprep.subr.bf16.mxu1 %v8058_v3  ;;  %3098 = vmatmul.mubr.f32.gmra.mrb[190].mxu0 %v2144_v20  ;;  %v2314_v20 = vld [vmem:[%s12688_s1 + $0x1d0] sm:$0xff] }
 0x1e2   : > { %v8527_v45 = vpop.eup %8526  ;;  %v1649_v48 = vadd.f32 %v10422_v12, %v1580_v15  ;;  %v6397_v13 = vadd.f32 %v6396_v14, %v6395_v4  ;;  %3102 = vmatprep.mubr.f32.mxu0 %v2157_v46  ;;  %8233 = vmatpush3.bf16.msra.mxu0 %v9802_v59  ;;  %v2315_v46 = vld [vmem:[%s12688_s1 + $0x1d8] sm:$0xff]  ;;  %v2168_v15 = vld [vmem:[%s8975_s30 + $0x460] sm:$0xff] }
 0x1e3   : > { %7607 = vmatmul.mubr.msk.f32.gmra.mrb[94].mxu1 %vm1685_vm2, %v8527_v45  ;;  %8235 = vmatprep.subr.bf16.mxu0 %v9806_v54  ;;  %v2181_v4 = vld [vmem:[%s8975_s30 + $0x4f8] sm:$0xff]  ;;  %v8070_v44 = vpack.c.bf16 %v2315_v46, %v2314_v20  ;;  %v2298_v45 = vld [vmem:[%s12688_s1 + $0x150] sm:$0xff] }
 0x1e4   : > { %8532 = vtanh.f32 %v1649_v48  ;;  %v1585_v49 = vadd.f32 %v6397_v13, %v10328_v53  ;;  %v6398_v3 = vpop.f32.mrb[104].mxu0  ;;  %7609 = vmatprep.mubr.msk.f32.mxu1 %vm8759_vm1, %v12833_v63  ;;  %8061 = vmatpush3.bf16.msra.mxu1 %v8060_v26  ;;  %v2299_v48 = vld [vmem:[%s12688_s1 + $0x158] sm:$0xff]  ;;  %v2318_v20 = vld [vmem:[%s12688_s1 + $0x1f0] sm:$0xff] }
 0x1e5   : > { %v6399_v19 = vpop.f32.mrb[105].mxu0  ;;  %8063 = vmatprep.subr.bf16.mxu1 %v8062_v30  ;;  %3103 = vmatmul.mubr.f32.gmra.mrb[192].mxu0 %v2156_v38  ;;  %v8068_v30 = vpack.c.bf16 %v2297_v39, %v2296_v36  ;;  %v2317_v38 = vld [vmem:[%s12688_s1 + $0x1e8] sm:$0xff]  ;;  %v2300_v39 = vld [vmem:[%s12688_s1 + $0x160] sm:$0xff]  ;;  %v2319_v46 = vld [vmem:[%s12688_s1 + $0x1f8] sm:$0xff] }
 0x1e6   : > { %v8529_v53 = vpop.eup %8528  ;;  %v1650_v51 = vadd.f32 %v10422_v12, %v1585_v49  ;;  %v6400_v34 = vadd.f32 %v6399_v19, %v6398_v3  ;;  %3107 = vmatprep.mubr.f32.mxu0 %v2169_v24  ;;  %8237 = vmatpush3.bf16.msra.mxu0 %v9824_v60  ;;  %v2180_v24 = vld [vmem:[%s8975_s30 + $0x4f0] sm:$0xff]  ;;  %v2193_v49 = vld [vmem:[%s8975_s30 + $0x588] sm:$0xff]  ;;  %v8072_v19 = vpack.c.bf16 %v2299_v48, %v2298_v45  ;;  %v2303_v48 = vld [vmem:[%s12688_s1 + $0x178] sm:$0xff] }
 0x1e7   : > { %7610 = vmatmul.mubr.msk.f32.gmra.mrb[96].mxu1 %vm1685_vm2, %v8529_v53  ;;  %8239 = vmatprep.subr.bf16.mxu0 %v9828_v25  ;;  %v8074_v36 = vpack.c.bf16 %v2317_v38, %v2316_v1  ;;  %v2301_v53 = vld [vmem:[%s12688_s1 + $0x168] sm:$0xff]  ;;  %v2302_v45 = vld [vmem:[%s12688_s1 + $0x170] sm:$0xff] }
 0x1e8   : > { %8534 = vtanh.f32 %v1650_v51  ;;  %v1590_v26 = vadd.f32 %v6400_v34, %v10333_v42  ;;  %v6401_v14 = vpop.f32.mrb[106].mxu0  ;;  %7612 = vmatprep.mubr.msk.f32.mxu1 %vm8759_vm1, %v12833_v63  ;;  %8065 = vmatpush3.bf16.msra.mxu1 %v8064_v55  ;;  %v2369_v1 = vld [vmem:[%s12688_s1 + $0x388] sm:$0xff]  ;;  %v2204_v38 = vld [vmem:[%s8975_s30 + $0x610] sm:$0xff] }
 0x1e9   : > { %v6402_v32 = vpop.f32.mrb[107].mxu0  ;;  %8067 = vmatprep.subr.bf16.mxu1 %v8066_v31  ;;  %3108 = vmatmul.mubr.f32.gmra.mrb[194].mxu0 %v2168_v15  ;;  %v2192_v15 = vld [vmem:[%s8975_s30 + $0x580] sm:$0xff] }
 0x1ea   : > { %v8531_v42 = vpop.eup %8530  ;;  %v1651_v13 = vadd.f32 %v10422_v12, %v1590_v26  ;;  %v6403_v2 = vadd.f32 %v6402_v32, %v6401_v14  ;;  %3112 = vmatprep.mubr.f32.mxu0 %v2181_v4  ;;  %8241 = vmatpush3.bf16.msra.mxu0 %v9840_v11  ;;  %v2205_v4 = vld [vmem:[%s8975_s30 + $0x618] sm:$0xff] }
 0x1eb   : > { %7613 = vmatmul.mubr.msk.f32.gmra.mrb[98].mxu1 %vm1685_vm2, %v8531_v42 }
 0x1ec   : > { %8536 = vtanh.f32 %v1651_v13  ;;  %v1595_v3 = vadd.f32 %v6403_v2, %v10350_v18  ;;  %v6404_v55 = vpop.f32.mrb[108].mxu0  ;;  %7615 = vmatprep.mubr.msk.f32.mxu1 %vm8759_vm1, %v12833_v63  ;;  %8069 = vmatpush3.bf16.msra.mxu1 %v8068_v30  ;;  %v8076_v30 = vpack.c.bf16 %v2301_v53, %v2300_v39  ;;  %v2368_v2 = vld [vmem:[%s12688_s1 + $0x380] sm:$0xff] }
 0x1ed   : > { %v6405_v31 = vpop.f32.mrb[109].mxu0  ;;  %8071 = vmatprep.subr.bf16.mxu1 %v8070_v44  ;;  %3113 = vmatmul.mubr.f32.gmra.mrb[196].mxu0 %v2180_v24  ;;  %v8078_v44 = vpack.c.bf16 %v2319_v46, %v2318_v20  ;;  %v2217_v24 = vld [vmem:[%s8975_s30 + $0x6a8] sm:$0xff] }
 0x1ee   : > { %v8533_v18 = vpop.eup %8532  ;;  %v1652_v51 = vadd.f32 %v10422_v12, %v1595_v3  ;;  %v6406_v34 = vadd.f32 %v6405_v31, %v6404_v55  ;;  %3117 = vmatprep.mubr.f32.mxu0 %v2193_v49  ;;  %v8080_v55 = vpack.c.bf16 %v2303_v48, %v2302_v45  ;;  %v8114_v31 = vpack.c.bf16 %v2369_v1, %v2368_v2 }
 0x1ef   : > { %7616 = vmatmul.mubr.msk.f32.gmra.mrb[100].mxu1 %vm1685_vm2, %v8533_v18  ;;  %v2216_v18 = vld [vmem:[%s8975_s30 + $0x6a0] sm:$0xff] }
 0x1f0   : > { %8538 = vtanh.f32 %v1652_v51  ;;  %v1600_v26 = vadd.f32 %v6406_v34, %v10355_v5  ;;  %v6407_v14 = vpop.f32.mrb[110].mxu0  ;;  %7618 = vmatprep.mubr.msk.f32.mxu1 %vm8759_vm1, %v12833_v63  ;;  %8073 = vmatpush3.bf16.msra.mxu1 %v8072_v19 }
 0x1f1   : > { %v6408_v32 = vpop.f32.mrb[111].mxu0  ;;  %8075 = vmatprep.subr.bf16.mxu1 %v8074_v36  ;;  %3118 = vmatmul.mubr.f32.gmra.mrb[198].mxu0 %v2192_v15 }
 0x1f2   : > { %v8535_v5 = vpop.eup %8534  ;;  %v1653_v42 = vadd.f32 %v10422_v12, %v1600_v26  ;;  %v6409_v13 = vadd.f32 %v6408_v32, %v6407_v14  ;;  %3122 = vmatprep.mubr.f32.mxu0 %v2205_v4  ;;  %v2228_v26 = vld [vmem:[%s8975_s30 + $0x730] sm:$0xff]  ;;  %v2241_v14 = vld [vmem:[%s8975_s30 + $0x7c8] sm:$0xff] }
 0x1f3   : > { %7619 = vmatmul.mubr.msk.f32.gmra.mrb[102].mxu1 %vm1685_vm2, %v8535_v5  ;;  %v2240_v5 = vld [vmem:[%s8975_s30 + $0x7c0] sm:$0xff] }
 0x1f4   : > { %8540 = vtanh.f32 %v1653_v42  ;;  %v1605_v49 = vadd.f32 %v6409_v13, %v10372_v35  ;;  %v6410_v3 = vpop.f32.mrb[112].mxu0  ;;  %7621 = vmatprep.mubr.msk.f32.mxu1 %vm8759_vm1, %v12833_v63  ;;  %8077 = vmatpush3.bf16.msra.mxu1 %v8076_v30  ;;  %v2229_v35 = vld [vmem:[%s8975_s30 + $0x738] sm:$0xff] }
 0x1f5   : > { %v6411_v19 = vpop.f32.mrb[113].mxu0  ;;  %8079 = vmatprep.subr.bf16.mxu1 %v8078_v44  ;;  %3123 = vmatmul.mubr.f32.gmra.mrb[200].mxu0 %v2204_v38  ;;  %v2253_v42 = vld [vmem:[%s8975_s30 + $0x858] sm:$0x7] }
 0x1f6   : > { %v8537_v36 = vpop.eup %8536  ;;  %v1654_v39 = vadd.f32 %v10422_v12, %v1605_v49  ;;  %v6412_v53 = vadd.f32 %v6411_v19, %v6410_v3  ;;  %3127 = vmatprep.mubr.f32.mxu0 %v2217_v24  ;;  %v2252_v49 = vld [vmem:[%s8975_s30 + $0x850] sm:$0x7]  ;;  %v3304_v3 = vld [vmem:[%s8975_s30 + $0x8] sm:$0xff] }
 0x1f7   : > { %7622 = vmatmul.mubr.msk.f32.gmra.mrb[104].mxu1 %vm1685_vm2, %v8537_v36 }
 0x1f8   : > { %8542 = vtanh.f32 %v1654_v39  ;;  %v1610_v51 = vadd.f32 %v6412_v53, %v10377_v23  ;;  %v6413_v34 = vpop.f32.mrb[114].mxu0  ;;  %7624 = vmatprep.mubr.msk.f32.mxu1 %vm8759_vm1, %v12833_v63  ;;  %8081 = vmatpush3.bf16.msra.mxu1 %v8080_v55  ;;  %v3305_v39 = vld [vmem:[%s8975_s30 + $0x90] sm:$0xff]  ;;  %v3308_v53 = vld [vmem:[%s8975_s30 + $0x128] sm:$0xff] }
 0x1f9   : > { %v6414_v20 = vpop.f32.mrb[115].mxu0  ;;  %8115 = vmatprep.subr.bf16.mxu1 %v8114_v31  ;;  %3128 = vmatmul.mubr.f32.gmra.mrb[202].mxu0 %v2216_v18  ;;  %v3303_v31 = vld [vmem:[%s8975_s30] sm:$0xff] }
 0x1fa   : > { %v8539_v46 = vpop.eup %8538  ;;  %v1655_v15 = vadd.f32 %v10422_v12, %v1610_v51  ;;  %v6415_v4 = vadd.f32 %v6414_v20, %v6413_v34  ;;  %3132 = vmatprep.mubr.f32.mxu0 %v2229_v35  ;;  %v3307_v35 = vld [vmem:[%s8975_s30 + $0x120] sm:$0xff]  ;;  %v3310_v51 = vld [vmem:[%s8975_s30 + $0x1b8] sm:$0xff]  ;;  %v2079_v34 = vld [vmem:[%s8975_s30 + $0x48] sm:$0xff] }
 0x1fb   : > { %7625 = vmatmul.mubr.msk.f32.gmra.mrb[106].mxu1 %vm1685_vm2, %v8539_v46  ;;  %v2352_v20 = vld [vmem:[%s12688_s1 + $0x300] sm:$0xff]  ;;  %v2353_v46 = vld [vmem:[%s12688_s1 + $0x308] sm:$0xff] }
 0x1fc   : > { %8544 = vtanh.f32 %v1655_v15  ;;  %v1615_v23 = vadd.f32 %v6415_v4, %v10394_v47  ;;  %v6416_v30 = vpop.f32.mrb[116].mxu0  ;;  %7627 = vmatprep.mubr.msk.f32.mxu1 %vm8759_vm1, %v12833_v63  ;;  %v2370_v4 = vld [vmem:[%s12688_s1 + $0x390] sm:$0xff] }
 0x1fd   : > { %v6417_v32 = vpop.f32.mrb[117].mxu0  ;;  %3133 = vmatmul.mubr.f32.gmra.mrb[204].mxu0 %v2228_v26  ;;  %v2371_v26 = vld [vmem:[%s12688_s1 + $0x398] sm:$0xff] }
 0x1fe   : > { %v8541_v44 = vpop.eup %8540  ;;  %v1656_v45 = vadd.f32 %v10422_v12, %v1615_v23  ;;  %v6418_v48 = vadd.f32 %v6417_v32, %v6416_v30  ;;  %3137 = vmatprep.mubr.f32.mxu0 %v2241_v14  ;;  %v3309_v14 = vld [vmem:[%s8975_s30 + $0x1b0] sm:$0xff]  ;;  %v3312_v23 = vld [vmem:[%s8975_s30 + $0x248] sm:$0xff]  ;;  %v2078_v30 = vld [vmem:[%s8975_s30 + $0x40] sm:$0xff]  ;;  %v8116_v32 = vpack.c.bf16 %v2353_v46, %v2352_v20 }
 0x1ff   : > { %7628 = vmatmul.mubr.msk.f32.gmra.mrb[108].mxu1 %vm1685_vm2, %v8541_v44  ;;  %v2091_v44 = vld [vmem:[%s8975_s30 + $0xd8] sm:$0xff]  ;;  %v2377_v20 = vld [vmem:[%s12688_s1 + $0x3c8] sm:$0xff]  ;;  %v3315_v46 = vld [vmem:[%s8975_s30 + $0x360] sm:$0xff] }
 0x200   : > { %8546 = vtanh.f32 %v1656_v45  ;;  %v1620_v47 = vadd.f32 %v6418_v48, %v10407_v7  ;;  %v6419_v13 = vpop.f32.mrb[118].mxu0  ;;  %7630 = vmatprep.mubr.msk.f32.mxu1 %vm8759_vm1, %v12833_v63  ;;  %v8118_v45 = vpack.c.bf16 %v2371_v26, %v2370_v4  ;;  %v2354_v48 = vld [vmem:[%s12688_s1 + $0x310] sm:$0xff] }
 0x201   : > { %v6420_v2 = vpop.f32.mrb[119].mxu0  ;;  %3138 = vmatmul.mubr.f32.gmra.mrb[206].mxu0 %v2240_v5  ;;  %v2355_v5 = vld [vmem:[%s12688_s1 + $0x318] sm:$0xff]  ;;  %v2114_v4 = vld [vmem:[%s8975_s30 + $0x1f0] sm:$0xff] }
 0x202   : > { %v8543_v1 = vpop.eup %8542  ;;  %v1657_v38 = vadd.f32 %v10422_v12, %v1620_v47  ;;  %v6421_v24 = vadd.f32 %v6420_v2, %v6419_v13  ;;  %3142 = vmatprep.mubr.f32.mxu0 %v2253_v42  ;;  %v2372_v42 = vld [vmem:[%s12688_s1 + $0x3a0] sm:$0xff]  ;;  %v2373_v47 = vld [vmem:[%s12688_s1 + $0x3a8] sm:$0xff]  ;;  %v3314_v2 = vld [vmem:[%s8975_s30 + $0x2d8] sm:$0xff] }
 0x203   : > { %7631 = vmatmul.mubr.msk.f32.gmra.mrb[110].mxu1 %vm1685_vm2, %v8543_v1  ;;  %v3311_v13 = vld [vmem:[%s8975_s30 + $0x240] sm:$0xff]  ;;  %v2090_v1 = vld [vmem:[%s8975_s30 + $0xd0] sm:$0xff] }
 0x204   : > { %8548 = vtanh.f32 %v1657_v38  ;;  %v1625_v7 = vadd.f32 %v6421_v24, %v10418_v52  ;;  %7633 = vmatprep.mubr.msk.f32.mxu1 %vm8759_vm1, %v12833_v63  ;;  %v3306_v52 = vld [vmem:[%s8975_s30 + $0x98] sm:$0xff]  ;;  %v8120_v38 = vpack.c.bf16 %v2355_v5, %v2354_v48  ;;  %v2103_v24 = vld [vmem:[%s8975_s30 + $0x168] sm:$0xff]  ;;  %v3317_v48 = vld [vmem:[%s8975_s30 + $0x3f0] sm:$0xff] }
 0x205   : > { %3143 = vmatmul.mubr.f32.gmra.mrb[208].mxu0 %v2252_v49  ;;  %v8122_v49 = vpack.c.bf16 %v2373_v47, %v2372_v42  ;;  %v3320_v5 = vld [vmem:[%s8975_s30 + $0x488] sm:$0xff]  ;;  %v2126_v42 = vld [vmem:[%s8975_s30 + $0x280] sm:$0xff] }
 0x206   : > { %v8545_v55 = vpop.eup %8544  ;;  %v1658_v19 = vadd.f32 %v10422_v12, %v1625_v7  ;;  %3397 = vmatprep.mubr.f32.mxu0 %v3304_v3  ;;  %v2356_v3 = vld [vmem:[%s12688_s1 + $0x320] sm:$0xff]  ;;  %v2357_v7 = vld [vmem:[%s12688_s1 + $0x328] sm:$0xff] }
 0x207   : > { %7634 = vmatmul.mubr.msk.f32.gmra.mrb[112].mxu1 %vm1685_vm2, %v8545_v55  ;;  %v2374_v55 = vld [vmem:[%s12688_s1 + $0x3b0] sm:$0xff] }
 0x208   : > { %8550 = vtanh.f32 %v1658_v19  ;;  %7636 = vmatprep.mubr.msk.f32.mxu1 %vm8759_vm1, %v12833_v63  ;;  %v2375_v19 = vld [vmem:[%s12688_s1 + $0x3b8] sm:$0xff] }
 0x209   : > { %3398 = vmatmul.mubr.f32.vlgmr.msra.gmra.mrb[210].mxu0 %v3303_v31  ;;  %v3313_v31 = vld [vmem:[%s8975_s30 + $0x2d0] sm:$0xff] }
 0x20a   : > { %v8547_v36 = vpop.eup %8546  ;;  %3402 = vmatprep.mubr.f32.mxu0 %v3306_v52  ;;  %v3316_v52 = vld [vmem:[%s8975_s30 + $0x368] sm:$0xff] }
 0x20b   : > { %7637 = vmatmul.mubr.msk.f32.gmra.mrb[114].mxu1 %vm1685_vm2, %v8547_v36  ;;  %v2102_v36 = vld [vmem:[%s8975_s30 + $0x160] sm:$0xff] }
 0x20c   : > { %7639 = vmatprep.mubr.msk.f32.mxu1 %vm8759_vm1, %v12833_v63 }
 0x20d   : > { %3403 = vmatmul.mubr.f32.gmra.mrb[212].mxu0 %v3305_v39  ;;  %v8124_v39 = vpack.c.bf16 %v2357_v7, %v2356_v3  ;;  %v3319_v3 = vld [vmem:[%s8975_s30 + $0x480] sm:$0xff] }
 0x20e   : > { %v8549_v18 = vpop.eup %8548  ;;  %3407 = vmatprep.mubr.f32.mxu0 %v3308_v53  ;;  %v2115_v53 = vld [vmem:[%s8975_s30 + $0x1f8] sm:$0xff] }
 0x20f   : > { %7640 = vmatmul.mubr.msk.f32.gmra.mrb[116].mxu1 %vm1685_vm2, %v8549_v18  ;;  %v8126_v18 = vpack.c.bf16 %v2375_v19, %v2374_v55  ;;  %v3322_v55 = vld [vmem:[%s8975_s30 + $0x518] sm:$0xff]  ;;  %v2138_v19 = vld [vmem:[%s8975_s30 + $0x310] sm:$0xff] }
 0x210   : > { %7642 = vmatprep.mubr.msk.f32.mxu1 %vm8759_vm1, %v12833_v63 }
 0x211   : > { %3408 = vmatmul.mubr.f32.gmra.mrb[214].mxu0 %v3307_v35  ;;  %v2358_v35 = vld [vmem:[%s12688_s1 + $0x330] sm:$0xff] }
 0x212   : > { %v8551_v15 = vpop.eup %8550  ;;  %3412 = vmatprep.mubr.f32.mxu0 %v3310_v51  ;;  %v2359_v51 = vld [vmem:[%s12688_s1 + $0x338] sm:$0xff] }
 0x213   : > { %7643 = vmatmul.mubr.msk.f32.gmra.mrb[118].mxu1 %vm1685_vm2, %v8551_v15  ;;  %v3318_v15 = vld [vmem:[%s8975_s30 + $0x3f8] sm:$0xff]  ;;  %v8128_v26 = vpack.c.bf16 %v2359_v51, %v2358_v35  ;;  %v2382_v51 = vld [vmem:[%s12688_s1 + $0x3f0] sm:$0xff] }
 0x214   : > { %2652 = vmatprep.mubr.f32.mxu1 %v2079_v34  ;;  %v2376_v34 = vld [vmem:[%s12688_s1 + $0x3c0] sm:$0xff] }
 0x215   : > { %3413 = vmatmul.mubr.f32.gmra.mrb[216].mxu0 %v3309_v14  ;;  %v2127_v14 = vld [vmem:[%s8975_s30 + $0x288] sm:$0xff] }
 0x216   : > { %3417 = vmatprep.mubr.f32.mxu0 %v3312_v23  ;;  %v8130_v23 = vpack.c.bf16 %v2377_v20, %v2376_v34  ;;  %v2383_v34 = vld [vmem:[%s12688_s1 + $0x3f8] sm:$0xff]  ;;  %v3321_v20 = vld [vmem:[%s8975_s30 + $0x510] sm:$0xff] }
 0x217   : > { %2653 = vmatmul.mubr.f32.vlgmr.msra.gmra.mrb[120].mxu1 %v2078_v30  ;;  %v2360_v30 = vld [vmem:[%s12688_s1 + $0x340] sm:$0xff] }
 0x218   : > { %8117 = vmatpush3.bf16.msra.mxu1 %v8116_v32  ;;  %2657 = vmatprep.mubr.f32.mxu1 %v2091_v44  ;;  %v2361_v32 = vld [vmem:[%s12688_s1 + $0x348] sm:$0xff]  ;;  %v2378_v44 = vld [vmem:[%s12688_s1 + $0x3d0] sm:$0xff] }
 0x219   : > { %8119 = vmatprep.subr.bf16.mxu1 %v8118_v45  ;;  %3418 = vmatmul.mubr.f32.gmra.mrb[218].mxu0 %v3311_v13  ;;  %v2379_v45 = vld [vmem:[%s12688_s1 + $0x3d8] sm:$0xff]  ;;  %v8132_v47 = vpack.c.bf16 %v2361_v32, %v2360_v30  ;;  %v2366_v30 = vld [vmem:[%s12688_s1 + $0x370] sm:$0xff] }
 0x21a   : > { %3422 = vmatprep.mubr.f32.mxu0 %v3314_v2  ;;  %v2139_v13 = vld [vmem:[%s8975_s30 + $0x318] sm:$0xff]  ;;  %v8134_v2 = vpack.c.bf16 %v2379_v45, %v2378_v44  ;;  %v2432_v44 = vld [vmem:[%s12688_s1 + $0x580] sm:$0xff]  ;;  %v2433_v45 = vld [vmem:[%s12688_s1 + $0x588] sm:$0xff] }
 0x21b   : > { %2658 = vmatmul.mubr.f32.gmra.mrb[122].mxu1 %v2090_v1  ;;  %v2362_v1 = vld [vmem:[%s12688_s1 + $0x350] sm:$0xff]  ;;  %v2367_v32 = vld [vmem:[%s12688_s1 + $0x378] sm:$0xff] }
 0x21c   : > { %2662 = vmatprep.mubr.f32.mxu1 %v2103_v24  ;;  %8121 = vmatpush3.bf16.msra.mxu1 %v8120_v38  ;;  %v2363_v38 = vld [vmem:[%s12688_s1 + $0x358] sm:$0xff]  ;;  %v2380_v24 = vld [vmem:[%s12688_s1 + $0x3e0] sm:$0xff] }
 0x21d   : > { %8123 = vmatprep.subr.bf16.mxu1 %v8122_v49  ;;  %3423 = vmatmul.mubr.f32.gmra.mrb[220].mxu0 %v3313_v31  ;;  %v2381_v49 = vld [vmem:[%s12688_s1 + $0x3e8] sm:$0xff]  ;;  %v8136_v31 = vpack.c.bf16 %v2363_v38, %v2362_v1  ;;  %v8144_v1 = vpack.c.bf16 %v2367_v32, %v2366_v30  ;;  %v2211_v32 = vld [vmem:[%s8975_s30 + $0x678] sm:$0xff] }
 0x21e   : > { %3427 = vmatprep.mubr.f32.mxu0 %v3316_v52  ;;  %v2175_v38 = vld [vmem:[%s8975_s30 + $0x4c8] sm:$0xff] }
 0x21f   : > { %2663 = vmatmul.mubr.f32.gmra.mrb[124].mxu1 %v2102_v36  ;;  %v2151_v36 = vld [vmem:[%s8975_s30 + $0x3a8] sm:$0xff] }
 0x220   : > { %2667 = vmatprep.mubr.f32.mxu1 %v2115_v53  ;;  %8125 = vmatpush3.bf16.msra.mxu1 %v8124_v39  ;;  %v8138_v39 = vpack.c.bf16 %v2381_v49, %v2380_v24  ;;  %v2364_v53 = vld [vmem:[%s12688_s1 + $0x360] sm:$0xff]  ;;  %v8178_v24 = vpack.c.bf16 %v2433_v45, %v2432_v44 }
 0x221   : > { %8127 = vmatprep.subr.bf16.mxu1 %v8126_v18  ;;  %3428 = vmatmul.mubr.f32.gmra.mrb[222].mxu0 %v3315_v46  ;;  %v2365_v18 = vld [vmem:[%s12688_s1 + $0x368] sm:$0xff]  ;;  %v3331_v45 = vld [vmem:[%s8975_s30 + $0x7e0] sm:$0x7] }
 0x222   : > { %3432 = vmatprep.mubr.f32.mxu0 %v3318_v15  ;;  %v3324_v15 = vld [vmem:[%s8975_s30 + $0x5a8] sm:$0xff] }
 0x223   : > { %2668 = vmatmul.mubr.f32.gmra.mrb[126].mxu1 %v2114_v4  ;;  %v6480_v7 = vpop.f32.mrb[120].mxu0  ;;  %v2150_v4 = vld [vmem:[%s8975_s30 + $0x3a0] sm:$0xff] }
 0x224   : > { %2672 = vmatprep.mubr.f32.mxu1 %v2127_v14  ;;  %8129 = vmatpush3.bf16.msra.mxu1 %v8128_v26  ;;  %v6481_v52 = vpop.f32.mrb[121].mxu0  ;;  %v8140_v26 = vpack.c.bf16 %v2365_v18, %v2364_v53  ;;  %v2163_v14 = vld [vmem:[%s8975_s30 + $0x438] sm:$0xff]  ;;  %v3327_v53 = vld [vmem:[%s8975_s30 + $0x6c0] sm:$0xff] }
 0x225   : > { %8131 = vmatprep.subr.bf16.mxu1 %v8130_v23  ;;  %3433 = vmatmul.mubr.f32.gmra.mrb[224].mxu0 %v3317_v48  ;;  %v10747_v35 = vadd.f32 %v6481_v52, %v6480_v7  ;;  %v8142_v23 = vpack.c.bf16 %v2383_v34, %v2382_v51  ;;  %v3330_v51 = vld [vmem:[%s8975_s30 + $0x758] sm:$0xff]  ;;  %v2186_v34 = vld [vmem:[%s8975_s30 + $0x550] sm:$0xff] }
 0x226   : > { %3437 = vmatprep.mubr.f32.mxu0 %v3320_v5  ;;  %v3323_v5 = vld [vmem:[%s8975_s30 + $0x5a0] sm:$0xff] }
 0x227   : > { %2673 = vmatmul.mubr.f32.gmra.mrb[128].mxu1 %v2126_v42  ;;  %v6483_v46 = vpop.f32.mrb[122].mxu0 }
 0x228   : > { %2677 = vmatprep.mubr.f32.mxu1 %v2139_v13  ;;  %8133 = vmatpush3.bf16.msra.mxu1 %v8132_v47  ;;  %v6484_v48 = vpop.f32.mrb[123].mxu0  ;;  %v3326_v13 = vld [vmem:[%s8975_s30 + $0x638] sm:$0xff] }
 0x229   : > { %8135 = vmatprep.subr.bf16.mxu1 %v8134_v2  ;;  %3438 = vmatmul.mubr.f32.gmra.mrb[226].mxu0 %v3319_v3  ;;  %v10772_v42 = vadd.f32 %v6484_v48, %v6483_v46  ;;  %v2162_v2 = vld [vmem:[%s8975_s30 + $0x430] sm:$0xff]  ;;  %v2199_v46 = vld [vmem:[%s8975_s30 + $0x5e8] sm:$0xff] }
 0x22a   : > { %3442 = vmatprep.mubr.f32.mxu0 %v3322_v55  ;;  %v3325_v3 = vld [vmem:[%s8975_s30 + $0x630] sm:$0xff] }
 0x22b   : > { %2678 = vmatmul.mubr.f32.gmra.mrb[130].mxu1 %v2138_v19  ;;  %v6486_v47 = vpop.f32.mrb[124].mxu0  ;;  %v3328_v19 = vld [vmem:[%s8975_s30 + $0x6c8] sm:$0xff] }
 0x22c   : > { %2682 = vmatprep.mubr.f32.mxu1 %v2151_v36  ;;  %8137 = vmatpush3.bf16.msra.mxu1 %v8136_v31  ;;  %v6487_v49 = vpop.f32.mrb[125].mxu0  ;;  %v2174_v31 = vld [vmem:[%s8975_s30 + $0x4c0] sm:$0xff]  ;;  %v2187_v36 = vld [vmem:[%s8975_s30 + $0x558] sm:$0xff] }
 0x22d   : > { %8139 = vmatprep.subr.bf16.mxu1 %v8138_v39  ;;  %3443 = vmatmul.mubr.f32.gmra.mrb[228].mxu0 %v3321_v20  ;;  %v10778_v7 = vadd.f32 %v6487_v49, %v6486_v47 }
 0x22e   : > { %3447 = vmatprep.mubr.f32.mxu0 %v3324_v15 }
 0x22f   : > { %2683 = vmatmul.mubr.f32.gmra.mrb[132].mxu1 %v2150_v4  ;;  %v6489_v55 = vpop.f32.mrb[126].mxu0  ;;  %v3329_v4 = vld [vmem:[%s8975_s30 + $0x750] sm:$0xff] }
 0x230   : > { %2687 = vmatprep.mubr.f32.mxu1 %v2163_v14  ;;  %8141 = vmatpush3.bf16.msra.mxu1 %v8140_v26  ;;  %v6490_v52 = vpop.f32.mrb[127].mxu0  ;;  %v3332_v14 = vld [vmem:[%s8975_s30 + $0x7e8] sm:$0x7] }
 0x231   : > { %8143 = vmatprep.subr.bf16.mxu1 %v8142_v23  ;;  %3448 = vmatmul.mubr.f32.gmra.mrb[230].mxu0 %v3323_v5  ;;  %v10783_v39 = vadd.f32 %v6490_v52, %v6489_v55  ;;  %v2198_v23 = vld [vmem:[%s8975_s30 + $0x5e0] sm:$0xff]  ;;  %v2210_v5 = vld [vmem:[%s8975_s30 + $0x670] sm:$0xff] }
 0x232   : > { %3452 = vmatprep.mubr.f32.mxu0 %v3326_v13  ;;  %v2223_v13 = vld [vmem:[%s8975_s30 + $0x708] sm:$0xff] }
 0x233   : > { %2688 = vmatmul.mubr.f32.gmra.mrb[134].mxu1 %v2162_v2  ;;  %v6492_v18 = vpop.f32.mrb[128].mxu0  ;;  %v2083_v2 = vld [vmem:[%s8975_s30 + $0x68] sm:$0xff] }
 0x234   : > { %2692 = vmatprep.mubr.f32.mxu1 %v2175_v38  ;;  %8145 = vmatpush3.bf16.msra.mxu1 %v8144_v1  ;;  %v6493_v20 = vpop.f32.mrb[129].mxu0 }
 0x235   : > { %8179 = vmatprep.subr.bf16.mxu1 %v8178_v24  ;;  %3453 = vmatmul.mubr.f32.gmra.mrb[232].mxu0 %v3325_v3  ;;  %v10789_v15 = vadd.f32 %v6493_v20, %v6492_v18  ;;  %v2222_v24 = vld [vmem:[%s8975_s30 + $0x700] sm:$0xff]  ;;  %v2235_v3 = vld [vmem:[%s8975_s30 + $0x798] sm:$0xff] }
 0x236   : > { %3457 = vmatprep.mubr.f32.mxu0 %v3328_v19  ;;  %v2416_v20 = vld [vmem:[%s12688_s1 + $0x500] sm:$0xff] }
 0x237   : > { %2693 = vmatmul.mubr.f32.gmra.mrb[136].mxu1 %v2174_v31  ;;  %v6495_v26 = vpop.f32.mrb[130].mxu0  ;;  %v2234_v31 = vld [vmem:[%s8975_s30 + $0x790] sm:$0xff] }
 0x238   : > { %2697 = vmatprep.mubr.f32.mxu1 %v2187_v36  ;;  %v6496_v30 = vpop.f32.mrb[131].mxu0  ;;  %v2247_v36 = vld [vmem:[%s8975_s30 + $0x828] sm:$0x7] }
 0x239   : > { %3458 = vmatmul.mubr.f32.gmra.mrb[234].mxu0 %v3327_v53  ;;  %v10795_v44 = vadd.f32 %v6496_v30, %v6495_v26  ;;  %v2434_v26 = vld [vmem:[%s12688_s1 + $0x590] sm:$0xff]  ;;  %v2082_v30 = vld [vmem:[%s8975_s30 + $0x60] sm:$0xff] }
 0x23a   : > { %3462 = vmatprep.mubr.f32.mxu0 %v3330_v51  ;;  %v2246_v51 = vld [vmem:[%s8975_s30 + $0x820] sm:$0x7] }
 0x23b   : > { %2698 = vmatmul.mubr.f32.gmra.mrb[138].mxu1 %v2186_v34  ;;  %v6498_v48 = vpop.f32.mrb[132].mxu0 }
 0x23c   : > { %2702 = vmatprep.mubr.f32.mxu1 %v2199_v46  ;;  %v6499_v47 = vpop.f32.mrb[133].mxu0  ;;  %v2417_v46 = vld [vmem:[%s12688_s1 + $0x508] sm:$0xff] }
 0x23d   : > { %3463 = vmatmul.mubr.f32.gmra.mrb[236].mxu0 %v3329_v4  ;;  %v10801_v1 = vadd.f32 %v6499_v47, %v6498_v48  ;;  %v2095_v48 = vld [vmem:[%s8975_s30 + $0xf8] sm:$0xff]  ;;  %v2418_v47 = vld [vmem:[%s12688_s1 + $0x510] sm:$0xff] }
 0x23e   : > { %3467 = vmatprep.mubr.f32.mxu0 %v3332_v14  ;;  %v2435_v14 = vld [vmem:[%s12688_s1 + $0x598] sm:$0xff] }
 0x23f   : > { %2703 = vmatmul.mubr.f32.gmra.mrb[140].mxu1 %v2198_v23 }
 0x240   : > { %2707 = vmatprep.mubr.f32.mxu1 %v2211_v32  ;;  %v8180_v32 = vpack.c.bf16 %v2417_v46, %v2416_v20  ;;  %v2438_v20 = vld [vmem:[%s12688_s1 + $0x5b0] sm:$0xff]  ;;  %v2439_v46 = vld [vmem:[%s12688_s1 + $0x5b8] sm:$0xff] }
 0x241   : > { %3468 = vmatmul.mubr.f32.gmra.mrb[238].mxu0 %v3331_v45  ;;  %v6501_v38 = vpop.f32.mrb[134].mxu0 }
 0x242   : > { %4136 = vmatprep.mubr.f32.mxu0 %v2083_v2  ;;  %v6502_v49 = vpop.f32.mrb[135].mxu0 }
 0x243   : > { %2708 = vmatmul.mubr.f32.gmra.mrb[142].mxu1 %v2210_v5  ;;  %v10805_v55 = vadd.f32 %v6502_v49, %v6501_v38  ;;  %v8182_v5 = vpack.c.bf16 %v2435_v14, %v2434_v26  ;;  %v2106_v26 = vld [vmem:[%s8975_s30 + $0x180] sm:$0xff] }
 0x244   : > { %2712 = vmatprep.mubr.f32.mxu1 %v2223_v13  ;;  %v2419_v13 = vld [vmem:[%s12688_s1 + $0x518] sm:$0xff] }
 0x245   : > { %v6504_v19 = vpop.f32.mrb[136].mxu0 }
 0x246   : > { %v6505_v52 = vpop.f32.mrb[137].mxu0 }
 0x247   : > { %2713 = vmatmul.mubr.f32.gmra.mrb[144].mxu1 %v2222_v24  ;;  %v10809_v53 = vadd.f32 %v6505_v52, %v6504_v19  ;;  %v2437_v24 = vld [vmem:[%s12688_s1 + $0x5a8] sm:$0xff]  ;;  %v8184_v19 = vpack.c.bf16 %v2419_v13, %v2418_v47  ;;  %v2440_v47 = vld [vmem:[%s12688_s1 + $0x5c0] sm:$0xff] }
 0x248   : > { %2717 = vmatprep.mubr.f32.mxu1 %v2235_v3  ;;  %v2094_v3 = vld [vmem:[%s8975_s30 + $0xf0] sm:$0xff]  ;;  %v2107_v52 = vld [vmem:[%s8975_s30 + $0x188] sm:$0xff] }
 0x249   : > { %v6507_v18 = vpop.f32.mrb[138].mxu0  ;;  %v2441_v13 = vld [vmem:[%s12688_s1 + $0x5c8] sm:$0xff] }
 0x24a   : > { %v6508_v34 = vpop.f32.mrb[139].mxu0 }
 0x24b   : > { %2718 = vmatmul.mubr.f32.gmra.mrb[146].mxu1 %v2234_v31  ;;  %v10818_v4 = vadd.f32 %v6508_v34, %v6507_v18  ;;  %v2420_v18 = vld [vmem:[%s12688_s1 + $0x520] sm:$0xff] }
 0x24c   : > { %2722 = vmatprep.mubr.f32.mxu1 %v2247_v36 }
 0x24d   : > { %v6510_v23 = vpop.f32.mrb[140].mxu0 }
 0x24e   : > { %v6511_v45 = vpop.f32.mrb[141].mxu0 }
 0x24f   : > { %2723 = vmatmul.mubr.f32.gmra.mrb[148].mxu1 %v2246_v51  ;;  %v10834_v38 = vadd.f32 %v6511_v45, %v6510_v23  ;;  %v2421_v51 = vld [vmem:[%s12688_s1 + $0x528] sm:$0xff]  ;;  %v2422_v45 = vld [vmem:[%s12688_s1 + $0x530] sm:$0xff] }
 0x250   : > { %2932 = vmatprep.mubr.f32.mxu1 %v2083_v2  ;;  %v2436_v2 = vld [vmem:[%s12688_s1 + $0x5a0] sm:$0xff]  ;;  %v8188_v14 = vpack.c.bf16 %v2421_v51, %v2420_v18  ;;  %v2442_v51 = vld [vmem:[%s12688_s1 + $0x5d0] sm:$0xff] }
 0x251   : > { %v6513_v49 = vpop.f32.mrb[142].mxu0  ;;  %v8186_v36 = vpack.c.bf16 %v2437_v24, %v2436_v2  ;;  %v2118_v24 = vld [vmem:[%s8975_s30 + $0x210] sm:$0xff] }
 0x252   : > { %v6514_v31 = vpop.f32.mrb[143].mxu0 }
 0x253   : > { %2933 = vmatmul.mubr.f32.vlgmr.msra.gmra.mrb[150].mxu1 %v2082_v30  ;;  %v10850_v34 = vadd.f32 %v6514_v31, %v6513_v49  ;;  %v2119_v30 = vld [vmem:[%s8975_s30 + $0x218] sm:$0xff]  ;;  %v8194_v31 = vpack.c.bf16 %v2441_v13, %v2440_v47  ;;  %v2444_v47 = vld [vmem:[%s12688_s1 + $0x5e0] sm:$0xff]  ;;  %v2445_v13 = vld [vmem:[%s12688_s1 + $0x5e8] sm:$0xff] }
 0x254   : > { %8181 = vmatpush3.bf16.msra.mxu1 %v8180_v32  ;;  %2937 = vmatprep.mubr.f32.mxu1 %v2095_v48  ;;  %v8190_v32 = vpack.c.bf16 %v2439_v46, %v2438_v20  ;;  %v2423_v48 = vld [vmem:[%s12688_s1 + $0x538] sm:$0xff] }
 0x255   : > { %8183 = vmatprep.subr.bf16.mxu1 %v8182_v5  ;;  %v8192_v49 = vpack.c.bf16 %v2423_v48, %v2422_v45  ;;  %v2443_v20 = vld [vmem:[%s12688_s1 + $0x5d8] sm:$0xff]  ;;  %v2426_v45 = vld [vmem:[%s12688_s1 + $0x550] sm:$0xff] }
 0x256   : > { %v6516_v23 = vpop.f32.mrb[144].mxu0  ;;  %v2427_v48 = vld [vmem:[%s12688_s1 + $0x558] sm:$0xff] }
 0x257   : > { %2938 = vmatmul.mubr.f32.gmra.mrb[152].mxu1 %v2094_v3  ;;  %v6517_v5 = vpop.f32.mrb[145].mxu0 }
 0x258   : > { %2942 = vmatprep.mubr.f32.mxu1 %v2107_v52  ;;  %8185 = vmatpush3.bf16.msra.mxu1 %v8184_v19  ;;  %v10872_v2 = vadd.f32 %v6517_v5, %v6516_v23  ;;  %v2131_v19 = vld [vmem:[%s8975_s30 + $0x2a8] sm:$0xff]  ;;  %v2424_v52 = vld [vmem:[%s12688_s1 + $0x540] sm:$0xff] }
 0x259   : > { %8187 = vmatprep.subr.bf16.mxu1 %v8186_v36  ;;  %v2425_v36 = vld [vmem:[%s12688_s1 + $0x548] sm:$0xff] }
 0x25a   : > { %v6519_v3 = vpop.f32.mrb[146].mxu0 }
 0x25b   : > { %2943 = vmatmul.mubr.f32.gmra.mrb[154].mxu1 %v2106_v26  ;;  %v6520_v18 = vpop.f32.mrb[147].mxu0  ;;  %v2130_v26 = vld [vmem:[%s8975_s30 + $0x2a0] sm:$0xff] }
 0x25c   : > { %2947 = vmatprep.mubr.f32.mxu1 %v2119_v30  ;;  %8189 = vmatpush3.bf16.msra.mxu1 %v8188_v14  ;;  %v10888_v46 = vadd.f32 %v6520_v18, %v6519_v3  ;;  %v8196_v14 = vpack.c.bf16 %v2425_v36, %v2424_v52  ;;  %v2143_v30 = vld [vmem:[%s8975_s30 + $0x338] sm:$0xff]  ;;  %v8200_v3 = vpack.c.bf16 %v2427_v48, %v2426_v45  ;;  %v2428_v36 = vld [vmem:[%s12688_s1 + $0x560] sm:$0xff]  ;;  %v2429_v18 = vld [vmem:[%s12688_s1 + $0x568] sm:$0xff] }
 0x25d   : > { %8191 = vmatprep.subr.bf16.mxu1 %v8190_v32  ;;  %v8198_v32 = vpack.c.bf16 %v2443_v20, %v2442_v51  ;;  %v8202_v52 = vpack.c.bf16 %v2445_v13, %v2444_v47  ;;  %v2446_v20 = vld [vmem:[%s12688_s1 + $0x5f0] sm:$0xff]  ;;  %v2167_v45 = vld [vmem:[%s8975_s30 + $0x458] sm:$0xff] }
 0x25e   : > { %v6522_v23 = vpop.f32.mrb[148].mxu0  ;;  %v2431_v47 = vld [vmem:[%s12688_s1 + $0x578] sm:$0xff] }
 0x25f   : > { %2948 = vmatmul.mubr.f32.gmra.mrb[156].mxu1 %v2118_v24  ;;  %v6523_v5 = vpop.f32.mrb[149].mxu0 }
 0x260   : > { %2952 = vmatprep.mubr.f32.mxu1 %v2131_v19  ;;  %8193 = vmatpush3.bf16.msra.mxu1 %v8192_v49  ;;  %v10904_v24 = vadd.f32 %v6523_v5, %v6522_v23  ;;  %v2142_v49 = vld [vmem:[%s8975_s30 + $0x330] sm:$0xff]  ;;  %v2154_v23 = vld [vmem:[%s8975_s30 + $0x3c0] sm:$0xff] }
 0x261   : > { %8195 = vmatprep.subr.bf16.mxu1 %v8194_v31  ;;  %v2155_v31 = vld [vmem:[%s8975_s30 + $0x3c8] sm:$0xff]  ;;  %v2430_v5 = vld [vmem:[%s12688_s1 + $0x570] sm:$0xff] }
 0x262   : > { %v6634_v19 = vpop.f32.mrb[150].mxu0 }
 0x263   : > { %2953 = vmatmul.mubr.f32.gmra.mrb[158].mxu1 %v2130_v26  ;;  %v6635_v51 = vpop.f32.mrb[151].mxu0  ;;  %v2447_v26 = vld [vmem:[%s12688_s1 + $0x5f8] sm:$0xff] }
 0x264   : > { %2957 = vmatprep.mubr.f32.mxu1 %v2143_v30  ;;  %8197 = vmatpush3.bf16.msra.mxu1 %v8196_v14  ;;  %v10920_v14 = vadd.f32 %v6635_v51, %v6634_v19  ;;  %v8204_v30 = vpack.c.bf16 %v2429_v18, %v2428_v36  ;;  %v8206_v48 = vpack.c.bf16 %v2447_v26, %v2446_v20  ;;  %v2178_v51 = vld [vmem:[%s8975_s30 + $0x4e0] sm:$0xff]  ;;  %v2191_v20 = vld [vmem:[%s8975_s30 + $0x578] sm:$0xff] }
 0x265   : > { %8199 = vmatprep.subr.bf16.mxu1 %v8198_v32  ;;  %v8208_v19 = vpack.c.bf16 %v2431_v47, %v2430_v5 }
 0x266   : > { %v6637_v32 = vpop.f32.mrb[152].mxu0 }
 0x267   : > { %2958 = vmatmul.mubr.f32.gmra.mrb[160].mxu1 %v2142_v49  ;;  %v6638_v13 = vpop.f32.mrb[153].mxu0 }
 0x268   : > { %2962 = vmatprep.mubr.f32.mxu1 %v2155_v31  ;;  %8201 = vmatpush3.bf16.msra.mxu1 %v8200_v3  ;;  %v10930_v49 = vadd.f32 %v6638_v13, %v6637_v32  ;;  %v2166_v3 = vld [vmem:[%s8975_s30 + $0x450] sm:$0xff]  ;;  %v2179_v31 = vld [vmem:[%s8975_s30 + $0x4e8] sm:$0xff]  ;;  %v2202_v13 = vld [vmem:[%s8975_s30 + $0x600] sm:$0xff] }
 0x269   : > { %8203 = vmatprep.subr.bf16.mxu1 %v8202_v52  ;;  %v2190_v32 = vld [vmem:[%s8975_s30 + $0x570] sm:$0xff] }
 0x26a   : > { %v6640_v52 = vpop.f32.mrb[154].mxu0 }
 0x26b   : > { %2963 = vmatmul.mubr.f32.gmra.mrb[162].mxu1 %v2154_v23  ;;  %v6641_v36 = vpop.f32.mrb[155].mxu0 }
 0x26c   : > { %2967 = vmatprep.mubr.f32.mxu1 %v2167_v45  ;;  %8205 = vmatpush3.bf16.msra.mxu1 %v8204_v30  ;;  %v10934_v18 = vadd.f32 %v6641_v36, %v6640_v52  ;;  %v2203_v45 = vld [vmem:[%s8975_s30 + $0x608] sm:$0xff]  ;;  %v2214_v36 = vld [vmem:[%s8975_s30 + $0x690] sm:$0xff] }
 0x26d   : > { %8207 = vmatprep.subr.bf16.mxu1 %v8206_v48 }
 0x26e   : > { %v6643_v26 = vpop.f32.mrb[156].mxu0 }
 0x26f   : > { %2968 = vmatmul.mubr.f32.gmra.mrb[164].mxu1 %v2166_v3  ;;  %v6644_v23 = vpop.f32.mrb[157].mxu0  ;;  %v2215_v3 = vld [vmem:[%s8975_s30 + $0x698] sm:$0xff] }
 0x270   : > { %2972 = vmatprep.mubr.f32.mxu1 %v2179_v31  ;;  %8209 = vmatpush3.bf16.msra.mxu1 %v8208_v19  ;;  %v10939_v30 = vadd.f32 %v6644_v23, %v6643_v26 }
 0x271   : > { %8242 = vmatprep.subr.bf16.mxu1 %v12831_v62 }
 0x272   : > { %v6646_v48 = vpop.f32.mrb[158].mxu0 }
 0x273   : > { %2973 = vmatmul.mubr.f32.gmra.mrb[166].mxu1 %v2178_v51  ;;  %v6647_v5 = vpop.f32.mrb[159].mxu0  ;;  %v2227_v51 = vld [vmem:[%s8975_s30 + $0x728] sm:$0xff] }
 0x274   : > { %2977 = vmatprep.mubr.f32.mxu1 %v2191_v20  ;;  %v10943_v47 = vadd.f32 %v6647_v5, %v6646_v48 }
 0x276   : > { %v6649_v19 = vpop.f32.mrb[160].mxu0 }
 0x277   : > { %2978 = vmatmul.mubr.f32.gmra.mrb[168].mxu1 %v2190_v32  ;;  %v6650_v31 = vpop.f32.mrb[161].mxu0  ;;  %v2226_v32 = vld [vmem:[%s8975_s30 + $0x720] sm:$0xff] }
 0x278   : > { %2982 = vmatprep.mubr.f32.mxu1 %v2203_v45  ;;  %v10947_v52 = vadd.f32 %v6650_v31, %v6649_v19  ;;  %v2239_v45 = vld [vmem:[%s8975_s30 + $0x7b8] sm:$0xff]  ;;  %v2251_v19 = vld [vmem:[%s8975_s30 + $0x848] sm:$0x7] }
 0x27a   : > { %v6652_v20 = vpop.f32.mrb[162].mxu0 }
 0x27b   : > { %2983 = vmatmul.mubr.f32.gmra.mrb[170].mxu1 %v2202_v13  ;;  %v6653_v26 = vpop.f32.mrb[163].mxu0 }
 0x27c   : > { %2987 = vmatprep.mubr.f32.mxu1 %v2215_v3  ;;  %v10951_v23 = vadd.f32 %v6653_v26, %v6652_v20  ;;  %v2238_v3 = vld [vmem:[%s8975_s30 + $0x7b0] sm:$0xff]  ;;  %v2087_v20 = vld [vmem:[%s8975_s30 + $0x88] sm:$0xff] }
 0x27f   : > { %2988 = vmatmul.mubr.f32.gmra.mrb[172].mxu1 %v2214_v36  ;;  %v6655_v48 = vpop.f32.mrb[164].mxu0 }
 0x280   : > { %2992 = vmatprep.mubr.f32.mxu1 %v2227_v51  ;;  %v6656_v5 = vpop.f32.mrb[165].mxu0  ;;  %v2250_v51 = vld [vmem:[%s8975_s30 + $0x840] sm:$0x7] }
 0x281   : > { %v10955_v13 = vadd.f32 %v6656_v5, %v6655_v48  ;;  %v2099_v48 = vld [vmem:[%s8975_s30 + $0x118] sm:$0xff] }
 0x283   : > { %2993 = vmatmul.mubr.f32.gmra.mrb[174].mxu1 %v2226_v32  ;;  %v6658_v31 = vpop.f32.mrb[166].mxu0 }
 0x284   : > { %2997 = vmatprep.mubr.f32.mxu1 %v2239_v45  ;;  %v6659_v11 = vpop.f32.mrb[167].mxu0  ;;  %v2086_v45 = vld [vmem:[%s8975_s30 + $0x80] sm:$0xff] }
 0x285   : > { %v10959_v36 = vadd.f32 %v6659_v11, %v6658_v31 }
 0x287   : > { %2998 = vmatmul.mubr.f32.gmra.mrb[176].mxu1 %v2238_v3  ;;  %v6661_v26 = vpop.f32.mrb[168].mxu0  ;;  %v2098_v3 = vld [vmem:[%s8975_s30 + $0x110] sm:$0xff] }
 0x288   : > { %3002 = vmatprep.mubr.f32.mxu1 %v2251_v19  ;;  %v6662_v25 = vpop.f32.mrb[169].mxu0  ;;  %v2111_v19 = vld [vmem:[%s8975_s30 + $0x1a8] sm:$0xff] }
 0x289   : > { %v10963_v32 = vadd.f32 %v6662_v25, %v6661_v26 }
 0x28b   : > { %3003 = vmatmul.mubr.f32.gmra.mrb[178].mxu1 %v2250_v51  ;;  %v6664_v5 = vpop.f32.mrb[170].mxu0  ;;  %v2110_v51 = vld [vmem:[%s8975_s30 + $0x1a0] sm:$0xff] }
 0x28c   : > { %3212 = vmatprep.mubr.f32.mxu1 %v2087_v20  ;;  %v6665_v60 = vpop.f32.mrb[171].mxu0  ;;  %v2123_v20 = vld [vmem:[%s8975_s30 + $0x238] sm:$0xff] }
 0x28d   : > { %v10967_v11 = vadd.f32 %v6665_v60, %v6664_v5 }
 0x28f   : > { %3213 = vmatmul.mubr.f32.vlgmr.msra.gmra.mrb[180].mxu1 %v2086_v45  ;;  %v6667_v31 = vpop.f32.mrb[172].mxu0  ;;  %v2122_v45 = vld [vmem:[%s8975_s30 + $0x230] sm:$0xff] }
 0x290   : > { %3217 = vmatprep.mubr.f32.mxu1 %v2099_v48  ;;  %v6668_v54 = vpop.f32.mrb[173].mxu0  ;;  %v2135_v48 = vld [vmem:[%s8975_s30 + $0x2c8] sm:$0xff] }
 0x291   : > { %v10971_v25 = vadd.f32 %v6668_v54, %v6667_v31 }
 0x293   : > { %3218 = vmatmul.mubr.f32.gmra.mrb[182].mxu1 %v2098_v3  ;;  %v6670_v26 = vpop.f32.mrb[174].mxu0  ;;  %v2134_v3 = vld [vmem:[%s8975_s30 + $0x2c0] sm:$0xff] }
 0x294   : > { %3222 = vmatprep.mubr.f32.mxu1 %v2111_v19  ;;  %v6671_v59 = vpop.f32.mrb[175].mxu0  ;;  %v2147_v19 = vld [vmem:[%s8975_s30 + $0x358] sm:$0xff] }
 0x295   : > { %v10975_v60 = vadd.f32 %v6671_v59, %v6670_v26 }
 0x297   : > { %3223 = vmatmul.mubr.f32.gmra.mrb[184].mxu1 %v2110_v51  ;;  %v6673_v5 = vpop.f32.mrb[176].mxu0  ;;  %v2146_v51 = vld [vmem:[%s8975_s30 + $0x350] sm:$0xff] }
 0x298   : > { %3227 = vmatprep.mubr.f32.mxu1 %v2123_v20  ;;  %v6674_v21 = vpop.f32.mrb[177].mxu0  ;;  %v2159_v20 = vld [vmem:[%s8975_s30 + $0x3e8] sm:$0xff] }
 0x299   : > { %v10979_v54 = vadd.f32 %v6674_v21, %v6673_v5 }
 0x29b   : > { %3228 = vmatmul.mubr.f32.gmra.mrb[186].mxu1 %v2122_v45  ;;  %v6676_v31 = vpop.f32.mrb[178].mxu0  ;;  %v2158_v45 = vld [vmem:[%s8975_s30 + $0x3e0] sm:$0xff] }
 0x29c   : > { %3232 = vmatprep.mubr.f32.mxu1 %v2135_v48  ;;  %v6677_v22 = vpop.f32.mrb[179].mxu0  ;;  %v2171_v48 = vld [vmem:[%s8975_s30 + $0x478] sm:$0xff] }
 0x29d   : > { %v10983_v59 = vadd.f32 %v6677_v22, %v6676_v31 }
 0x29f   : > { %3233 = vmatmul.mubr.f32.gmra.mrb[188].mxu1 %v2134_v3  ;;  %v6788_v26 = vpop.f32.mrb[180].mxu0  ;;  %v2170_v3 = vld [vmem:[%s8975_s30 + $0x470] sm:$0xff] }
 0x2a0   : > { %3237 = vmatprep.mubr.f32.mxu1 %v2147_v19  ;;  %v6789_v56 = vpop.f32.mrb[181].mxu0  ;;  %v2183_v19 = vld [vmem:[%s8975_s30 + $0x508] sm:$0xff] }
 0x2a1   : > { %v10987_v21 = vadd.f32 %v6789_v56, %v6788_v26 }
 0x2a3   : > { %3238 = vmatmul.mubr.f32.gmra.mrb[190].mxu1 %v2146_v51  ;;  %v6791_v5 = vpop.f32.mrb[182].mxu0  ;;  %v2182_v51 = vld [vmem:[%s8975_s30 + $0x500] sm:$0xff] }
 0x2a4   : > { %3242 = vmatprep.mubr.f32.mxu1 %v2159_v20  ;;  %v6792_v33 = vpop.f32.mrb[183].mxu0  ;;  %v2195_v20 = vld [vmem:[%s8975_s30 + $0x598] sm:$0xff] }
 0x2a5   : > { %v10991_v22 = vadd.f32 %v6792_v33, %v6791_v5  ;;  %v2207_v5 = vld [vmem:[%s8975_s30 + $0x628] sm:$0xff] }
 0x2a7   : > { %3243 = vmatmul.mubr.f32.gmra.mrb[192].mxu1 %v2158_v45  ;;  %v6794_v31 = vpop.f32.mrb[184].mxu0 }
 0x2a8   : > { %3247 = vmatprep.mubr.f32.mxu1 %v2171_v48  ;;  %v6795_v29 = vpop.f32.mrb[185].mxu0  ;;  %v2194_v48 = vld [vmem:[%s8975_s30 + $0x590] sm:$0xff] }
 0x2a9   : > { %v10995_v56 = vadd.f32 %v6795_v29, %v6794_v31 }
 0x2ab   : > { %3248 = vmatmul.mubr.f32.gmra.mrb[194].mxu1 %v2170_v3  ;;  %v6797_v26 = vpop.f32.mrb[186].mxu0 }
 0x2ac   : > { %3252 = vmatprep.mubr.f32.mxu1 %v2183_v19  ;;  %v6798_v6 = vpop.f32.mrb[187].mxu0 }
 0x2ad   : > { %v11001_v33 = vadd.f32 %v6798_v6, %v6797_v26  ;;  %v2206_v26 = vld [vmem:[%s8975_s30 + $0x620] sm:$0xff] }
 0x2ae   : > { %v10999_v50 = vpop.f32.mrb[90].mxu1 }
 0x2af   : > { %v7602_v45 = vpop.f32.mrb[91].mxu1  ;;  %3253 = vmatmul.mubr.f32.gmra.mrb[196].mxu1 %v2182_v51  ;;  %v1905_v29 = vrot.slane %v10999_v50, 1  ;;  %v1991_v6 = vrot.slane %v10999_v50, 2 }
 0x2b0   : > { %3257 = vmatprep.mubr.f32.mxu1 %v2195_v20  ;;  %v6800_v0 = vpop.f32.mrb[188].mxu0 }
 0x2b1   : > { %v6801_v19 = vpop.f32.mrb[189].mxu0 }
 0x2b2   : > { %v11005_v3 = vpop.f32.mrb[92].mxu1  ;;  %v11011_v20 = vadd.f32 %v6801_v19, %v6800_v0 }
 0x2b3   : > { %v7605_v31 = vpop.f32.mrb[93].mxu1  ;;  %3258 = vmatmul.mubr.f32.gmra.mrb[198].mxu1 %v2194_v48  ;;  %v1906_v45 = vrot.slane %v11005_v3, 1  ;;  %v1992_v51 = vrot.slane %v11005_v3, 2 }
 0x2b4   : > { %12834 = vst [vmem:[#allocation67_spill] sm:$0xff] %v11011_v20  ;;  %3262 = vmatprep.mubr.f32.mxu1 %v2207_v5  ;;  %v6803_v61 = vpop.f32.mrb[190].mxu0 }
 0x2b5   : > { %v1907_v28 = vsel %vm1904_vm3, %v1905_v29, %v1906_v45  ;;  %v1993_v12 = vsel %vm1990_vm4, %v1991_v6, %v1992_v51  ;;  %v6804_v31 = vpop.f32.mrb[191].mxu0  ;;  %v2218_v29 = vld [vmem:[%s8975_s30 + $0x6b0] sm:$0xff] }
 0x2b6   : > { %1934 = vrot.lane.b32.xlu0 %v1907_v28, %s8760_s26  ;;  %v11018_v48 = vpop.f32.mrb[94].mxu1  ;;  %v11022_v19 = vadd.f32 %v6804_v31, %v6803_v61 }
 0x2b7   : > { %v7608_v9 = vpop.f32.mrb[95].mxu1  ;;  %3263 = vmatmul.mubr.f32.gmra.mrb[200].mxu1 %v2206_v26  ;;  %v1994_v0 = vrot.slane %v11018_v48, 2  ;;  %v1908_v5 = vrot.slane %v11018_v48, 1 }
 0x2b8   : > { %12835 = vst [vmem:[#allocation68_spill] sm:$0xff] %v11022_v19  ;;  %3267 = vmatprep.mubr.f32.mxu1 %v2219_v10  ;;  %v6806_v43 = vpop.f32.mrb[192].mxu0 }
 0x2b9   : > { %v1995_v6 = vsel %vm1990_vm4, %v1992_v51, %v1994_v0  ;;  %v1909_v28 = vsel %vm1904_vm3, %v1906_v45, %v1908_v5  ;;  %v6807_v26 = vpop.f32.mrb[193].mxu0 }
 0x2ba   : > { %2020 = vrot.lane.b32.xlu0 %v1993_v12, %s8761_s27  ;;  %2022 = vrot.lane.b32.xlu1 %v1995_v6, %s8761_s27  ;;  %v11030_v9 = vpop.f32.mrb[96].mxu1  ;;  %v11034_v51 = vadd.f32 %v6807_v26, %v6806_v43  ;;  %v5827_v43 = vld [vmem:[%s12689_s2 + $0x58] sm:$0xff] }
 0x2bb   : > { %v7611_v61 = vpop.f32.mrb[97].mxu1  ;;  %3268 = vmatmul.mubr.f32.gmra.mrb[202].mxu1 %v2218_v29  ;;  %v1910_v10 = vrot.slane %v11030_v9, 1  ;;  %v1996_v31 = vrot.slane %v11030_v9, 2 }
 0x2bc   : > { %12836 = vst [vmem:[#allocation69_spill] sm:$0xff] %v11034_v51  ;;  %3272 = vmatprep.mubr.f32.mxu1 %v2231_v8  ;;  %v6809_v19 = vpop.f32.mrb[194].mxu0  ;;  %v5828_v8 = vld [vmem:[%s12689_s2 + $0x60] sm:$0xff] }
 0x2bd   : > { %v1911_v45 = vsel %vm1904_vm3, %v1908_v5, %v1910_v10  ;;  %v1997_v12 = vsel %vm1990_vm4, %v1994_v0, %v1996_v31  ;;  %v6810_v5 = vpop.f32.mrb[195].mxu0  ;;  %v8243_v26 = vpack.c.bf16 %v5828_v8, %v5827_v43  ;;  %v3992_v61 = vld [vmem:[%s12688_s1 + $0x80] sm:$0xff]  ;;  %v3977_v43 = vld [vmem:[%s12688_s1 + $0x8] sm:$0xff] }
 0x2be   : > { %1936 = vrot.lane.b32.xlu0 %v1909_v28, %s8760_s26  ;;  %1938 = vrot.lane.b32.xlu1 %v1911_v45, %s8760_s26  ;;  %v11042_v29 = vpop.f32.mrb[98].mxu1  ;;  %v3993_v45 = vld [vmem:[%s12688_s1 + $0x88] sm:$0xff]  ;;  %v11058_v51 = vadd.f32 %v6810_v5, %v6809_v19 }
 0x2bf   : > { %v7614_v6 = vpop.f32.mrb[99].mxu1  ;;  %3273 = vmatmul.mubr.f32.gmra.mrb[204].mxu1 %v2230_v40  ;;  %v1912_v0 = vrot.slane %v11042_v29, 1  ;;  %v1998_v28 = vrot.slane %v11042_v29, 2  ;;  %v2242_v40 = vld [vmem:[%s8975_s30 + $0x7d0] sm:$0xff]  ;;  %v8257_v16 = vpack.c.bf16 %v3993_v45, %v3992_v61 }
 0x2c0   : > { %12837 = vst [vmem:[#allocation70_spill] sm:$0xff] %v11058_v51  ;;  %v3976_v6 = vld [vmem:[%s12688_s1] sm:$0xff]  ;;  %3277 = vmatprep.mubr.f32.mxu1 %v2243_v17  ;;  %8244 = vmatpush3.bf16.msra.mxu1 %v8243_v26  ;;  %v6812_v5 = vpop.f32.mrb[196].mxu0 }
 0x2c1   : > { %v1913_v8 = vsel %vm1904_vm3, %v1910_v10, %v1912_v0  ;;  %v1999_v20 = vsel %vm1990_vm4, %v1996_v31, %v1998_v28  ;;  %v8259_v19 = vpack.c.bf16 %v3977_v43, %v3976_v6  ;;  %v6813_v61 = vpop.f32.mrb[197].mxu0  ;;  %8258 = vmatprep.subr.bf16.mxu0 %v8257_v16  ;;  %v2254_v31 = vld [vmem:[%s8975_s30 + $0x860] sm:$0x7]  ;;  %8245 = vmatprep.subr.bf16.mxu1 %v12831_v62  ;;  %v3994_v16 = vld [vmem:[%s12688_s1 + $0x90] sm:$0xff] }
 0x2c2   : > { %2024 = vrot.lane.b32.xlu0 %v1997_v12, %s8761_s27  ;;  %1940 = vrot.lane.b32.xlu1 %v1913_v8, %s8760_s26  ;;  %v11072_v17 = vpop.f32.mrb[100].mxu1  ;;  %v11076_v57 = vadd.f32 %v6813_v61, %v6812_v5  ;;  %v5829_v5 = vld [vmem:[%s12689_s2 + $0x68] sm:$0xff]  ;;  %v5830_v61 = vld [vmem:[%s12689_s2 + $0x70] sm:$0xff] }
 0x2c3   : > { %v7617_v45 = vpop.f32.mrb[101].mxu1  ;;  %3278 = vmatmul.mubr.f32.gmra.mrb[206].mxu1 %v2242_v40  ;;  %v1914_v51 = vrot.slane %v11072_v17, 1  ;;  %v2000_v10 = vrot.slane %v11072_v17, 2  ;;  %8260 = vmatpush3.bf16.msra.mxu0 %v8259_v19 }
 0x2c4   : > { %12838 = vst [vmem:[#allocation71_spill] sm:$0xff] %v11076_v57  ;;  %3282 = vmatprep.mubr.f32.mxu1 %v2255_v58  ;;  %v6815_v6 = vpop.f32.mrb[198].mxu0  ;;  %v3995_v58 = vld [vmem:[%s12688_s1 + $0x98] sm:$0xff]  ;;  %v3978_v45 = vld [vmem:[%s12688_s1 + $0x10] sm:$0xff] }
 0x2c5   : > { %v1915_v26 = vsel %vm1904_vm3, %v1912_v0, %v1914_v51  ;;  %v2001_v12 = vsel %vm1990_vm4, %v1998_v28, %v2000_v10  ;;  %v6816_v0 = vpop.f32.mrb[199].mxu0 }
 0x2c6   : > { %2026 = vrot.lane.b32.xlu1 %v1999_v20, %s8761_s27  ;;  %1942 = vrot.lane.b32.xlu0 %v1915_v26, %s8760_s26  ;;  %v11084_v40 = vpop.f32.mrb[102].mxu1  ;;  %v8261_v20 = vpack.c.bf16 %v3995_v58, %v3994_v16  ;;  %v11094_v19 = vadd.f32 %v6816_v0, %v6815_v6  ;;  %v3979_v26 = vld [vmem:[%s12688_s1 + $0x18] sm:$0xff] }
 0x2c7   : > { %12839 = vst [vmem:[#allocation72_spill] sm:$0xff] %v11084_v40  ;;  %v7620_v43 = vpop.f32.mrb[103].mxu1  ;;  %3283 = vmatmul.mubr.f32.gmra.mrb[208].mxu1 %v2254_v31  ;;  %v1916_v28 = vrot.slane %v11084_v40, 1  ;;  %v2002_v8 = vrot.slane %v11084_v40, 2  ;;  %v8246_v31 = vpack.c.bf16 %v5830_v61, %v5829_v5  ;;  %v8263_v58 = vpack.c.bf16 %v3979_v26, %v3978_v45 }
 0x2c8   : > { %12840 = vst [vmem:[#allocation73_spill] sm:$0xff] %v11094_v19  ;;  %7667 = vmatprep.mubr.msk.f32.mxu1 %vm8759_vm1, %v12833_v63  ;;  %8262 = vmatprep.subr.bf16.mxu0 %v8261_v20  ;;  %v6818_v0 = vpop.f32.mrb[200].mxu0 }
 0x2c9   : > { %v1917_v6 = vsel %vm1904_vm3, %v1914_v51, %v1916_v28  ;;  %v2003_v16 = vsel %vm1990_vm4, %v2000_v10, %v2002_v8  ;;  %v6819_v5 = vpop.f32.mrb[201].mxu0  ;;  %8247 = vmatpush3.bf16.msra.mxu1 %v8246_v31  ;;  %8264 = vmatpush3.bf16.msra.mxu0 %v8263_v58  ;;  %v3997_v31 = vld [vmem:[%s12688_s1 + $0xa8] sm:$0xff] }
 0x2ca   : > { %2028 = vrot.lane.b32.xlu0 %v2001_v12, %s8761_s27  ;;  %1944 = vrot.lane.b32.xlu1 %v1917_v6, %s8760_s26  ;;  %v11114_v43 = vpop.f32.mrb[104].mxu1  ;;  %v11118_v51 = vadd.f32 %v6819_v5, %v6818_v0  ;;  %v3981_v0 = vld [vmem:[%s12688_s1 + $0x28] sm:$0xff] }
 0x2cb   : > { %12841 = vst [vmem:[#allocation74_spill] sm:$0xff] %v11114_v43  ;;  %v1918_v61 = vrot.slane %v11114_v43, 1  ;;  %v2004_v19 = vrot.slane %v11114_v43, 2  ;;  %v7623_v57 = vpop.f32.mrb[105].mxu1  ;;  %8248 = vmatprep.subr.bf16.mxu1 %v12831_v62 }
 0x2cc   : > { %12842 = vst [vmem:[#allocation75_spill] sm:$0xff] %v11118_v51  ;;  %v6821_v20 = vpop.f32.mrb[202].mxu0  ;;  %v3996_v57 = vld [vmem:[%s12688_s1 + $0xa0] sm:$0xff] }
 0x2cd   : > { %v1919_v10 = vsel %vm1904_vm3, %v1916_v28, %v1918_v61  ;;  %v2005_v12 = vsel %vm1990_vm4, %v2002_v8, %v2004_v19  ;;  %v6822_v26 = vpop.f32.mrb[203].mxu0  ;;  %v8265_v58 = vpack.c.bf16 %v3997_v31, %v3996_v57  ;;  %v5831_v31 = vld [vmem:[%s12689_s2 + $0x78] sm:$0xff] }
 0x2ce   : > { %2030 = vrot.lane.b32.xlu1 %v2003_v16, %s8761_s27  ;;  %1946 = vrot.lane.b32.xlu0 %v1919_v10, %s8760_s26  ;;  %v11125_v45 = vpop.f32.mrb[106].mxu1  ;;  %v3980_v16 = vld [vmem:[%s12688_s1 + $0x20] sm:$0xff]  ;;  %v11141_v5 = vadd.f32 %v6822_v26, %v6821_v20 }
 0x2cf   : > { %12843 = vst [vmem:[#allocation76_spill] sm:$0xff] %v11125_v45  ;;  %v1920_v28 = vrot.slane %v11125_v45, 1  ;;  %v2006_v8 = vrot.slane %v11125_v45, 2  ;;  %v7626_v6 = vpop.f32.mrb[107].mxu1  ;;  %v8267_v10 = vpack.c.bf16 %v3981_v0, %v3980_v16  ;;  %8266 = vmatprep.subr.bf16.mxu0 %v8265_v58  ;;  %v5832_v20 = vld [vmem:[%s12689_s2 + $0x80] sm:$0xff] }
 0x2d0   : > { %12844 = vst [vmem:[#allocation77_spill] sm:$0xff] %v11141_v5  ;;  %v6824_v40 = vpop.f32.mrb[204].mxu0 }
 0x2d1   : > { %v1921_v51 = vsel %vm1904_vm3, %v1918_v61, %v1920_v28  ;;  %v2007_v43 = vsel %vm1990_vm4, %v2004_v19, %v2006_v8  ;;  %v6825_v26 = vpop.f32.mrb[205].mxu0  ;;  %8268 = vmatpush3.bf16.msra.mxu0 %v8267_v10 }
 0x2d2   : > { %2032 = vrot.lane.b32.xlu0 %v2005_v12, %s8761_s27  ;;  %1948 = vrot.lane.b32.xlu1 %v1921_v51, %s8760_s26  ;;  %v11147_v57 = vpop.f32.mrb[108].mxu1  ;;  %v8249_v12 = vpack.c.bf16 %v5832_v20, %v5831_v31  ;;  %v11157_v58 = vadd.f32 %v6825_v26, %v6824_v40  ;;  %v3999_v40 = vld [vmem:[%s12688_s1 + $0xb8] sm:$0xff] }
 0x2d3   : > { %12845 = vst [vmem:[#allocation78_spill] sm:$0xff] %v11147_v57  ;;  %v1922_v61 = vrot.slane %v11147_v57, 1  ;;  %v2008_v19 = vrot.slane %v11147_v57, 2  ;;  %v7629_v6 = vpop.f32.mrb[109].mxu1  ;;  %v3983_v26 = vld [vmem:[%s12688_s1 + $0x38] sm:$0xff] }
 0x2d4   : > { %12846 = vst [vmem:[#allocation79_spill] sm:$0xff] %v11157_v58  ;;  %8250 = vmatpush3.bf16.msra.mxu1 %v8249_v12  ;;  %v6827_v0 = vpop.f32.mrb[206].mxu0  ;;  %v3998_v6 = vld [vmem:[%s12688_s1 + $0xb0] sm:$0xff] }
 0x2d5   : > { %v1923_v51 = vsel %vm1904_vm3, %v1920_v28, %v1922_v61  ;;  %v2009_v16 = vsel %vm1990_vm4, %v2006_v8, %v2008_v19  ;;  %v6828_v10 = vpop.f32.mrb[207].mxu0  ;;  %v8269_v20 = vpack.c.bf16 %v3999_v40, %v3998_v6  ;;  %8251 = vmatprep.subr.bf16.mxu1 %v12831_v62 }
 0x2d6   : > { %2034 = vrot.lane.b32.xlu1 %v2007_v43, %s8761_s27  ;;  %1950 = vrot.lane.b32.xlu0 %v1923_v51, %s8760_s26  ;;  %v11163_v5 = vpop.f32.mrb[110].mxu1  ;;  %v3982_v43 = vld [vmem:[%s12688_s1 + $0x30] sm:$0xff]  ;;  %v11179_v12 = vadd.f32 %v6828_v10, %v6827_v0  ;;  %v5833_v0 = vld [vmem:[%s12689_s2 + $0x88] sm:$0xff] }
 0x2d7   : > { %12847 = vst [vmem:[#allocation80_spill] sm:$0xff] %v11163_v5  ;;  %v1924_v28 = vrot.slane %v11163_v5, 1  ;;  %v2010_v8 = vrot.slane %v11163_v5, 2  ;;  %v7632_v31 = vpop.f32.mrb[111].mxu1  ;;  %v8271_v51 = vpack.c.bf16 %v3983_v26, %v3982_v43  ;;  %8270 = vmatprep.subr.bf16.mxu0 %v8269_v20  ;;  %v5834_v10 = vld [vmem:[%s12689_s2 + $0x90] sm:$0xff] }
 0x2d8   : > { %12848 = vst [vmem:[#allocation81_spill] sm:$0xff] %v11179_v12  ;;  %v6830_v31 = vpop.f32.mrb[208].mxu0 }
 0x2d9   : > { %v1925_v58 = vsel %vm1904_vm3, %v1922_v61, %v1924_v28  ;;  %v2011_v57 = vsel %vm1990_vm4, %v2008_v19, %v2010_v8  ;;  %v6831_v40 = vpop.f32.mrb[209].mxu0  ;;  %8272 = vmatpush3.bf16.msra.mxu0 %v8271_v51  ;;  %v4000_v51 = vld [vmem:[%s12688_s1 + $0xc0] sm:$0xff] }
 0x2da   : > { %2036 = vrot.lane.b32.xlu0 %v2009_v16, %s8761_s27  ;;  %1952 = vrot.lane.b32.xlu1 %v1925_v58, %s8760_s26  ;;  %v11186_v6 = vpop.f32.mrb[112].mxu1  ;;  %v11196_v16 = vadd.f32 %v6831_v40, %v6830_v31  ;;  %v8252_v58 = vpack.c.bf16 %v5834_v10, %v5833_v0  ;;  %v4001_v31 = vld [vmem:[%s12688_s1 + $0xc8] sm:$0xff] }
 0x2db   : > { %12849 = vst [vmem:[#allocation82_spill] sm:$0xff] %v11186_v6  ;;  %v1926_v61 = vrot.slane %v11186_v6, 1  ;;  %v2012_v19 = vrot.slane %v11186_v6, 2  ;;  %v7635_v20 = vpop.f32.mrb[113].mxu1  ;;  %v8273_v10 = vpack.c.bf16 %v4001_v31, %v4000_v51 }
 0x2dc   : > { %12850 = vst [vmem:[#allocation83_spill] sm:$0xff] %v11196_v16  ;;  %v6942_v43 = vpop.f32.mrb[210].mxu0  ;;  %8253 = vmatpush3.bf16.msra.mxu1 %v8252_v58  ;;  %v3985_v20 = vld [vmem:[%s12688_s1 + $0x48] sm:$0xff] }
 0x2dd   : > { %v1927_v26 = vsel %vm1904_vm3, %v1924_v28, %v1926_v61  ;;  %v2013_v12 = vsel %vm1990_vm4, %v2010_v8, %v2012_v19  ;;  %v6943_v5 = vpop.f32.mrb[211].mxu0  ;;  %8254 = vmatprep.subr.bf16.mxu1 %v12831_v62  ;;  %8274 = vmatprep.subr.bf16.mxu0 %v8273_v10 }
 0x2de   : > { %2038 = vrot.lane.b32.xlu1 %v2011_v57, %s8761_s27  ;;  %1954 = vrot.lane.b32.xlu0 %v1927_v26, %s8760_s26  ;;  %v11202_v45 = vpop.f32.mrb[114].mxu1  ;;  %v6944_v40 = vadd.f32 %v6943_v5, %v6942_v43  ;;  %v3984_v57 = vld [vmem:[%s12688_s1 + $0x40] sm:$0xff] }
 0x2df   : > { %12851 = vst [vmem:[#allocation84_spill] sm:$0xff] %v11202_v45  ;;  %v1928_v28 = vrot.slane %v11202_v45, 1  ;;  %v2014_v8 = vrot.slane %v11202_v45, 2  ;;  %v7638_v0 = vpop.f32.mrb[115].mxu1  ;;  %v8275_v58 = vpack.c.bf16 %v3985_v20, %v3984_v57 }
 0x2e0   : > { %v6945_v26 = vpop.f32.mrb[212].mxu0  ;;  %v3488_v31 = vrot.slane %v6944_v40, 1 }
 0x2e1   : > { %v1929_v5 = vsel %vm1904_vm3, %v1926_v61, %v1928_v28  ;;  %v2015_v43 = vsel %vm1990_vm4, %v2012_v19, %v2014_v8  ;;  %v6946_v16 = vpop.f32.mrb[213].mxu0  ;;  %8276 = vmatpush3.bf16.msra.mxu0 %v8275_v58 }
 0x2e2   : > { %2040 = vrot.lane.b32.xlu0 %v2013_v12, %s8761_s27  ;;  %1956 = vrot.lane.b32.xlu1 %v1929_v5, %s8760_s26  ;;  %v11223_v51 = vpop.f32.mrb[116].mxu1  ;;  %v6947_v0 = vadd.f32 %v6946_v16, %v6945_v26 }
 0x2e3   : > { %12852 = vst [vmem:[#allocation85_spill] sm:$0xff] %v11223_v51  ;;  %v1930_v45 = vrot.slane %v11223_v51, 1  ;;  %v2016_v62 = vrot.slane %v11223_v51, 2  ;;  %v7641_v57 = vpop.f32.mrb[117].mxu1 }
 0x2e4   : > { %v3489_v20 = vrot.slane %v6947_v0, 1  ;;  %v6948_v61 = vpop.f32.mrb[214].mxu0 }
 0x2e5   : > { %v1931_v19 = vsel %vm1904_vm3, %v1928_v28, %v1930_v45  ;;  %v2017_v10 = vsel %vm1990_vm4, %v2014_v8, %v2016_v62  ;;  %v6949_v6 = vpop.f32.mrb[215].mxu0  ;;  %v4002_v8 = vld [vmem:[%s12688_s1 + $0xd0] sm:$0xff] }
 0x2e6   : > { %2042 = vrot.lane.b32.xlu1 %v2015_v43, %s8761_s27  ;;  %1958 = vrot.lane.b32.xlu0 %v1931_v19, %s8760_s26  ;;  %v1871_v12 = vpop.f32.mrb[118].mxu1  ;;  %v6950_v40 = vadd.f32 %v6949_v6, %v6948_v61  ;;  %v11232_v16 = vsel %vm1904_vm3, %v3488_v31, %v3489_v20  ;;  %v4003_v6 = vld [vmem:[%s12688_s1 + $0xd8] sm:$0xff] }
 0x2e7   : > { %v1932_v26 = vrot.slane %v1871_v12, 1  ;;  %v2018_v5 = vrot.slane %v1871_v12, 2  ;;  %v7644_v57 = vpop.f32.mrb[119].mxu1  ;;  %v8277_v61 = vpack.c.bf16 %v4003_v6, %v4002_v8 }
 0x2e8   : > { %v3491_v58 = vrot.slane %v6950_v40, 1  ;;  %v6951_v0 = vpop.f32.mrb[216].mxu0 }
 0x2e9   : > { %v1933_v51 = vsel %vm1904_vm3, %v1930_v45, %v1932_v26  ;;  %v2019_v28 = vsel %vm1990_vm4, %v2016_v62, %v2018_v5  ;;  %v6952_v43 = vpop.f32.mrb[217].mxu0  ;;  %v3986_v45 = vld [vmem:[%s12688_s1 + $0x50] sm:$0xff]  ;;  %v3987_v62 = vld [vmem:[%s12688_s1 + $0x58] sm:$0xff]  ;;  %8278 = vmatprep.subr.bf16.mxu0 %v8277_v61 }
 0x2ea   : > { %2044 = vrot.lane.b32.xlu0 %v2017_v10, %s8761_s27  ;;  %1960 = vrot.lane.b32.xlu1 %v1933_v51, %s8760_s26  ;;  %v6557_v31 = vpop.f32.mrb[120].mxu1  ;;  %v6953_v19 = vadd.f32 %v6952_v43, %v6951_v0  ;;  %v11251_v12 = vsel %vm1904_vm3, %v3489_v20, %v3491_v58  ;;  %v8279_v26 = vpack.c.bf16 %v3987_v62, %v3986_v45  ;;  %v5835_v51 = vld [vmem:[%s12689_s2 + $0x98] sm:$0xff]  ;;  %v5836_v10 = vld [vmem:[%s12689_s2 + $0xa0] sm:$0xff] }
 0x2eb   : > { %v6558_v40 = vpop.f32.mrb[121].mxu1  ;;  %v8255_v6 = vpack.c.bf16 %v5836_v10, %v5835_v51  ;;  %v4004_v20 = vld [vmem:[%s12688_s1 + $0xe0] sm:$0xff]  ;;  %v4005_v43 = vld [vmem:[%s12688_s1 + $0xe8] sm:$0xff] }
 0x2ec   : > { %v6559_v5 = vadd.f32 %v6558_v40, %v6557_v31  ;;  %v3493_v57 = vrot.slane %v6953_v19, 1  ;;  %v6954_v8 = vpop.f32.mrb[218].mxu0  ;;  %8280 = vmatpush3.bf16.msra.mxu0 %v8279_v26  ;;  %v8281_v62 = vpack.c.bf16 %v4005_v43, %v4004_v20  ;;  %v3988_v40 = vld [vmem:[%s12688_s1 + $0x60] sm:$0xff]  ;;  %v3989_v26 = vld [vmem:[%s12688_s1 + $0x68] sm:$0xff] }
 0x2ed   : > { %v6955_v0 = vpop.f32.mrb[219].mxu0  ;;  %8256 = vmatpush3.bf16.msra.mxu1 %v8255_v6  ;;  %v8283_v10 = vpack.c.bf16 %v3989_v26, %v3988_v40  ;;  %v4007_v6 = vld [vmem:[%s12688_s1 + $0xf8] sm:$0xff] }
 0x2ee   : > { %v2655_v31 = vadd.f32 %v6559_v5, %v10747_v35  ;;  %2046 = vrot.lane.b32.xlu1 %v2019_v28, %s8761_s27  ;;  %v6560_v61 = vpop.f32.mrb[122].mxu1  ;;  %v6956_v45 = vadd.f32 %v6955_v0, %v6954_v8  ;;  %v11268_v19 = vsel %vm1904_vm3, %v3491_v58, %v3493_v57  ;;  %8282 = vmatprep.subr.bf16.mxu0 %v8281_v62  ;;  %v4006_v0 = vld [vmem:[%s12688_s1 + $0xf0] sm:$0xff]  ;;  %v3991_v62 = vld [vmem:[%s12688_s1 + $0x78] sm:$0xff] }
 0x2ef   : > { %v6561_v51 = vpop.f32.mrb[123].mxu1  ;;  %7665 = vmatprep.subr.mxu1 %v12833_v63 }
 0x2f0   : > { %v6562_v35 = vadd.f32 %v6561_v51, %v6560_v61  ;;  %v11277_v28 = vadd.f32 %v10920_v14, %v2655_v31  ;;  %v3495_v5 = vrot.slane %v6956_v45, 1  ;;  %v6957_v8 = vpop.f32.mrb[220].mxu0  ;;  %8284 = vmatpush3.bf16.msra.mxu0 %v8283_v10  ;;  %v8285_v61 = vpack.c.bf16 %v4007_v6, %v4006_v0  ;;  %v3990_v45 = vld [vmem:[%s12688_s1 + $0x70] sm:$0xff] }
 0x2f1   : > { %v6958_v58 = vpop.f32.mrb[221].mxu0  ;;  %v8287_v26 = vpack.c.bf16 %v3991_v62, %v3990_v45  ;;  %v8640_v62 = vld [vmem:[%s8975_s30 + $0x60] sm:$0xff] }
 0x2f2   : > { %v2660_v20 = vadd.f32 %v6562_v35, %v10772_v42  ;;  %v6563_v43 = vpop.f32.mrb[124].mxu1  ;;  %v6959_v14 = vadd.f32 %v6958_v58, %v6957_v8  ;;  %v11288_v31 = vsel %vm1904_vm3, %v3493_v57, %v3495_v5  ;;  %v5837_v57 = vld [vmem:[%s12689_s2 + $0xa8] sm:$0xf]  ;;  %8286 = vmatprep.subr.bf16.mxu0 %v8285_v61 }
 0x2f3   : > { %v6564_v40 = vpop.f32.mrb[125].mxu1  ;;  %7666 = vmatpush3.msk.msra.mxu1 %vm1731_vm0, %v5837_v57 }
 0x2f4   : > { %v6565_v51 = vadd.f32 %v6564_v40, %v6563_v43  ;;  %v11297_v10 = vadd.f32 %v10930_v49, %v2660_v20  ;;  %v3497_v42 = vrot.slane %v6959_v14, 1  ;;  %v6960_v35 = vpop.f32.mrb[222].mxu0  ;;  %8288 = vmatpush3.bf16.msra.mxu0 %v8287_v26  ;;  %v8641_v26 = vld [vmem:[%s8975_s30 + $0xf8] sm:$0xff] }
 0x2f5   : > { %v6961_v8 = vpop.f32.mrb[223].mxu0 }
 0x2f6   : > { %v2665_v58 = vadd.f32 %v6565_v51, %v10778_v7  ;;  %v6566_v0 = vpop.f32.mrb[126].mxu1  ;;  %v6962_v6 = vadd.f32 %v6961_v8, %v6960_v35  ;;  %v11305_v49 = vsel %vm1904_vm3, %v3495_v5, %v3497_v42 }
 0x2f7   : > { %v6567_v20 = vpop.f32.mrb[127].mxu1  ;;  %4137 = vmatmul.mubr.f32.vlgmr.msra.gmra.mrb[240].mxu0 %v8640_v62  ;;  %v8643_v62 = vld [vmem:[%s8975_s30 + $0x188] sm:$0xff] }
 0x2f8   : > { %v6568_v43 = vadd.f32 %v6567_v20, %v6566_v0  ;;  %v11308_v14 = vadd.f32 %v10934_v18, %v2665_v58  ;;  %v3499_v45 = vrot.slane %v6962_v6, 1  ;;  %v6963_v61 = vpop.f32.mrb[224].mxu0  ;;  %4141 = vmatprep.mubr.f32.mxu0 %v8641_v26  ;;  %v8642_v6 = vld [vmem:[%s8975_s30 + $0xf0] sm:$0xff] }
 0x2f9   : > { %v6964_v40 = vpop.f32.mrb[225].mxu0 }
 0x2fa   : > { %v2670_v7 = vadd.f32 %v6568_v43, %v10783_v39  ;;  %v6569_v51 = vpop.f32.mrb[128].mxu1  ;;  %v6965_v57 = vadd.f32 %v6964_v40, %v6963_v61  ;;  %v11314_v5 = vsel %vm1904_vm3, %v3497_v42, %v3499_v45 }
 0x2fb   : > { %12853 = vst [vmem:[#allocation86_spill] sm:$0xff] %v11314_v5  ;;  %v6570_v35 = vpop.f32.mrb[129].mxu1  ;;  %4142 = vmatmul.mubr.f32.gmra.mrb[242].mxu0 %v8642_v6  ;;  %v8645_v6 = vld [vmem:[%s8975_s30 + $0x218] sm:$0xff]  ;;  %v8647_v5 = vld [vmem:[%s8975_s30 + $0x2a8] sm:$0xff] }
 0x2fc   : > { %v6571_v8 = vadd.f32 %v6570_v35, %v6569_v51  ;;  %v11317_v18 = vadd.f32 %v10939_v30, %v2670_v7  ;;  %v3501_v58 = vrot.slane %v6965_v57, 1  ;;  %v6966_v0 = vpop.f32.mrb[226].mxu0  ;;  %4146 = vmatprep.mubr.f32.mxu0 %v8643_v62  ;;  %v4024_v7 = vld [vmem:[%s12688_s1 + $0x180] sm:$0xff]  ;;  %v4025_v51 = vld [vmem:[%s12688_s1 + $0x188] sm:$0xff] }
 0x2fd   : > { %v6967_v20 = vpop.f32.mrb[227].mxu0  ;;  %v8644_v35 = vld [vmem:[%s8975_s30 + $0x180] sm:$0xff] }
 0x2fe   : > { %v2675_v39 = vadd.f32 %v6571_v8, %v10789_v15  ;;  %v6572_v43 = vpop.f32.mrb[130].mxu1  ;;  %v6968_v61 = vadd.f32 %v6967_v20, %v6966_v0  ;;  %v11323_v42 = vsel %vm1904_vm3, %v3499_v45, %v3501_v58  ;;  %v8289_v8 = vpack.c.bf16 %v4025_v51, %v4024_v7  ;;  %v4056_v45 = vld [vmem:[%s12688_s1 + $0x280] sm:$0xff] }
 0x2ff   : > { %12854 = vst [vmem:[#allocation87_spill] sm:$0xff] %v11323_v42  ;;  %v6573_v40 = vpop.f32.mrb[131].mxu1  ;;  %4147 = vmatmul.mubr.f32.gmra.mrb[244].mxu0 %v8644_v35 }
 0x300   : > { %v6574_v26 = vadd.f32 %v6573_v40, %v6572_v43  ;;  %v11326_v30 = vadd.f32 %v10943_v47, %v2675_v39  ;;  %v3503_v15 = vrot.slane %v6968_v61, 1  ;;  %v6969_v57 = vpop.f32.mrb[228].mxu0  ;;  %v4057_v47 = vld [vmem:[%s12688_s1 + $0x288] sm:$0xff]  ;;  %4151 = vmatprep.mubr.f32.mxu0 %v8645_v6  ;;  %v4040_v43 = vld [vmem:[%s12688_s1 + $0x200] sm:$0xff]  ;;  %8290 = vmatprep.subr.bf16.mxu1 %v8289_v8 }
 0x301   : > { %v6970_v0 = vpop.f32.mrb[229].mxu0  ;;  %v8321_v39 = vpack.c.bf16 %v4057_v47, %v4056_v45  ;;  %v4041_v61 = vld [vmem:[%s12688_s1 + $0x208] sm:$0xff]  ;;  %v8646_v47 = vld [vmem:[%s8975_s30 + $0x210] sm:$0xff] }
 0x302   : > { %v2680_v20 = vadd.f32 %v6574_v26, %v10795_v44  ;;  %v6575_v62 = vpop.f32.mrb[132].mxu1  ;;  %v6971_v40 = vadd.f32 %v6970_v0, %v6969_v57  ;;  %v8323_v51 = vpack.c.bf16 %v4041_v61, %v4040_v43  ;;  %v11350_v35 = vsel %vm1904_vm3, %v3501_v58, %v3503_v15  ;;  %v8648_v61 = vld [vmem:[%s8975_s30 + $0x2a0] sm:$0xff] }
 0x303   : > { %v6576_v7 = vpop.f32.mrb[133].mxu1  ;;  %8322 = vmatprep.subr.bf16.mxu0 %v8321_v39  ;;  %4152 = vmatmul.mubr.f32.gmra.mrb[246].mxu0 %v8646_v47 }
 0x304   : > { %v6577_v6 = vadd.f32 %v6576_v7, %v6575_v62  ;;  %v11353_v44 = vadd.f32 %v10947_v52, %v2680_v20  ;;  %v3505_v26 = vrot.slane %v6971_v40, 1  ;;  %v6972_v45 = vpop.f32.mrb[230].mxu0  ;;  %8324 = vmatpush3.bf16.msra.mxu0 %v8323_v51  ;;  %4156 = vmatprep.mubr.f32.mxu0 %v8647_v5  ;;  %v4058_v5 = vld [vmem:[%s12688_s1 + $0x290] sm:$0xff] }
 0x305   : > { %v6973_v42 = vpop.f32.mrb[231].mxu0  ;;  %v4042_v51 = vld [vmem:[%s12688_s1 + $0x210] sm:$0xff] }
 0x306   : > { %v2685_v57 = vadd.f32 %v6577_v6, %v10801_v1  ;;  %v6578_v8 = vpop.f32.mrb[134].mxu1  ;;  %v6974_v58 = vadd.f32 %v6973_v42, %v6972_v45  ;;  %v11359_v0 = vsel %vm1904_vm3, %v3503_v15, %v3505_v26  ;;  %v4059_v1 = vld [vmem:[%s12688_s1 + $0x298] sm:$0xff] }
 0x307   : > { %v6579_v52 = vpop.f32.mrb[135].mxu1  ;;  %4157 = vmatmul.mubr.f32.gmra.mrb[248].mxu0 %v8648_v61  ;;  %v8649_v15 = vld [vmem:[%s8975_s30 + $0x338] sm:$0xff]  ;;  %v8325_v7 = vpack.c.bf16 %v4059_v1, %v4058_v5  ;;  %v8650_v61 = vld [vmem:[%s8975_s30 + $0x330] sm:$0xff]  ;;  %v8651_v1 = vld [vmem:[%s8975_s30 + $0x3c8] sm:$0xff] }
 0x308   : > { %v6580_v20 = vadd.f32 %v6579_v52, %v6578_v8  ;;  %v11362_v62 = vadd.f32 %v10951_v23, %v2685_v57  ;;  %v3507_v39 = vrot.slane %v6974_v58, 1  ;;  %v6975_v43 = vpop.f32.mrb[232].mxu0  ;;  %4161 = vmatprep.mubr.f32.mxu0 %v8649_v15  ;;  %v4043_v6 = vld [vmem:[%s12688_s1 + $0x218] sm:$0xff] }
 0x309   : > { %v6976_v42 = vpop.f32.mrb[233].mxu0  ;;  %v8327_v57 = vpack.c.bf16 %v4043_v6, %v4042_v51  ;;  %8326 = vmatprep.subr.bf16.mxu0 %v8325_v7  ;;  %v4060_v7 = vld [vmem:[%s12688_s1 + $0x2a0] sm:$0xff] }
 0x30a   : > { %v2690_v40 = vadd.f32 %v6580_v20, %v10805_v55  ;;  %v6581_v23 = vpop.f32.mrb[136].mxu1  ;;  %v6977_v45 = vadd.f32 %v6976_v42, %v6975_v43  ;;  %v11380_v8 = vsel %vm1904_vm3, %v3505_v26, %v3507_v39 }
 0x30b   : > { %v6582_v47 = vpop.f32.mrb[137].mxu1  ;;  %4162 = vmatmul.mubr.f32.gmra.mrb[250].mxu0 %v8650_v61 }
 0x30c   : > { %v6583_v58 = vadd.f32 %v6582_v47, %v6581_v23  ;;  %v11383_v55 = vadd.f32 %v10955_v13, %v2690_v40  ;;  %v3509_v52 = vrot.slane %v6977_v45, 1  ;;  %v6978_v20 = vpop.f32.mrb[234].mxu0  ;;  %8328 = vmatpush3.bf16.msra.mxu0 %v8327_v57  ;;  %4166 = vmatprep.mubr.f32.mxu0 %v8651_v1  ;;  %v8652_v45 = vld [vmem:[%s8975_s30 + $0x3c0] sm:$0xff]  ;;  %v8653_v57 = vld [vmem:[%s8975_s30 + $0x458] sm:$0xff] }
 0x30d   : > { %v6979_v5 = vpop.f32.mrb[235].mxu0 }
 0x30e   : > { %v2695_v43 = vadd.f32 %v6583_v58, %v10809_v53  ;;  %v6584_v42 = vpop.f32.mrb[138].mxu1  ;;  %v6980_v26 = vadd.f32 %v6979_v5, %v6978_v20  ;;  %v11389_v15 = vsel %vm1904_vm3, %v3507_v39, %v3509_v52  ;;  %v4061_v53 = vld [vmem:[%s12688_s1 + $0x2a8] sm:$0xff]  ;;  %v4044_v39 = vld [vmem:[%s12688_s1 + $0x220] sm:$0xff] }
 0x30f   : > { %12855 = vst [vmem:[#allocation88_spill] sm:$0xff] %v11389_v15  ;;  %v6585_v13 = vpop.f32.mrb[139].mxu1  ;;  %4167 = vmatmul.mubr.f32.gmra.mrb[252].mxu0 %v8652_v45  ;;  %v8329_v61 = vpack.c.bf16 %v4061_v53, %v4060_v7 }
 0x310   : > { %v6586_v40 = vadd.f32 %v6585_v13, %v6584_v42  ;;  %v11392_v23 = vadd.f32 %v10959_v36, %v2695_v43  ;;  %v3511_v51 = vrot.slane %v6980_v26, 1  ;;  %v6981_v6 = vpop.f32.mrb[236].mxu0  ;;  %v4045_v36 = vld [vmem:[%s12688_s1 + $0x228] sm:$0xff]  ;;  %4171 = vmatprep.mubr.f32.mxu0 %v8653_v57  ;;  %v8654_v57 = vld [vmem:[%s8975_s30 + $0x450] sm:$0xff] }
 0x311   : > { %v6982_v47 = vpop.f32.mrb[237].mxu0  ;;  %v8331_v5 = vpack.c.bf16 %v4045_v36, %v4044_v39  ;;  %8330 = vmatprep.subr.bf16.mxu0 %v8329_v61 }
 0x312   : > { %v2700_v58 = vadd.f32 %v6586_v40, %v10818_v4  ;;  %v6587_v20 = vpop.f32.mrb[140].mxu1  ;;  %v6983_v1 = vadd.f32 %v6982_v47, %v6981_v6  ;;  %v11410_v42 = vsel %vm1904_vm3, %v3509_v52, %v3511_v51  ;;  %v8655_v40 = vld [vmem:[%s8975_s30 + $0x4e8] sm:$0xff]  ;;  %v4062_v47 = vld [vmem:[%s12688_s1 + $0x2b0] sm:$0xff] }
 0x313   : > { %v6588_v43 = vpop.f32.mrb[141].mxu1  ;;  %4172 = vmatmul.mubr.f32.gmra.mrb[254].mxu0 %v8654_v57 }
 0x314   : > { %v6589_v26 = vadd.f32 %v6588_v43, %v6587_v20  ;;  %v11413_v13 = vadd.f32 %v10963_v32, %v2700_v58  ;;  %v3513_v45 = vrot.slane %v6983_v1, 1  ;;  %v6984_v15 = vpop.f32.mrb[238].mxu0  ;;  %8332 = vmatpush3.bf16.msra.mxu0 %v8331_v5  ;;  %4176 = vmatprep.mubr.f32.mxu0 %v8655_v40  ;;  %v8656_v20 = vld [vmem:[%s8975_s30 + $0x4e0] sm:$0xff] }
 0x315   : > { %v6985_v4 = vpop.f32.mrb[239].mxu0 }
 0x316   : > { %v2705_v7 = vadd.f32 %v6589_v26, %v10834_v38  ;;  %v6590_v6 = vpop.f32.mrb[142].mxu1  ;;  %v11418_v52 = vadd.f32 %v6985_v4, %v6984_v15  ;;  %v11421_v53 = vsel %vm1904_vm3, %v3511_v51, %v3513_v45  ;;  %v4063_v38 = vld [vmem:[%s12688_s1 + $0x2b8] sm:$0xff]  ;;  %v4046_v15 = vld [vmem:[%s12688_s1 + $0x230] sm:$0xff] }
 0x317   : > { %v6591_v32 = vpop.f32.mrb[143].mxu1  ;;  %4177 = vmatmul.mubr.f32.gmra.mrb[0].mxu0 %v8656_v20  ;;  %v8657_v51 = vld [vmem:[%s8975_s30 + $0x578] sm:$0xff]  ;;  %v8333_v1 = vpack.c.bf16 %v4063_v38, %v4062_v47  ;;  %v4065_v20 = vld [vmem:[%s12688_s1 + $0x2c8] sm:$0xff]  ;;  %v4048_v38 = vld [vmem:[%s12688_s1 + $0x240] sm:$0xff] }
 0x318   : > { %v6592_v39 = vadd.f32 %v6591_v32, %v6590_v6  ;;  %v11424_v36 = vadd.f32 %v10967_v11, %v2705_v7  ;;  %v3515_v58 = vrot.slane %v11418_v52, 1  ;;  %v4047_v11 = vld [vmem:[%s12688_s1 + $0x238] sm:$0xff]  ;;  %4181 = vmatprep.mubr.f32.mxu0 %v8657_v51  ;;  %v8658_v7 = vld [vmem:[%s8975_s30 + $0x570] sm:$0xff] }
 0x319   : > { %v8335_v43 = vpack.c.bf16 %v4047_v11, %v4046_v15  ;;  %8334 = vmatprep.subr.bf16.mxu0 %v8333_v1  ;;  %v8660_v15 = vld [vmem:[%s8975_s30 + $0x600] sm:$0xff]  ;;  %v8661_v11 = vld [vmem:[%s8975_s30 + $0x698] sm:$0xff] }
 0x31a   : > { %v2710_v61 = vadd.f32 %v6592_v39, %v10850_v34  ;;  %v6593_v5 = vpop.f32.mrb[144].mxu1  ;;  %v11445_v26 = vsel %vm1904_vm3, %v3513_v45, %v3515_v58  ;;  %v8659_v34 = vld [vmem:[%s8975_s30 + $0x608] sm:$0xff]  ;;  %v4622_v52 = vld [vmem:[%s8975_s30 + $0x7f8] sm:$0x7] }
 0x31b   : > { %v6594_v57 = vpop.f32.mrb[145].mxu1  ;;  %4182 = vmatmul.mubr.f32.gmra.mrb[2].mxu0 %v8658_v7  ;;  %v4067_v7 = vld [vmem:[%s12688_s1 + $0x2d8] sm:$0xff] }
 0x31c   : > { %v6595_v4 = vadd.f32 %v6594_v57, %v6593_v5  ;;  %v11448_v40 = vadd.f32 %v10971_v25, %v2710_v61  ;;  %8336 = vmatpush3.bf16.msra.mxu0 %v8335_v43  ;;  %4186 = vmatprep.mubr.f32.mxu0 %v8659_v34  ;;  %v4064_v25 = vld [vmem:[%s12688_s1 + $0x2c0] sm:$0xff]  ;;  %v8662_v34 = vld [vmem:[%s8975_s30 + $0x690] sm:$0xff] }
 0x31e   : > { %v2715_v6 = vadd.f32 %v6595_v4, %v10872_v2  ;;  %v6596_v32 = vpop.f32.mrb[146].mxu1  ;;  %v8337_v2 = vpack.c.bf16 %v4065_v20, %v4064_v25  ;;  %v4066_v4 = vld [vmem:[%s12688_s1 + $0x2d0] sm:$0xff] }
 0x31f   : > { %v6597_v39 = vpop.f32.mrb[147].mxu1  ;;  %4187 = vmatmul.mubr.f32.gmra.mrb[4].mxu0 %v8660_v15 }
 0x320   : > { %v6598_v47 = vadd.f32 %v6597_v39, %v6596_v32  ;;  %v11454_v45 = vadd.f32 %v10975_v60, %v2715_v6  ;;  %v4049_v60 = vld [vmem:[%s12688_s1 + $0x248] sm:$0xff]  ;;  %4191 = vmatprep.mubr.f32.mxu0 %v8661_v11  ;;  %8338 = vmatprep.subr.bf16.mxu0 %v8337_v2  ;;  %v8341_v32 = vpack.c.bf16 %v4067_v7, %v4066_v4  ;;  %v4051_v39 = vld [vmem:[%s12688_s1 + $0x258] sm:$0xff]  ;;  %v4052_v11 = vld [vmem:[%s12688_s1 + $0x260] sm:$0xff] }
 0x321   : > { %v8339_v5 = vpack.c.bf16 %v4049_v60, %v4048_v38  ;;  %v4069_v60 = vld [vmem:[%s12688_s1 + $0x2e8] sm:$0xff] }
 0x322   : > { %v2720_v51 = vadd.f32 %v6598_v47, %v10888_v46  ;;  %v6599_v61 = vpop.f32.mrb[148].mxu1  ;;  %v8663_v47 = vld [vmem:[%s8975_s30 + $0x728] sm:$0xff] }
 0x323   : > { %v6600_v1 = vpop.f32.mrb[149].mxu1  ;;  %8340 = vmatpush3.bf16.msra.mxu0 %v8339_v5 }
 0x324   : > { %v6601_v43 = vadd.f32 %v6600_v1, %v6599_v61  ;;  %v11472_v57 = vadd.f32 %v10979_v54, %v2720_v51  ;;  %4192 = vmatmul.mubr.f32.gmra.mrb[6].mxu0 %v8662_v34  ;;  %v4050_v54 = vld [vmem:[%s12688_s1 + $0x250] sm:$0xff]  ;;  %8342 = vmatprep.subr.bf16.mxu0 %v8341_v32  ;;  %v8665_v34 = vld [vmem:[%s8975_s30 + $0x7b8] sm:$0xff] }
 0x325   : > { %4196 = vmatprep.mubr.f32.mxu0 %v8663_v47  ;;  %v8343_v20 = vpack.c.bf16 %v4051_v39, %v4050_v54  ;;  %v4071_v54 = vld [vmem:[%s12688_s1 + $0x2f8] sm:$0xff] }
 0x326   : > { %v2725_v46 = vadd.f32 %v6601_v43, %v10904_v24  ;;  %v6711_v6 = vpop.f32.mrb[150].mxu1  ;;  %v4068_v24 = vld [vmem:[%s12688_s1 + $0x2e0] sm:$0xff] }
 0x327   : > { %v6712_v25 = vpop.f32.mrb[151].mxu1  ;;  %8344 = vmatpush3.bf16.msra.mxu0 %v8343_v20  ;;  %v8345_v61 = vpack.c.bf16 %v4069_v60, %v4068_v24  ;;  %v8664_v43 = vld [vmem:[%s8975_s30 + $0x720] sm:$0xff]  ;;  %v8667_v60 = vld [vmem:[%s8975_s30 + $0x848] sm:$0x7] }
 0x328   : > { %v6713_v38 = vadd.f32 %v6712_v25, %v6711_v6  ;;  %v1935_v15 = vpop.permute.xlu0 %1934  ;;  %v11490_v2 = vadd.f32 %v10983_v59, %v2725_v46  ;;  %v4053_v59 = vld [vmem:[%s12688_s1 + $0x268] sm:$0xff]  ;;  %4197 = vmatmul.mubr.f32.gmra.mrb[8].mxu0 %v8664_v43 }
 0x329   : > { %v1976_v51 = vadd.f32 %v1935_v15, %v10999_v50  ;;  %v8347_v4 = vpack.c.bf16 %v4053_v59, %v4052_v11  ;;  %8346 = vmatprep.subr.bf16.mxu0 %v8345_v61  ;;  %4201 = vmatprep.mubr.f32.mxu0 %v8665_v34  ;;  %v4055_v15 = vld [vmem:[%s12688_s1 + $0x278] sm:$0xff] }
 0x32a   : > { %v2935_v5 = vadd.f32 %v6713_v38, %v11277_v28  ;;  %v6714_v1 = vpop.f32.mrb[152].mxu1  ;;  %v4070_v28 = vld [vmem:[%s12688_s1 + $0x2f0] sm:$0xff] }
 0x32b   : > { %v6715_v7 = vpop.f32.mrb[153].mxu1  ;;  %8348 = vmatpush3.bf16.msra.mxu0 %v8347_v4  ;;  %v8349_v47 = vpack.c.bf16 %v4071_v54, %v4070_v28  ;;  %v8666_v38 = vld [vmem:[%s8975_s30 + $0x7b0] sm:$0xff] }
 0x32c   : > { %v6716_v46 = vadd.f32 %v6715_v7, %v6714_v1  ;;  %v2021_v50 = vpop.permute.xlu0 %2020  ;;  %v2023_v6 = vpop.permute.xlu1 %2022  ;;  %v11509_v32 = vadd.f32 %v10987_v21, %v2935_v5  ;;  %4202 = vmatmul.mubr.f32.gmra.mrb[10].mxu0 %v8666_v38  ;;  %v4054_v21 = vld [vmem:[%s12688_s1 + $0x270] sm:$0xff]  ;;  %v8668_v7 = vld [vmem:[%s8975_s30 + $0x840] sm:$0x7] }
 0x32d   : > { %v11517_v39 = vadd.f32 %v2021_v50, %v1976_v51  ;;  %4206 = vmatprep.mubr.f32.mxu0 %v8667_v60  ;;  %8350 = vmatprep.subr.bf16.mxu0 %v8349_v47  ;;  %v8351_v11 = vpack.c.bf16 %v4055_v15, %v4054_v21  ;;  %v8669_v50 = vld [vmem:[%s8975_s30 + $0x88] sm:$0xff] }
 0x32e   : > { %v2940_v25 = vadd.f32 %v6716_v46, %v11297_v10  ;;  %v6717_v20 = vpop.f32.mrb[154].mxu1 }
 0x32f   : > { %v6718_v24 = vpop.f32.mrb[155].mxu1  ;;  %8352 = vmatpush3.bf16.msra.mxu0 %v8351_v11  ;;  %v8672_v11 = vld [vmem:[%s8975_s30 + $0x110] sm:$0xff] }
 0x330   : > { %v6719_v51 = vadd.f32 %v6718_v24, %v6717_v20  ;;  %v1937_v10 = vpop.permute.xlu0 %1936  ;;  %v1939_v61 = vpop.permute.xlu1 %1938  ;;  %v11529_v59 = vadd.f32 %v10991_v22, %v2940_v25  ;;  %4207 = vmatmul.mubr.f32.gmra.mrb[12].mxu0 %v8668_v7  ;;  %8386 = vmatprep.subr.bf16.mxu0 %v9292_v41  ;;  %v8670_v41 = vld [vmem:[%s8975_s30 + $0x80] sm:$0xff]  ;;  %v8671_v20 = vld [vmem:[%s8975_s30 + $0x118] sm:$0xff] }
 0x331   : > { %v1977_v5 = vadd.f32 %v1937_v10, %v11005_v3  ;;  %v1978_v1 = vadd.f32 %v1939_v61, %v11018_v48  ;;  %4416 = vmatprep.mubr.f32.mxu0 %v8669_v50  ;;  %v12856_v10 = vld [vmem:[#allocation24_spill] sm:$0xff] }
 0x332   : > { %v2945_v43 = vadd.f32 %v6719_v51, %v11308_v14  ;;  %v6720_v4 = vpop.f32.mrb[156].mxu1 }
 0x333   : > { %v11536_v34 = vadd.f32 %v2023_v6, %v1977_v5  ;;  %v6721_v46 = vpop.f32.mrb[157].mxu1 }
 0x334   : > { %v6722_v22 = vadd.f32 %v6721_v46, %v6720_v4  ;;  %v2025_v28 = vpop.permute.xlu0 %2024  ;;  %v1941_v3 = vpop.permute.xlu1 %1940  ;;  %v11540_v48 = vadd.f32 %v10995_v56, %v2945_v43  ;;  %4417 = vmatmul.mubr.f32.vlgmr.msra.gmra.mrb[14].mxu0 %v8670_v41  ;;  %v12858_v43 = vld [vmem:[#allocation25_spill] sm:$0xff] }
 0x335   : > { %v11542_v54 = vadd.f32 %v2025_v28, %v1978_v1  ;;  %v1979_v14 = vadd.f32 %v1941_v3, %v11030_v9  ;;  %4421 = vmatprep.mubr.f32.mxu0 %v8671_v20  ;;  %8388 = vmatpush3.bf16.msra.mxu0 %v9358_v27  ;;  %v8673_v27 = vld [vmem:[%s8975_s30 + $0x1a8] sm:$0xff]  ;;  %v8674_v46 = vld [vmem:[%s8975_s30 + $0x1a0] sm:$0xff]  ;;  %v12859_v28 = vld [vmem:[#allocation28_spill] sm:$0xff] }
 0x336   : > { %v2950_v47 = vadd.f32 %v6722_v22, %v11317_v18  ;;  %v6723_v25 = vpop.f32.mrb[158].mxu1  ;;  %8390 = vmatprep.subr.bf16.mxu0 %v9369_v37  ;;  %v12857_v37 = vld [vmem:[#allocation67_spill] sm:$0xff]  ;;  %v8675_v22 = vld [vmem:[%s8975_s30 + $0x238] sm:$0xff] }
 0x337   : > { %v6724_v6 = vpop.f32.mrb[159].mxu1 }
 0x338   : > { %v6725_v38 = vadd.f32 %v6724_v6, %v6723_v25  ;;  %v2027_v21 = vpop.permute.xlu1 %2026  ;;  %v1943_v56 = vpop.permute.xlu0 %1942  ;;  %v11550_v15 = vadd.f32 %v11001_v33, %v2950_v47  ;;  %4422 = vmatmul.mubr.f32.gmra.mrb[16].mxu0 %v8672_v11  ;;  %v12860_v25 = vld [vmem:[#allocation68_spill] sm:$0xff]  ;;  %v12861_v6 = vld [vmem:[#allocation29_spill] sm:$0xff] }
 0x339   : > { %v11553_v9 = vadd.f32 %v2027_v21, %v1979_v14  ;;  %v1980_v18 = vadd.f32 %v1943_v56, %v11042_v29  ;;  %4426 = vmatprep.mubr.f32.mxu0 %v8673_v27  ;;  %8392 = vmatpush3.bf16.msra.mxu0 %v12856_v10  ;;  %v8676_v56 = vld [vmem:[%s8975_s30 + $0x230] sm:$0xff]  ;;  %v12864_v10 = vld [vmem:[#allocation69_spill] sm:$0xff] }
 0x33a   : > { %v2955_v24 = vadd.f32 %v6725_v38, %v11326_v30  ;;  %v6726_v60 = vpop.f32.mrb[160].mxu1  ;;  %8394 = vmatprep.subr.bf16.mxu0 %v12858_v43 }
 0x33b   : > { %v6727_v51 = vpop.f32.mrb[161].mxu1 }
 0x33c   : > { %v6728_v33 = vadd.f32 %v6727_v51, %v6726_v60  ;;  %v2029_v61 = vpop.permute.xlu0 %2028  ;;  %v1945_v5 = vpop.permute.xlu1 %1944  ;;  %v11561_v1 = vadd.f32 %v12857_v37, %v2955_v24  ;;  %4427 = vmatmul.mubr.f32.gmra.mrb[18].mxu0 %v8674_v46  ;;  %v8677_v24 = vld [vmem:[%s8975_s30 + $0x2c8] sm:$0xff]  ;;  %v12863_v60 = vld [vmem:[#allocation32_spill] sm:$0xff] }
 0x33d   : > { %v11564_v29 = vadd.f32 %v2029_v61, %v1980_v18  ;;  %v1981_v30 = vadd.f32 %v1945_v5, %v11072_v17  ;;  %4431 = vmatprep.mubr.f32.mxu0 %v8675_v22  ;;  %8396 = vmatpush3.bf16.msra.mxu0 %v12859_v28  ;;  %v12865_v61 = vld [vmem:[#allocation33_spill] sm:$0xff]  ;;  %v8679_v46 = vld [vmem:[%s8975_s30 + $0x358] sm:$0xff] }
 0x33e   : > { %v2960_v4 = vadd.f32 %v6728_v33, %v11353_v44  ;;  %v6729_v7 = vpop.f32.mrb[162].mxu1  ;;  %8398 = vmatprep.subr.bf16.mxu0 %v12861_v6  ;;  %v12862_v44 = vld [vmem:[#allocation72_spill] sm:$0xff] }
 0x33f   : > { %v6730_v50 = vpop.f32.mrb[163].mxu1 }
 0x340   : > { %v6731_v3 = vadd.f32 %v6730_v50, %v6729_v7  ;;  %v2031_v14 = vpop.permute.xlu1 %2030  ;;  %v1947_v47 = vpop.permute.xlu0 %1946  ;;  %v11572_v41 = vadd.f32 %v12860_v25, %v2960_v4  ;;  %4432 = vmatmul.mubr.f32.gmra.mrb[20].mxu0 %v8676_v56  ;;  %v8678_v4 = vld [vmem:[%s8975_s30 + $0x2c0] sm:$0xff]  ;;  %v12867_v50 = vld [vmem:[#allocation36_spill] sm:$0xff] }
 0x341   : > { %v11575_v17 = vadd.f32 %v2031_v14, %v1981_v30  ;;  %v1982_v20 = vadd.f32 %v1947_v47, %v12862_v44  ;;  %4436 = vmatprep.mubr.f32.mxu0 %v8677_v24  ;;  %8400 = vmatpush3.bf16.msra.mxu0 %v12863_v60  ;;  %v12868_v14 = vld [vmem:[#allocation70_spill] sm:$0xff]  ;;  %v12869_v25 = vld [vmem:[#allocation37_spill] sm:$0xff]  ;;  %v12871_v24 = vld [vmem:[#allocation40_spill] sm:$0xff] }
 0x342   : > { %v2965_v38 = vadd.f32 %v6731_v3, %v11362_v62  ;;  %v6732_v21 = vpop.f32.mrb[164].mxu1  ;;  %8402 = vmatprep.subr.bf16.mxu0 %v12865_v61  ;;  %v12866_v62 = vld [vmem:[#allocation74_spill] sm:$0xff]  ;;  %v12873_v61 = vld [vmem:[#allocation41_spill] sm:$0xff] }
 0x343   : > { %v6733_v18 = vpop.f32.mrb[165].mxu1 }
 0x344   : > { %v6734_v11 = vadd.f32 %v6733_v18, %v6732_v21  ;;  %v2033_v51 = vpop.permute.xlu0 %2032  ;;  %v1949_v27 = vpop.permute.xlu1 %1948  ;;  %v11583_v33 = vadd.f32 %v12864_v10, %v2965_v38  ;;  %4437 = vmatmul.mubr.f32.gmra.mrb[22].mxu0 %v8678_v4  ;;  %v8680_v21 = vld [vmem:[%s8975_s30 + $0x350] sm:$0xff]  ;;  %v8681_v18 = vld [vmem:[%s8975_s30 + $0x3e8] sm:$0xff]  ;;  %v8682_v4 = vld [vmem:[%s8975_s30 + $0x3e0] sm:$0xff] }
 0x345   : > { %v11586_v5 = vadd.f32 %v2033_v51, %v1982_v20  ;;  %v1983_v37 = vadd.f32 %v1949_v27, %v12866_v62  ;;  %4441 = vmatprep.mubr.f32.mxu0 %v8679_v46  ;;  %8404 = vmatpush3.bf16.msra.mxu0 %v12867_v50  ;;  %v12872_v27 = vld [vmem:[#allocation71_spill] sm:$0xff]  ;;  %v8683_v46 = vld [vmem:[%s8975_s30 + $0x478] sm:$0xff] }
 0x346   : > { %v2970_v43 = vadd.f32 %v6734_v11, %v11383_v55  ;;  %v6735_v30 = vpop.f32.mrb[166].mxu1  ;;  %8406 = vmatprep.subr.bf16.mxu0 %v12869_v25  ;;  %v12870_v55 = vld [vmem:[#allocation76_spill] sm:$0xff] }
 0x347   : > { %v6736_v7 = vpop.f32.mrb[167].mxu1  ;;  %v12875_v50 = vld [vmem:[#allocation44_spill] sm:$0xff] }
 0x348   : > { %v6737_v22 = vadd.f32 %v6736_v7, %v6735_v30  ;;  %v2035_v28 = vpop.permute.xlu1 %2034  ;;  %v1951_v3 = vpop.permute.xlu0 %1950  ;;  %v11594_v47 = vadd.f32 %v12868_v14, %v2970_v43  ;;  %4442 = vmatmul.mubr.f32.gmra.mrb[24].mxu0 %v8680_v21  ;;  %v12876_v14 = vld [vmem:[#allocation73_spill] sm:$0xff] }
 0x349   : > { %v11597_v6 = vadd.f32 %v2035_v28, %v1983_v37  ;;  %v1984_v44 = vadd.f32 %v1951_v3, %v12870_v55  ;;  %4446 = vmatprep.mubr.f32.mxu0 %v8681_v18  ;;  %8408 = vmatpush3.bf16.msra.mxu0 %v12871_v24  ;;  %v12877_v55 = vld [vmem:[#allocation45_spill] sm:$0xff]  ;;  %v8685_v24 = vld [vmem:[%s8975_s30 + $0x508] sm:$0xff] }
 0x34a   : > { %v2975_v20 = vadd.f32 %v6737_v22, %v11392_v23  ;;  %v6738_v38 = vpop.f32.mrb[168].mxu1  ;;  %8410 = vmatprep.subr.bf16.mxu0 %v12873_v61  ;;  %v12874_v23 = vld [vmem:[#allocation78_spill] sm:$0xff]  ;;  %v12880_v61 = vld [vmem:[#allocation75_spill] sm:$0xff] }
 0x34b   : > { %v6739_v56 = vpop.f32.mrb[169].mxu1 }
 0x34c   : > { %v6740_v60 = vadd.f32 %v6739_v56, %v6738_v38  ;;  %v2037_v11 = vpop.permute.xlu0 %2036  ;;  %v1953_v51 = vpop.permute.xlu1 %1952  ;;  %v11605_v10 = vadd.f32 %v12872_v27, %v2975_v20  ;;  %4447 = vmatmul.mubr.f32.gmra.mrb[26].mxu0 %v8682_v4  ;;  %v8684_v56 = vld [vmem:[%s8975_s30 + $0x470] sm:$0xff] }
 0x34d   : > { %v11608_v62 = vadd.f32 %v2037_v11, %v1984_v44  ;;  %v1985_v37 = vadd.f32 %v1953_v51, %v12874_v23  ;;  %4451 = vmatprep.mubr.f32.mxu0 %v8683_v46  ;;  %8412 = vmatpush3.bf16.msra.mxu0 %v12875_v50  ;;  %v8686_v46 = vld [vmem:[%s8975_s30 + $0x500] sm:$0xff] }
 0x34e   : > { %v2980_v43 = vadd.f32 %v6740_v60, %v11413_v13  ;;  %v6741_v30 = vpop.f32.mrb[170].mxu1  ;;  %8414 = vmatprep.subr.bf16.mxu0 %v12877_v55  ;;  %v12878_v13 = vld [vmem:[#allocation80_spill] sm:$0xff]  ;;  %v12883_v55 = vld [vmem:[#allocation77_spill] sm:$0xff] }
 0x34f   : > { %v6742_v7 = vpop.f32.mrb[171].mxu1  ;;  %v12879_v60 = vld [vmem:[#allocation48_spill] sm:$0xff] }
 0x350   : > { %v6743_v22 = vadd.f32 %v6742_v7, %v6741_v30  ;;  %v2039_v28 = vpop.permute.xlu1 %2038  ;;  %v1955_v3 = vpop.permute.xlu0 %1954  ;;  %v11616_v25 = vadd.f32 %v12876_v14, %v2980_v43  ;;  %4452 = vmatmul.mubr.f32.gmra.mrb[28].mxu0 %v8684_v56 }
 0x351   : > { %v11619_v44 = vadd.f32 %v2039_v28, %v1985_v37  ;;  %v1986_v20 = vadd.f32 %v1955_v3, %v12878_v13  ;;  %4456 = vmatprep.mubr.f32.mxu0 %v8685_v24  ;;  %8416 = vmatpush3.bf16.msra.mxu0 %v12879_v60  ;;  %v12881_v37 = vld [vmem:[#allocation50_spill] sm:$0xff] }
 0x352   : > { %v2985_v38 = vadd.f32 %v6743_v22, %v11424_v36  ;;  %v6744_v21 = vpop.f32.mrb[172].mxu1  ;;  %8450 = vmatprep.subr.bf16.mxu0 %v12881_v37  ;;  %v12882_v36 = vld [vmem:[#allocation82_spill] sm:$0xff]  ;;  %v8687_v22 = vld [vmem:[%s8975_s30 + $0x598] sm:$0xff]  ;;  %v12886_v37 = vld [vmem:[#allocation85_spill] sm:$0xff] }
 0x353   : > { %v6745_v18 = vpop.f32.mrb[173].mxu1  ;;  %v8689_v60 = vld [vmem:[%s8975_s30 + $0x628] sm:$0xff] }
 0x354   : > { %v6746_v11 = vadd.f32 %v6745_v18, %v6744_v21  ;;  %v2041_v51 = vpop.permute.xlu0 %2040  ;;  %v1957_v27 = vpop.permute.xlu1 %1956  ;;  %v11627_v23 = vadd.f32 %v12880_v61, %v2985_v38  ;;  %4457 = vmatmul.mubr.f32.gmra.mrb[30].mxu0 %v8686_v46  ;;  %v12884_v38 = vld [vmem:[#allocation84_spill] sm:$0xff]  ;;  %v8688_v18 = vld [vmem:[%s8975_s30 + $0x590] sm:$0xff] }
 0x355   : > { %v11630_v43 = vadd.f32 %v2041_v51, %v1986_v20  ;;  %v1987_v30 = vadd.f32 %v1957_v27, %v12882_v36  ;;  %4461 = vmatprep.mubr.f32.mxu0 %v8687_v22  ;;  %v12885_v27 = vld [vmem:[#allocation79_spill] sm:$0xff]  ;;  %v8691_v46 = vld [vmem:[%s8975_s30 + $0x6b8] sm:$0xff]  ;;  %v12887_v22 = vld [vmem:[#allocation81_spill] sm:$0xff] }
 0x356   : > { %v2990_v4 = vadd.f32 %v6746_v11, %v11448_v40  ;;  %v6747_v7 = vpop.f32.mrb[174].mxu1 }
 0x357   : > { %v6748_v50 = vpop.f32.mrb[175].mxu1 }
 0x358   : > { %v6749_v28 = vadd.f32 %v6748_v50, %v6747_v7  ;;  %v2043_v3 = vpop.permute.xlu1 %2042  ;;  %v1959_v14 = vpop.permute.xlu0 %1958  ;;  %v11637_v13 = vadd.f32 %v12883_v55, %v2990_v4  ;;  %4462 = vmatmul.mubr.f32.gmra.mrb[32].mxu0 %v8688_v18  ;;  %v8690_v4 = vld [vmem:[%s8975_s30 + $0x620] sm:$0xff]  ;;  %v8692_v55 = vld [vmem:[%s8975_s30 + $0x6b0] sm:$0xff] }
 0x359   : > { %v11639_v20 = vadd.f32 %v2043_v3, %v1987_v30  ;;  %v11642_v21 = vadd.f32 %v1959_v14, %v12884_v38  ;;  %4466 = vmatprep.mubr.f32.mxu0 %v8689_v60 }
 0x35a   : > { %v2995_v40 = vadd.f32 %v6749_v28, %v11454_v45  ;;  %v6750_v56 = vpop.f32.mrb[176].mxu1 }
 0x35b   : > { %v6751_v24 = vpop.f32.mrb[177].mxu1 }
 0x35c   : > { %v6752_v11 = vadd.f32 %v6751_v24, %v6750_v56  ;;  %v1961_v51 = vpop.permute.xlu1 %1960  ;;  %v11648_v61 = vadd.f32 %v12885_v27, %v2995_v40  ;;  %4467 = vmatmul.mubr.f32.gmra.mrb[34].mxu0 %v8690_v4  ;;  %v8693_v40 = vld [vmem:[%s8975_s30 + $0x748] sm:$0xff]  ;;  %v12888_v56 = vld [vmem:[#allocation83_spill] sm:$0xff] }
 0x35d   : > { %v11651_v36 = vadd.f32 %v1961_v51, %v12886_v37  ;;  %4471 = vmatprep.mubr.f32.mxu0 %v8691_v46  ;;  %v8696_v46 = vld [vmem:[%s8975_s30 + $0x7d0] sm:$0xff] }
 0x35e   : > { %v3000_v30 = vadd.f32 %v6752_v11, %v11472_v57  ;;  %v6753_v45 = vpop.f32.mrb[178].mxu1  ;;  %v8694_v11 = vld [vmem:[%s8975_s30 + $0x740] sm:$0xff] }
 0x35f   : > { %v6754_v7 = vpop.f32.mrb[179].mxu1 }
 0x360   : > { %v6755_v50 = vadd.f32 %v6754_v7, %v6753_v45  ;;  %v11657_v28 = vadd.f32 %v12887_v22, %v3000_v30  ;;  %4472 = vmatmul.mubr.f32.gmra.mrb[36].mxu0 %v8692_v55  ;;  %v12889_v30 = vld [vmem:[#allocation66_spill] sm:$0xff] }
 0x361   : > { %4476 = vmatprep.mubr.f32.mxu0 %v8693_v40  ;;  %v8698_v40 = vld [vmem:[%s8975_s30 + $0x860] sm:$0x7] }
 0x362   : > { %v3005_v3 = vadd.f32 %v6755_v50, %v11490_v2  ;;  %v6865_v14 = vpop.f32.mrb[180].mxu1  ;;  %v8695_v2 = vld [vmem:[%s8975_s30 + $0x7d8] sm:$0xff]  ;;  %v8697_v50 = vld [vmem:[%s8975_s30 + $0x868] sm:$0x7] }
 0x363   : > { %v6866_v38 = vpop.f32.mrb[181].mxu1 }
 0x364   : > { %v6867_v57 = vadd.f32 %v6866_v38, %v6865_v14  ;;  %v11663_v18 = vadd.f32 %v12888_v56, %v3005_v3  ;;  %4477 = vmatmul.mubr.f32.gmra.mrb[38].mxu0 %v8694_v11  ;;  %v4510_v14 = vld [vmem:[%s8975_s30 + $0x18] sm:$0xff] }
 0x365   : > { %4481 = vmatprep.mubr.f32.mxu0 %v8695_v2 }
 0x366   : > { %v3215_v24 = vadd.f32 %v6867_v57, %v11509_v32  ;;  %v6868_v60 = vpop.f32.mrb[182].mxu1  ;;  %v4509_v57 = vld [vmem:[%s8975_s30 + $0x10] sm:$0xff] }
 0x367   : > { %v6869_v51 = vpop.f32.mrb[183].mxu1 }
 0x368   : > { %v3532_v27 = vadd.f32 %v11232_v16, %v3215_v24  ;;  %v6870_v37 = vadd.f32 %v6869_v51, %v6868_v60  ;;  %4482 = vmatmul.mubr.f32.gmra.mrb[40].mxu0 %v8696_v46  ;;  %v4518_v60 = vld [vmem:[%s8975_s30 + $0xa8] sm:$0xff] }
 0x369   : > { %4486 = vmatprep.mubr.f32.mxu0 %v8697_v50  ;;  %v12891_v50 = vld [vmem:[#allocation52_spill] sm:$0xff] }
 0x36a   : > { %v3547_v45 = vadd.f32 %v3532_v27, %v12889_v30  ;;  %v3220_v4 = vadd.f32 %v6870_v37, %v11529_v59  ;;  %v6871_v7 = vpop.f32.mrb[184].mxu1  ;;  %v4027_v27 = vld [vmem:[%s12688_s1 + $0x198] sm:$0xff] }
 0x36b   : > { %v6872_v32 = vpop.f32.mrb[185].mxu1 }
 0x36c   : > { %8552 = vtanh.f32 %v3547_v45  ;;  %v3533_v22 = vadd.f32 %v11251_v12, %v3220_v4  ;;  %v6873_v3 = vadd.f32 %v6872_v32, %v6871_v7  ;;  %4487 = vmatmul.mubr.f32.gmra.mrb[42].mxu0 %v8698_v40  ;;  %v4008_v12 = vld [vmem:[%s12688_s1 + $0x100] sm:$0xff]  ;;  %v12890_v45 = vld [vmem:[#allocation51_spill] sm:$0xff]  ;;  %v4526_v32 = vld [vmem:[%s8975_s30 + $0x138] sm:$0xff] }
 0x36d   : > { %4831 = vmatprep.mubr.f32.mxu0 %v4510_v14  ;;  %v4517_v4 = vld [vmem:[%s8975_s30 + $0xa0] sm:$0xff]  ;;  %v4011_v14 = vld [vmem:[%s12688_s1 + $0x118] sm:$0xff] }
 0x36e   : > { %v3548_v16 = vadd.f32 %v3533_v22, %v12889_v30  ;;  %v3225_v55 = vadd.f32 %v6873_v3, %v11540_v48  ;;  %v6874_v38 = vpop.f32.mrb[186].mxu1  ;;  %v4009_v48 = vld [vmem:[%s12688_s1 + $0x108] sm:$0xff]  ;;  %v4010_v3 = vld [vmem:[%s12688_s1 + $0x110] sm:$0xff]  ;;  %v4028_v40 = vld [vmem:[%s12688_s1 + $0x1a0] sm:$0xff] }
 0x36f   : > { %v6875_v59 = vpop.f32.mrb[187].mxu1 }
 0x370   : > { %8554 = vtanh.f32 %v3548_v16  ;;  %v3534_v56 = vadd.f32 %v11268_v19, %v3225_v55  ;;  %v6876_v24 = vadd.f32 %v6875_v59, %v6874_v38  ;;  %v4026_v19 = vld [vmem:[%s12688_s1 + $0x190] sm:$0xff]  ;;  %4832 = vmatmul.mubr.f32.vlgmr.msra.gmra.mrb[44].mxu0 %v4509_v57  ;;  %v4029_v59 = vld [vmem:[%s12688_s1 + $0x1a8] sm:$0xff] }
 0x371   : > { %4836 = vmatprep.mubr.f32.mxu0 %v4518_v60  ;;  %8452 = vmatpush3.bf16.msra.mxu0 %v12890_v45  ;;  %v8293_v22 = vpack.c.bf16 %v4027_v27, %v4026_v19  ;;  %v4030_v45 = vld [vmem:[%s12688_s1 + $0x1b0] sm:$0xff] }
 0x372   : > { %v3549_v11 = vadd.f32 %v3534_v56, %v12889_v30  ;;  %v3230_v51 = vadd.f32 %v6876_v24, %v11550_v15  ;;  %v6877_v2 = vpop.f32.mrb[188].mxu1  ;;  %v8291_v15 = vpack.c.bf16 %v4009_v48, %v4008_v12  ;;  %8454 = vmatprep.subr.bf16.mxu0 %v12891_v50  ;;  %v4525_v56 = vld [vmem:[%s8975_s30 + $0x130] sm:$0xff]  ;;  %v4534_v12 = vld [vmem:[%s8975_s30 + $0x1c8] sm:$0xff]  ;;  %v8297_v48 = vpack.c.bf16 %v4029_v59, %v4028_v40 }
 0x373   : > { %v6878_v37 = vpop.f32.mrb[189].mxu1 }
 0x374   : > { %8556 = vtanh.f32 %v3549_v11  ;;  %v3535_v7 = vadd.f32 %v11288_v31, %v3230_v51  ;;  %v6879_v46 = vadd.f32 %v6878_v37, %v6877_v2  ;;  %4837 = vmatmul.mubr.f32.gmra.mrb[46].mxu0 %v4517_v4  ;;  %v4012_v11 = vld [vmem:[%s12688_s1 + $0x120] sm:$0xff]  ;;  %v4013_v51 = vld [vmem:[%s12688_s1 + $0x128] sm:$0xff]  ;;  %v4031_v4 = vld [vmem:[%s12688_s1 + $0x1b8] sm:$0xff] }
 0x375   : > { %4841 = vmatprep.mubr.f32.mxu0 %v4526_v32  ;;  %v12892_v2 = vld [vmem:[#allocation53_spill] sm:$0xff] }
 0x376   : > { %v8553_v16 = vpop.eup %8552  ;;  %v3550_v55 = vadd.f32 %v3535_v7, %v12889_v30  ;;  %v3235_v31 = vadd.f32 %v6879_v46, %v11561_v1  ;;  %v6880_v38 = vpop.f32.mrb[190].mxu1  ;;  %v8295_v1 = vpack.c.bf16 %v4011_v14, %v4010_v3  ;;  %8456 = vmatpush3.bf16.msra.mxu0 %v12892_v2  ;;  %v12893_v7 = vld [vmem:[#allocation54_spill] sm:$0xff]  ;;  %v4542_v3 = vld [vmem:[%s8975_s30 + $0x258] sm:$0xff]  ;;  %v8301_v14 = vpack.c.bf16 %v4031_v4, %v4030_v45 }
 0x377   : > { %v6881_v57 = vpop.f32.mrb[191].mxu1  ;;  %7668 = vmatmul.mubr.msk.f32.vlgmr.msra.gmra.mrb[210].mxu1 %vm1685_vm2, %v8553_v16  ;;  %8458 = vmatprep.subr.bf16.mxu0 %v12893_v7  ;;  %v4014_v16 = vld [vmem:[%s12688_s1 + $0x130] sm:$0xff]  ;;  %v4550_v2 = vld [vmem:[%s8975_s30 + $0x2e8] sm:$0xff] }
 0x378   : > { %8558 = vtanh.f32 %v3550_v55  ;;  %v3536_v24 = vadd.f32 %v11305_v49, %v3235_v31  ;;  %v6882_v60 = vadd.f32 %v6881_v57, %v6880_v38  ;;  %8292 = vmatpush3.bf16.msra.mxu1 %v8291_v15  ;;  %7670 = vmatprep.mubr.msk.f32.mxu1 %vm8759_vm1, %v12833_v63  ;;  %v4533_v15 = vld [vmem:[%s8975_s30 + $0x1c0] sm:$0xff]  ;;  %v4015_v55 = vld [vmem:[%s12688_s1 + $0x138] sm:$0xff]  ;;  %v12895_v31 = vld [vmem:[#allocation55_spill] sm:$0xff] }
 0x379   : > { %8294 = vmatprep.subr.bf16.mxu1 %v8293_v22  ;;  %4842 = vmatmul.mubr.f32.gmra.mrb[48].mxu0 %v4525_v56  ;;  %v8299_v22 = vpack.c.bf16 %v4013_v51, %v4012_v11  ;;  %v4032_v56 = vld [vmem:[%s12688_s1 + $0x1c0] sm:$0xff]  ;;  %v8303_v51 = vpack.c.bf16 %v4015_v55, %v4014_v16  ;;  %v4558_v16 = vld [vmem:[%s8975_s30 + $0x378] sm:$0xff] }
 0x37a   : > { %v8555_v49 = vpop.eup %8554  ;;  %v3551_v19 = vadd.f32 %v3536_v24, %v12889_v30  ;;  %v3240_v27 = vadd.f32 %v6882_v60, %v11572_v41  ;;  %v6883_v37 = vpop.f32.mrb[192].mxu1  ;;  %4846 = vmatprep.mubr.f32.mxu0 %v4534_v12  ;;  %v12894_v41 = vld [vmem:[#allocation86_spill] sm:$0xff]  ;;  %8460 = vmatpush3.bf16.msra.mxu0 %v12895_v31  ;;  %v12896_v60 = vld [vmem:[#allocation56_spill] sm:$0xff]  ;;  %v4541_v12 = vld [vmem:[%s8975_s30 + $0x250] sm:$0xff] }
 0x37b   : > { %v6884_v46 = vpop.f32.mrb[193].mxu1  ;;  %7671 = vmatmul.mubr.msk.f32.gmra.mrb[212].mxu1 %vm1685_vm2, %v8555_v49  ;;  %v4033_v24 = vld [vmem:[%s12688_s1 + $0x1c8] sm:$0xff]  ;;  %8462 = vmatprep.subr.bf16.mxu0 %v12896_v60  ;;  %v4018_v31 = vld [vmem:[%s12688_s1 + $0x150] sm:$0xff] }
 0x37c   : > { %8560 = vtanh.f32 %v3551_v19  ;;  %v3537_v32 = vadd.f32 %v12894_v41, %v3240_v27  ;;  %v6885_v50 = vadd.f32 %v6884_v46, %v6883_v37  ;;  %7673 = vmatprep.mubr.msk.f32.mxu1 %vm8759_vm1, %v12833_v63  ;;  %8296 = vmatpush3.bf16.msra.mxu1 %v8295_v1  ;;  %v8305_v49 = vpack.c.bf16 %v4033_v24, %v4032_v56  ;;  %v4016_v19 = vld [vmem:[%s12688_s1 + $0x140] sm:$0xff]  ;;  %v4017_v27 = vld [vmem:[%s12688_s1 + $0x148] sm:$0xff]  ;;  %v4035_v41 = vld [vmem:[%s12688_s1 + $0x1d8] sm:$0xff] }
 0x37d   : > { %8298 = vmatprep.subr.bf16.mxu1 %v8297_v48  ;;  %4847 = vmatmul.mubr.f32.gmra.mrb[50].mxu0 %v4533_v15  ;;  %v12898_v37 = vld [vmem:[#allocation57_spill] sm:$0xff]  ;;  %v4034_v15 = vld [vmem:[%s12688_s1 + $0x1d0] sm:$0xff]  ;;  %v4037_v60 = vld [vmem:[%s12688_s1 + $0x1e8] sm:$0xff] }
 0x37e   : > { %v8557_v38 = vpop.eup %8556  ;;  %v3552_v40 = vadd.f32 %v3537_v32, %v12889_v30  ;;  %v3245_v59 = vadd.f32 %v6885_v50, %v11583_v33  ;;  %v6886_v57 = vpop.f32.mrb[194].mxu1  ;;  %4851 = vmatprep.mubr.f32.mxu0 %v4542_v3  ;;  %v12897_v33 = vld [vmem:[#allocation87_spill] sm:$0xff]  ;;  %8464 = vmatpush3.bf16.msra.mxu0 %v12898_v37  ;;  %v12899_v32 = vld [vmem:[#allocation58_spill] sm:$0xff]  ;;  %v8309_v55 = vpack.c.bf16 %v4035_v41, %v4034_v15  ;;  %v4036_v24 = vld [vmem:[%s12688_s1 + $0x1e0] sm:$0xff] }
 0x37f   : > { %v6887_v1 = vpop.f32.mrb[195].mxu1  ;;  %7674 = vmatmul.mubr.msk.f32.gmra.mrb[214].mxu1 %vm1685_vm2, %v8557_v38  ;;  %8466 = vmatprep.subr.bf16.mxu0 %v12899_v32  ;;  %v4019_v38 = vld [vmem:[%s12688_s1 + $0x158] sm:$0xff]  ;;  %v12903_v15 = vld [vmem:[#allocation62_spill] sm:$0xff]  ;;  %v4565_v32 = vld [vmem:[%s8975_s30 + $0x400] sm:$0xff] }
 0x380   : > { %8562 = vtanh.f32 %v3552_v40  ;;  %v3538_v48 = vadd.f32 %v12897_v33, %v3245_v59  ;;  %v6888_v11 = vadd.f32 %v6887_v1, %v6886_v57  ;;  %7676 = vmatprep.mubr.msk.f32.mxu1 %vm8759_vm1, %v12833_v63  ;;  %8300 = vmatpush3.bf16.msra.mxu1 %v8299_v22  ;;  %v4549_v22 = vld [vmem:[%s8975_s30 + $0x2e0] sm:$0xff]  ;;  %v12900_v40 = vld [vmem:[#allocation59_spill] sm:$0xff]  ;;  %v12901_v1 = vld [vmem:[#allocation60_spill] sm:$0xff] }
 0x381   : > { %8302 = vmatprep.subr.bf16.mxu1 %v8301_v14  ;;  %4852 = vmatmul.mubr.f32.gmra.mrb[52].mxu0 %v4541_v12  ;;  %v8307_v14 = vpack.c.bf16 %v4017_v27, %v4016_v19  ;;  %v4557_v33 = vld [vmem:[%s8975_s30 + $0x370] sm:$0xff]  ;;  %v4021_v19 = vld [vmem:[%s12688_s1 + $0x168] sm:$0xff]  ;;  %v12902_v27 = vld [vmem:[#allocation61_spill] sm:$0xff] }
 0x382   : > { %v8559_v45 = vpop.eup %8558  ;;  %v3553_v4 = vadd.f32 %v3538_v48, %v12889_v30  ;;  %v3250_v7 = vadd.f32 %v6888_v11, %v11594_v47  ;;  %v6889_v46 = vpop.f32.mrb[196].mxu1  ;;  %4856 = vmatprep.mubr.f32.mxu0 %v4550_v2  ;;  %8468 = vmatpush3.bf16.msra.mxu0 %v12900_v40  ;;  %v8311_v11 = vpack.c.bf16 %v4019_v38, %v4018_v31 }
 0x383   : > { %v6890_v50 = vpop.f32.mrb[197].mxu1  ;;  %7677 = vmatmul.mubr.msk.f32.gmra.mrb[216].mxu1 %vm1685_vm2, %v8559_v45  ;;  %8470 = vmatprep.subr.bf16.mxu0 %v12901_v1  ;;  %v8313_v2 = vpack.c.bf16 %v4037_v60, %v4036_v24 }
 0x384   : > { %8564 = vtanh.f32 %v3553_v4  ;;  %v3539_v47 = vadd.f32 %v11350_v35, %v3250_v7  ;;  %v6891_v3 = vadd.f32 %v6890_v50, %v6889_v46  ;;  %7679 = vmatprep.mubr.msk.f32.mxu1 %vm8759_vm1, %v12833_v63  ;;  %8304 = vmatpush3.bf16.msra.mxu1 %v8303_v51  ;;  %v4566_v51 = vld [vmem:[%s8975_s30 + $0x408] sm:$0xff]  ;;  %v4038_v7 = vld [vmem:[%s12688_s1 + $0x1f0] sm:$0xff]  ;;  %v4039_v46 = vld [vmem:[%s12688_s1 + $0x1f8] sm:$0xff] }
 0x385   : > { %8306 = vmatprep.subr.bf16.mxu1 %v8305_v49  ;;  %4857 = vmatmul.mubr.f32.gmra.mrb[54].mxu0 %v4549_v22  ;;  %v4020_v49 = vld [vmem:[%s12688_s1 + $0x160] sm:$0xff] }
 0x386   : > { %v8561_v35 = vpop.eup %8560  ;;  %v3554_v59 = vadd.f32 %v3539_v47, %v12889_v30  ;;  %v3255_v57 = vadd.f32 %v6891_v3, %v11605_v10  ;;  %v6892_v56 = vpop.f32.mrb[198].mxu1  ;;  %4861 = vmatprep.mubr.f32.mxu0 %v4558_v16  ;;  %8472 = vmatpush3.bf16.msra.mxu0 %v12902_v27  ;;  %v8315_v22 = vpack.c.bf16 %v4021_v19, %v4020_v49  ;;  %v4574_v47 = vld [vmem:[%s8975_s30 + $0x498] sm:$0xff] }
 0x387   : > { %v6893_v12 = vpop.f32.mrb[199].mxu1  ;;  %7680 = vmatmul.mubr.msk.f32.gmra.mrb[218].mxu1 %vm1685_vm2, %v8561_v35  ;;  %8474 = vmatprep.subr.bf16.mxu0 %v12903_v15  ;;  %v8317_v3 = vpack.c.bf16 %v4039_v46, %v4038_v7  ;;  %v4023_v16 = vld [vmem:[%s12688_s1 + $0x178] sm:$0xff] }
 0x388   : > { %8566 = vtanh.f32 %v3554_v59  ;;  %v3540_v10 = vadd.f32 %v11359_v0, %v3255_v57  ;;  %v6894_v48 = vadd.f32 %v6893_v12, %v6892_v56  ;;  %7682 = vmatprep.mubr.msk.f32.mxu1 %vm8759_vm1, %v12833_v63  ;;  %8308 = vmatpush3.bf16.msra.mxu1 %v8307_v14  ;;  %v4022_v14 = vld [vmem:[%s12688_s1 + $0x170] sm:$0xff]  ;;  %v12905_v35 = vld [vmem:[#allocation64_spill] sm:$0xff]  ;;  %v12907_v12 = vld [vmem:[#allocation65_spill] sm:$0xff] }
 0x389   : > { %8310 = vmatprep.subr.bf16.mxu1 %v8309_v55  ;;  %4862 = vmatmul.mubr.f32.gmra.mrb[56].mxu0 %v4557_v33  ;;  %v12904_v55 = vld [vmem:[#allocation63_spill] sm:$0xff]  ;;  %v12906_v56 = vld [vmem:[#allocation88_spill] sm:$0xff]  ;;  %v8319_v1 = vpack.c.bf16 %v4023_v16, %v4022_v14 }
 0x38a   : > { %v8563_v0 = vpop.eup %8562  ;;  %v3555_v37 = vadd.f32 %v3540_v10, %v12889_v30  ;;  %v3260_v45 = vadd.f32 %v6894_v48, %v11616_v25  ;;  %v6895_v4 = vpop.f32.mrb[200].mxu1  ;;  %4866 = vmatprep.mubr.f32.mxu0 %v4566_v51  ;;  %8476 = vmatpush3.bf16.msra.mxu0 %v12904_v55  ;;  %v4573_v57 = vld [vmem:[%s8975_s30 + $0x490] sm:$0xff]  ;;  %v4590_v27 = vld [vmem:[%s8975_s30 + $0x5b8] sm:$0xff] }
 0x38b   : > { %v6896_v41 = vpop.f32.mrb[201].mxu1  ;;  %7683 = vmatmul.mubr.msk.f32.gmra.mrb[220].mxu1 %vm1685_vm2, %v8563_v0  ;;  %8478 = vmatprep.subr.bf16.mxu0 %v12905_v35  ;;  %v12908_v0 = vld [vmem:[#allocation5_spill] sm:$0xff]  ;;  %v4606_v14 = vld [vmem:[%s8975_s30 + $0x6d8] sm:$0xff]  ;;  %v4621_v35 = vld [vmem:[%s8975_s30 + $0x7f0] sm:$0x7] }
 0x38c   : > { %8568 = vtanh.f32 %v3555_v37  ;;  %v3541_v25 = vadd.f32 %v11380_v8, %v3260_v45  ;;  %v6897_v50 = vadd.f32 %v6896_v41, %v6895_v4  ;;  %7685 = vmatprep.mubr.msk.f32.mxu1 %vm8759_vm1, %v12833_v63  ;;  %8312 = vmatpush3.bf16.msra.mxu1 %v8311_v11  ;;  %v4598_v41 = vld [vmem:[%s8975_s30 + $0x648] sm:$0xff] }
 0x38d   : > { %8314 = vmatprep.subr.bf16.mxu1 %v8313_v2  ;;  %4867 = vmatmul.mubr.f32.gmra.mrb[58].mxu0 %v4565_v32  ;;  %v4581_v2 = vld [vmem:[%s8975_s30 + $0x520] sm:$0xff] }
 0x38e   : > { %v8565_v8 = vpop.eup %8564  ;;  %v3556_v31 = vadd.f32 %v3541_v25, %v12889_v30  ;;  %v3265_v38 = vadd.f32 %v6897_v50, %v11627_v23  ;;  %v6898_v40 = vpop.f32.mrb[202].mxu1  ;;  %4871 = vmatprep.mubr.f32.mxu0 %v4574_v47  ;;  %v4582_v23 = vld [vmem:[%s8975_s30 + $0x528] sm:$0xff]  ;;  %8480 = vmatpush3.bf16.msra.mxu0 %v12907_v12  ;;  %v4597_v47 = vld [vmem:[%s8975_s30 + $0x640] sm:$0xff]  ;;  %v8700_v12 = vld [vmem:[%s8975_s30 + $0x70] sm:$0xff] }
 0x38f   : > { %v6899_v59 = vpop.f32.mrb[203].mxu1  ;;  %7686 = vmatmul.mubr.msk.f32.gmra.mrb[222].mxu1 %vm1685_vm2, %v8565_v8  ;;  %v4605_v8 = vld [vmem:[%s8975_s30 + $0x6d0] sm:$0xff] }
 0x390   : > { %8570 = vtanh.f32 %v3556_v31  ;;  %v3542_v24 = vadd.f32 %v12906_v56, %v3265_v38  ;;  %v6900_v60 = vadd.f32 %v6899_v59, %v6898_v40  ;;  %7688 = vmatprep.mubr.msk.f32.mxu1 %vm8759_vm1, %v12833_v63  ;;  %8316 = vmatpush3.bf16.msra.mxu1 %v8315_v22  ;;  %v4614_v31 = vld [vmem:[%s8975_s30 + $0x768] sm:$0xff]  ;;  %v4513_v56 = vld [vmem:[%s8975_s30 + $0x30] sm:$0xff] }
 0x391   : > { %8318 = vmatprep.subr.bf16.mxu1 %v8317_v3  ;;  %4872 = vmatmul.mubr.f32.gmra.mrb[60].mxu0 %v4573_v57  ;;  %v4514_v57 = vld [vmem:[%s8975_s30 + $0x38] sm:$0xff] }
 0x392   : > { %v8567_v33 = vpop.eup %8566  ;;  %v3557_v10 = vadd.f32 %v3542_v24, %v12889_v30  ;;  %v3270_v48 = vadd.f32 %v6900_v60, %v11637_v13  ;;  %v6901_v11 = vpop.f32.mrb[204].mxu1  ;;  %4876 = vmatprep.mubr.f32.mxu0 %v4582_v23  ;;  %v4522_v60 = vld [vmem:[%s8975_s30 + $0xc8] sm:$0xff]  ;;  %v8699_v23 = vld [vmem:[%s8975_s30 + $0x78] sm:$0xff] }
 0x393   : > { %v6902_v51 = vpop.f32.mrb[205].mxu1  ;;  %7689 = vmatmul.mubr.msk.f32.gmra.mrb[224].mxu1 %vm1685_vm2, %v8567_v33  ;;  %v4530_v33 = vld [vmem:[%s8975_s30 + $0x158] sm:$0xff] }
 0x394   : > { %8572 = vtanh.f32 %v3557_v10  ;;  %v3543_v49 = vadd.f32 %v11410_v42, %v3270_v48  ;;  %v6903_v19 = vadd.f32 %v6902_v51, %v6901_v11  ;;  %7691 = vmatprep.mubr.msk.f32.mxu1 %vm8759_vm1, %v12833_v63  ;;  %8320 = vmatpush3.bf16.msra.mxu1 %v8319_v1  ;;  %v4589_v42 = vld [vmem:[%s8975_s30 + $0x5b0] sm:$0xff]  ;;  %v4521_v1 = vld [vmem:[%s8975_s30 + $0xc0] sm:$0xff]  ;;  %v12909_v48 = vld [vmem:[#allocation6_spill] sm:$0xff] }
 0x395   : > { %8354 = vmatprep.subr.bf16.mxu1 %v12908_v0  ;;  %4877 = vmatmul.mubr.f32.gmra.mrb[62].mxu0 %v4581_v2  ;;  %v4529_v10 = vld [vmem:[%s8975_s30 + $0x150] sm:$0xff]  ;;  %v8701_v11 = vld [vmem:[%s8975_s30 + $0x108] sm:$0xff]  ;;  %v8702_v2 = vld [vmem:[%s8975_s30 + $0x100] sm:$0xff] }
 0x396   : > { %v8569_v13 = vpop.eup %8568  ;;  %v3558_v37 = vadd.f32 %v3543_v49, %v12889_v30  ;;  %v3275_v45 = vadd.f32 %v6903_v19, %v11648_v61  ;;  %v6904_v4 = vpop.f32.mrb[206].mxu1  ;;  %4881 = vmatprep.mubr.f32.mxu0 %v4590_v27  ;;  %v12910_v51 = vld [vmem:[#allocation7_spill] sm:$0xff]  ;;  %v4538_v49 = vld [vmem:[%s8975_s30 + $0x1e8] sm:$0xff]  ;;  %v4537_v19 = vld [vmem:[%s8975_s30 + $0x1e0] sm:$0xff] }
 0x397   : > { %v6905_v7 = vpop.f32.mrb[207].mxu1  ;;  %7692 = vmatmul.mubr.msk.f32.gmra.mrb[226].mxu1 %vm1685_vm2, %v8569_v13  ;;  %v8703_v27 = vld [vmem:[%s8975_s30 + $0x198] sm:$0xff]  ;;  %v12912_v13 = vld [vmem:[#allocation9_spill] sm:$0xff] }
 0x398   : > { %8574 = vtanh.f32 %v3558_v37  ;;  %v3544_v46 = vadd.f32 %v11421_v53, %v3275_v45  ;;  %v6906_v15 = vadd.f32 %v6905_v7, %v6904_v4  ;;  %7694 = vmatprep.mubr.msk.f32.mxu1 %vm8759_vm1, %v12833_v63  ;;  %v12911_v0 = vld [vmem:[#allocation8_spill] sm:$0xff]  ;;  %v8704_v37 = vld [vmem:[%s8975_s30 + $0x190] sm:$0xff]  ;;  %v8705_v7 = vld [vmem:[%s8975_s30 + $0x228] sm:$0xff] }
 0x399   : > { %4882 = vmatmul.mubr.f32.gmra.mrb[64].mxu0 %v4589_v42  ;;  %v4546_v45 = vld [vmem:[%s8975_s30 + $0x278] sm:$0xff]  ;;  %v4545_v4 = vld [vmem:[%s8975_s30 + $0x270] sm:$0xff]  ;;  %v12913_v42 = vld [vmem:[#allocation10_spill] sm:$0xff] }
 0x39a   : > { %v8571_v32 = vpop.eup %8570  ;;  %v3559_v61 = vadd.f32 %v3544_v46, %v12889_v30  ;;  %v3280_v25 = vadd.f32 %v6906_v15, %v11657_v28  ;;  %v6907_v50 = vpop.f32.mrb[208].mxu1  ;;  %4886 = vmatprep.mubr.f32.mxu0 %v4598_v41  ;;  %v12914_v46 = vld [vmem:[#allocation11_spill] sm:$0xff]  ;;  %v8706_v15 = vld [vmem:[%s8975_s30 + $0x220] sm:$0xff]  ;;  %v4554_v41 = vld [vmem:[%s8975_s30 + $0x308] sm:$0xff] }
 0x39b   : > { %v6908_v22 = vpop.f32.mrb[209].mxu1  ;;  %7695 = vmatmul.mubr.msk.f32.gmra.mrb[228].mxu1 %vm1685_vm2, %v8571_v32  ;;  %v4553_v32 = vld [vmem:[%s8975_s30 + $0x300] sm:$0xff] }
 0x39c   : > { %8576 = vtanh.f32 %v3559_v61  ;;  %v3545_v53 = vadd.f32 %v11445_v26, %v3280_v25  ;;  %v6909_v3 = vadd.f32 %v6908_v22, %v6907_v50  ;;  %7697 = vmatprep.mubr.msk.f32.mxu1 %vm8759_vm1, %v12833_v63  ;;  %v8707_v61 = vld [vmem:[%s8975_s30 + $0x2b8] sm:$0xff]  ;;  %v12916_v50 = vld [vmem:[#allocation13_spill] sm:$0xff]  ;;  %v8708_v22 = vld [vmem:[%s8975_s30 + $0x2b0] sm:$0xff] }
 0x39d   : > { %4887 = vmatmul.mubr.f32.gmra.mrb[66].mxu0 %v4597_v47  ;;  %v12915_v25 = vld [vmem:[#allocation12_spill] sm:$0xff] }
 0x39e   : > { %v8573_v16 = vpop.eup %8572  ;;  %v3560_v28 = vadd.f32 %v3545_v53, %v12889_v30  ;;  %v3285_v55 = vadd.f32 %v6909_v3, %v11663_v18  ;;  %4891 = vmatprep.mubr.f32.mxu0 %v4606_v14  ;;  %v4613_v18 = vld [vmem:[%s8975_s30 + $0x760] sm:$0xff]  ;;  %v4562_v47 = vld [vmem:[%s8975_s30 + $0x398] sm:$0xff]  ;;  %v4561_v53 = vld [vmem:[%s8975_s30 + $0x390] sm:$0xff] }
 0x39f   : > { %7698 = vmatmul.mubr.msk.f32.gmra.mrb[230].mxu1 %vm1685_vm2, %v8573_v16  ;;  %v8709_v3 = vld [vmem:[%s8975_s30 + $0x348] sm:$0xff]  ;;  %v12918_v16 = vld [vmem:[#allocation15_spill] sm:$0xff] }
 0x3a0   : > { %8578 = vtanh.f32 %v3560_v28  ;;  %v3546_v26 = vadd.f32 %v3515_v58, %v3285_v55  ;;  %7700 = vmatprep.mubr.msk.f32.mxu1 %vm8759_vm1, %v12833_v63  ;;  %v12917_v14 = vld [vmem:[#allocation14_spill] sm:$0xff]  ;;  %v8710_v28 = vld [vmem:[%s8975_s30 + $0x340] sm:$0xff] }
 0x3a1   : > { %4892 = vmatmul.mubr.f32.gmra.mrb[68].mxu0 %v4605_v8  ;;  %v4570_v55 = vld [vmem:[%s8975_s30 + $0x428] sm:$0xff]  ;;  %v4569_v8 = vld [vmem:[%s8975_s30 + $0x420] sm:$0xff] }
 0x3a2   : > { %v8575_v38 = vpop.eup %8574  ;;  %v3561_v40 = vadd.f32 %v3546_v26, %v12889_v30  ;;  %4896 = vmatprep.mubr.f32.mxu0 %v4614_v31  ;;  %v8711_v26 = vld [vmem:[%s8975_s30 + $0x3d8] sm:$0xff] }
 0x3a3   : > { %7701 = vmatmul.mubr.msk.f32.gmra.mrb[232].mxu1 %vm1685_vm2, %v8575_v38  ;;  %v12919_v31 = vld [vmem:[#allocation16_spill] sm:$0xff]  ;;  %v12920_v38 = vld [vmem:[#allocation17_spill] sm:$0xff] }
 0x3a4   : > { %8580 = vtanh.f32 %v3561_v40  ;;  %7703 = vmatprep.mubr.msk.f32.mxu1 %vm8759_vm1, %v12833_v63  ;;  %v8712_v40 = vld [vmem:[%s8975_s30 + $0x3d0] sm:$0xff] }
 0x3a5   : > { %4897 = vmatmul.mubr.f32.gmra.mrb[70].mxu0 %v4613_v18 }
 0x3a6   : > { %v8577_v58 = vpop.eup %8576  ;;  %4901 = vmatprep.mubr.f32.mxu0 %v4622_v52  ;;  %v4578_v52 = vld [vmem:[%s8975_s30 + $0x4b8] sm:$0xff] }
 0x3a7   : > { %7704 = vmatmul.mubr.msk.f32.gmra.mrb[234].mxu1 %vm1685_vm2, %v8577_v58  ;;  %v4577_v58 = vld [vmem:[%s8975_s30 + $0x4b0] sm:$0xff] }
 0x3a8   : > { %7706 = vmatprep.mubr.msk.f32.mxu1 %vm8759_vm1, %v12833_v63 }
 0x3a9   : > { %4902 = vmatmul.mubr.f32.gmra.mrb[72].mxu0 %v4621_v35  ;;  %v8713_v35 = vld [vmem:[%s8975_s30 + $0x468] sm:$0xff] }
 0x3aa   : > { %v8579_v59 = vpop.eup %8578  ;;  %5111 = vmatprep.mubr.f32.mxu0 %v4514_v57 }
 0x3ab   : > { %7707 = vmatmul.mubr.msk.f32.gmra.mrb[236].mxu1 %vm1685_vm2, %v8579_v59  ;;  %v12921_v59 = vld [vmem:[#allocation18_spill] sm:$0xff] }
 0x3ac   : > { %7709 = vmatprep.mubr.msk.f32.mxu1 %vm8759_vm1, %v12833_v63 }
 0x3ad   : > { %5112 = vmatmul.mubr.f32.vlgmr.msra.gmra.mrb[74].mxu0 %v4513_v56  ;;  %v12922_v56 = vld [vmem:[#allocation19_spill] sm:$0xff] }
 0x3ae   : > { %v8581_v24 = vpop.eup %8580  ;;  %5116 = vmatprep.mubr.f32.mxu0 %v4522_v60  ;;  %v8714_v60 = vld [vmem:[%s8975_s30 + $0x460] sm:$0xff] }
 0x3af   : > { %7710 = vmatmul.mubr.msk.f32.gmra.mrb[238].mxu1 %vm1685_vm2, %v8581_v24 }
 0x3b0   : > { %4276 = vmatprep.mubr.f32.mxu1 %v8699_v23  ;;  %v4586_v23 = vld [vmem:[%s8975_s30 + $0x548] sm:$0xff] }
 0x3b1   : > { %5117 = vmatmul.mubr.f32.gmra.mrb[76].mxu0 %v4521_v1 }
 0x3b2   : > { %5121 = vmatprep.mubr.f32.mxu0 %v4530_v33  ;;  %v8715_v33 = vld [vmem:[%s8975_s30 + $0x4f8] sm:$0xff] }
 0x3b3   : > { %4277 = vmatmul.mubr.f32.vlgmr.msra.gmra.mrb[240].mxu1 %v8700_v12  ;;  %v4585_v12 = vld [vmem:[%s8975_s30 + $0x540] sm:$0xff] }
 0x3b4   : > { %8356 = vmatpush3.bf16.msra.mxu1 %v12909_v48  ;;  %4281 = vmatprep.mubr.f32.mxu1 %v8701_v11  ;;  %v12924_v11 = vld [vmem:[#allocation21_spill] sm:$0xff] }
 0x3b5   : > { %8358 = vmatprep.subr.bf16.mxu1 %v12910_v51  ;;  %5122 = vmatmul.mubr.f32.gmra.mrb[78].mxu0 %v4529_v10  ;;  %v12923_v10 = vld [vmem:[#allocation20_spill] sm:$0xff] }
 0x3b6   : > { %5126 = vmatprep.mubr.f32.mxu0 %v4538_v49 }
 0x3b7   : > { %4282 = vmatmul.mubr.f32.gmra.mrb[242].mxu1 %v8702_v2  ;;  %v8716_v2 = vld [vmem:[%s8975_s30 + $0x4f0] sm:$0xff] }
 0x3b8   : > { %4286 = vmatprep.mubr.f32.mxu1 %v8703_v27  ;;  %8360 = vmatpush3.bf16.msra.mxu1 %v12911_v0  ;;  %v4593_v27 = vld [vmem:[%s8975_s30 + $0x5d0] sm:$0xff]  ;;  %v8717_v0 = vld [vmem:[%s8975_s30 + $0x588] sm:$0xff] }
 0x3b9   : > { %8362 = vmatprep.subr.bf16.mxu1 %v12912_v13  ;;  %5127 = vmatmul.mubr.f32.gmra.mrb[80].mxu0 %v4537_v19  ;;  %v4594_v19 = vld [vmem:[%s8975_s30 + $0x5d8] sm:$0xff] }
 0x3ba   : > { %5131 = vmatprep.mubr.f32.mxu0 %v4546_v45  ;;  %v8718_v45 = vld [vmem:[%s8975_s30 + $0x580] sm:$0xff] }
 0x3bb   : > { %4287 = vmatmul.mubr.f32.gmra.mrb[244].mxu1 %v8704_v37 }
 0x3bc   : > { %4291 = vmatprep.mubr.f32.mxu1 %v8705_v7  ;;  %8364 = vmatpush3.bf16.msra.mxu1 %v12913_v42  ;;  %v4602_v7 = vld [vmem:[%s8975_s30 + $0x668] sm:$0xff]  ;;  %v4601_v42 = vld [vmem:[%s8975_s30 + $0x660] sm:$0xff] }
 0x3bd   : > { %8366 = vmatprep.subr.bf16.mxu1 %v12914_v46  ;;  %5132 = vmatmul.mubr.f32.gmra.mrb[82].mxu0 %v4545_v4  ;;  %v8719_v46 = vld [vmem:[%s8975_s30 + $0x618] sm:$0xff] }
 0x3be   : > { %5136 = vmatprep.mubr.f32.mxu0 %v4554_v41 }
 0x3bf   : > { %4292 = vmatmul.mubr.f32.gmra.mrb[246].mxu1 %v8706_v15 }
 0x3c0   : > { %4296 = vmatprep.mubr.f32.mxu1 %v8707_v61  ;;  %8368 = vmatpush3.bf16.msra.mxu1 %v12915_v25  ;;  %v4610_v25 = vld [vmem:[%s8975_s30 + $0x6f8] sm:$0xff] }
 0x3c1   : > { %8370 = vmatprep.subr.bf16.mxu1 %v12916_v50  ;;  %5137 = vmatmul.mubr.f32.gmra.mrb[84].mxu0 %v4553_v32  ;;  %v8720_v32 = vld [vmem:[%s8975_s30 + $0x610] sm:$0xff] }
 0x3c2   : > { %5141 = vmatprep.mubr.f32.mxu0 %v4562_v47  ;;  %v4609_v50 = vld [vmem:[%s8975_s30 + $0x6f0] sm:$0xff] }
 0x3c3   : > { %4297 = vmatmul.mubr.f32.gmra.mrb[248].mxu1 %v8708_v22  ;;  %v8721_v22 = vld [vmem:[%s8975_s30 + $0x6a8] sm:$0xff] }
 0x3c4   : > { %4301 = vmatprep.mubr.f32.mxu1 %v8709_v3  ;;  %8372 = vmatpush3.bf16.msra.mxu1 %v12917_v14  ;;  %v8722_v3 = vld [vmem:[%s8975_s30 + $0x6a0] sm:$0xff] }
 0x3c5   : > { %8374 = vmatprep.subr.bf16.mxu1 %v12918_v16  ;;  %5142 = vmatmul.mubr.f32.gmra.mrb[86].mxu0 %v4561_v53  ;;  %v4618_v16 = vld [vmem:[%s8975_s30 + $0x788] sm:$0xff] }
 0x3c6   : > { %5146 = vmatprep.mubr.f32.mxu0 %v4570_v55  ;;  %v8723_v55 = vld [vmem:[%s8975_s30 + $0x738] sm:$0xff] }
 0x3c7   : > { %4302 = vmatmul.mubr.f32.gmra.mrb[250].mxu1 %v8710_v28  ;;  %v4617_v28 = vld [vmem:[%s8975_s30 + $0x780] sm:$0xff] }
 0x3c8   : > { %4306 = vmatprep.mubr.f32.mxu1 %v8711_v26  ;;  %8376 = vmatpush3.bf16.msra.mxu1 %v12919_v31  ;;  %v8724_v31 = vld [vmem:[%s8975_s30 + $0x730] sm:$0xff] }
 0x3c9   : > { %8378 = vmatprep.subr.bf16.mxu1 %v12920_v38  ;;  %5147 = vmatmul.mubr.f32.gmra.mrb[88].mxu0 %v4569_v8 }
 0x3ca   : > { %v7045_v18 = vpop.f32.mrb[240].mxu0  ;;  %5151 = vmatprep.mubr.f32.mxu0 %v4578_v52 }
 0x3cb   : > { %4307 = vmatmul.mubr.f32.gmra.mrb[252].mxu1 %v8712_v40  ;;  %v7046_v57 = vpop.f32.mrb[241].mxu0  ;;  %v4626_v40 = vld [vmem:[%s8975_s30 + $0x818] sm:$0x7] }
 0x3cc   : > { %4311 = vmatprep.mubr.f32.mxu1 %v8713_v35  ;;  %8380 = vmatpush3.bf16.msra.mxu1 %v12921_v59  ;;  %v11942_v24 = vadd.f32 %v7046_v57, %v7045_v18  ;;  %v8725_v18 = vld [vmem:[%s8975_s30 + $0x7c8] sm:$0xff]  ;;  %v8726_v59 = vld [vmem:[%s8975_s30 + $0x7c0] sm:$0xff] }
 0x3cd   : > { %8382 = vmatprep.subr.bf16.mxu1 %v12922_v56  ;;  %5152 = vmatmul.mubr.f32.gmra.mrb[90].mxu0 %v4577_v58  ;;  %v4625_v58 = vld [vmem:[%s8975_s30 + $0x810] sm:$0x7]  ;;  %v8727_v56 = vld [vmem:[%s8975_s30 + $0x858] sm:$0x7] }
 0x3ce   : > { %v7048_v1 = vpop.f32.mrb[242].mxu0  ;;  %5156 = vmatprep.mubr.f32.mxu0 %v4586_v23 }
 0x3cf   : > { %4312 = vmatmul.mubr.f32.gmra.mrb[254].mxu1 %v8714_v60  ;;  %v7049_v48 = vpop.f32.mrb[243].mxu0 }
 0x3d0   : > { %4316 = vmatprep.mubr.f32.mxu1 %v8715_v33  ;;  %8384 = vmatpush3.bf16.msra.mxu1 %v12923_v10  ;;  %v11950_v51 = vadd.f32 %v7049_v48, %v7048_v1  ;;  %v4508_v1 = vld [vmem:[%s8975_s30 + $0x8] sm:$0xff]  ;;  %v4507_v10 = vld [vmem:[%s8975_s30] sm:$0xff] }
 0x3d1   : > { %8418 = vmatprep.subr.bf16.mxu1 %v12924_v11  ;;  %5157 = vmatmul.mubr.f32.gmra.mrb[92].mxu0 %v4585_v12  ;;  %v8728_v12 = vld [vmem:[%s8975_s30 + $0x850] sm:$0x7]  ;;  %v4516_v11 = vld [vmem:[%s8975_s30 + $0x98] sm:$0xff] }
 0x3d2   : > { %v7051_v49 = vpop.f32.mrb[244].mxu0  ;;  %5161 = vmatprep.mubr.f32.mxu0 %v4594_v19  ;;  %v12925_v19 = vld [vmem:[#allocation22_spill] sm:$0xff] }
 0x3d3   : > { %4317 = vmatmul.mubr.f32.gmra.mrb[0].mxu1 %v8716_v2  ;;  %v7052_v13 = vpop.f32.mrb[245].mxu0 }
 0x3d4   : > { %4321 = vmatprep.mubr.f32.mxu1 %v8717_v0  ;;  %v11956_v37 = vadd.f32 %v7052_v13, %v7051_v49  ;;  %v4524_v13 = vld [vmem:[%s8975_s30 + $0x128] sm:$0xff] }
 0x3d5   : > { %5162 = vmatmul.mubr.f32.gmra.mrb[94].mxu0 %v4593_v27  ;;  %v4515_v27 = vld [vmem:[%s8975_s30 + $0x90] sm:$0xff] }
 0x3d6   : > { %v7054_v4 = vpop.f32.mrb[246].mxu0  ;;  %5166 = vmatprep.mubr.f32.mxu0 %v4602_v7 }
 0x3d7   : > { %4322 = vmatmul.mubr.f32.gmra.mrb[2].mxu1 %v8718_v45  ;;  %v7055_v15 = vpop.f32.mrb[247].mxu0  ;;  %v12926_v45 = vld [vmem:[#allocation23_spill] sm:$0xff] }
 0x3d8   : > { %4326 = vmatprep.mubr.f32.mxu1 %v8719_v46  ;;  %v11962_v41 = vadd.f32 %v7055_v15, %v7054_v4  ;;  %v12927_v46 = vld [vmem:[#allocation26_spill] sm:$0xff] }
 0x3d9   : > { %5167 = vmatmul.mubr.f32.gmra.mrb[96].mxu0 %v4601_v42  ;;  %v4523_v42 = vld [vmem:[%s8975_s30 + $0x120] sm:$0xff] }
 0x3da   : > { %v7057_v61 = vpop.f32.mrb[248].mxu0  ;;  %5171 = vmatprep.mubr.f32.mxu0 %v4610_v25 }
 0x3db   : > { %4327 = vmatmul.mubr.f32.gmra.mrb[4].mxu1 %v8720_v32  ;;  %v7058_v47 = vpop.f32.mrb[249].mxu0  ;;  %v4532_v32 = vld [vmem:[%s8975_s30 + $0x1b8] sm:$0xff] }
 0x3dc   : > { %4331 = vmatprep.mubr.f32.mxu1 %v8721_v22  ;;  %v11968_v53 = vadd.f32 %v7058_v47, %v7057_v61  ;;  %v12928_v61 = vld [vmem:[#allocation27_spill] sm:$0xff]  ;;  %v12929_v22 = vld [vmem:[#allocation30_spill] sm:$0xff] }
 0x3dd   : > { %5172 = vmatmul.mubr.f32.gmra.mrb[98].mxu0 %v4609_v50  ;;  %v4531_v50 = vld [vmem:[%s8975_s30 + $0x1b0] sm:$0xff] }
 0x3de   : > { %v7060_v14 = vpop.f32.mrb[250].mxu0  ;;  %5176 = vmatprep.mubr.f32.mxu0 %v4618_v16 }
 0x3df   : > { %4332 = vmatmul.mubr.f32.gmra.mrb[6].mxu1 %v8722_v3  ;;  %v7061_v8 = vpop.f32.mrb[251].mxu0  ;;  %v4540_v3 = vld [vmem:[%s8975_s30 + $0x248] sm:$0xff] }
 0x3e0   : > { %4336 = vmatprep.mubr.f32.mxu1 %v8723_v55  ;;  %v11974_v26 = vadd.f32 %v7061_v8, %v7060_v14  ;;  %v12930_v14 = vld [vmem:[#allocation31_spill] sm:$0xff]  ;;  %v4539_v55 = vld [vmem:[%s8975_s30 + $0x240] sm:$0xff]  ;;  %v12931_v8 = vld [vmem:[#allocation34_spill] sm:$0xff] }
 0x3e1   : > { %5177 = vmatmul.mubr.f32.gmra.mrb[100].mxu0 %v4617_v28 }
 0x3e2   : > { %v7063_v38 = vpop.f32.mrb[252].mxu0  ;;  %5181 = vmatprep.mubr.f32.mxu0 %v4626_v40 }
 0x3e3   : > { %4337 = vmatmul.mubr.f32.gmra.mrb[8].mxu1 %v8724_v31  ;;  %v7064_v52 = vpop.f32.mrb[253].mxu0  ;;  %v4548_v31 = vld [vmem:[%s8975_s30 + $0x2d8] sm:$0xff] }
 0x3e4   : > { %4341 = vmatprep.mubr.f32.mxu1 %v8725_v18  ;;  %v11980_v35 = vadd.f32 %v7064_v52, %v7063_v38  ;;  %v12932_v38 = vld [vmem:[#allocation35_spill] sm:$0xff] }
 0x3e5   : > { %5182 = vmatmul.mubr.f32.gmra.mrb[102].mxu0 %v4625_v58  ;;  %v4547_v58 = vld [vmem:[%s8975_s30 + $0x2d0] sm:$0xff] }
 0x3e6   : > { %v7066_v57 = vpop.f32.mrb[254].mxu0 }
 0x3e7   : > { %4342 = vmatmul.mubr.f32.gmra.mrb[10].mxu1 %v8726_v59  ;;  %v7067_v60 = vpop.f32.mrb[255].mxu0  ;;  %v12933_v59 = vld [vmem:[#allocation38_spill] sm:$0xff] }
 0x3e8   : > { %4346 = vmatprep.mubr.f32.mxu1 %v8727_v56  ;;  %v11985_v23 = vadd.f32 %v7067_v60, %v7066_v57  ;;  %v4556_v57 = vld [vmem:[%s8975_s30 + $0x368] sm:$0xff]  ;;  %v12934_v56 = vld [vmem:[#allocation39_spill] sm:$0xff] }
 0x3ea   : > { %v7069_v33 = vpop.f32.mrb[0].mxu0 }
 0x3eb   : > { %4347 = vmatmul.mubr.f32.gmra.mrb[12].mxu1 %v8728_v12  ;;  %v7070_v48 = vpop.f32.mrb[1].mxu0 }
 0x3ec   : > { %4691 = vmatprep.mubr.f32.mxu1 %v4508_v1  ;;  %v11990_v2 = vadd.f32 %v7070_v48, %v7069_v33  ;;  %v4555_v33 = vld [vmem:[%s8975_s30 + $0x360] sm:$0xff]  ;;  %v4564_v48 = vld [vmem:[%s8975_s30 + $0x3f8] sm:$0xff] }
 0x3ee   : > { %v7072_v49 = vpop.f32.mrb[2].mxu0 }
 0x3ef   : > { %4692 = vmatmul.mubr.f32.vlgmr.msra.gmra.mrb[14].mxu1 %v4507_v10  ;;  %v7073_v0 = vpop.f32.mrb[3].mxu0  ;;  %v12935_v10 = vld [vmem:[#allocation42_spill] sm:$0xff] }
 0x3f0   : > { %8420 = vmatpush3.bf16.msra.mxu1 %v12925_v19  ;;  %4696 = vmatprep.mubr.f32.mxu1 %v4516_v11  ;;  %v11996_v4 = vadd.f32 %v7073_v0, %v7072_v49  ;;  %v12936_v11 = vld [vmem:[#allocation43_spill] sm:$0xff] }
 0x3f1   : > { %8422 = vmatprep.subr.bf16.mxu1 %v12926_v45  ;;  %v4563_v0 = vld [vmem:[%s8975_s30 + $0x3f0] sm:$0xff]  ;;  %v4572_v45 = vld [vmem:[%s8975_s30 + $0x488] sm:$0xff] }
 0x3f2   : > { %v7075_v7 = vpop.f32.mrb[4].mxu0 }
 0x3f3   : > { %4697 = vmatmul.mubr.f32.gmra.mrb[16].mxu1 %v4515_v27  ;;  %v7076_v15 = vpop.f32.mrb[5].mxu0 }
 0x3f4   : > { %4701 = vmatprep.mubr.f32.mxu1 %v4524_v13  ;;  %8424 = vmatpush3.bf16.msra.mxu1 %v12927_v46  ;;  %v12002_v25 = vadd.f32 %v7076_v15, %v7075_v7  ;;  %v12937_v13 = vld [vmem:[#allocation46_spill] sm:$0xff]  ;;  %v12938_v7 = vld [vmem:[#allocation47_spill] sm:$0xff] }
 0x3f5   : > { %8426 = vmatprep.subr.bf16.mxu1 %v12928_v61  ;;  %v12939_v61 = vld [vmem:[#allocation49_spill] sm:$0xff] }
 0x3f7   : > { %4702 = vmatmul.mubr.f32.gmra.mrb[18].mxu1 %v4523_v42  ;;  %v7078_v47 = vpop.f32.mrb[6].mxu0 }
 0x3f8   : > { %4706 = vmatprep.mubr.f32.mxu1 %v4532_v32  ;;  %8428 = vmatpush3.bf16.msra.mxu1 %v12929_v22  ;;  %v7079_v16 = vpop.f32.mrb[7].mxu0  ;;  %v4571_v32 = vld [vmem:[%s8975_s30 + $0x480] sm:$0xff] }
 0x3f9   : > { %8430 = vmatprep.subr.bf16.mxu1 %v12930_v14  ;;  %v12008_v28 = vadd.f32 %v7079_v16, %v7078_v47  ;;  %v12940_v47 = vmov 0.0|0.0   ;;  %v4579_v16 = vld [vmem:[%s8975_s30 + $0x510] sm:$0xff] }
 0x3fb   : > { %4707 = vmatmul.mubr.f32.gmra.mrb[20].mxu1 %v4531_v50  ;;  %v7081_v40 = vpop.f32.mrb[8].mxu0  ;;  %v4580_v50 = vld [vmem:[%s8975_s30 + $0x518] sm:$0xff] }
 0x3fc   : > { %4711 = vmatprep.mubr.f32.mxu1 %v4540_v3  ;;  %8432 = vmatpush3.bf16.msra.mxu1 %v12931_v8  ;;  %v7082_v18 = vpop.f32.mrb[9].mxu0 }
 0x3fd   : > { %8434 = vmatprep.subr.bf16.mxu1 %v12932_v38  ;;  %v12014_v52 = vadd.f32 %v7082_v18, %v7081_v40  ;;  %v4587_v40 = vld [vmem:[%s8975_s30 + $0x5a0] sm:$0xff]  ;;  %v4596_v18 = vld [vmem:[%s8975_s30 + $0x638] sm:$0xff] }
 0x3ff   : > { %4712 = vmatmul.mubr.f32.gmra.mrb[22].mxu1 %v4539_v55  ;;  %v7084_v60 = vpop.f32.mrb[10].mxu0  ;;  %v4588_v55 = vld [vmem:[%s8975_s30 + $0x5a8] sm:$0xff] }
 0x400   : > { %4716 = vmatprep.mubr.f32.mxu1 %v4548_v31  ;;  %8436 = vmatpush3.bf16.msra.mxu1 %v12933_v59  ;;  %v7085_v1 = vpop.f32.mrb[11].mxu0 }
 0x401   : > { %8438 = vmatprep.subr.bf16.mxu1 %v12934_v56  ;;  %v12020_v12 = vadd.f32 %v7085_v1, %v7084_v60  ;;  %v4595_v56 = vld [vmem:[%s8975_s30 + $0x630] sm:$0xff]  ;;  %v4604_v60 = vld [vmem:[%s8975_s30 + $0x6c8] sm:$0xff] }
 0x403   : > { %4717 = vmatmul.mubr.f32.gmra.mrb[24].mxu1 %v4547_v58  ;;  %v7087_v49 = vpop.f32.mrb[12].mxu0 }
 0x404   : > { %4721 = vmatprep.mubr.f32.mxu1 %v4556_v57  ;;  %8440 = vmatpush3.bf16.msra.mxu1 %v12935_v10  ;;  %v7088_v19 = vpop.f32.mrb[13].mxu0 }
 0x405   : > { %8442 = vmatprep.subr.bf16.mxu1 %v12936_v11  ;;  %v12026_v27 = vadd.f32 %v7088_v19, %v7087_v49  ;;  %v4612_v11 = vld [vmem:[%s8975_s30 + $0x758] sm:$0xff] }
 0x407   : > { %4722 = vmatmul.mubr.f32.gmra.mrb[26].mxu1 %v4555_v33  ;;  %v7199_v42 = vpop.f32.mrb[14].mxu0 }
 0x408   : > { %4726 = vmatprep.mubr.f32.mxu1 %v4564_v48  ;;  %8444 = vmatpush3.bf16.msra.mxu1 %v12937_v13  ;;  %v7200_v46 = vpop.f32.mrb[15].mxu0  ;;  %v4603_v48 = vld [vmem:[%s8975_s30 + $0x6c0] sm:$0xff]  ;;  %v4611_v13 = vld [vmem:[%s8975_s30 + $0x750] sm:$0xff] }
 0x409   : > { %8446 = vmatprep.subr.bf16.mxu1 %v12938_v7  ;;  %v12032_v15 = vadd.f32 %v7200_v46, %v7199_v42 }
 0x40b   : > { %4727 = vmatmul.mubr.f32.gmra.mrb[28].mxu1 %v4563_v0  ;;  %v7202_v22 = vpop.f32.mrb[16].mxu0 }
 0x40c   : > { %4731 = vmatprep.mubr.f32.mxu1 %v4572_v45  ;;  %8448 = vmatpush3.bf16.msra.mxu1 %v12939_v61  ;;  %v7203_v3 = vpop.f32.mrb[17].mxu0  ;;  %v4620_v45 = vld [vmem:[%s8975_s30 + $0x7e8] sm:$0x7] }
 0x40d   : > { %8481 = vmatprep.subr.bf16.mxu1 %v12940_v47  ;;  %v12038_v14 = vadd.f32 %v7203_v3, %v7202_v22  ;;  %v4512_v61 = vld [vmem:[%s8975_s30 + $0x28] sm:$0xff] }
 0x40f   : > { %4732 = vmatmul.mubr.f32.gmra.mrb[30].mxu1 %v4571_v32  ;;  %v7205_v8 = vpop.f32.mrb[18].mxu0  ;;  %v4619_v32 = vld [vmem:[%s8975_s30 + $0x7e0] sm:$0x7] }
 0x410   : > { %4736 = vmatprep.mubr.f32.mxu1 %v4580_v50  ;;  %v7206_v31 = vpop.f32.mrb[19].mxu0 }
 0x411   : > { %v12042_v38 = vadd.f32 %v7206_v31, %v7205_v8 }
 0x413   : > { %4737 = vmatmul.mubr.f32.gmra.mrb[32].mxu1 %v4579_v16  ;;  %v7208_v58 = vpop.f32.mrb[20].mxu0  ;;  %v4511_v16 = vld [vmem:[%s8975_s30 + $0x20] sm:$0xff] }
 0x414   : > { %4741 = vmatprep.mubr.f32.mxu1 %v4588_v55  ;;  %v7209_v59 = vpop.f32.mrb[21].mxu0  ;;  %v4520_v55 = vld [vmem:[%s8975_s30 + $0xb8] sm:$0xff] }
 0x415   : > { %v12046_v57 = vadd.f32 %v7209_v59, %v7208_v58  ;;  %v4528_v58 = vld [vmem:[%s8975_s30 + $0x148] sm:$0xff] }
 0x417   : > { %4742 = vmatmul.mubr.f32.gmra.mrb[34].mxu1 %v4587_v40  ;;  %v7211_v1 = vpop.f32.mrb[22].mxu0 }
 0x418   : > { %4746 = vmatprep.mubr.f32.mxu1 %v4596_v18  ;;  %v7212_v33 = vpop.f32.mrb[23].mxu0  ;;  %v4519_v18 = vld [vmem:[%s8975_s30 + $0xb0] sm:$0xff] }
 0x419   : > { %v12050_v10 = vadd.f32 %v7212_v33, %v7211_v1  ;;  %v4527_v1 = vld [vmem:[%s8975_s30 + $0x140] sm:$0xff]  ;;  %v4536_v33 = vld [vmem:[%s8975_s30 + $0x1d8] sm:$0xff] }
 0x41b   : > { %4747 = vmatmul.mubr.f32.gmra.mrb[36].mxu1 %v4595_v56  ;;  %v7214_v49 = vpop.f32.mrb[24].mxu0 }
 0x41c   : > { %4751 = vmatprep.mubr.f32.mxu1 %v4604_v60  ;;  %v7215_v19 = vpop.f32.mrb[25].mxu0 }
 0x41d   : > { %v12054_v0 = vadd.f32 %v7215_v19, %v7214_v49  ;;  %v4535_v19 = vld [vmem:[%s8975_s30 + $0x1d0] sm:$0xff] }
 0x41f   : > { %4752 = vmatmul.mubr.f32.gmra.mrb[38].mxu1 %v4603_v48  ;;  %v7217_v7 = vpop.f32.mrb[26].mxu0 }
 0x420   : > { %4756 = vmatprep.mubr.f32.mxu1 %v4612_v11  ;;  %v7218_v42 = vpop.f32.mrb[27].mxu0 }
 0x421   : > { %v12058_v46 = vadd.f32 %v7218_v42, %v7217_v7 }
 0x423   : > { %4757 = vmatmul.mubr.f32.gmra.mrb[40].mxu1 %v4611_v13  ;;  %v7220_v50 = vpop.f32.mrb[28].mxu0  ;;  %v4544_v13 = vld [vmem:[%s8975_s30 + $0x268] sm:$0xff] }
 0x424   : > { %4761 = vmatprep.mubr.f32.mxu1 %v4620_v45  ;;  %v7221_v22 = vpop.f32.mrb[29].mxu0 }
 0x425   : > { %v12062_v3 = vadd.f32 %v7221_v22, %v7220_v50 }
 0x427   : > { %4762 = vmatmul.mubr.f32.gmra.mrb[42].mxu1 %v4619_v32  ;;  %v7223_v8 = vpop.f32.mrb[30].mxu0  ;;  %v4543_v32 = vld [vmem:[%s8975_s30 + $0x260] sm:$0xff] }
 0x428   : > { %4971 = vmatprep.mubr.f32.mxu1 %v4512_v61  ;;  %v7224_v31 = vpop.f32.mrb[31].mxu0  ;;  %v4552_v61 = vld [vmem:[%s8975_s30 + $0x2f8] sm:$0xff] }
 0x429   : > { %v12066_v40 = vadd.f32 %v7224_v31, %v7223_v8  ;;  %v4560_v8 = vld [vmem:[%s8975_s30 + $0x388] sm:$0xff] }
 0x42b   : > { %4972 = vmatmul.mubr.f32.vlgmr.msra.gmra.mrb[44].mxu1 %v4511_v16  ;;  %v7226_v59 = vpop.f32.mrb[32].mxu0 }
 0x42c   : > { %4976 = vmatprep.mubr.f32.mxu1 %v4520_v55  ;;  %v7227_v56 = vpop.f32.mrb[33].mxu0  ;;  %v4551_v55 = vld [vmem:[%s8975_s30 + $0x2f0] sm:$0xff] }
 0x42d   : > { %v12070_v60 = vadd.f32 %v7227_v56, %v7226_v59  ;;  %v4559_v59 = vld [vmem:[%s8975_s30 + $0x380] sm:$0xff]  ;;  %v4568_v56 = vld [vmem:[%s8975_s30 + $0x418] sm:$0xff] }
 0x42f   : > { %4977 = vmatmul.mubr.f32.gmra.mrb[46].mxu1 %v4519_v18  ;;  %v7229_v48 = vpop.f32.mrb[34].mxu0 }
 0x430   : > { %4981 = vmatprep.mubr.f32.mxu1 %v4528_v58  ;;  %v7230_v11 = vpop.f32.mrb[35].mxu0 }
 0x431   : > { %v12074_v49 = vadd.f32 %v7230_v11, %v7229_v48  ;;  %v4567_v11 = vld [vmem:[%s8975_s30 + $0x410] sm:$0xff] }
 0x433   : > { %4982 = vmatmul.mubr.f32.gmra.mrb[48].mxu1 %v4527_v1  ;;  %v7232_v45 = vpop.f32.mrb[36].mxu0 }
 0x434   : > { %4986 = vmatprep.mubr.f32.mxu1 %v4536_v33  ;;  %v7233_v7 = vpop.f32.mrb[37].mxu0 }
 0x435   : > { %v12078_v42 = vadd.f32 %v7233_v7, %v7232_v45 }
 0x437   : > { %4987 = vmatmul.mubr.f32.gmra.mrb[50].mxu1 %v4535_v19  ;;  %v7235_v50 = vpop.f32.mrb[38].mxu0  ;;  %v4576_v19 = vld [vmem:[%s8975_s30 + $0x4a8] sm:$0xff] }
 0x438   : > { %4991 = vmatprep.mubr.f32.mxu1 %v4544_v13  ;;  %v7236_v22 = vpop.f32.mrb[39].mxu0 }
 0x439   : > { %v12082_v16 = vadd.f32 %v7236_v22, %v7235_v50 }
 0x43b   : > { %4992 = vmatmul.mubr.f32.gmra.mrb[52].mxu1 %v4543_v32  ;;  %v7238_v31 = vpop.f32.mrb[40].mxu0  ;;  %v4575_v32 = vld [vmem:[%s8975_s30 + $0x4a0] sm:$0xff] }
 0x43c   : > { %4996 = vmatprep.mubr.f32.mxu1 %v4552_v61  ;;  %v7239_v18 = vpop.f32.mrb[41].mxu0  ;;  %v4584_v61 = vld [vmem:[%s8975_s30 + $0x538] sm:$0xff] }
 0x43d   : > { %v12086_v58 = vadd.f32 %v7239_v18, %v7238_v31 }
 0x43f   : > { %4997 = vmatmul.mubr.f32.gmra.mrb[54].mxu1 %v4551_v55  ;;  %v7241_v1 = vpop.f32.mrb[42].mxu0 }
 0x440   : > { %5001 = vmatprep.mubr.f32.mxu1 %v4560_v8  ;;  %v7242_v33 = vpop.f32.mrb[43].mxu0 }
 0x441   : > { %v12090_v48 = vadd.f32 %v7242_v33, %v7241_v1 }
 0x443   : > { %5002 = vmatmul.mubr.f32.gmra.mrb[56].mxu1 %v4559_v59  ;;  %v7353_v13 = vpop.f32.mrb[44].mxu0  ;;  %v4583_v59 = vld [vmem:[%s8975_s30 + $0x530] sm:$0xff] }
 0x444   : > { %5006 = vmatprep.mubr.f32.mxu1 %v4568_v56  ;;  %v7354_v45 = vpop.f32.mrb[45].mxu0  ;;  %v4592_v56 = vld [vmem:[%s8975_s30 + $0x5c8] sm:$0xff] }
 0x445   : > { %v12094_v7 = vadd.f32 %v7354_v45, %v7353_v13 }
 0x447   : > { %5007 = vmatmul.mubr.f32.gmra.mrb[58].mxu1 %v4567_v11  ;;  %12941 = vst [vmem:[#allocation24_spill] sm:$0xff] %v12094_v7  ;;  %v7356_v50 = vpop.f32.mrb[46].mxu0 }
 0x448   : > { %5011 = vmatprep.mubr.f32.mxu1 %v4576_v19  ;;  %v7357_v55 = vpop.f32.mrb[47].mxu0 }
 0x449   : > { %v12101_v18 = vadd.f32 %v7357_v55, %v7356_v50  ;;  %v4600_v55 = vld [vmem:[%s8975_s30 + $0x658] sm:$0xff] }
 0x44a   : > { %v3703_v22 = vpop.f32.mrb[210].mxu1 }
 0x44b   : > { %v7669_v8 = vpop.f32.mrb[211].mxu1  ;;  %5012 = vmatmul.mubr.f32.gmra.mrb[60].mxu1 %v4575_v32  ;;  %v12099_v31 = vadd.f32 %v3703_v22, %v11517_v39  ;;  %12943 = vst [vmem:[#allocation25_spill] sm:$0xff] %v12101_v18  ;;  %v3806_v33 = vrot.slane %v3703_v22, 1  ;;  %v3891_v11 = vrot.slane %v3703_v22, 2 }
 0x44c   : > { %5016 = vmatprep.mubr.f32.mxu1 %v4584_v61  ;;  %v7359_v1 = vpop.f32.mrb[48].mxu0  ;;  %v4591_v61 = vld [vmem:[%s8975_s30 + $0x5c0] sm:$0xff] }
 0x44d   : > { %12942 = vst [vmem:[#allocation67_spill] sm:$0xff] %v12099_v31  ;;  %v7360_v13 = vpop.f32.mrb[49].mxu0 }
 0x44e   : > { %v3708_v19 = vpop.f32.mrb[212].mxu1  ;;  %v12108_v39 = vadd.f32 %v7360_v13, %v7359_v1 }
 0x44f   : > { %v3807_v45 = vrot.slane %v3708_v19, 1  ;;  %v3892_v30 = vrot.slane %v3708_v19, 2  ;;  %v7672_v7 = vpop.f32.mrb[213].mxu1  ;;  %5017 = vmatmul.mubr.f32.gmra.mrb[62].mxu1 %v4583_v59  ;;  %v12106_v32 = vadd.f32 %v3708_v19, %v11536_v34 }
 0x450   : > { %5021 = vmatprep.mubr.f32.mxu1 %v4592_v56  ;;  %v7362_v8 = vpop.f32.mrb[50].mxu0 }
 0x451   : > { %12944 = vst [vmem:[#allocation28_spill] sm:$0xff] %v12106_v32  ;;  %v3808_v50 = vsel %vm1904_vm3, %v3806_v33, %v3807_v45  ;;  %v3893_v22 = vsel %vm1990_vm4, %v3891_v11, %v3892_v30  ;;  %v7363_v7 = vpop.f32.mrb[51].mxu0  ;;  %v4599_v33 = vld [vmem:[%s8975_s30 + $0x650] sm:$0xff]  ;;  %v4608_v11 = vld [vmem:[%s8975_s30 + $0x6e8] sm:$0xff] }
 0x452   : > { %3835 = vrot.lane.b32.xlu0 %v3808_v50, %s8760_s26  ;;  %v3713_v31 = vpop.f32.mrb[214].mxu1  ;;  %v12118_v56 = vadd.f32 %v7363_v7, %v7362_v8 }
 0x453   : > { %v3809_v59 = vrot.slane %v3713_v31, 1  ;;  %v3894_v18 = vrot.slane %v3713_v31, 2  ;;  %v7675_v34 = vpop.f32.mrb[215].mxu1  ;;  %5022 = vmatmul.mubr.f32.gmra.mrb[64].mxu1 %v4591_v61  ;;  %v12116_v1 = vadd.f32 %v3713_v31, %v11542_v54 }
 0x454   : > { %5026 = vmatprep.mubr.f32.mxu1 %v4600_v55  ;;  %v7365_v50 = vpop.f32.mrb[52].mxu0 }
 0x455   : > { %12945 = vst [vmem:[#allocation68_spill] sm:$0xff] %v12116_v1  ;;  %v3810_v19 = vsel %vm1904_vm3, %v3807_v45, %v3809_v59  ;;  %v3895_v13 = vsel %vm1990_vm4, %v3892_v30, %v3894_v18  ;;  %v7366_v34 = vpop.f32.mrb[53].mxu0  ;;  %v4607_v45 = vld [vmem:[%s8975_s30 + $0x6e0] sm:$0xff]  ;;  %v4616_v1 = vld [vmem:[%s8975_s30 + $0x778] sm:$0xff] }
 0x456   : > { %3920 = vrot.lane.b32.xlu0 %v3893_v22, %s8761_s27  ;;  %3837 = vrot.lane.b32.xlu1 %v3810_v19, %s8760_s26  ;;  %v3718_v61 = vpop.f32.mrb[216].mxu1  ;;  %v12129_v7 = vadd.f32 %v7366_v34, %v7365_v50 }
 0x457   : > { %v3811_v54 = vrot.slane %v3718_v61, 1  ;;  %v3896_v31 = vrot.slane %v3718_v61, 2  ;;  %v7678_v8 = vpop.f32.mrb[217].mxu1  ;;  %5027 = vmatmul.mubr.f32.gmra.mrb[66].mxu1 %v4599_v33  ;;  %v12127_v55 = vadd.f32 %v3718_v61, %v11553_v9 }
 0x458   : > { %5031 = vmatprep.mubr.f32.mxu1 %v4608_v11  ;;  %v7368_v19 = vpop.f32.mrb[54].mxu0 }
 0x459   : > { %12946 = vst [vmem:[#allocation29_spill] sm:$0xff] %v12127_v55  ;;  %v3812_v30 = vsel %vm1904_vm3, %v3809_v59, %v3811_v54  ;;  %v3897_v22 = vsel %vm1990_vm4, %v3894_v18, %v3896_v31  ;;  %v7369_v8 = vpop.f32.mrb[55].mxu0  ;;  %v4615_v59 = vld [vmem:[%s8975_s30 + $0x770] sm:$0xff]  ;;  %v4624_v55 = vld [vmem:[%s8975_s30 + $0x808] sm:$0x7] }
 0x45a   : > { %3922 = vrot.lane.b32.xlu1 %v3895_v13, %s8761_s27  ;;  %3839 = vrot.lane.b32.xlu0 %v3812_v30, %s8760_s26  ;;  %v3723_v33 = vpop.f32.mrb[218].mxu1  ;;  %v12140_v34 = vadd.f32 %v7369_v8, %v7368_v19 }
 0x45b   : > { %v3813_v9 = vrot.slane %v3723_v33, 1  ;;  %v3898_v61 = vrot.slane %v3723_v33, 2  ;;  %v7681_v50 = vpop.f32.mrb[219].mxu1  ;;  %5032 = vmatmul.mubr.f32.gmra.mrb[68].mxu1 %v4607_v45  ;;  %v12138_v11 = vadd.f32 %v3723_v33, %v11564_v29 }
 0x45c   : > { %5036 = vmatprep.mubr.f32.mxu1 %v4616_v1  ;;  %v7371_v30 = vpop.f32.mrb[56].mxu0 }
 0x45d   : > { %12947 = vst [vmem:[#allocation72_spill] sm:$0xff] %v12138_v11  ;;  %v3814_v18 = vsel %vm1904_vm3, %v3811_v54, %v3813_v9  ;;  %v3899_v13 = vsel %vm1990_vm4, %v3896_v31, %v3898_v61  ;;  %v7372_v45 = vpop.f32.mrb[57].mxu0  ;;  %v4623_v54 = vld [vmem:[%s8975_s30 + $0x800] sm:$0x7] }
 0x45e   : > { %3924 = vrot.lane.b32.xlu0 %v3897_v22, %s8761_s27  ;;  %3841 = vrot.lane.b32.xlu1 %v3814_v18, %s8760_s26  ;;  %v3728_v50 = vpop.f32.mrb[220].mxu1  ;;  %v12151_v19 = vadd.f32 %v7372_v45, %v7371_v30 }
 0x45f   : > { %v3815_v32 = vrot.slane %v3728_v50, 1  ;;  %v3900_v29 = vrot.slane %v3728_v50, 2  ;;  %v7684_v33 = vpop.f32.mrb[221].mxu1  ;;  %5037 = vmatmul.mubr.f32.gmra.mrb[70].mxu1 %v4615_v59  ;;  %v12149_v1 = vadd.f32 %v3728_v50, %v11575_v17  ;;  %v5854_v17 = vld [vmem:[%s12689_s2 + $0xb0] sm:$0xff] }
 0x460   : > { %5041 = vmatprep.mubr.f32.mxu1 %v4624_v55  ;;  %v7374_v22 = vpop.f32.mrb[58].mxu0  ;;  %v5855_v55 = vld [vmem:[%s12689_s2 + $0xb8] sm:$0xff] }
 0x461   : > { %12948 = vst [vmem:[#allocation32_spill] sm:$0xff] %v12149_v1  ;;  %v3816_v31 = vsel %vm1904_vm3, %v3813_v9, %v3815_v32  ;;  %v3901_v8 = vsel %vm1990_vm4, %v3898_v61, %v3900_v29  ;;  %v7375_v11 = vpop.f32.mrb[59].mxu0  ;;  %v8482_v50 = vpack.c.bf16 %v5855_v55, %v5854_v17 }
 0x462   : > { %3926 = vrot.lane.b32.xlu1 %v3899_v13, %s8761_s27  ;;  %3843 = vrot.lane.b32.xlu0 %v3816_v31, %s8760_s26  ;;  %v3733_v18 = vpop.f32.mrb[222].mxu1  ;;  %v12167_v13 = vadd.f32 %v7375_v11, %v7374_v22 }
 0x463   : > { %v3817_v59 = vrot.slane %v3733_v18, 1  ;;  %v3902_v30 = vrot.slane %v3733_v18, 2  ;;  %v7687_v9 = vpop.f32.mrb[223].mxu1  ;;  %5042 = vmatmul.mubr.f32.gmra.mrb[72].mxu1 %v4623_v54  ;;  %v12165_v61 = vadd.f32 %v3733_v18, %v11586_v5 }
 0x464   : > { %7734 = vmatprep.mubr.msk.f32.mxu1 %vm8759_vm1, %v12833_v63  ;;  %v7377_v31 = vpop.f32.mrb[60].mxu0  ;;  %8483 = vmatpush3.bf16.msra.mxu1 %v8482_v50 }
 0x465   : > { %12949 = vst [vmem:[#allocation69_spill] sm:$0xff] %v12165_v61  ;;  %v3818_v45 = vsel %vm1904_vm3, %v3815_v32, %v3817_v59  ;;  %v3903_v33 = vsel %vm1990_vm4, %v3900_v29, %v3902_v30  ;;  %v7378_v54 = vpop.f32.mrb[61].mxu0  ;;  %8484 = vmatprep.subr.bf16.mxu1 %v12940_v47 }
 0x466   : > { %3928 = vrot.lane.b32.xlu0 %v3901_v8, %s8761_s27  ;;  %3845 = vrot.lane.b32.xlu1 %v3818_v45, %s8760_s26  ;;  %v3738_v9 = vpop.f32.mrb[224].mxu1  ;;  %v12178_v22 = vadd.f32 %v7378_v54, %v7377_v31 }
 0x467   : > { %v3819_v1 = vrot.slane %v3738_v9, 1  ;;  %v3904_v5 = vrot.slane %v3738_v9, 2  ;;  %v7690_v18 = vpop.f32.mrb[225].mxu1  ;;  %v12176_v11 = vadd.f32 %v3738_v9, %v11597_v6 }
 0x468   : > { %12951 = vst [vmem:[#allocation74_spill] sm:$0xff] %v12178_v22  ;;  %v7380_v8 = vpop.f32.mrb[62].mxu0 }
 0x469   : > { %12950 = vst [vmem:[#allocation33_spill] sm:$0xff] %v12176_v11  ;;  %v3820_v32 = vsel %vm1904_vm3, %v3817_v59, %v3819_v1  ;;  %v3905_v29 = vsel %vm1990_vm4, %v3902_v30, %v3904_v5  ;;  %v7381_v55 = vpop.f32.mrb[63].mxu0 }
 0x46a   : > { %3930 = vrot.lane.b32.xlu1 %v3903_v33, %s8761_s27  ;;  %3847 = vrot.lane.b32.xlu0 %v3820_v32, %s8760_s26  ;;  %v3743_v17 = vpop.f32.mrb[226].mxu1  ;;  %v12188_v31 = vadd.f32 %v7381_v55, %v7380_v8  ;;  %v5856_v32 = vld [vmem:[%s12689_s2 + $0xc0] sm:$0xff] }
 0x46b   : > { %v3821_v45 = vrot.slane %v3743_v17, 1  ;;  %v3906_v18 = vrot.slane %v3743_v17, 2  ;;  %v7693_v6 = vpop.f32.mrb[227].mxu1  ;;  %v12186_v50 = vadd.f32 %v3743_v17, %v11608_v62  ;;  %v5857_v62 = vld [vmem:[%s12689_s2 + $0xc8] sm:$0xff] }
 0x46c   : > { %12953 = vst [vmem:[#allocation70_spill] sm:$0xff] %v12188_v31  ;;  %v7383_v30 = vpop.f32.mrb[64].mxu0 }
 0x46d   : > { %12952 = vst [vmem:[#allocation36_spill] sm:$0xff] %v12186_v50  ;;  %v3822_v9 = vsel %vm1904_vm3, %v3819_v1, %v3821_v45  ;;  %v3907_v59 = vsel %vm1990_vm4, %v3904_v5, %v3906_v18  ;;  %v7384_v54 = vpop.f32.mrb[65].mxu0 }
 0x46e   : > { %3932 = vrot.lane.b32.xlu0 %v3905_v29, %s8761_s27  ;;  %3849 = vrot.lane.b32.xlu1 %v3822_v9, %s8760_s26  ;;  %v3748_v33 = vpop.f32.mrb[228].mxu1  ;;  %v12203_v55 = vadd.f32 %v7384_v54, %v7383_v30  ;;  %v8485_v29 = vpack.c.bf16 %v5857_v62, %v5856_v32 }
 0x46f   : > { %v3823_v8 = vrot.slane %v3748_v33, 1  ;;  %v3908_v17 = vrot.slane %v3748_v33, 2  ;;  %v7696_v1 = vpop.f32.mrb[229].mxu1  ;;  %v12201_v5 = vadd.f32 %v3748_v33, %v11619_v44 }
 0x470   : > { %v7386_v50 = vpop.f32.mrb[66].mxu0  ;;  %8486 = vmatpush3.bf16.msra.mxu1 %v8485_v29 }
 0x471   : > { %12954 = vst [vmem:[#allocation37_spill] sm:$0xff] %v12201_v5  ;;  %v3824_v6 = vsel %vm1904_vm3, %v3821_v45, %v3823_v8  ;;  %v3909_v9 = vsel %vm1990_vm4, %v3906_v18, %v3908_v17  ;;  %v7387_v61 = vpop.f32.mrb[67].mxu0  ;;  %8487 = vmatprep.subr.bf16.mxu1 %v12940_v47  ;;  %v2045_v45 = vpop.permute.xlu0 %2044 }
 0x472   : > { %3934 = vrot.lane.b32.xlu1 %v3907_v59, %s8761_s27  ;;  %3851 = vrot.lane.b32.xlu0 %v3824_v6, %s8760_s26  ;;  %v3753_v11 = vpop.f32.mrb[230].mxu1  ;;  %v12212_v30 = vadd.f32 %v7387_v61, %v7386_v50  ;;  %v5859_v61 = vld [vmem:[%s12689_s2 + $0xd8] sm:$0xff]  ;;  %v2074_v6 = vadd.f32 %v2045_v45, %v11642_v21 }
 0x473   : > { %v3825_v31 = vrot.slane %v3753_v11, 1  ;;  %v3910_v22 = vrot.slane %v3753_v11, 2  ;;  %v7699_v1 = vpop.f32.mrb[231].mxu1  ;;  %v12210_v44 = vadd.f32 %v3753_v11, %v11630_v43  ;;  %v5858_v43 = vld [vmem:[%s12689_s2 + $0xd0] sm:$0xff] }
 0x474   : > { %12956 = vst [vmem:[#allocation40_spill] sm:$0xff] %v12212_v30  ;;  %v7389_v33 = vpop.f32.mrb[68].mxu0  ;;  %v8488_v29 = vpack.c.bf16 %v5859_v61, %v5858_v43 }
 0x475   : > { %12955 = vst [vmem:[#allocation76_spill] sm:$0xff] %v12210_v44  ;;  %v3826_v18 = vsel %vm1904_vm3, %v3823_v8, %v3825_v31  ;;  %v3911_v59 = vsel %vm1990_vm4, %v3908_v17, %v3910_v22  ;;  %v7390_v32 = vpop.f32.mrb[69].mxu0 }
 0x476   : > { %3936 = vrot.lane.b32.xlu0 %v3909_v9, %s8761_s27  ;;  %3853 = vrot.lane.b32.xlu1 %v3826_v18, %s8760_s26  ;;  %v3758_v54 = vpop.f32.mrb[232].mxu1  ;;  %v12228_v17 = vadd.f32 %v7390_v32, %v7389_v33  ;;  %v2047_v9 = vpop.permute.xlu1 %2046 }
 0x477   : > { %v3827_v11 = vrot.slane %v3758_v54, 1  ;;  %v3912_v50 = vrot.slane %v3758_v54, 2  ;;  %v7702_v62 = vpop.f32.mrb[233].mxu1  ;;  %v12226_v8 = vadd.f32 %v3758_v54, %v11639_v20  ;;  %8489 = vmatpush3.bf16.msra.mxu1 %v8488_v29  ;;  %v2075_v21 = vadd.f32 %v2047_v9, %v11651_v36 }
 0x478   : > { %v7392_v44 = vpop.f32.mrb[70].mxu0  ;;  %8490 = vmatprep.subr.bf16.mxu1 %v12940_v47 }
 0x479   : > { %12957 = vst [vmem:[#allocation71_spill] sm:$0xff] %v12226_v8  ;;  %v3828_v1 = vsel %vm1904_vm3, %v3825_v31, %v3827_v11  ;;  %v3913_v18 = vsel %vm1990_vm4, %v3910_v22, %v3912_v50  ;;  %v7393_v62 = vpop.f32.mrb[71].mxu0 }
 0x47a   : > { %3938 = vrot.lane.b32.xlu1 %v3911_v59, %s8761_s27  ;;  %3855 = vrot.lane.b32.xlu0 %v3828_v1, %s8760_s26  ;;  %v3763_v5 = vpop.f32.mrb[234].mxu1  ;;  %v12237_v32 = vadd.f32 %v7393_v62, %v7392_v44  ;;  %v5860_v1 = vld [vmem:[%s12689_s2 + $0xe0] sm:$0xff] }
 0x47b   : > { %v3829_v30 = vrot.slane %v3763_v5, 1  ;;  %v3914_v20 = vrot.slane %v3763_v5, 2  ;;  %v7705_v54 = vpop.f32.mrb[235].mxu1  ;;  %v12235_v33 = vadd.f32 %v3763_v5, %v2074_v6 }
 0x47c   : > { %v7395_v45 = vpop.f32.mrb[72].mxu0 }
 0x47d   : > { %12958 = vst [vmem:[#allocation41_spill] sm:$0xff] %v12235_v33  ;;  %v3830_v22 = vsel %vm1904_vm3, %v3827_v11, %v3829_v30  ;;  %v3915_v31 = vsel %vm1990_vm4, %v3912_v50, %v3914_v20  ;;  %v7396_v43 = vpop.f32.mrb[73].mxu0 }
 0x47e   : > { %3940 = vrot.lane.b32.xlu0 %v3913_v18, %s8761_s27  ;;  %3857 = vrot.lane.b32.xlu1 %v3830_v22, %s8760_s26  ;;  %v3768_v59 = vpop.f32.mrb[236].mxu1  ;;  %v12247_v6 = vadd.f32 %v7396_v43, %v7395_v45  ;;  %v5861_v18 = vld [vmem:[%s12689_s2 + $0xe8] sm:$0xff] }
 0x47f   : > { %v3831_v5 = vrot.slane %v3768_v59, 1  ;;  %v3916_v61 = vrot.slane %v3768_v59, 2  ;;  %v7708_v29 = vpop.f32.mrb[237].mxu1  ;;  %v12245_v44 = vadd.f32 %v3768_v59, %v2075_v21  ;;  %v8491_v22 = vpack.c.bf16 %v5861_v18, %v5860_v1 }
 0x480   : > { %v7507_v9 = vpop.f32.mrb[74].mxu0 }
 0x481   : > { %12959 = vst [vmem:[#allocation78_spill] sm:$0xff] %v12245_v44  ;;  %v3832_v36 = vsel %vm1904_vm3, %v3829_v30, %v3831_v5  ;;  %v3917_v11 = vsel %vm1990_vm4, %v3914_v20, %v3916_v61  ;;  %v7508_v62 = vpop.f32.mrb[75].mxu0  ;;  %8492 = vmatpush3.bf16.msra.mxu1 %v8491_v22 }
 0x482   : > { %3942 = vrot.lane.b32.xlu1 %v3915_v31, %s8761_s27  ;;  %3859 = vrot.lane.b32.xlu0 %v3832_v36, %s8760_s26  ;;  %v3773_v50 = vpop.f32.mrb[238].mxu1  ;;  %v12259_v20 = vadd.f32 %v7508_v62, %v7507_v9 }
 0x483   : > { %v3833_v54 = vrot.slane %v3773_v50, 1  ;;  %v3918_v21 = vrot.slane %v3773_v50, 2  ;;  %v7711_v30 = vpop.f32.mrb[239].mxu1  ;;  %8493 = vmatprep.subr.bf16.mxu1 %v12940_v47 }
 0x484   : > { %v7510_v59 = vpop.f32.mrb[76].mxu0 }
 0x485   : > { %v3834_v31 = vsel %vm1904_vm3, %v3831_v5, %v3833_v54  ;;  %v3919_v45 = vsel %vm1990_vm4, %v3916_v61, %v3918_v21  ;;  %v7511_v29 = vpop.f32.mrb[77].mxu0 }
 0x486   : > { %3944 = vrot.lane.b32.xlu0 %v3917_v11, %s8761_s27  ;;  %3861 = vrot.lane.b32.xlu1 %v3834_v31, %s8760_s26  ;;  %v7122_v43 = vpop.f32.mrb[240].mxu1  ;;  %v12265_v44 = vadd.f32 %v7511_v29, %v7510_v59 }
 0x487   : > { %v7123_v36 = vpop.f32.mrb[241].mxu1 }
 0x488   : > { %v7124_v50 = vadd.f32 %v7123_v36, %v7122_v43  ;;  %v7513_v9 = vpop.f32.mrb[78].mxu0 }
 0x489   : > { %v7514_v61 = vpop.f32.mrb[79].mxu0 }
 0x48a   : > { %v4279_v1 = vadd.f32 %v7124_v50, %v11942_v24  ;;  %3946 = vrot.lane.b32.xlu1 %v3919_v45, %s8761_s27  ;;  %v7125_v5 = vpop.f32.mrb[242].mxu1  ;;  %v12270_v62 = vadd.f32 %v7514_v61, %v7513_v9 }
 0x48b   : > { %v7126_v18 = vpop.f32.mrb[243].mxu1 }
 0x48c   : > { %v12273_v11 = vadd.f32 %v12032_v15, %v4279_v1  ;;  %v7127_v54 = vadd.f32 %v7126_v18, %v7125_v5  ;;  %v7516_v21 = vpop.f32.mrb[80].mxu0  ;;  %v5862_v5 = vld [vmem:[%s12689_s2 + $0xf0] sm:$0xff] }
 0x48d   : > { %v7517_v47 = vpop.f32.mrb[81].mxu0 }
 0x48e   : > { %v4284_v30 = vadd.f32 %v7127_v54, %v11950_v51  ;;  %v7128_v22 = vpop.f32.mrb[244].mxu1  ;;  %v12276_v59 = vadd.f32 %v7517_v47, %v7516_v21 }
 0x48f   : > { %v7129_v31 = vpop.f32.mrb[245].mxu1 }
 0x490   : > { %v12279_v24 = vadd.f32 %v12038_v14, %v4284_v30  ;;  %v7130_v45 = vadd.f32 %v7129_v31, %v7128_v22  ;;  %v7519_v43 = vpop.f32.mrb[82].mxu0  ;;  %v5863_v14 = vld [vmem:[%s12689_s2 + $0xf8] sm:$0xff] }
 0x491   : > { %v7520_v50 = vpop.f32.mrb[83].mxu0  ;;  %v8494_v54 = vpack.c.bf16 %v5863_v14, %v5862_v5 }
 0x492   : > { %v4289_v29 = vadd.f32 %v7130_v45, %v11956_v37  ;;  %v7131_v36 = vpop.f32.mrb[246].mxu1  ;;  %v12282_v9 = vadd.f32 %v7520_v50, %v7519_v43 }
 0x493   : > { %v7132_v15 = vpop.f32.mrb[247].mxu1  ;;  %8495 = vmatpush3.bf16.msra.mxu1 %v8494_v54 }
 0x494   : > { %v12285_v1 = vadd.f32 %v12042_v38, %v4289_v29  ;;  %v7133_v51 = vadd.f32 %v7132_v15, %v7131_v36  ;;  %v7522_v61 = vpop.f32.mrb[84].mxu0  ;;  %7732 = vmatprep.subr.mxu1 %v12833_v63 }
 0x495   : > { %v7523_v21 = vpop.f32.mrb[85].mxu0 }
 0x496   : > { %v4294_v37 = vadd.f32 %v7133_v51, %v11962_v41  ;;  %v7134_v18 = vpop.f32.mrb[248].mxu1  ;;  %v12294_v22 = vadd.f32 %v7523_v21, %v7522_v61  ;;  %v5864_v41 = vld [vmem:[%s12689_s2 + $0x100] sm:$0xf] }
 0x497   : > { %v7135_v30 = vpop.f32.mrb[249].mxu1  ;;  %7733 = vmatpush3.msk.msra.mxu1 %vm1731_vm0, %v5864_v41 }
 0x498   : > { %v12297_v38 = vadd.f32 %v12046_v57, %v4294_v37  ;;  %v7136_v47 = vadd.f32 %v7135_v30, %v7134_v18  ;;  %v7525_v31 = vpop.f32.mrb[86].mxu0 }
 0x499   : > { %v7526_v29 = vpop.f32.mrb[87].mxu0 }
 0x49a   : > { %v4299_v45 = vadd.f32 %v7136_v47, %v11968_v53  ;;  %v7137_v43 = vpop.f32.mrb[250].mxu1  ;;  %v12304_v50 = vadd.f32 %v7526_v29, %v7525_v31 }
 0x49b   : > { %v7138_v36 = vpop.f32.mrb[251].mxu1 }
 0x49c   : > { %v12307_v15 = vadd.f32 %v12050_v10, %v4299_v45  ;;  %v7139_v57 = vadd.f32 %v7138_v36, %v7137_v43  ;;  %v7528_v51 = vpop.f32.mrb[88].mxu0 }
 0x49d   : > { %v7529_v53 = vpop.f32.mrb[89].mxu0 }
 0x49e   : > { %v4304_v5 = vadd.f32 %v7139_v57, %v11974_v26  ;;  %v7140_v14 = vpop.f32.mrb[252].mxu1  ;;  %v12311_v37 = vadd.f32 %v7529_v53, %v7528_v51 }
 0x49f   : > { %v7141_v61 = vpop.f32.mrb[253].mxu1 }
 0x4a0   : > { %v12314_v18 = vadd.f32 %v12054_v0, %v4304_v5  ;;  %v7142_v54 = vadd.f32 %v7141_v61, %v7140_v14  ;;  %v7531_v21 = vpop.f32.mrb[90].mxu0 }
 0x4a1   : > { %v7532_v47 = vpop.f32.mrb[91].mxu0 }
 0x4a2   : > { %v4309_v30 = vadd.f32 %v7142_v54, %v11980_v35  ;;  %v7143_v10 = vpop.f32.mrb[254].mxu1  ;;  %v12317_v45 = vadd.f32 %v7532_v47, %v7531_v21 }
 0x4a3   : > { %v7144_v31 = vpop.f32.mrb[255].mxu1 }
 0x4a4   : > { %v12320_v43 = vadd.f32 %v12058_v46, %v4309_v30  ;;  %v7145_v26 = vadd.f32 %v7144_v31, %v7143_v10  ;;  %v7534_v29 = vpop.f32.mrb[92].mxu0 }
 0x4a5   : > { %v7535_v57 = vpop.f32.mrb[93].mxu0 }
 0x4a6   : > { %v4314_v36 = vadd.f32 %v7145_v26, %v11985_v23  ;;  %v7146_v41 = vpop.f32.mrb[0].mxu1  ;;  %v12323_v51 = vadd.f32 %v7535_v57, %v7534_v29 }
 0x4a7   : > { %v7147_v0 = vpop.f32.mrb[1].mxu1 }
 0x4a8   : > { %v12326_v5 = vadd.f32 %v12062_v3, %v4314_v36  ;;  %v7148_v35 = vadd.f32 %v7147_v0, %v7146_v41  ;;  %v7537_v14 = vpop.f32.mrb[94].mxu0 }
 0x4a9   : > { %v7538_v54 = vpop.f32.mrb[95].mxu0 }
 0x4aa   : > { %v4319_v53 = vadd.f32 %v7148_v35, %v11990_v2  ;;  %v7149_v61 = vpop.f32.mrb[2].mxu1  ;;  %v12329_v21 = vadd.f32 %v7538_v54, %v7537_v14 }
 0x4ab   : > { %v7150_v46 = vpop.f32.mrb[3].mxu1 }
 0x4ac   : > { %v12332_v30 = vadd.f32 %v12066_v40, %v4319_v53  ;;  %v7151_v23 = vadd.f32 %v7150_v46, %v7149_v61  ;;  %v7540_v10 = vpop.f32.mrb[96].mxu0 }
 0x4ad   : > { %v7541_v26 = vpop.f32.mrb[97].mxu0 }
 0x4ae   : > { %v4324_v47 = vadd.f32 %v7151_v23, %v11996_v4  ;;  %v7152_v31 = vpop.f32.mrb[4].mxu1  ;;  %v12335_v29 = vadd.f32 %v7541_v26, %v7540_v10 }
 0x4af   : > { %v7153_v3 = vpop.f32.mrb[5].mxu1 }
 0x4b0   : > { %v12338_v36 = vadd.f32 %v12070_v60, %v4324_v47  ;;  %v7154_v2 = vadd.f32 %v7153_v3, %v7152_v31  ;;  %v7543_v41 = vpop.f32.mrb[98].mxu0 }
 0x4b1   : > { %v7544_v35 = vpop.f32.mrb[99].mxu0 }
 0x4b2   : > { %v4329_v57 = vadd.f32 %v7154_v2, %v12002_v25  ;;  %v7155_v0 = vpop.f32.mrb[6].mxu1  ;;  %v12341_v14 = vadd.f32 %v7544_v35, %v7543_v41 }
 0x4b3   : > { %v7156_v40 = vpop.f32.mrb[7].mxu1 }
 0x4b4   : > { %v12344_v53 = vadd.f32 %v12074_v49, %v4329_v57  ;;  %v7157_v4 = vadd.f32 %v7156_v40, %v7155_v0  ;;  %v7546_v61 = vpop.f32.mrb[100].mxu0 }
 0x4b5   : > { %v7547_v23 = vpop.f32.mrb[101].mxu0 }
 0x4b6   : > { %v4334_v54 = vadd.f32 %v7157_v4, %v12008_v28  ;;  %v7158_v46 = vpop.f32.mrb[8].mxu1  ;;  %v12347_v10 = vadd.f32 %v7547_v23, %v7546_v61 }
 0x4b7   : > { %v7159_v60 = vpop.f32.mrb[9].mxu1 }
 0x4b8   : > { %v12350_v47 = vadd.f32 %v12078_v42, %v4334_v54  ;;  %v7160_v25 = vadd.f32 %v7159_v60, %v7158_v46  ;;  %v7549_v31 = vpop.f32.mrb[102].mxu0  ;;  %v12960_v60 = vld [vmem:[#allocation24_spill] sm:$0xff] }
 0x4b9   : > { %v7550_v2 = vpop.f32.mrb[103].mxu0 }
 0x4ba   : > { %v4339_v26 = vadd.f32 %v7160_v25, %v12014_v52  ;;  %v7161_v3 = vpop.f32.mrb[10].mxu1  ;;  %v12353_v41 = vadd.f32 %v7550_v2, %v7549_v31 }
 0x4bb   : > { %v7162_v49 = vpop.f32.mrb[11].mxu1 }
 0x4bc   : > { %v12356_v57 = vadd.f32 %v12082_v16, %v4339_v26  ;;  %v7163_v28 = vadd.f32 %v7162_v49, %v7161_v3 }
 0x4be   : > { %v4344_v0 = vadd.f32 %v7163_v28, %v12020_v12  ;;  %v7164_v35 = vpop.f32.mrb[12].mxu1  ;;  %v12961_v12 = vld [vmem:[#allocation25_spill] sm:$0xff] }
 0x4bf   : > { %v7165_v40 = vpop.f32.mrb[13].mxu1 }
 0x4c0   : > { %v12360_v42 = vadd.f32 %v12086_v58, %v4344_v0  ;;  %v7166_v4 = vadd.f32 %v7165_v40, %v7164_v35 }
 0x4c2   : > { %v4349_v61 = vadd.f32 %v7166_v4, %v12026_v27  ;;  %v7276_v52 = vpop.f32.mrb[14].mxu1 }
 0x4c3   : > { %v7277_v54 = vpop.f32.mrb[15].mxu1 }
 0x4c4   : > { %v12364_v46 = vadd.f32 %v12090_v48, %v4349_v61  ;;  %v7278_v23 = vadd.f32 %v7277_v54, %v7276_v52 }
 0x4c6   : > { %v4834_v16 = vadd.f32 %v12960_v60, %v7278_v23  ;;  %v7279_v25 = vpop.f32.mrb[16].mxu1 }
 0x4c7   : > { %v7280_v31 = vpop.f32.mrb[17].mxu1 }
 0x4c8   : > { %v7281_v26 = vadd.f32 %v7280_v31, %v7279_v25 }
 0x4ca   : > { %v4839_v3 = vadd.f32 %v12961_v12, %v7281_v26  ;;  %v7282_v2 = vpop.f32.mrb[18].mxu1 }
 0x4cb   : > { %v7283_v49 = vpop.f32.mrb[19].mxu1 }
 0x4cc   : > { %v7284_v58 = vadd.f32 %v7283_v49, %v7282_v2 }
 0x4ce   : > { %v12369_v28 = vadd.f32 %v12108_v39, %v7284_v58  ;;  %v7285_v27 = vpop.f32.mrb[20].mxu1 }
 0x4cf   : > { %v7286_v0 = vpop.f32.mrb[21].mxu1 }
 0x4d0   : > { %v7287_v35 = vadd.f32 %v7286_v0, %v7285_v27 }
 0x4d2   : > { %v12372_v48 = vadd.f32 %v12118_v56, %v7287_v35  ;;  %v7288_v40 = vpop.f32.mrb[22].mxu1  ;;  %v12962_v35 = vld [vmem:[#allocation74_spill] sm:$0xff] }
 0x4d3   : > { %v7289_v4 = vpop.f32.mrb[23].mxu1 }
 0x4d4   : > { %v7290_v61 = vadd.f32 %v7289_v4, %v7288_v40 }
 0x4d6   : > { %v12375_v52 = vadd.f32 %v12129_v7, %v7290_v61  ;;  %v7291_v54 = vpop.f32.mrb[24].mxu1 }
 0x4d7   : > { %v7292_v23 = vpop.f32.mrb[25].mxu1 }
 0x4d8   : > { %v7293_v60 = vadd.f32 %v7292_v23, %v7291_v54  ;;  %v12963_v54 = vld [vmem:[#allocation70_spill] sm:$0xff] }
 0x4da   : > { %v12378_v25 = vadd.f32 %v12140_v34, %v7293_v60  ;;  %v7294_v39 = vpop.f32.mrb[26].mxu1 }
 0x4db   : > { %v7295_v31 = vpop.f32.mrb[27].mxu1 }
 0x4dc   : > { %v7296_v26 = vadd.f32 %v7295_v31, %v7294_v39 }
 0x4de   : > { %v12381_v12 = vadd.f32 %v12151_v19, %v7296_v26  ;;  %v7297_v56 = vpop.f32.mrb[28].mxu1 }
 0x4df   : > { %v7298_v2 = vpop.f32.mrb[29].mxu1 }
 0x4e0   : > { %v7299_v49 = vadd.f32 %v7298_v2, %v7297_v56  ;;  %v12964_v2 = vld [vmem:[#allocation40_spill] sm:$0xff] }
 0x4e2   : > { %v12384_v58 = vadd.f32 %v12167_v13, %v7299_v49  ;;  %v7300_v7 = vpop.f32.mrb[30].mxu1 }
 0x4e3   : > { %v7301_v27 = vpop.f32.mrb[31].mxu1 }
 0x4e4   : > { %v7302_v0 = vadd.f32 %v7301_v27, %v7300_v7 }
 0x4e6   : > { %v12387_v40 = vadd.f32 %v12962_v35, %v7302_v0  ;;  %v7303_v34 = vpop.f32.mrb[32].mxu1 }
 0x4e7   : > { %v7304_v4 = vpop.f32.mrb[33].mxu1 }
 0x4e8   : > { %v7305_v61 = vadd.f32 %v7304_v4, %v7303_v34 }
 0x4ea   : > { %v12390_v23 = vadd.f32 %v12963_v54, %v7305_v61  ;;  %v7306_v19 = vpop.f32.mrb[34].mxu1 }
 0x4eb   : > { %v7307_v60 = vpop.f32.mrb[35].mxu1 }
 0x4ec   : > { %v7308_v39 = vadd.f32 %v7307_v60, %v7306_v19 }
 0x4ee   : > { %v12393_v31 = vadd.f32 %v12203_v55, %v7308_v39  ;;  %v7309_v13 = vpop.f32.mrb[36].mxu1 }
 0x4ef   : > { %v7310_v26 = vpop.f32.mrb[37].mxu1 }
 0x4f0   : > { %v7311_v56 = vadd.f32 %v7310_v26, %v7309_v13 }
 0x4f2   : > { %v12396_v49 = vadd.f32 %v12964_v2, %v7311_v56  ;;  %v7312_v7 = vpop.f32.mrb[38].mxu1 }
 0x4f3   : > { %v7313_v27 = vpop.f32.mrb[39].mxu1 }
 0x4f4   : > { %v7314_v0 = vadd.f32 %v7313_v27, %v7312_v7 }
 0x4f6   : > { %v12399_v35 = vadd.f32 %v12228_v17, %v7314_v0  ;;  %v7315_v34 = vpop.f32.mrb[40].mxu1 }
 0x4f7   : > { %v7316_v4 = vpop.f32.mrb[41].mxu1 }
 0x4f8   : > { %v7317_v61 = vadd.f32 %v7316_v4, %v7315_v34 }
 0x4fa   : > { %v12402_v54 = vadd.f32 %v12237_v32, %v7317_v61  ;;  %v7318_v55 = vpop.f32.mrb[42].mxu1 }
 0x4fb   : > { %v7319_v19 = vpop.f32.mrb[43].mxu1 }
 0x4fc   : > { %v7320_v60 = vadd.f32 %v7319_v19, %v7318_v55 }
 0x4fe   : > { %v12405_v39 = vadd.f32 %v12247_v6, %v7320_v60  ;;  %v7430_v13 = vpop.f32.mrb[44].mxu1 }
 0x4ff   : > { %v7431_v26 = vpop.f32.mrb[45].mxu1 }
 0x500   : > { %v7432_v56 = vadd.f32 %v7431_v26, %v7430_v13 }
 0x502   : > { %v4974_v2 = vadd.f32 %v7432_v56, %v4834_v16  ;;  %v7433_v7 = vpop.f32.mrb[46].mxu1 }
 0x503   : > { %v7434_v27 = vpop.f32.mrb[47].mxu1 }
 0x504   : > { %v5114_v17 = vadd.f32 %v12259_v20, %v4974_v2  ;;  %v7435_v0 = vadd.f32 %v7434_v27, %v7433_v7  ;;  %v12965_v7 = vld [vmem:[#allocation66_spill] sm:$0xff] }
 0x506   : > { %v4979_v33 = vadd.f32 %v7435_v0, %v4839_v3  ;;  %v7436_v34 = vpop.f32.mrb[48].mxu1  ;;  %v5202_v8 = vrot.slane %v5114_v17, 1 }
 0x507   : > { %v7437_v4 = vpop.f32.mrb[49].mxu1 }
 0x508   : > { %v5119_v32 = vadd.f32 %v12265_v44, %v4979_v33  ;;  %v7438_v61 = vadd.f32 %v7437_v4, %v7436_v34 }
 0x50a   : > { %v5203_v55 = vrot.slane %v5119_v32, 1  ;;  %v4984_v6 = vadd.f32 %v7438_v61, %v12369_v28  ;;  %v7439_v19 = vpop.f32.mrb[50].mxu1 }
 0x50b   : > { %v7440_v60 = vpop.f32.mrb[51].mxu1 }
 0x50c   : > { %v5204_v13 = vsel %vm1904_vm3, %v5202_v8, %v5203_v55  ;;  %v5124_v16 = vadd.f32 %v12270_v62, %v4984_v6  ;;  %v7441_v26 = vadd.f32 %v7440_v60, %v7439_v19 }
 0x50d   : > { %v5246_v20 = vadd.f32 %v5204_v13, %v12273_v11 }
 0x50e   : > { %v5205_v56 = vrot.slane %v5124_v16, 1  ;;  %v4989_v3 = vadd.f32 %v7441_v26, %v12372_v48  ;;  %v7442_v2 = vpop.f32.mrb[52].mxu1 }
 0x50f   : > { %v5261_v33 = vadd.f32 %v5246_v20, %v12965_v7  ;;  %v7443_v44 = vpop.f32.mrb[53].mxu1 }
 0x510   : > { %v5206_v27 = vsel %vm1904_vm3, %v5203_v55, %v5205_v56  ;;  %v5129_v28 = vadd.f32 %v12276_v59, %v4989_v3  ;;  %v7444_v17 = vadd.f32 %v7443_v44, %v7442_v2 }
 0x511   : > { %8582 = vtanh.f32 %v5261_v33  ;;  %v5247_v8 = vadd.f32 %v5206_v27, %v12279_v24 }
 0x512   : > { %v5207_v0 = vrot.slane %v5129_v28, 1  ;;  %v4994_v62 = vadd.f32 %v7444_v17, %v12375_v52  ;;  %v7445_v34 = vpop.f32.mrb[54].mxu1 }
 0x513   : > { %v5262_v11 = vadd.f32 %v5247_v8, %v12965_v7  ;;  %v7446_v4 = vpop.f32.mrb[55].mxu1 }
 0x514   : > { %v5208_v48 = vsel %vm1904_vm3, %v5205_v56, %v5207_v0  ;;  %v5134_v32 = vadd.f32 %v12282_v9, %v4994_v62  ;;  %v7447_v61 = vadd.f32 %v7446_v4, %v7445_v34 }
 0x515   : > { %8584 = vtanh.f32 %v5262_v11  ;;  %v5248_v55 = vadd.f32 %v5208_v48, %v12285_v1 }
 0x516   : > { %v5209_v59 = vrot.slane %v5134_v32, 1  ;;  %v4999_v6 = vadd.f32 %v7447_v61, %v12378_v25  ;;  %v7448_v19 = vpop.f32.mrb[56].mxu1 }
 0x517   : > { %v5263_v24 = vadd.f32 %v5248_v55, %v12965_v7  ;;  %v7449_v60 = vpop.f32.mrb[57].mxu1 }
 0x518   : > { %v5210_v52 = vsel %vm1904_vm3, %v5207_v0, %v5209_v59  ;;  %v5139_v13 = vadd.f32 %v12294_v22, %v4999_v6  ;;  %v7450_v16 = vadd.f32 %v7449_v60, %v7448_v19 }
 0x519   : > { %8586 = vtanh.f32 %v5263_v24  ;;  %v5249_v26 = vadd.f32 %v5210_v52, %v12297_v38 }
 0x51a   : > { %v5211_v9 = vrot.slane %v5139_v13, 1  ;;  %v5004_v20 = vadd.f32 %v7450_v16, %v12381_v12  ;;  %v7451_v56 = vpop.f32.mrb[58].mxu1 }
 0x51b   : > { %v8583_v1 = vpop.eup %8582  ;;  %v5264_v3 = vadd.f32 %v5249_v26, %v12965_v7  ;;  %v7452_v25 = vpop.f32.mrb[59].mxu1 }
 0x51c   : > { %v5212_v2 = vsel %vm1904_vm3, %v5209_v59, %v5211_v9  ;;  %v5144_v33 = vadd.f32 %v12304_v50, %v5004_v20  ;;  %v7453_v44 = vadd.f32 %v7452_v25, %v7451_v56  ;;  %7735 = vmatmul.mubr.msk.f32.vlgmr.msra.gmra.mrb[74].mxu1 %vm1685_vm2, %v8583_v1 }
 0x51d   : > { %8588 = vtanh.f32 %v5264_v3  ;;  %v5250_v22 = vadd.f32 %v5212_v2, %v12307_v15  ;;  %7737 = vmatprep.mubr.msk.f32.mxu1 %vm8759_vm1, %v12833_v63 }
 0x51e   : > { %v5213_v38 = vrot.slane %v5144_v33, 1  ;;  %v5009_v12 = vadd.f32 %v7453_v44, %v12384_v58  ;;  %v7454_v27 = vpop.f32.mrb[60].mxu1 }
 0x51f   : > { %v8585_v28 = vpop.eup %8584  ;;  %v5265_v17 = vadd.f32 %v5250_v22, %v12965_v7  ;;  %v7455_v8 = vpop.f32.mrb[61].mxu1 }
 0x520   : > { %v5214_v0 = vsel %vm1904_vm3, %v5211_v9, %v5213_v38  ;;  %v5149_v50 = vadd.f32 %v12311_v37, %v5009_v12  ;;  %v7456_v62 = vadd.f32 %v7455_v8, %v7454_v27  ;;  %7738 = vmatmul.mubr.msk.f32.gmra.mrb[76].mxu1 %vm1685_vm2, %v8585_v28 }
 0x521   : > { %8590 = vtanh.f32 %v5265_v17  ;;  %v5251_v15 = vadd.f32 %v5214_v0, %v12314_v18  ;;  %7740 = vmatprep.mubr.msk.f32.mxu1 %vm8759_vm1, %v12833_v63 }
 0x522   : > { %v5215_v34 = vrot.slane %v5149_v50, 1  ;;  %v5014_v58 = vadd.f32 %v7456_v62, %v12387_v40  ;;  %v7457_v11 = vpop.f32.mrb[62].mxu1 }
 0x523   : > { %v8587_v4 = vpop.eup %8586  ;;  %v5266_v48 = vadd.f32 %v5251_v15, %v12965_v7  ;;  %v7458_v32 = vpop.f32.mrb[63].mxu1 }
 0x524   : > { %v5216_v61 = vsel %vm1904_vm3, %v5213_v38, %v5215_v34  ;;  %v5154_v37 = vadd.f32 %v12317_v45, %v5014_v58  ;;  %v7459_v55 = vadd.f32 %v7458_v32, %v7457_v11  ;;  %7741 = vmatmul.mubr.msk.f32.gmra.mrb[78].mxu1 %vm1685_vm2, %v8587_v4 }
 0x525   : > { %8592 = vtanh.f32 %v5266_v48  ;;  %v5252_v18 = vadd.f32 %v5216_v61, %v12320_v43  ;;  %7743 = vmatprep.mubr.msk.f32.mxu1 %vm8759_vm1, %v12833_v63 }
 0x526   : > { %v5217_v59 = vrot.slane %v5154_v37, 1  ;;  %v5019_v40 = vadd.f32 %v7459_v55, %v12390_v23  ;;  %v7460_v6 = vpop.f32.mrb[64].mxu1 }
 0x527   : > { %v8589_v19 = vpop.eup %8588  ;;  %v5267_v24 = vadd.f32 %v5252_v18, %v12965_v7  ;;  %v7461_v60 = vpop.f32.mrb[65].mxu1 }
 0x528   : > { %v5218_v52 = vsel %vm1904_vm3, %v5215_v34, %v5217_v59  ;;  %v5159_v45 = vadd.f32 %v12323_v51, %v5019_v40  ;;  %v7462_v13 = vadd.f32 %v7461_v60, %v7460_v6  ;;  %7744 = vmatmul.mubr.msk.f32.gmra.mrb[80].mxu1 %vm1685_vm2, %v8589_v19 }
 0x529   : > { %8594 = vtanh.f32 %v5267_v24  ;;  %v5253_v43 = vadd.f32 %v5218_v52, %v12326_v5  ;;  %7746 = vmatprep.mubr.msk.f32.mxu1 %vm8759_vm1, %v12833_v63 }
 0x52a   : > { %v5219_v16 = vrot.slane %v5159_v45, 1  ;;  %v5024_v23 = vadd.f32 %v7462_v13, %v12393_v31  ;;  %v7463_v26 = vpop.f32.mrb[66].mxu1  ;;  %v3836_v45 = vpop.permute.xlu0 %3835 }
 0x52b   : > { %v8591_v9 = vpop.eup %8590  ;;  %v5268_v20 = vadd.f32 %v5253_v43, %v12965_v7  ;;  %v7464_v56 = vpop.f32.mrb[67].mxu1 }
 0x52c   : > { %v5220_v1 = vsel %vm1904_vm3, %v5217_v59, %v5219_v16  ;;  %v5164_v51 = vadd.f32 %v12329_v21, %v5024_v23  ;;  %v7465_v3 = vadd.f32 %v7464_v56, %v7463_v26  ;;  %7747 = vmatmul.mubr.msk.f32.gmra.mrb[82].mxu1 %vm1685_vm2, %v8591_v9  ;;  %v3838_v13 = vpop.permute.xlu1 %3837 }
 0x52d   : > { %8596 = vtanh.f32 %v5268_v20  ;;  %v5254_v5 = vadd.f32 %v5220_v1, %v12332_v30  ;;  %7749 = vmatprep.mubr.msk.f32.mxu1 %vm8759_vm1, %v12833_v63 }
 0x52e   : > { %v5221_v25 = vrot.slane %v5164_v51, 1  ;;  %v5029_v31 = vadd.f32 %v7465_v3, %v12396_v49  ;;  %v7466_v2 = vpop.f32.mrb[68].mxu1  ;;  %v3921_v43 = vpop.permute.xlu0 %3920  ;;  %v12966_v3 = vld [vmem:[#allocation67_spill] sm:$0xff] }
 0x52f   : > { %v8593_v33 = vpop.eup %8592  ;;  %v5269_v44 = vadd.f32 %v5254_v5, %v12965_v7  ;;  %v7467_v22 = vpop.f32.mrb[69].mxu1  ;;  %v3877_v5 = vadd.f32 %v3836_v45, %v12966_v3 }
 0x530   : > { %v5222_v38 = vsel %vm1904_vm3, %v5219_v16, %v5221_v25  ;;  %v5169_v21 = vadd.f32 %v12335_v29, %v5029_v31  ;;  %v7468_v12 = vadd.f32 %v7467_v22, %v7466_v2  ;;  %7750 = vmatmul.mubr.msk.f32.gmra.mrb[84].mxu1 %vm1685_vm2, %v8593_v33  ;;  %v3923_v16 = vpop.permute.xlu1 %3922 }
 0x531   : > { %8598 = vtanh.f32 %v5269_v44  ;;  %v5255_v30 = vadd.f32 %v5222_v38, %v12338_v36  ;;  %7752 = vmatprep.mubr.msk.f32.mxu1 %vm8759_vm1, %v12833_v63 }
 0x532   : > { %v5223_v27 = vrot.slane %v5169_v21, 1  ;;  %v5034_v49 = vadd.f32 %v7468_v12, %v12399_v35  ;;  %v7469_v28 = vpop.f32.mrb[70].mxu1  ;;  %v3840_v23 = vpop.permute.xlu0 %3839  ;;  %v12968_v12 = vld [vmem:[#allocation68_spill] sm:$0xff] }
 0x533   : > { %v8595_v17 = vpop.eup %8594  ;;  %v5270_v8 = vadd.f32 %v5255_v30, %v12965_v7  ;;  %v7470_v0 = vpop.f32.mrb[71].mxu1  ;;  %v3879_v30 = vadd.f32 %v3840_v23, %v12968_v12 }
 0x534   : > { %v5224_v50 = vsel %vm1904_vm3, %v5221_v25, %v5223_v27  ;;  %v5174_v29 = vadd.f32 %v12341_v14, %v5034_v49  ;;  %v7471_v62 = vadd.f32 %v7470_v0, %v7469_v28  ;;  %7753 = vmatmul.mubr.msk.f32.gmra.mrb[86].mxu1 %vm1685_vm2, %v8595_v17  ;;  %v3842_v26 = vpop.permute.xlu1 %3841  ;;  %v3962_v25 = vadd.f32 %v3921_v43, %v3877_v5 }
 0x535   : > { %8600 = vtanh.f32 %v5270_v8  ;;  %v5256_v36 = vadd.f32 %v5224_v50, %v12344_v53  ;;  %7755 = vmatprep.mubr.msk.f32.mxu1 %vm8759_vm1, %v12833_v63 }
 0x536   : > { %v5225_v15 = vrot.slane %v5174_v29, 1  ;;  %v5039_v35 = vadd.f32 %v7471_v62, %v12402_v54  ;;  %v7472_v34 = vpop.f32.mrb[72].mxu1  ;;  %v3925_v9 = vpop.permute.xlu0 %3924 }
 0x537   : > { %v8597_v58 = vpop.eup %8596  ;;  %v5271_v11 = vadd.f32 %v5256_v36, %v12965_v7  ;;  %v7473_v4 = vpop.f32.mrb[73].mxu1  ;;  %v3964_v62 = vadd.f32 %v3925_v9, %v3879_v30 }
 0x538   : > { %v5226_v48 = vsel %vm1904_vm3, %v5223_v27, %v5225_v15  ;;  %v5179_v14 = vadd.f32 %v12347_v10, %v5039_v35  ;;  %v7474_v32 = vadd.f32 %v7473_v4, %v7472_v34  ;;  %7756 = vmatmul.mubr.msk.f32.gmra.mrb[88].mxu1 %vm1685_vm2, %v8597_v58  ;;  %v3927_v20 = vpop.permute.xlu1 %3926  ;;  %v12969_v58 = vld [vmem:[#allocation29_spill] sm:$0xff] }
 0x539   : > { %8602 = vtanh.f32 %v5271_v11  ;;  %v5257_v53 = vadd.f32 %v5226_v48, %v12350_v47  ;;  %7758 = vmatprep.mubr.msk.f32.mxu1 %vm8759_vm1, %v12833_v63  ;;  %v3880_v11 = vadd.f32 %v3842_v26, %v12969_v58 }
 0x53a   : > { %v5227_v61 = vrot.slane %v5179_v14, 1  ;;  %v5044_v54 = vadd.f32 %v7474_v32, %v12405_v39  ;;  %v3844_v56 = vpop.permute.xlu0 %3843 }
 0x53b   : > { %v8599_v37 = vpop.eup %8598  ;;  %v5272_v55 = vadd.f32 %v5257_v53, %v12965_v7  ;;  %v3965_v53 = vadd.f32 %v3927_v20, %v3880_v11  ;;  %v12972_v20 = vld [vmem:[#allocation69_spill] sm:$0xff] }
 0x53c   : > { %v5228_v18 = vsel %vm1904_vm3, %v5225_v15, %v5227_v61  ;;  %v5184_v59 = vadd.f32 %v12353_v41, %v5044_v54  ;;  %7759 = vmatmul.mubr.msk.f32.gmra.mrb[90].mxu1 %vm1685_vm2, %v8599_v37  ;;  %v3846_v1 = vpop.permute.xlu1 %3845 }
 0x53d   : > { %8604 = vtanh.f32 %v5272_v55  ;;  %v5258_v10 = vadd.f32 %v5228_v18, %v12356_v57  ;;  %7761 = vmatprep.mubr.msk.f32.mxu1 %vm8759_vm1, %v12833_v63  ;;  %v12970_v18 = vld [vmem:[#allocation72_spill] sm:$0xff] }
 0x53e   : > { %v5229_v47 = vrot.slane %v5184_v59, 1  ;;  %v3929_v51 = vpop.permute.xlu0 %3928  ;;  %v3881_v59 = vadd.f32 %v3844_v56, %v12970_v18 }
 0x53f   : > { %v8601_v40 = vpop.eup %8600  ;;  %v5273_v6 = vadd.f32 %v5258_v10, %v12965_v7 }
 0x540   : > { %v5230_v39 = vsel %vm1904_vm3, %v5227_v61, %v5229_v47  ;;  %v5260_v19 = vadd.f32 %v5229_v47, %v12364_v46  ;;  %7762 = vmatmul.mubr.msk.f32.gmra.mrb[92].mxu1 %vm1685_vm2, %v8601_v40  ;;  %v3931_v31 = vpop.permute.xlu1 %3930 }
 0x541   : > { %8606 = vtanh.f32 %v5273_v6  ;;  %v5259_v41 = vadd.f32 %v5230_v39, %v12360_v42  ;;  %7764 = vmatprep.mubr.msk.f32.mxu1 %vm8759_vm1, %v12833_v63 }
 0x542   : > { %v5275_v60 = vadd.f32 %v5260_v19, %v12965_v7  ;;  %v3848_v38 = vpop.permute.xlu0 %3847  ;;  %v3966_v19 = vadd.f32 %v3929_v51, %v3881_v59 }
 0x543   : > { %v8603_v57 = vpop.eup %8602  ;;  %v5274_v24 = vadd.f32 %v5259_v41, %v12965_v7  ;;  %v3883_v56 = vadd.f32 %v3848_v38, %v12972_v20 }
 0x544   : > { %7765 = vmatmul.mubr.msk.f32.gmra.mrb[94].mxu1 %vm1685_vm2, %v8603_v57  ;;  %v3850_v29 = vpop.permute.xlu1 %3849 }
 0x545   : > { %8608 = vtanh.f32 %v5274_v24  ;;  %7767 = vmatprep.mubr.msk.f32.mxu1 %vm8759_vm1, %v12833_v63 }
 0x546   : > { %8610 = vtanh.f32 %v5275_v60  ;;  %v3933_v35 = vpop.permute.xlu0 %3932  ;;  %v12971_v60 = vld [vmem:[#allocation32_spill] sm:$0xff] }
 0x547   : > { %v8605_v46 = vpop.eup %8604 }
 0x548   : > { %7768 = vmatmul.mubr.msk.f32.gmra.mrb[96].mxu1 %vm1685_vm2, %v8605_v46  ;;  %v3935_v37 = vpop.permute.xlu1 %3934  ;;  %v3882_v46 = vadd.f32 %v3846_v1, %v12971_v60 }
 0x549   : > { %7770 = vmatprep.mubr.msk.f32.mxu1 %vm8759_vm1, %v12833_v63 }
 0x54a   : > { %v3852_v39 = vpop.permute.xlu0 %3851  ;;  %v3967_v43 = vadd.f32 %v3931_v31, %v3882_v46 }
 0x54b   : > { %v8607_v42 = vpop.eup %8606 }
 0x54c   : > { %7771 = vmatmul.mubr.msk.f32.gmra.mrb[98].mxu1 %vm1685_vm2, %v8607_v42 }
 0x54d   : > { %7773 = vmatprep.mubr.msk.f32.mxu1 %vm8759_vm1, %v12833_v63 }
 0x54e   : > { %v3937_v26 = vpop.permute.xlu0 %3936 }
 0x54f   : > { %v8609_v52 = vpop.eup %8608 }
 0x550   : > { %7774 = vmatmul.mubr.msk.f32.gmra.mrb[100].mxu1 %vm1685_vm2, %v8609_v52  ;;  %v8611_v7 = vpop.eup %8610 }
 0x551   : > { %7776 = vmatprep.mubr.msk.f32.mxu1 %vm8759_vm1, %v12833_v63  ;;  %v12967_v63 = vld [vmem:[#allocation28_spill] sm:$0xff] }
 0x552   : > { %v3878_v33 = vadd.f32 %v3838_v13, %v12967_v63  ;;  %v3854_v13 = vpop.permute.xlu1 %3853 }
 0x554   : > { %7777 = vmatmul.mubr.msk.f32.gmra.mrb[102].mxu1 %vm1685_vm2, %v8611_v7  ;;  %v3963_v21 = vadd.f32 %v3923_v16, %v3878_v33 }
 0x556   : > { %v3939_v63 = vpop.permute.xlu1 %3938 }
 0x55a   : > { %v3858_v58 = vpop.permute.xlu1 %3857 }
 0x5ef   : > { %v5417_v2 = vpop.f32.mrb[74].mxu1 }
 0x5f0   : > { %v7736_v44 = vpop.f32.mrb[75].mxu1  ;;  %v12524_v22 = vadd.f32 %v5417_v2, %v3962_v25  ;;  %v5520_v27 = vrot.slane %v5417_v2, 1  ;;  %v5605_v28 = vrot.slane %v5417_v2, 2  ;;  %v3968_v25 = vadd.f32 %v3933_v35, %v3883_v56 }
 0x5f1   : > { %v12973_v44 = vld [vmem:[#allocation33_spill] sm:$0xff] }
 0x5f3   : > { %v5422_v49 = vpop.f32.mrb[76].mxu1 }
 0x5f4   : > { %v5521_v17 = vrot.slane %v5422_v49, 1  ;;  %v5606_v8 = vrot.slane %v5422_v49, 2  ;;  %v7739_v0 = vpop.f32.mrb[77].mxu1  ;;  %v12527_v50 = vadd.f32 %v5422_v49, %v3963_v21  ;;  %v3884_v21 = vadd.f32 %v3850_v29, %v12973_v44  ;;  %v3856_v49 = vpop.permute.xlu0 %3855 }
 0x5f6   : > { %v5522_v36 = vsel %vm1904_vm3, %v5520_v27, %v5521_v17  ;;  %v5607_v15 = vsel %vm1990_vm4, %v5605_v28, %v5606_v8  ;;  %v3969_v28 = vadd.f32 %v3935_v37, %v3884_v21 }
 0x5f7   : > { %5549 = vrot.lane.b32.xlu0 %v5522_v36, %s8760_s26  ;;  %v5427_v34 = vpop.f32.mrb[78].mxu1 }
 0x5f8   : > { %v5523_v4 = vrot.slane %v5427_v34, 1  ;;  %v5608_v48 = vrot.slane %v5427_v34, 2  ;;  %v7742_v14 = vpop.f32.mrb[79].mxu1  ;;  %v12533_v32 = vadd.f32 %v5427_v34, %v3964_v62  ;;  %v12974_v62 = vld [vmem:[#allocation36_spill] sm:$0xff] }
 0x5f9   : > { %v3885_v36 = vadd.f32 %v3852_v39, %v12974_v62  ;;  %v3941_v14 = vpop.permute.xlu0 %3940  ;;  %v3943_v39 = vpop.permute.xlu1 %3942  ;;  %v12979_v62 = vld [vmem:[#allocation78_spill] sm:$0xff] }
 0x5fa   : > { %v5524_v61 = vsel %vm1904_vm3, %v5521_v17, %v5523_v4  ;;  %v5609_v54 = vsel %vm1990_vm4, %v5606_v8, %v5608_v48 }
 0x5fb   : > { %5634 = vrot.lane.b32.xlu0 %v5607_v15, %s8761_s27  ;;  %5551 = vrot.lane.b32.xlu1 %v5524_v61, %s8760_s26  ;;  %v5432_v55 = vpop.f32.mrb[80].mxu1  ;;  %v3970_v11 = vadd.f32 %v3937_v26, %v3885_v36  ;;  %v12975_v61 = vld [vmem:[#allocation37_spill] sm:$0xff] }
 0x5fc   : > { %v5525_v10 = vrot.slane %v5432_v55, 1  ;;  %v5610_v47 = vrot.slane %v5432_v55, 2  ;;  %v7745_v40 = vpop.f32.mrb[81].mxu1  ;;  %v12540_v6 = vadd.f32 %v5432_v55, %v3965_v53 }
 0x5fe   : > { %v5526_v41 = vsel %vm1904_vm3, %v5523_v4, %v5525_v10  ;;  %v5611_v57 = vsel %vm1990_vm4, %v5608_v48, %v5610_v47 }
 0x5ff   : > { %5636 = vrot.lane.b32.xlu1 %v5609_v54, %s8761_s27  ;;  %5553 = vrot.lane.b32.xlu0 %v5526_v41, %s8760_s26  ;;  %v5437_v24 = vpop.f32.mrb[82].mxu1  ;;  %v3886_v54 = vadd.f32 %v3854_v13, %v12975_v61  ;;  %v12976_v41 = vld [vmem:[#allocation76_spill] sm:$0xff] }
 0x600   : > { %v5527_v42 = vrot.slane %v5437_v24, 1  ;;  %v5612_v52 = vrot.slane %v5437_v24, 2  ;;  %v7748_v7 = vpop.f32.mrb[83].mxu1  ;;  %v12547_v45 = vadd.f32 %v5437_v24, %v3966_v19 }
 0x602   : > { %v5528_v16 = vsel %vm1904_vm3, %v5525_v10, %v5527_v42  ;;  %v5613_v23 = vsel %vm1990_vm4, %v5610_v47, %v5612_v52  ;;  %v3971_v10 = vadd.f32 %v3939_v63, %v3886_v54 }
 0x603   : > { %5638 = vrot.lane.b32.xlu0 %v5611_v57, %s8761_s27  ;;  %5555 = vrot.lane.b32.xlu1 %v5528_v16, %s8760_s26  ;;  %v5442_v9 = vpop.f32.mrb[84].mxu1  ;;  %v3887_v57 = vadd.f32 %v3856_v49, %v12976_v41 }
 0x604   : > { %v5529_v1 = vrot.slane %v5442_v9, 1  ;;  %v5614_v51 = vrot.slane %v5442_v9, 2  ;;  %v7751_v3 = vpop.f32.mrb[85].mxu1  ;;  %v12554_v5 = vadd.f32 %v5442_v9, %v3967_v43 }
 0x605   : > { %v3972_v7 = vadd.f32 %v3941_v14, %v3887_v57 }
 0x606   : > { %v5530_v31 = vsel %vm1904_vm3, %v5527_v42, %v5529_v1  ;;  %v5615_v2 = vsel %vm1990_vm4, %v5612_v52, %v5614_v51  ;;  %v3860_v52 = vpop.permute.xlu0 %3859 }
 0x607   : > { %5640 = vrot.lane.b32.xlu1 %v5613_v23, %s8761_s27  ;;  %5557 = vrot.lane.b32.xlu0 %v5530_v31, %s8760_s26  ;;  %v5447_v33 = vpop.f32.mrb[86].mxu1  ;;  %v12977_v23 = vld [vmem:[#allocation71_spill] sm:$0xff] }
 0x608   : > { %v5531_v12 = vrot.slane %v5447_v33, 1  ;;  %v5616_v38 = vrot.slane %v5447_v33, 2  ;;  %v7754_v30 = vpop.f32.mrb[87].mxu1  ;;  %v12561_v27 = vadd.f32 %v5447_v33, %v3968_v25  ;;  %v3888_v26 = vadd.f32 %v3858_v58, %v12977_v23  ;;  %v12978_v33 = vld [vmem:[#allocation41_spill] sm:$0xff] }
 0x609   : > { %v3889_v44 = vadd.f32 %v3860_v52, %v12978_v33 }
 0x60a   : > { %v5532_v17 = vsel %vm1904_vm3, %v5529_v1, %v5531_v12  ;;  %v5617_v8 = vsel %vm1990_vm4, %v5614_v51, %v5616_v38  ;;  %v3862_v51 = vpop.permute.xlu1 %3861  ;;  %v3973_v3 = vadd.f32 %v3943_v39, %v3888_v26 }
 0x60b   : > { %5642 = vrot.lane.b32.xlu0 %v5615_v2, %s8761_s27  ;;  %5559 = vrot.lane.b32.xlu1 %v5532_v17, %s8760_s26  ;;  %v5452_v0 = vpop.f32.mrb[88].mxu1  ;;  %v3945_v2 = vpop.permute.xlu0 %3944  ;;  %v3890_v36 = vadd.f32 %v3862_v51, %v12979_v62 }
 0x60c   : > { %v5533_v15 = vrot.slane %v5452_v0, 1  ;;  %v5618_v29 = vrot.slane %v5452_v0, 2  ;;  %v7757_v35 = vpop.f32.mrb[89].mxu1  ;;  %v12568_v34 = vadd.f32 %v5452_v0, %v3969_v28  ;;  %v3974_v49 = vadd.f32 %v3945_v2, %v3889_v44 }
 0x60e   : > { %v5534_v4 = vsel %vm1904_vm3, %v5531_v12, %v5533_v15  ;;  %v5619_v48 = vsel %vm1990_vm4, %v5616_v38, %v5618_v29 }
 0x60f   : > { %5644 = vrot.lane.b32.xlu1 %v5617_v8, %s8761_s27  ;;  %5561 = vrot.lane.b32.xlu0 %v5534_v4, %s8760_s26  ;;  %v5457_v53 = vpop.f32.mrb[90].mxu1  ;;  %v3947_v8 = vpop.permute.xlu1 %3946 }
 0x610   : > { %v5535_v37 = vrot.slane %v5457_v53, 1  ;;  %v5620_v55 = vrot.slane %v5457_v53, 2  ;;  %v7760_v18 = vpop.f32.mrb[91].mxu1  ;;  %v12575_v59 = vadd.f32 %v5457_v53, %v3970_v11  ;;  %v3975_v11 = vadd.f32 %v3947_v8, %v3890_v36 }
 0x612   : > { %v5536_v47 = vsel %vm1904_vm3, %v5533_v15, %v5535_v37  ;;  %v5621_v40 = vsel %vm1990_vm4, %v5618_v29, %v5620_v55 }
 0x613   : > { %5646 = vrot.lane.b32.xlu0 %v5619_v48, %s8761_s27  ;;  %5563 = vrot.lane.b32.xlu1 %v5536_v47, %s8760_s26  ;;  %v5462_v19 = vpop.f32.mrb[92].mxu1 }
 0x614   : > { %v5537_v24 = vrot.slane %v5462_v19, 1  ;;  %v5622_v60 = vrot.slane %v5462_v19, 2  ;;  %v7763_v46 = vpop.f32.mrb[93].mxu1  ;;  %v12582_v42 = vadd.f32 %v5462_v19, %v3971_v10 }
 0x616   : > { %v5538_v13 = vsel %vm1904_vm3, %v5535_v37, %v5537_v24  ;;  %v5623_v43 = vsel %vm1990_vm4, %v5620_v55, %v5622_v60 }
 0x617   : > { %5648 = vrot.lane.b32.xlu1 %v5621_v40, %s8761_s27  ;;  %5565 = vrot.lane.b32.xlu0 %v5538_v13, %s8760_s26  ;;  %v5467_v16 = vpop.f32.mrb[94].mxu1 }
 0x618   : > { %v5539_v9 = vrot.slane %v5467_v16, 1  ;;  %v5624_v20 = vrot.slane %v5467_v16, 2  ;;  %v7766_v56 = vpop.f32.mrb[95].mxu1  ;;  %v12589_v1 = vadd.f32 %v5467_v16, %v3972_v7 }
 0x61a   : > { %v5540_v25 = vsel %vm1904_vm3, %v5537_v24, %v5539_v9  ;;  %v5625_v31 = vsel %vm1990_vm4, %v5622_v60, %v5624_v20  ;;  %v12621_v60 = vstv %s5810_s7 }
 0x61b   : > { %5650 = vrot.lane.b32.xlu0 %v5623_v43, %s8761_s27  ;;  %5567 = vrot.lane.b32.xlu1 %v5540_v25, %s8760_s26  ;;  %v5472_v63 = vpop.f32.mrb[96].mxu1 }
 0x61c   : > { %v5541_v21 = vrot.slane %v5472_v63, 1  ;;  %v5626_v12 = vrot.slane %v5472_v63, 2  ;;  %v7769_v38 = vpop.f32.mrb[97].mxu1  ;;  %v12596_v30 = vadd.f32 %v5472_v63, %v3973_v3 }
 0x61e   : > { %v5542_v28 = vsel %vm1904_vm3, %v5539_v9, %v5541_v21  ;;  %v5627_v17 = vsel %vm1990_vm4, %v5624_v20, %v5626_v12 }
 0x61f   : > { %5652 = vrot.lane.b32.xlu1 %v5625_v31, %s8761_s27  ;;  %5569 = vrot.lane.b32.xlu0 %v5542_v28, %s8760_s26  ;;  %v5477_v0 = vpop.f32.mrb[98].mxu1 }
 0x620   : > { %v5543_v15 = vrot.slane %v5477_v0, 1  ;;  %v5628_v29 = vrot.slane %v5477_v0, 2  ;;  %v7772_v35 = vpop.f32.mrb[99].mxu1  ;;  %v12603_v58 = vadd.f32 %v5477_v0, %v3974_v49 }
 0x622   : > { %v5544_v4 = vsel %vm1904_vm3, %v5541_v21, %v5543_v15  ;;  %v5629_v48 = vsel %vm1990_vm4, %v5626_v12, %v5628_v29 }
 0x623   : > { %5654 = vrot.lane.b32.xlu0 %v5627_v17, %s8761_s27  ;;  %5571 = vrot.lane.b32.xlu1 %v5544_v4, %s8760_s26  ;;  %v5482_v14 = vpop.f32.mrb[100].mxu1 }
 0x624   : > { %v5545_v53 = vrot.slane %v5482_v14, 1  ;;  %v5630_v61 = vrot.slane %v5482_v14, 2  ;;  %v7775_v54 = vpop.f32.mrb[101].mxu1  ;;  %v12609_v37 = vadd.f32 %v5482_v14, %v3975_v11 }
 0x626   : > { %v5546_v55 = vsel %vm1904_vm3, %v5543_v15, %v5545_v53  ;;  %v5631_v18 = vsel %vm1990_vm4, %v5628_v29, %v5630_v61 }
 0x627   : > { %5656 = vrot.lane.b32.xlu1 %v5629_v48, %s8761_s27  ;;  %5573 = vrot.lane.b32.xlu0 %v5546_v55, %s8760_s26  ;;  %v5487_v10 = vpop.f32.mrb[102].mxu1 }
 0x628   : > { %v5547_v47 = vrot.slane %v5487_v10, 1  ;;  %v5632_v40 = vrot.slane %v5487_v10, 2  ;;  %v7778_v39 = vpop.f32.mrb[103].mxu1 }
 0x62a   : > { %v5548_v19 = vsel %vm1904_vm3, %v5545_v53, %v5547_v47  ;;  %v5633_v41 = vsel %vm1990_vm4, %v5630_v61, %v5632_v40 }
 0x62b   : > { %5658 = vrot.lane.b32.xlu0 %v5631_v18, %s8761_s27  ;;  %5575 = vrot.lane.b32.xlu1 %v5548_v19, %s8760_s26  ;;  %s8497_s26 = smul.u32 112, %s12981_s16 }
 0x62d   : > { %s12633_s10 = scalar_lea.vmem %s12691_s4, %s8497_s26 }
 0x62f   : > { %5660 = vrot.lane.b32.xlu1 %v5633_v41, %s8761_s27 }
 0x669   : > { %v5550_v57 = vpop.permute.xlu0 %5549 }
 0x66a   : > { %v5591_v24 = vadd.f32 %v5550_v57, %v12524_v22 }
 0x66d   : > { %v5635_v46 = vpop.permute.xlu0 %5634  ;;  %v5552_v52 = vpop.permute.xlu1 %5551 }
 0x66e   : > { %v5676_v7 = vadd.f32 %v5635_v46, %v5591_v24  ;;  %v5592_v43 = vadd.f32 %v5552_v52, %v12527_v50 }
 0x670   : > { %v5691_v13 = vadd.f32 %v12621_v60, %v5676_v7 }
 0x671   : > { %v5637_v16 = vpop.permute.xlu1 %5636  ;;  %v5554_v23 = vpop.permute.xlu0 %5553 }
 0x672   : > { %8612 = vtanh.f32 %v5691_v13  ;;  %v5677_v26 = vadd.f32 %v5637_v16, %v5592_v43  ;;  %v5593_v20 = vadd.f32 %v5554_v23, %v12533_v32 }
 0x674   : > { %v5692_v9 = vadd.f32 %v12621_v60, %v5677_v26 }
 0x675   : > { %v5639_v56 = vpop.permute.xlu0 %5638  ;;  %v5556_v51 = vpop.permute.xlu1 %5555 }
 0x676   : > { %8614 = vtanh.f32 %v5692_v9  ;;  %v5678_v22 = vadd.f32 %v5639_v56, %v5593_v20  ;;  %v5594_v25 = vadd.f32 %v5556_v51, %v12540_v6 }
 0x678   : > { %v5693_v3 = vadd.f32 %v12621_v60, %v5678_v22 }
 0x679   : > { %v5641_v31 = vpop.permute.xlu1 %5640  ;;  %v5558_v2 = vpop.permute.xlu0 %5557 }
 0x67a   : > { %8616 = vtanh.f32 %v5693_v3  ;;  %v5679_v50 = vadd.f32 %v5641_v31, %v5594_v25  ;;  %v5595_v33 = vadd.f32 %v5558_v2, %v12547_v45 }
 0x67c   : > { %v8613_v32 = vpop.eup %8612  ;;  %v5694_v63 = vadd.f32 %v12621_v60, %v5679_v50 }
 0x67d   : > { %5720 = vst.msk [vmem:[%s12633_s10] sm:$0xff] %vm5719_vm5, %v8613_v32  ;;  %v5643_v6 = vpop.permute.xlu0 %5642  ;;  %v5560_v44 = vpop.permute.xlu1 %5559 }
 0x67e   : > { %8618 = vtanh.f32 %v5694_v63  ;;  %v5680_v21 = vadd.f32 %v5643_v6, %v5595_v33  ;;  %v5596_v49 = vadd.f32 %v5560_v44, %v12554_v5 }
 0x680   : > { %v8615_v12 = vpop.eup %8614  ;;  %v5695_v38 = vadd.f32 %v12621_v60, %v5680_v21 }
 0x681   : > { %5721 = vst.msk [vmem:[%s12633_s10 + $0x8] sm:$0xff] %vm5719_vm5, %v8615_v12  ;;  %v5645_v28 = vpop.permute.xlu1 %5644  ;;  %v5562_v17 = vpop.permute.xlu0 %5561 }
 0x682   : > { %8620 = vtanh.f32 %v5695_v38  ;;  %v5681_v8 = vadd.f32 %v5645_v28, %v5596_v49  ;;  %v5597_v62 = vadd.f32 %v5562_v17, %v12561_v27 }
 0x684   : > { %v8617_v45 = vpop.eup %8616  ;;  %v5696_v0 = vadd.f32 %v12621_v60, %v5681_v8 }
 0x685   : > { %5722 = vst.msk [vmem:[%s12633_s10 + $0x10] sm:$0xff] %vm5719_vm5, %v8617_v45  ;;  %v5647_v36 = vpop.permute.xlu0 %5646  ;;  %v5564_v15 = vpop.permute.xlu1 %5563 }
 0x686   : > { %8622 = vtanh.f32 %v5696_v0  ;;  %v5682_v29 = vadd.f32 %v5647_v36, %v5597_v62  ;;  %v5598_v11 = vadd.f32 %v5564_v15, %v12568_v34 }
 0x688   : > { %v8619_v5 = vpop.eup %8618  ;;  %v5697_v35 = vadd.f32 %v12621_v60, %v5682_v29 }
 0x689   : > { %5723 = vst.msk [vmem:[%s12633_s10 + $0x18] sm:$0xff] %vm5719_vm5, %v8619_v5  ;;  %v5649_v4 = vpop.permute.xlu1 %5648  ;;  %v5566_v48 = vpop.permute.xlu0 %5565 }
 0x68a   : > { %8624 = vtanh.f32 %v5697_v35  ;;  %v5683_v14 = vadd.f32 %v5649_v4, %v5598_v11  ;;  %v5599_v61 = vadd.f32 %v5566_v48, %v12575_v59 }
 0x68c   : > { %v8621_v27 = vpop.eup %8620  ;;  %v5698_v53 = vadd.f32 %v12621_v60, %v5683_v14 }
 0x68d   : > { %5724 = vst.msk [vmem:[%s12633_s10 + $0x20] sm:$0xff] %vm5719_vm5, %v8621_v27  ;;  %v5651_v54 = vpop.permute.xlu0 %5650  ;;  %v5568_v55 = vpop.permute.xlu1 %5567 }
 0x68e   : > { %8626 = vtanh.f32 %v5698_v53  ;;  %v5684_v18 = vadd.f32 %v5651_v54, %v5599_v61  ;;  %v5600_v47 = vadd.f32 %v5568_v55, %v12582_v42 }
 0x690   : > { %v8623_v34 = vpop.eup %8622  ;;  %v5699_v10 = vadd.f32 %v12621_v60, %v5684_v18 }
 0x691   : > { %5725 = vst.msk [vmem:[%s12633_s10 + $0x28] sm:$0xff] %vm5719_vm5, %v8623_v34  ;;  %v5653_v40 = vpop.permute.xlu1 %5652  ;;  %v5570_v39 = vpop.permute.xlu0 %5569 }
 0x692   : > { %8628 = vtanh.f32 %v5699_v10  ;;  %v5685_v19 = vadd.f32 %v5653_v40, %v5600_v47  ;;  %v5601_v57 = vadd.f32 %v5570_v39, %v12589_v1 }
 0x694   : > { %v8625_v59 = vpop.eup %8624  ;;  %v5700_v41 = vadd.f32 %v12621_v60, %v5685_v19 }
 0x695   : > { %5726 = vst.msk [vmem:[%s12633_s10 + $0x30] sm:$0xff] %vm5719_vm5, %v8625_v59  ;;  %v5655_v24 = vpop.permute.xlu0 %5654  ;;  %v5572_v46 = vpop.permute.xlu1 %5571 }
 0x696   : > { %8630 = vtanh.f32 %v5700_v41  ;;  %v5686_v52 = vadd.f32 %v5655_v24, %v5601_v57  ;;  %v5602_v13 = vadd.f32 %v5572_v46, %v12596_v30 }
 0x698   : > { %v8627_v42 = vpop.eup %8626  ;;  %v5701_v7 = vadd.f32 %v12621_v60, %v5686_v52 }
 0x699   : > { %5727 = vst.msk [vmem:[%s12633_s10 + $0x38] sm:$0xff] %vm5719_vm5, %v8627_v42  ;;  %v5657_v43 = vpop.permute.xlu1 %5656  ;;  %v5574_v16 = vpop.permute.xlu0 %5573 }
 0x69a   : > { %8632 = vtanh.f32 %v5701_v7  ;;  %v5687_v23 = vadd.f32 %v5657_v43, %v5602_v13  ;;  %v5603_v9 = vadd.f32 %v5574_v16, %v12603_v58 }
 0x69c   : > { %v8629_v1 = vpop.eup %8628  ;;  %v5702_v26 = vadd.f32 %v12621_v60, %v5687_v23 }
 0x69d   : > { %5728 = vst.msk [vmem:[%s12633_s10 + $0x40] sm:$0xff] %vm5719_vm5, %v8629_v1  ;;  %v5659_v20 = vpop.permute.xlu0 %5658  ;;  %v5576_v56 = vpop.permute.xlu1 %5575 }
 0x69e   : > { %8634 = vtanh.f32 %v5702_v26  ;;  %v5688_v30 = vadd.f32 %v5659_v20, %v5603_v9  ;;  %v5604_v3 = vadd.f32 %v5576_v56, %v12609_v37 }
 0x6a0   : > { %v8631_v51 = vpop.eup %8630  ;;  %v5703_v22 = vadd.f32 %v12621_v60, %v5688_v30 }
 0x6a1   : > { %5729 = vst.msk [vmem:[%s12633_s10 + $0x48] sm:$0xff] %vm5719_vm5, %v8631_v51  ;;  %v5661_v25 = vpop.permute.xlu1 %5660 }
 0x6a2   : > { %8636 = vtanh.f32 %v5703_v22  ;;  %v5689_v31 = vadd.f32 %v5661_v25, %v5604_v3 }
 0x6a4   : > { %v8633_v58 = vpop.eup %8632  ;;  %v5704_v2 = vadd.f32 %v12621_v60, %v5689_v31 }
 0x6a5   : > { %5730 = vst.msk [vmem:[%s12633_s10 + $0x50] sm:$0xff] %vm5719_vm5, %v8633_v58 }
 0x6a6   : > { %8638 = vtanh.f32 %v5704_v2 }
 0x6a8   : > { %v8635_v50 = vpop.eup %8634 }
 0x6a9   : > { %5731 = vst.msk [vmem:[%s12633_s10 + $0x58] sm:$0xff] %vm5719_vm5, %v8635_v50 }
 0x6ac   : > { %v8637_v32 = vpop.eup %8636 }
 0x6ad   : > { %5732 = vst.msk [vmem:[%s12633_s10 + $0x60] sm:$0xff] %vm5719_vm5, %v8637_v32 }
 0x6b0   : > { %v8639_v63 = vpop.eup %8638 }
 0x6b1   : > { %5733 = vst.msk [vmem:[%s12633_s10 + $0x68] sm:$0xff] %vm5719_vm5, %v8639_v63 }
 0x6b2 PF: > { %s15_s15 = sadd.s32 1, %s8754_s15  }
 0x6b3   : > { %p12_p1 = scmp.ge.s32.totalorder %s15_s15, 4  }
 0x6b5   :  { %14 = sbr.rel (!%p12_p1) target bundleno = 1 (0x1), region = 73 }
 0x6bc   :  { %5755 = vsyncpa [#allocation3], 1 }
 0x6bd   :  { %5757 = vsyncpa [#allocation3 + $0x1], 1 }

</bundles_post_ra>
